<compile_context>
chip_gen: v7x
topology: tpu7x:2x2x1
jax: 0.10.0
libtpu: 0.0.40
codegen_flags: <defaults>
</compile_context>

<pallas_src>
import functools

import jax
import jax.numpy as jnp
from jax import lax
from jax.experimental import pallas as pl
from jax.experimental.pallas import tpu as pltpu


# ----------------------------------------------------------------------------
# Fused kernel
# ----------------------------------------------------------------------------
def _char_cnn_fused_kernel(
        ce_ref,     # (TB*S, Lc, Ec)        bf16  char embeddings (row per word)
        we_ref,     # (TB, S, Ew)           bf16  word embeddings
        wcc_ref,    # (Kmax, Ec, Np)        bf16  per-tap char-conv weights
        bcc_ref,    # (1, Np)               f32
        mcc_ref,    # (max(c_tail,1), Np)   f32   tail validity mask (0 / -1e30)
        wcww_ref,   # (Kmax, Ew, Np)        bf16  word part of word+char conv
        wcwc_ref,   # (Kmax, Np, Np)        bf16  char-pool part of word+char conv
        bcw_ref,    # (1, Np)               f32
        mcw_ref,    # (max(w_tail,1), Np)   f32
        w1_ref,     # (Np, Hp)              bf16
        b1_ref,     # (1, Hp)               f32
        w2_ref,     # (Hp, Lp)              bf16
        b2_ref,     # (1, Lp)               f32
        o_ref,      # (TB, 1, Lp)           f32   lane-dense padded logits
        xpc_ref,    # scratch (cb*S, Lc_pad, Ec)  bf16  padded char chunk
        xpw_ref,    # scratch (TB, S_pad, Ew)     bf16  padded word embeddings
        cpool_ref,  # scratch (TB, S_pad, Np)     bf16  padded pooled char feats
        *, cb, seq_len, char_len, kmax,
        c_pad_l, c_pad_r, c_lout, c_min_lout, c_tail,
        w_pad_l, w_pad_r, w_lout, w_min_lout, w_tail):
    f32 = jnp.float32
    S, Lc = seq_len, char_len
    tb = we_ref.shape[0]
    np_ = bcc_ref.shape[1]
    rows = cb * S
    n_chunks = tb // cb

    # -- Zero only the padding *borders* of the persistent scratches.  Done
    #    every grid step (a handful of rows, cheap) so there is no reliance on
    #    a program_id==0 init that another TensorCore would never execute when
    #    the "parallel" batch axis is sharded across cores.
    def zero_borders(ref, pad_l, pad_r, interior):
        n, _, d = ref.shape
        if pad_l:
            ref[:, pl.ds(0, pad_l), :] = jnp.zeros((n, pad_l, d), ref.dtype)
        if pad_r:
            ref[:, pl.ds(pad_l + interior, pad_r), :] = jnp.zeros(
                (n, pad_r, d), ref.dtype)

    zero_borders(xpc_ref, c_pad_l, c_pad_r, Lc)
    zero_borders(xpw_ref, w_pad_l, w_pad_r, S)
    zero_borders(cpool_ref, w_pad_l, w_pad_r, S)

    dims = (((2,), (0,)), ((), ()))   # contract last lhs dim with first rhs dim

    def shifted_conv(xp_ref, w_ref, l_out):
        """Conv as a sum of Kmax shifted matmuls with f32 accumulation
        (no im2col copy, no lane-axis concat)."""
        acc = lax.dot_general(xp_ref[:, 0:l_out, :], w_ref[0], dims,
                              preferred_element_type=f32)
        for k in range(1, kmax):
            acc = acc + lax.dot_general(xp_ref[:, k:k + l_out, :], w_ref[k],
                                        dims, preferred_element_type=f32)
        return acc

    def masked_pool(acc, min_lout, tail, mask_ref):
        """Max-pool over time: rows < min_lout are valid for every branch, so
        only the tiny tail gets the per-branch -1e30 validity mask."""
        pooled = jnp.max(acc[:, :min_lout, :], axis=1)
        if tail:
            pooled = jnp.maximum(
                pooled, jnp.max(acc[:, min_lout:, :] + mask_ref[...], axis=1))
        return pooled

    # ------------------- char-level convs, chunked over the batch -----------
    def char_chunk(c):
        if n_chunks == 1:
            chunk = ce_ref[...]
        else:
            chunk = ce_ref[pl.ds(c * rows, rows), :, :]
        xpc_ref[:, pl.ds(c_pad_l, Lc), :] = chunk
        acc = shifted_conv(xpc_ref, wcc_ref, c_lout)      # (rows, c_lout, Np) f32
        pooled = masked_pool(acc, c_min_lout, c_tail, mcc_ref)
        # pool BEFORE bias/tanh is exact (tanh monotone, bias length-invariant)
        feat = jnp.tanh(pooled + bcc_ref[...]).astype(cpool_ref.dtype)
        feat = feat.reshape(cb, S, np_)                   # leading-dim split only
        if n_chunks == 1:
            cpool_ref[:, pl.ds(w_pad_l, S), :] = feat
        else:
            cpool_ref[pl.ds(c * cb, cb), pl.ds(w_pad_l, S), :] = feat

    if n_chunks == 1:
        char_chunk(0)
    else:
        def _body(c, carry):
            char_chunk(c)
            return carry
        lax.fori_loop(0, n_chunks, _body, 0, unroll=n_chunks <= 8)

    # ---------- sentence-level convs: word part + char-pool part summed -----
    xpw_ref[:, pl.ds(w_pad_l, S), :] = we_ref[...]
    accw = None
    for k in range(kmax):
        term = lax.dot_general(xpw_ref[:, k:k + w_lout, :], wcww_ref[k], dims,
                               preferred_element_type=f32)
        term = term + lax.dot_general(cpool_ref[:, k:k + w_lout, :],
                                      wcwc_ref[k], dims,
                                      preferred_element_type=f32)
        accw = term if accw is None else accw + term
    pooledw = masked_pool(accw, w_min_lout, w_tail, mcw_ref)
    pooledw = jnp.tanh(pooledw + bcw_ref[...])            # (TB, Np) f32

    # ---------- classifier head: linear2(tanh(linear1(tanh(x)))) ------------
    h = jnp.dot(jnp.tanh(pooledw).astype(w1_ref.dtype), w1_ref[...],
                preferred_element_type=f32) + b1_ref[...]
    logits = jnp.dot(jnp.tanh(h).astype(w2_ref.dtype), w2_ref[...],
                     preferred_element_type=f32) + b2_ref[...]
    o_ref[...] = logits[:, None, :]


# ----------------------------------------------------------------------------
# Geometry / packing helpers (one-time, hoisted out of the forward path)
# ----------------------------------------------------------------------------
def _round_up(x, m):
    return ((x + m - 1) // m) * m


def _conv_geometry(kernel_sizes, length):
    """Shared Kmax padding geometry for all branches (stride = 1)."""
    kmax = max(kernel_sizes)
    pad_l = kmax // 2
    louts = [length + 2 * (k // 2) - k + 1 for k in kernel_sizes]
    l_out = max(louts)
    pad_r = l_out + kmax - 1 - length - pad_l
    return kmax, pad_l, pad_r, l_out, louts


def prepare_params(params, kernel_sizes, *, seq_len, char_len):
    """One-time packing of model weights for the fused kernel (cache this).

    Produces per-tap conv weight slabs padded to the shared Kmax window and a
    lane-aligned feature dim Np, the split word / char-pool sentence-conv
    weights, tiny tail validity masks, padded MLP weights and bf16 tables.
    """
    kernel_sizes = tuple(kernel_sizes)
    Ew = params["word_embed"].shape[1]
    Ec = params["char_embed"].shape[1]
    C = params["char_conv_b"][0].shape[1]
    nk = len(kernel_sizes)
    nkc = nk * C
    hidden = params["w1"].shape[1]
    label_num = params["w2"].shape[1]
    Np = _round_up(nkc, 128)       # lane-aligned conv feature dim
    Hp = _round_up(hidden, 128)
    Lp = _round_up(label_num, 128)

    kmax, c_pl, c_pr, c_lout, c_louts = _conv_geometry(kernel_sizes, char_len)
    _, w_pl, w_pr, w_lout, w_louts = _conv_geometry(kernel_sizes, seq_len)

    def stack_taps(w_list, d_in, d_pad=None):
        d_pad = d_in if d_pad is None else d_pad
        w = jnp.zeros((kmax, d_pad, Np), jnp.float32)
        for i, K in enumerate(kernel_sizes):
            off = kmax // 2 - K // 2          # tap offset inside the Kmax window
            w = w.at[off:off + K, :d_in, i * C:(i + 1) * C].set(w_list[i])
        return w.astype(jnp.bfloat16)

    def stack_bias(b_list):
        b = jnp.zeros((1, Np), jnp.float32)
        return b.at[:, :nkc].set(
            jnp.concatenate(b_list, axis=1).astype(jnp.float32))

    def tail_mask(louts, l_out):
        min_lo = min(louts)
        tail = l_out - min_lo
        m = jnp.zeros((max(tail, 1), Np), jnp.float32)
        if tail > 0:
            t = jnp.arange(min_lo, l_out)[:, None]
            block = jnp.concatenate(
                [jnp.broadcast_to(jnp.where(t < lo, 0.0, -1e30), (tail, C))
                 for lo in louts], axis=1)
            m = m.at[:, :nkc].set(block)
        return m, min_lo, tail

    mcc, c_min, c_tail = tail_mask(c_louts, c_lout)
    mcw, w_min, w_tail = tail_mask(w_louts, w_lout)

    # split word||char-pool conv weights -> two matmuls, no lane-axis concat
    wcw_word = stack_taps([w[:, :Ew, :] for w in params["wc_conv_w"]], Ew)
    wcw_char = stack_taps([w[:, Ew:, :] for w in params["wc_conv_w"]],
                          nkc, d_pad=Np)

    w1 = jnp.zeros((Np, Hp), jnp.float32).at[:nkc, :hidden].set(params["w1"])
    b1 = jnp.zeros((1, Hp), jnp.float32).at[:, :hidden].set(params["b1"])
    w2 = jnp.zeros((Hp, Lp), jnp.float32).at[:hidden, :label_num].set(params["w2"])
    b2 = jnp.zeros((1, Lp), jnp.float32).at[:, :label_num].set(params["b2"])

    packed = dict(
        word_embed=params["word_embed"].astype(jnp.bfloat16),
        char_embed=params["char_embed"].astype(jnp.bfloat16),
        wcc=stack_taps(params["char_conv_w"], Ec),
        bcc=stack_bias(params["char_conv_b"]), mcc=mcc,
        wcw_w=wcw_word, wcw_c=wcw_char,
        bcw=stack_bias(params["wc_conv_b"]), mcw=mcw,
        w1=w1.astype(jnp.bfloat16), b1=b1,
        w2=w2.astype(jnp.bfloat16), b2=b2)
    geom = dict(seq_len=seq_len, char_len=char_len, kmax=kmax,
                Ew=Ew, Ec=Ec, Np=Np, Hp=Hp, Lp=Lp, label_num=label_num,
                c_pad_l=c_pl, c_pad_r=c_pr, c_lout=c_lout,
                c_min_lout=c_min, c_tail=c_tail,
                w_pad_l=w_pl, w_pad_r=w_pr, w_lout=w_lout,
                w_min_lout=w_min, w_tail=w_tail)
    return packed, geom


# ----------------------------------------------------------------------------
# VMEM-budget-aware tiling
# ----------------------------------------------------------------------------
def _vmem_budget_bytes():
    """Scoped-VMEM budget: ~56 MiB on v7x (64 MiB/TC physical),
    ~100 MiB on v5e/v6e (128 MiB physical)."""
    try:
        kind = jax.devices()[0].device_kind.lower()
    except Exception:
        kind = ""
    if "v7" in kind:
        return 56 * 1024 * 1024
    return 100 * 1024 * 1024


def _divisors_desc(n):
    return [d for d in range(n, 0, -1) if n % d == 0]


def _step_vmem_bytes(tb, cb, S, Lc, geom):
    """Rough per-grid-step VMEM footprint (bytes) for tiles (tb, cb)."""
    Ec, Ew, Np, Hp, Lp = geom["Ec"], geom["Ew"], geom["Np"], geom["Hp"], geom["Lp"]
    kmax, c_lout, w_lout = geom["kmax"], geom["c_lout"], geom["w_lout"]
    lc_pad = Lc + geom["c_pad_l"] + geom["c_pad_r"]
    s_pad = S + geom["w_pad_l"] + geom["w_pad_r"]
    bf, f4 = 2, 4
    fixed = (kmax * (Ec + Ew + Np) * Np + Np * Hp + Hp * Lp) * bf \
        + (4 * Np + Hp + Lp) * f4                       # single-buffered weights
    stream = 2 * (tb * S * Lc * Ec + tb * S * Ew) * bf + 2 * tb * Lp * f4
    scratch = cb * S * lc_pad * Ec * bf + tb * s_pad * (Ew + Np) * bf
    live = 2 * cb * S * c_lout * Np * f4 + 2 * tb * w_lout * Np * f4
    return fixed + stream + scratch + live


def _choose_tiles(B, S, Lc, geom, budget_bytes):
    """VMEM-budget- and core-count-aware (batch_tile, char_chunk) choice."""
    usable = int(budget_bytes * 0.75)
    # Keep >= 2 grid steps so the "parallel" batch axis can shard across two
    # TensorCores (v7x) and the pipeline has a next block to prefetch against.
    cands = [tb for tb in _divisors_desc(B) if B // tb >= 2] or [B]
    for tb in cands:
        for cb in _divisors_desc(tb):
            if _step_vmem_bytes(tb, cb, S, Lc, geom) <= usable:
                return tb, cb
    return 1, 1


def _cost_estimate(B, S, Lc, geom):
    Ec, Ew, Np, Hp, Lp = geom["Ec"], geom["Ew"], geom["Np"], geom["Hp"], geom["Lp"]
    kmax, c_lout, w_lout = geom["kmax"], geom["c_lout"], geom["w_lout"]
    flops = 2 * B * (S * c_lout * kmax * Ec * Np
                     + w_lout * kmax * (Ew + Np) * Np
                     + Np * Hp + Hp * Lp)
    transcendentals = B * (S * Np + 2 * Np + Hp)
    weight_bytes = 2 * kmax * (Ec + Ew + Np) * Np + 2 * (Np * Hp + Hp * Lp)
    bytes_accessed = 2 * B * S * (Lc * Ec + Ew) + 4 * B * Lp + weight_bytes
    return pl.CostEstimate(flops=int(flops),
                           transcendentals=int(transcendentals),
                           bytes_accessed=int(bytes_accessed))


# ----------------------------------------------------------------------------
# Full Char_CNN forward
# ----------------------------------------------------------------------------
def char_cnn_forward(packed, geom, sent_ids, char_ids,
                     batch_tile=None, char_chunk=None):
    """
    packed, geom : from prepare_params (one-time)
    sent_ids     : (B, S) int32 word ids
    char_ids     : (B, S, Lc) int32 char ids per word
    returns      : (B, label_num) float32 logits
    """
    B, S = sent_ids.shape
    Lc = char_ids.shape[2]
    assert S == geom["seq_len"] and Lc == geom["char_len"], (S, Lc)
    Ew, Ec = geom["Ew"], geom["Ec"]
    Np, Hp, Lp = geom["Np"], geom["Hp"], geom["Lp"]

    # glue: one gather per (pre-cast bf16) embedding table
    word_emb = jnp.take(packed["word_embed"], sent_ids, axis=0)            # (B,S,Ew)
    char_emb = jnp.take(packed["char_embed"], char_ids.reshape(B * S, Lc),
                        axis=0)                                            # (B*S,Lc,Ec)
    # embed_dropout / fc_dropout are identities in eval mode.

    budget = _vmem_budget_bytes()
    tb, cb = _choose_tiles(B, S, Lc, geom, budget)
    if batch_tile is not None:
        tb = batch_tile
    if char_chunk is not None:
        cb = char_chunk
    assert B % tb == 0 and tb % cb == 0, (B, tb, cb)

    kernel_fn = functools.partial(
        _char_cnn_fused_kernel, cb=cb, seq_len=S, char_len=Lc,
        kmax=geom["kmax"],
        c_pad_l=geom["c_pad_l"], c_pad_r=geom["c_pad_r"],
        c_lout=geom["c_lout"], c_min_lout=geom["c_min_lout"],
        c_tail=geom["c_tail"],
        w_pad_l=geom["w_pad_l"], w_pad_r=geom["w_pad_r"],
        w_lout=geom["w_lout"], w_min_lout=geom["w_min_lout"],
        w_tail=geom["w_tail"])

    grid = (B // tb,)
    lc_pad = Lc + geom["c_pad_l"] + geom["c_pad_r"]
    s_pad = S + geom["w_pad_l"] + geom["w_pad_r"]
    scratch_shapes = [
        pltpu.VMEM((cb * S, lc_pad, Ec), jnp.bfloat16),   # padded char chunk
        pltpu.VMEM((tb, s_pad, Ew), jnp.bfloat16),        # padded word embeds
        pltpu.VMEM((tb, s_pad, Np), jnp.bfloat16),        # padded pooled chars
    ]
    cost = _cost_estimate(B, S, Lc, geom)
    weights = (packed["wcc"], packed["bcc"], packed["mcc"],
               packed["wcw_w"], packed["wcw_c"], packed["bcw"], packed["mcw"],
               packed["w1"], packed["b1"], packed["w2"], packed["b2"])

    def attempt(single_buffer):
        def rep(arr):   # whole array resident in VMEM, same block every step
            nd = arr.ndim
            if single_buffer:
                return pl.BlockSpec(arr.shape, lambda b, _n=nd: (0,) * _n,
                                    pipeline_mode=pl.Buffered(1))
            return pl.BlockSpec(arr.shape, lambda b, _n=nd: (0,) * _n)

        in_specs = [pl.BlockSpec((tb * S, Lc, Ec), lambda b: (b, 0, 0)),
                    pl.BlockSpec((tb, S, Ew), lambda b: (b, 0, 0))]
        in_specs += [rep(w) for w in weights]

        out = pl.pallas_call(
            kernel_fn,
            grid=grid,
            in_specs=in_specs,
            out_specs=pl.BlockSpec((tb, 1, Lp), lambda b: (b, 0, 0)),
            out_shape=jax.ShapeDtypeStruct((B, 1, Lp), jnp.float32),
            scratch_shapes=scratch_shapes,
            compiler_params=pltpu.CompilerParams(
                dimension_semantics=("parallel",),
                vmem_limit_bytes=budget),
            cost_estimate=cost if single_buffer else None,
        )(char_emb, word_emb, *weights)
        # eager sync so a failure of the perf-only Buffered(1)/cost hints can
        # be caught and retried with plain specs.
        return jax.block_until_ready(out)

    try:
        out = attempt(True)
    except Exception:
        # TODO(synk): pl.Buffered(1) single-buffering of replicated weights is
        # a perf-only hint; retry with default double-buffered specs.
        out = attempt(False)

    return out[:, 0, :geom["label_num"]]


# ----------------------------------------------------------------------------
# Pure-JAX f32 reference
# ----------------------------------------------------------------------------
def char_cnn_reference(params, sent_ids, char_ids, kernel_sizes):
    B, S = sent_ids.shape
    Lc = char_ids.shape[2]
    word_emb = jnp.take(params["word_embed"], sent_ids, axis=0)
    char_x = jnp.take(params["char_embed"], char_ids, axis=0).reshape(B * S, Lc, -1)

    def conv_tanh_pool(x, w, b, K):
        pad = K // 2
        xp = jnp.pad(x, ((0, 0), (pad, pad), (0, 0)))
        L_out = xp.shape[1] - K + 1
        acc = jnp.zeros((x.shape[0], L_out, w.shape[2]), jnp.float32)
        for k in range(K):
            acc = acc + jnp.einsum("nld,dc->nlc", xp[:, k:k + L_out, :], w[k])
        return jnp.max(jnp.tanh(acc + b), axis=1)

    cp = jnp.concatenate(
        [conv_tanh_pool(char_x, params["char_conv_w"][i],
                        params["char_conv_b"][i], K)
         for i, K in enumerate(kernel_sizes)], axis=1)
    wc = jnp.concatenate([word_emb, cp.reshape(B, S, -1)], axis=2)
    pooled = jnp.concatenate(
        [conv_tanh_pool(wc, params["wc_conv_w"][i],
                        params["wc_conv_b"][i], K)
         for i, K in enumerate(kernel_sizes)], axis=1)
    h = jnp.dot(jnp.tanh(pooled), params["w1"]) + params["b1"]
    return jnp.dot(jnp.tanh(h), params["w2"]) + params["b2"]


# ----------------------------------------------------------------------------
# Deterministic parameter construction
# ----------------------------------------------------------------------------
def make_params(key, *, vocab_size, char_num, embed_dim, char_embed_dim,
                kernel_sizes, kernel_num, label_num, init=0.1):
    n_k = len(kernel_sizes)
    wc_dim = embed_dim + n_k * kernel_num
    infea = n_k * kernel_num
    hidden = infea // 2

    def uni(k, shape):
        return jax.random.uniform(k, shape, jnp.float32, -init, init)

    keys = jax.random.split(key, 6 + 4 * n_k)
    it = iter(keys)
    return {
        "word_embed": uni(next(it), (vocab_size, embed_dim)),
        "char_embed": uni(next(it), (char_num, char_embed_dim)),
        "char_conv_w": [uni(next(it), (K, char_embed_dim, kernel_num))
                        for K in kernel_sizes],
        "char_conv_b": [uni(next(it), (1, kernel_num)) for _ in kernel_sizes],
        "wc_conv_w": [uni(next(it), (K, wc_dim, kernel_num))
                      for K in kernel_sizes],
        "wc_conv_b": [uni(next(it), (1, kernel_num)) for _ in kernel_sizes],
        "w1": uni(next(it), (infea, hidden)),
        "b1": uni(next(it), (1, hidden)),
        "w2": uni(next(it), (hidden, label_num)),
        "b2": uni(next(it), (1, label_num)),
    }


# ----------------------------------------------------------------------------
if __name__ == "__main__":
    # small synthetic config consistent with the module
    B, S, Lc = 2, 8, 8
    vocab_size, char_num = 50, 30
    embed_dim, char_embed_dim = 16, 8
    kernel_sizes = (3, 4, 5)
    kernel_num = 8
    label_num = 4

    key = jax.random.PRNGKey(0)
    k_param, k_sent, k_char = jax.random.split(key, 3)

    params = make_params(
        k_param,
        vocab_size=vocab_size, char_num=char_num,
        embed_dim=embed_dim, char_embed_dim=char_embed_dim,
        kernel_sizes=kernel_sizes, kernel_num=kernel_num,
        label_num=label_num)

    sent_ids = jax.random.randint(k_sent, (B, S), 0, vocab_size, jnp.int32)
    char_ids = jax.random.randint(k_char, (B, S, Lc), 0, char_num, jnp.int32)

    # one-time weight packing (hoisted out of the forward path)
    packed, geom = prepare_params(params, kernel_sizes, seq_len=S, char_len=Lc)

    ref = jax.block_until_ready(
        char_cnn_reference(params, sent_ids, char_ids, kernel_sizes))

    # default tiling (tb=1, grid of 2 "parallel" steps)
    logits = jax.block_until_ready(
        char_cnn_forward(packed, geom, sent_ids, char_ids))
    assert logits.shape == (B, label_num), logits.shape
    assert bool(jnp.all(jnp.isfinite(logits)))
    max_err = float(jnp.max(jnp.abs(logits - ref)))
    assert max_err < 5e-2, max_err   # bf16 matmul inputs vs f32 reference

    # also exercise the chunked char-stage path (cb < tb, in-kernel loop)
    logits2 = jax.block_until_ready(
        char_cnn_forward(packed, geom, sent_ids, char_ids,
                         batch_tile=B, char_chunk=1))
    max_err2 = float(jnp.max(jnp.abs(logits2 - ref)))
    assert max_err2 < 5e-2, max_err2

    print("KERNEL_OK")
</pallas_src>

<mosaic_0001>
module attributes {stable_mosaic.version = 11 : i64} {
  func.func @_char_cnn_fused_kernel(%arg0: i32, %arg1: memref<8x8x8xbf16, #tpu.memory_space<vmem>>, %arg2: memref<1x8x16xbf16, #tpu.memory_space<vmem>>, %arg3: memref<5x8x128xbf16, #tpu.memory_space<vmem>>, %arg4: memref<1x128xf32, #tpu.memory_space<vmem>>, %arg5: memref<1x128xf32, #tpu.memory_space<vmem>>, %arg6: memref<5x16x128xbf16, #tpu.memory_space<vmem>>, %arg7: memref<5x128x128xbf16, #tpu.memory_space<vmem>>, %arg8: memref<1x128xf32, #tpu.memory_space<vmem>>, %arg9: memref<1x128xf32, #tpu.memory_space<vmem>>, %arg10: memref<128x128xbf16, #tpu.memory_space<vmem>>, %arg11: memref<1x128xf32, #tpu.memory_space<vmem>>, %arg12: memref<128x128xbf16, #tpu.memory_space<vmem>>, %arg13: memref<1x128xf32, #tpu.memory_space<vmem>>, %arg14: memref<1x1x128xf32, #tpu.memory_space<vmem>>, %arg15: memref<8x13x8xbf16, #tpu.memory_space<vmem>>, %arg16: memref<1x13x16xbf16, #tpu.memory_space<vmem>>, %arg17: memref<1x13x128xbf16, #tpu.memory_space<vmem>>) attributes {dimension_semantics = [#tpu.dimension_semantics<parallel>], iteration_bounds = array<i64: 2>, scalar_prefetch = 0 : i64, scratch_operands = 3 : i64, tpu.core_type = #tpu.core_type<tc>, window_params = [{transform_indices = @transform_0, window_bounds = array<i64: 8, 8, 8>}, {transform_indices = @transform_1, window_bounds = array<i64: 1, 8, 16>}, {pipeline_mode = #tpu.pipeline_mode<synchronous>, transform_indices = @transform_2, window_bounds = array<i64: 5, 8, 128>}, {pipeline_mode = #tpu.pipeline_mode<synchronous>, transform_indices = @transform_3, window_bounds = array<i64: 1, 128>}, {pipeline_mode = #tpu.pipeline_mode<synchronous>, transform_indices = @transform_4, window_bounds = array<i64: 1, 128>}, {pipeline_mode = #tpu.pipeline_mode<synchronous>, transform_indices = @transform_5, window_bounds = array<i64: 5, 16, 128>}, {pipeline_mode = #tpu.pipeline_mode<synchronous>, transform_indices = @transform_6, window_bounds = array<i64: 5, 128, 128>}, {pipeline_mode = #tpu.pipeline_mode<synchronous>, transform_indices = @transform_7, window_bounds = array<i64: 1, 128>}, {pipeline_mode = #tpu.pipeline_mode<synchronous>, transform_indices = @transform_8, window_bounds = array<i64: 1, 128>}, {pipeline_mode = #tpu.pipeline_mode<synchronous>, transform_indices = @transform_9, window_bounds = array<i64: 128, 128>}, {pipeline_mode = #tpu.pipeline_mode<synchronous>, transform_indices = @transform_10, window_bounds = array<i64: 1, 128>}, {pipeline_mode = #tpu.pipeline_mode<synchronous>, transform_indices = @transform_11, window_bounds = array<i64: 128, 128>}, {pipeline_mode = #tpu.pipeline_mode<synchronous>, transform_indices = @transform_12, window_bounds = array<i64: 1, 128>}, {transform_indices = @transform_13, window_bounds = array<i64: 1, 1, 128>}]} {
    %cst = arith.constant 0.000000e+00 : bf16
    %0 = vector.broadcast %cst : bf16 to vector<8x2x8xbf16>
    %c0 = arith.constant 0 : index
    %c0_0 = arith.constant 0 : index
    %c0_1 = arith.constant 0 : index
    %1 = vector.load %arg15[%c0, %c0_0, %c0_1] : memref<8x13x8xbf16, #tpu.memory_space<vmem>>, vector<8x2x8xbf16>
    tpu.vector_store %arg15[%c0, %c0_0, %c0_1], %0 {strides = array<i32>} : memref<8x13x8xbf16, #tpu.memory_space<vmem>>, vector<8x2x8xbf16>,
    %cst_2 = arith.constant 0.000000e+00 : bf16
    %2 = vector.broadcast %cst_2 : bf16 to vector<8x3x8xbf16>
    %c0_3 = arith.constant 0 : index
    %c10 = arith.constant 10 : index
    %c0_4 = arith.constant 0 : index
    %3 = vector.load %arg15[%c0_3, %c10, %c0_4] : memref<8x13x8xbf16, #tpu.memory_space<vmem>>, vector<8x3x8xbf16>
    tpu.vector_store %arg15[%c0_3, %c10, %c0_4], %2 {strides = array<i32>} : memref<8x13x8xbf16, #tpu.memory_space<vmem>>, vector<8x3x8xbf16>,
    %cst_5 = arith.constant 0.000000e+00 : bf16
    %4 = vector.broadcast %cst_5 : bf16 to vector<1x2x16xbf16>
    %c0_6 = arith.constant 0 : index
    %c0_7 = arith.constant 0 : index
    %c0_8 = arith.constant 0 : index
    %5 = vector.load %arg16[%c0_6, %c0_7, %c0_8] : memref<1x13x16xbf16, #tpu.memory_space<vmem>>, vector<1x2x16xbf16>
    tpu.vector_store %arg16[%c0_6, %c0_7, %c0_8], %4 {strides = array<i32>} : memref<1x13x16xbf16, #tpu.memory_space<vmem>>, vector<1x2x16xbf16>,
    %cst_9 = arith.constant 0.000000e+00 : bf16
    %6 = vector.broadcast %cst_9 : bf16 to vector<1x3x16xbf16>
    %c0_10 = arith.constant 0 : index
    %c10_11 = arith.constant 10 : index
    %c0_12 = arith.constant 0 : index
    %7 = vector.load %arg16[%c0_10, %c10_11, %c0_12] : memref<1x13x16xbf16, #tpu.memory_space<vmem>>, vector<1x3x16xbf16>
    tpu.vector_store %arg16[%c0_10, %c10_11, %c0_12], %6 {strides = array<i32>} : memref<1x13x16xbf16, #tpu.memory_space<vmem>>, vector<1x3x16xbf16>,
    %cst_13 = arith.constant 0.000000e+00 : bf16
    %8 = vector.broadcast %cst_13 : bf16 to vector<1x2x128xbf16>
    %c0_14 = arith.constant 0 : index
    %c0_15 = arith.constant 0 : index
    %c0_16 = arith.constant 0 : index
    %9 = vector.load %arg17[%c0_14, %c0_15, %c0_16] : memref<1x13x128xbf16, #tpu.memory_space<vmem>>, vector<1x2x128xbf16>
    tpu.vector_store %arg17[%c0_14, %c0_15, %c0_16], %8 {strides = array<i32>} : memref<1x13x128xbf16, #tpu.memory_space<vmem>>, vector<1x2x128xbf16>,
    %cst_17 = arith.constant 0.000000e+00 : bf16
    %10 = vector.broadcast %cst_17 : bf16 to vector<1x3x128xbf16>
    %c0_18 = arith.constant 0 : index
    %c10_19 = arith.constant 10 : index
    %c0_20 = arith.constant 0 : index
    %11 = vector.load %arg17[%c0_18, %c10_19, %c0_20] : memref<1x13x128xbf16, #tpu.memory_space<vmem>>, vector<1x3x128xbf16>
    tpu.vector_store %arg17[%c0_18, %c10_19, %c0_20], %10 {strides = array<i32>} : memref<1x13x128xbf16, #tpu.memory_space<vmem>>, vector<1x3x128xbf16>,
    %c0_21 = arith.constant 0 : index
    %c0_22 = arith.constant 0 : index
    %c0_23 = arith.constant 0 : index
    %12 = vector.load %arg1[%c0_21, %c0_22, %c0_23] : memref<8x8x8xbf16, #tpu.memory_space<vmem>>, vector<8x8x8xbf16>
    %c0_24 = arith.constant 0 : index
    %c2 = arith.constant 2 : index
    %c0_25 = arith.constant 0 : index
    %13 = vector.load %arg15[%c0_24, %c2, %c0_25] : memref<8x13x8xbf16, #tpu.memory_space<vmem>>, vector<8x8x8xbf16>
    tpu.vector_store %arg15[%c0_24, %c2, %c0_25], %12 {strides = array<i32>} : memref<8x13x8xbf16, #tpu.memory_space<vmem>>, vector<8x8x8xbf16>,
    %c0_26 = arith.constant 0 : index
    %c0_27 = arith.constant 0 : index
    %c0_28 = arith.constant 0 : index
    %14 = vector.load %arg15[%c0_26, %c0_27, %c0_28] : memref<8x13x8xbf16, #tpu.memory_space<vmem>>, vector<8x9x8xbf16>
    %c0_29 = arith.constant 0 : index
    %c0_30 = arith.constant 0 : index
    %c0_31 = arith.constant 0 : index
    %15 = vector.load %arg3[%c0_29, %c0_30, %c0_31] : memref<5x8x128xbf16, #tpu.memory_space<vmem>>, vector<1x8x128xbf16>
    %16 = vector.shape_cast %15 : vector<1x8x128xbf16> to vector<8x128xbf16>
    %cst_32 = arith.constant dense<0.000000e+00> : vector<8x9x128xf32>
    %17 = tpu.matmul %14, %16, %cst_32 {dimension_numbers = #tpu.dot_dimension_numbers<[2], [0], [0, 1], [1], [0, 0, 0, 1, 1, 1], [], []>} : vector<8x9x8xbf16>, vector<8x128xbf16>, vector<8x9x128xf32> -> vector<8x9x128xf32>
    %c0_33 = arith.constant 0 : index
    %c1 = arith.constant 1 : index
    %c0_34 = arith.constant 0 : index
    %18 = vector.load %arg15[%c0_33, %c1, %c0_34] : memref<8x13x8xbf16, #tpu.memory_space<vmem>>, vector<8x9x8xbf16>
    %c1_35 = arith.constant 1 : index
    %c0_36 = arith.constant 0 : index
    %c0_37 = arith.constant 0 : index
    %19 = vector.load %arg3[%c1_35, %c0_36, %c0_37] : memref<5x8x128xbf16, #tpu.memory_space<vmem>>, vector<1x8x128xbf16>
    %20 = vector.shape_cast %19 : vector<1x8x128xbf16> to vector<8x128xbf16>
    %cst_38 = arith.constant dense<0.000000e+00> : vector<8x9x128xf32>
    %21 = tpu.matmul %18, %20, %cst_38 {dimension_numbers = #tpu.dot_dimension_numbers<[2], [0], [0, 1], [1], [0, 0, 0, 1, 1, 1], [], []>} : vector<8x9x8xbf16>, vector<8x128xbf16>, vector<8x9x128xf32> -> vector<8x9x128xf32>
    %22 = arith.addf %17, %21 : vector<8x9x128xf32>
    %c0_39 = arith.constant 0 : index
    %c2_40 = arith.constant 2 : index
    %c0_41 = arith.constant 0 : index
    %23 = vector.load %arg15[%c0_39, %c2_40, %c0_41] : memref<8x13x8xbf16, #tpu.memory_space<vmem>>, vector<8x9x8xbf16>
    %c2_42 = arith.constant 2 : index
    %c0_43 = arith.constant 0 : index
    %c0_44 = arith.constant 0 : index
    %24 = vector.load %arg3[%c2_42, %c0_43, %c0_44] : memref<5x8x128xbf16, #tpu.memory_space<vmem>>, vector<1x8x128xbf16>
    %25 = vector.shape_cast %24 : vector<1x8x128xbf16> to vector<8x128xbf16>
    %cst_45 = arith.constant dense<0.000000e+00> : vector<8x9x128xf32>
    %26 = tpu.matmul %23, %25, %cst_45 {dimension_numbers = #tpu.dot_dimension_numbers<[2], [0], [0, 1], [1], [0, 0, 0, 1, 1, 1], [], []>} : vector<8x9x8xbf16>, vector<8x128xbf16>, vector<8x9x128xf32> -> vector<8x9x128xf32>
    %27 = arith.addf %22, %26 : vector<8x9x128xf32>
    %c0_46 = arith.constant 0 : index
    %c3 = arith.constant 3 : index
    %c0_47 = arith.constant 0 : index
    %28 = vector.load %arg15[%c0_46, %c3, %c0_47] : memref<8x13x8xbf16, #tpu.memory_space<vmem>>, vector<8x9x8xbf16>
    %c3_48 = arith.constant 3 : index
    %c0_49 = arith.constant 0 : index
    %c0_50 = arith.constant 0 : index
    %29 = vector.load %arg3[%c3_48, %c0_49, %c0_50] : memref<5x8x128xbf16, #tpu.memory_space<vmem>>, vector<1x8x128xbf16>
    %30 = vector.shape_cast %29 : vector<1x8x128xbf16> to vector<8x128xbf16>
    %cst_51 = arith.constant dense<0.000000e+00> : vector<8x9x128xf32>
    %31 = tpu.matmul %28, %30, %cst_51 {dimension_numbers = #tpu.dot_dimension_numbers<[2], [0], [0, 1], [1], [0, 0, 0, 1, 1, 1], [], []>} : vector<8x9x8xbf16>, vector<8x128xbf16>, vector<8x9x128xf32> -> vector<8x9x128xf32>
    %32 = arith.addf %27, %31 : vector<8x9x128xf32>
    %c0_52 = arith.constant 0 : index
    %c4 = arith.constant 4 : index
    %c0_53 = arith.constant 0 : index
    %33 = vector.load %arg15[%c0_52, %c4, %c0_53] : memref<8x13x8xbf16, #tpu.memory_space<vmem>>, vector<8x9x8xbf16>
    %c4_54 = arith.constant 4 : index
    %c0_55 = arith.constant 0 : index
    %c0_56 = arith.constant 0 : index
    %34 = vector.load %arg3[%c4_54, %c0_55, %c0_56] : memref<5x8x128xbf16, #tpu.memory_space<vmem>>, vector<1x8x128xbf16>
    %35 = vector.shape_cast %34 : vector<1x8x128xbf16> to vector<8x128xbf16>
    %cst_57 = arith.constant dense<0.000000e+00> : vector<8x9x128xf32>
    %36 = tpu.matmul %33, %35, %cst_57 {dimension_numbers = #tpu.dot_dimension_numbers<[2], [0], [0, 1], [1], [0, 0, 0, 1, 1, 1], [], []>} : vector<8x9x8xbf16>, vector<8x128xbf16>, vector<8x9x128xf32> -> vector<8x9x128xf32>
    %37 = arith.addf %32, %36 : vector<8x9x128xf32>
    %38 = vector.extract_strided_slice %37 {offsets = [0, 0, 0], sizes = [8, 8, 128], strides = [1, 1, 1]} : vector<8x9x128xf32> to vector<8x8x128xf32>
    %cst_58 = arith.constant dense<0xFF800000> : vector<8x128xf32>
    %39 = vector.multi_reduction <maximumf>, %38, %cst_58 [1] : vector<8x8x128xf32> to vector<8x128xf32>
    %40 = vector.extract_strided_slice %37 {offsets = [0, 8, 0], sizes = [8, 1, 128], strides = [1, 1, 1]} : vector<8x9x128xf32> to vector<8x1x128xf32>
    %c0_59 = arith.constant 0 : index
    %c0_60 = arith.constant 0 : index
    %41 = vector.load %arg5[%c0_59, %c0_60] : memref<1x128xf32, #tpu.memory_space<vmem>>, vector<1x128xf32>
    %42 = vector.shape_cast %41 : vector<1x128xf32> to vector<1x1x128xf32>
    %43 = vector.broadcast %42 : vector<1x1x128xf32> to vector<8x1x128xf32>
    %44 = arith.addf %40, %43 : vector<8x1x128xf32>
    %cst_61 = arith.constant dense<0xFF800000> : vector<8x128xf32>
    %45 = vector.multi_reduction <maximumf>, %44, %cst_61 [1] : vector<8x1x128xf32> to vector<8x128xf32>
    %46 = arith.maximumf %39, %45 : vector<8x128xf32>
    %c0_62 = arith.constant 0 : index
    %c0_63 = arith.constant 0 : index
    %47 = vector.load %arg4[%c0_62, %c0_63] : memref<1x128xf32, #tpu.memory_space<vmem>>, vector<1x128xf32>
    %48 = vector.broadcast %47 : vector<1x128xf32> to vector<8x128xf32>
    %49 = arith.addf %46, %48 : vector<8x128xf32>
    %50 = math.tanh %49 : vector<8x128xf32>
    %51 = arith.truncf %50 : vector<8x128xf32> to vector<8x128xbf16>
    %52 = vector.shape_cast %51 : vector<8x128xbf16> to vector<1x8x128xbf16>
    %c0_64 = arith.constant 0 : index
    %c2_65 = arith.constant 2 : index
    %c0_66 = arith.constant 0 : index
    %53 = vector.load %arg17[%c0_64, %c2_65, %c0_66] : memref<1x13x128xbf16, #tpu.memory_space<vmem>>, vector<1x8x128xbf16>
    tpu.vector_store %arg17[%c0_64, %c2_65, %c0_66], %52 {strides = array<i32>} : memref<1x13x128xbf16, #tpu.memory_space<vmem>>, vector<1x8x128xbf16>,
    %c0_67 = arith.constant 0 : index
    %c0_68 = arith.constant 0 : index
    %c0_69 = arith.constant 0 : index
    %54 = vector.load %arg2[%c0_67, %c0_68, %c0_69] : memref<1x8x16xbf16, #tpu.memory_space<vmem>>, vector<1x8x16xbf16>
    %c0_70 = arith.constant 0 : index
    %c2_71 = arith.constant 2 : index
    %c0_72 = arith.constant 0 : index
    %55 = vector.load %arg16[%c0_70, %c2_71, %c0_72] : memref<1x13x16xbf16, #tpu.memory_space<vmem>>, vector<1x8x16xbf16>
    tpu.vector_store %arg16[%c0_70, %c2_71, %c0_72], %54 {strides = array<i32>} : memref<1x13x16xbf16, #tpu.memory_space<vmem>>, vector<1x8x16xbf16>,
    %c0_73 = arith.constant 0 : index
    %c0_74 = arith.constant 0 : index
    %c0_75 = arith.constant 0 : index
    %56 = vector.load %arg16[%c0_73, %c0_74, %c0_75] : memref<1x13x16xbf16, #tpu.memory_space<vmem>>, vector<1x9x16xbf16>
    %c0_76 = arith.constant 0 : index
    %c0_77 = arith.constant 0 : index
    %c0_78 = arith.constant 0 : index
    %57 = vector.load %arg6[%c0_76, %c0_77, %c0_78] : memref<5x16x128xbf16, #tpu.memory_space<vmem>>, vector<1x16x128xbf16>
    %58 = vector.shape_cast %57 : vector<1x16x128xbf16> to vector<16x128xbf16>
    %cst_79 = arith.constant dense<0.000000e+00> : vector<1x9x128xf32>
    %59 = tpu.matmul %56, %58, %cst_79 {dimension_numbers = #tpu.dot_dimension_numbers<[2], [0], [0, 1], [1], [0, 0, 0, 1, 1, 1], [], []>} : vector<1x9x16xbf16>, vector<16x128xbf16>, vector<1x9x128xf32> -> vector<1x9x128xf32>
    %c0_80 = arith.constant 0 : index
    %c0_81 = arith.constant 0 : index
    %c0_82 = arith.constant 0 : index
    %60 = vector.load %arg17[%c0_80, %c0_81, %c0_82] : memref<1x13x128xbf16, #tpu.memory_space<vmem>>, vector<1x9x128xbf16>
    %c0_83 = arith.constant 0 : index
    %c0_84 = arith.constant 0 : index
    %c0_85 = arith.constant 0 : index
    %61 = vector.load %arg7[%c0_83, %c0_84, %c0_85] : memref<5x128x128xbf16, #tpu.memory_space<vmem>>, vector<1x128x128xbf16>
    %62 = vector.shape_cast %61 : vector<1x128x128xbf16> to vector<128x128xbf16>
    %cst_86 = arith.constant dense<0.000000e+00> : vector<1x9x128xf32>
    %63 = tpu.matmul %60, %62, %cst_86 {dimension_numbers = #tpu.dot_dimension_numbers<[2], [0], [0, 1], [1], [0, 0, 0, 1, 1, 1], [], []>} : vector<1x9x128xbf16>, vector<128x128xbf16>, vector<1x9x128xf32> -> vector<1x9x128xf32>
    %64 = arith.addf %59, %63 : vector<1x9x128xf32>
    %c0_87 = arith.constant 0 : index
    %c1_88 = arith.constant 1 : index
    %c0_89 = arith.constant 0 : index
    %65 = vector.load %arg16[%c0_87, %c1_88, %c0_89] : memref<1x13x16xbf16, #tpu.memory_space<vmem>>, vector<1x9x16xbf16>
    %c1_90 = arith.constant 1 : index
    %c0_91 = arith.constant 0 : index
    %c0_92 = arith.constant 0 : index
    %66 = vector.load %arg6[%c1_90, %c0_91, %c0_92] : memref<5x16x128xbf16, #tpu.memory_space<vmem>>, vector<1x16x128xbf16>
    %67 = vector.shape_cast %66 : vector<1x16x128xbf16> to vector<16x128xbf16>
    %cst_93 = arith.constant dense<0.000000e+00> : vector<1x9x128xf32>
    %68 = tpu.matmul %65, %67, %cst_93 {dimension_numbers = #tpu.dot_dimension_numbers<[2], [0], [0, 1], [1], [0, 0, 0, 1, 1, 1], [], []>} : vector<1x9x16xbf16>, vector<16x128xbf16>, vector<1x9x128xf32> -> vector<1x9x128xf32>
    %c0_94 = arith.constant 0 : index
    %c1_95 = arith.constant 1 : index
    %c0_96 = arith.constant 0 : index
    %69 = vector.load %arg17[%c0_94, %c1_95, %c0_96] : memref<1x13x128xbf16, #tpu.memory_space<vmem>>, vector<1x9x128xbf16>
    %c1_97 = arith.constant 1 : index
    %c0_98 = arith.constant 0 : index
    %c0_99 = arith.constant 0 : index
    %70 = vector.load %arg7[%c1_97, %c0_98, %c0_99] : memref<5x128x128xbf16, #tpu.memory_space<vmem>>, vector<1x128x128xbf16>
    %71 = vector.shape_cast %70 : vector<1x128x128xbf16> to vector<128x128xbf16>
    %cst_100 = arith.constant dense<0.000000e+00> : vector<1x9x128xf32>
    %72 = tpu.matmul %69, %71, %cst_100 {dimension_numbers = #tpu.dot_dimension_numbers<[2], [0], [0, 1], [1], [0, 0, 0, 1, 1, 1], [], []>} : vector<1x9x128xbf16>, vector<128x128xbf16>, vector<1x9x128xf32> -> vector<1x9x128xf32>
    %73 = arith.addf %68, %72 : vector<1x9x128xf32>
    %74 = arith.addf %64, %73 : vector<1x9x128xf32>
    %c0_101 = arith.constant 0 : index
    %c2_102 = arith.constant 2 : index
    %c0_103 = arith.constant 0 : index
    %75 = vector.load %arg16[%c0_101, %c2_102, %c0_103] : memref<1x13x16xbf16, #tpu.memory_space<vmem>>, vector<1x9x16xbf16>
    %c2_104 = arith.constant 2 : index
    %c0_105 = arith.constant 0 : index
    %c0_106 = arith.constant 0 : index
    %76 = vector.load %arg6[%c2_104, %c0_105, %c0_106] : memref<5x16x128xbf16, #tpu.memory_space<vmem>>, vector<1x16x128xbf16>
    %77 = vector.shape_cast %76 : vector<1x16x128xbf16> to vector<16x128xbf16>
    %cst_107 = arith.constant dense<0.000000e+00> : vector<1x9x128xf32>
    %78 = tpu.matmul %75, %77, %cst_107 {dimension_numbers = #tpu.dot_dimension_numbers<[2], [0], [0, 1], [1], [0, 0, 0, 1, 1, 1], [], []>} : vector<1x9x16xbf16>, vector<16x128xbf16>, vector<1x9x128xf32> -> vector<1x9x128xf32>
    %c0_108 = arith.constant 0 : index
    %c2_109 = arith.constant 2 : index
    %c0_110 = arith.constant 0 : index
    %79 = vector.load %arg17[%c0_108, %c2_109, %c0_110] : memref<1x13x128xbf16, #tpu.memory_space<vmem>>, vector<1x9x128xbf16>
    %c2_111 = arith.constant 2 : index
    %c0_112 = arith.constant 0 : index
    %c0_113 = arith.constant 0 : index
    %80 = vector.load %arg7[%c2_111, %c0_112, %c0_113] : memref<5x128x128xbf16, #tpu.memory_space<vmem>>, vector<1x128x128xbf16>
    %81 = vector.shape_cast %80 : vector<1x128x128xbf16> to vector<128x128xbf16>
    %cst_114 = arith.constant dense<0.000000e+00> : vector<1x9x128xf32>
    %82 = tpu.matmul %79, %81, %cst_114 {dimension_numbers = #tpu.dot_dimension_numbers<[2], [0], [0, 1], [1], [0, 0, 0, 1, 1, 1], [], []>} : vector<1x9x128xbf16>, vector<128x128xbf16>, vector<1x9x128xf32> -> vector<1x9x128xf32>
    %83 = arith.addf %78, %82 : vector<1x9x128xf32>
    %84 = arith.addf %74, %83 : vector<1x9x128xf32>
    %c0_115 = arith.constant 0 : index
    %c3_116 = arith.constant 3 : index
    %c0_117 = arith.constant 0 : index
    %85 = vector.load %arg16[%c0_115, %c3_116, %c0_117] : memref<1x13x16xbf16, #tpu.memory_space<vmem>>, vector<1x9x16xbf16>
    %c3_118 = arith.constant 3 : index
    %c0_119 = arith.constant 0 : index
    %c0_120 = arith.constant 0 : index
    %86 = vector.load %arg6[%c3_118, %c0_119, %c0_120] : memref<5x16x128xbf16, #tpu.memory_space<vmem>>, vector<1x16x128xbf16>
    %87 = vector.shape_cast %86 : vector<1x16x128xbf16> to vector<16x128xbf16>
    %cst_121 = arith.constant dense<0.000000e+00> : vector<1x9x128xf32>
    %88 = tpu.matmul %85, %87, %cst_121 {dimension_numbers = #tpu.dot_dimension_numbers<[2], [0], [0, 1], [1], [0, 0, 0, 1, 1, 1], [], []>} : vector<1x9x16xbf16>, vector<16x128xbf16>, vector<1x9x128xf32> -> vector<1x9x128xf32>
    %c0_122 = arith.constant 0 : index
    %c3_123 = arith.constant 3 : index
    %c0_124 = arith.constant 0 : index
    %89 = vector.load %arg17[%c0_122, %c3_123, %c0_124] : memref<1x13x128xbf16, #tpu.memory_space<vmem>>, vector<1x9x128xbf16>
    %c3_125 = arith.constant 3 : index
    %c0_126 = arith.constant 0 : index
    %c0_127 = arith.constant 0 : index
    %90 = vector.load %arg7[%c3_125, %c0_126, %c0_127] : memref<5x128x128xbf16, #tpu.memory_space<vmem>>, vector<1x128x128xbf16>
    %91 = vector.shape_cast %90 : vector<1x128x128xbf16> to vector<128x128xbf16>
    %cst_128 = arith.constant dense<0.000000e+00> : vector<1x9x128xf32>
    %92 = tpu.matmul %89, %91, %cst_128 {dimension_numbers = #tpu.dot_dimension_numbers<[2], [0], [0, 1], [1], [0, 0, 0, 1, 1, 1], [], []>} : vector<1x9x128xbf16>, vector<128x128xbf16>, vector<1x9x128xf32> -> vector<1x9x128xf32>
    %93 = arith.addf %88, %92 : vector<1x9x128xf32>
    %94 = arith.addf %84, %93 : vector<1x9x128xf32>
    %c0_129 = arith.constant 0 : index
    %c4_130 = arith.constant 4 : index
    %c0_131 = arith.constant 0 : index
    %95 = vector.load %arg16[%c0_129, %c4_130, %c0_131] : memref<1x13x16xbf16, #tpu.memory_space<vmem>>, vector<1x9x16xbf16>
    %c4_132 = arith.constant 4 : index
    %c0_133 = arith.constant 0 : index
    %c0_134 = arith.constant 0 : index
    %96 = vector.load %arg6[%c4_132, %c0_133, %c0_134] : memref<5x16x128xbf16, #tpu.memory_space<vmem>>, vector<1x16x128xbf16>
    %97 = vector.shape_cast %96 : vector<1x16x128xbf16> to vector<16x128xbf16>
    %cst_135 = arith.constant dense<0.000000e+00> : vector<1x9x128xf32>
    %98 = tpu.matmul %95, %97, %cst_135 {dimension_numbers = #tpu.dot_dimension_numbers<[2], [0], [0, 1], [1], [0, 0, 0, 1, 1, 1], [], []>} : vector<1x9x16xbf16>, vector<16x128xbf16>, vector<1x9x128xf32> -> vector<1x9x128xf32>
    %c0_136 = arith.constant 0 : index
    %c4_137 = arith.constant 4 : index
    %c0_138 = arith.constant 0 : index
    %99 = vector.load %arg17[%c0_136, %c4_137, %c0_138] : memref<1x13x128xbf16, #tpu.memory_space<vmem>>, vector<1x9x128xbf16>
    %c4_139 = arith.constant 4 : index
    %c0_140 = arith.constant 0 : index
    %c0_141 = arith.constant 0 : index
    %100 = vector.load %arg7[%c4_139, %c0_140, %c0_141] : memref<5x128x128xbf16, #tpu.memory_space<vmem>>, vector<1x128x128xbf16>
    %101 = vector.shape_cast %100 : vector<1x128x128xbf16> to vector<128x128xbf16>
    %cst_142 = arith.constant dense<0.000000e+00> : vector<1x9x128xf32>
    %102 = tpu.matmul %99, %101, %cst_142 {dimension_numbers = #tpu.dot_dimension_numbers<[2], [0], [0, 1], [1], [0, 0, 0, 1, 1, 1], [], []>} : vector<1x9x128xbf16>, vector<128x128xbf16>, vector<1x9x128xf32> -> vector<1x9x128xf32>
    %103 = arith.addf %98, %102 : vector<1x9x128xf32>
    %104 = arith.addf %94, %103 : vector<1x9x128xf32>
    %105 = vector.extract_strided_slice %104 {offsets = [0, 0, 0], sizes = [1, 8, 128], strides = [1, 1, 1]} : vector<1x9x128xf32> to vector<1x8x128xf32>
    %cst_143 = arith.constant dense<0xFF800000> : vector<1x128xf32>
    %106 = vector.multi_reduction <maximumf>, %105, %cst_143 [1] : vector<1x8x128xf32> to vector<1x128xf32>
    %107 = vector.extract_strided_slice %104 {offsets = [0, 8, 0], sizes = [1, 1, 128], strides = [1, 1, 1]} : vector<1x9x128xf32> to vector<1x1x128xf32>
    %c0_144 = arith.constant 0 : index
    %c0_145 = arith.constant 0 : index
    %108 = vector.load %arg9[%c0_144, %c0_145] : memref<1x128xf32, #tpu.memory_space<vmem>>, vector<1x128xf32>
    %109 = vector.shape_cast %108 : vector<1x128xf32> to vector<1x1x128xf32>
    %110 = arith.addf %107, %109 : vector<1x1x128xf32>
    %cst_146 = arith.constant dense<0xFF800000> : vector<1x128xf32>
    %111 = vector.multi_reduction <maximumf>, %110, %cst_146 [1] : vector<1x1x128xf32> to vector<1x128xf32>
    %112 = arith.maximumf %106, %111 : vector<1x128xf32>
    %c0_147 = arith.constant 0 : index
    %c0_148 = arith.constant 0 : index
    %113 = vector.load %arg8[%c0_147, %c0_148] : memref<1x128xf32, #tpu.memory_space<vmem>>, vector<1x128xf32>
    %114 = arith.addf %112, %113 : vector<1x128xf32>
    %115 = math.tanh %114 : vector<1x128xf32>
    %116 = math.tanh %115 : vector<1x128xf32>
    %117 = arith.truncf %116 : vector<1x128xf32> to vector<1x128xbf16>
    %c0_149 = arith.constant 0 : index
    %c0_150 = arith.constant 0 : index
    %118 = vector.load %arg10[%c0_149, %c0_150] : memref<128x128xbf16, #tpu.memory_space<vmem>>, vector<128x128xbf16>
    %cst_151 = arith.constant dense<0.000000e+00> : vector<1x128xf32>
    %119 = tpu.matmul %117, %118, %cst_151 {dimension_numbers = #tpu.dot_dimension_numbers<[1], [0], [0], [1], [0, 0, 1, 1], [], []>} : vector<1x128xbf16>, vector<128x128xbf16>, vector<1x128xf32> -> vector<1x128xf32>
    %c0_152 = arith.constant 0 : index
    %c0_153 = arith.constant 0 : index
    %120 = vector.load %arg11[%c0_152, %c0_153] : memref<1x128xf32, #tpu.memory_space<vmem>>, vector<1x128xf32>
    %121 = arith.addf %119, %120 : vector<1x128xf32>
    %122 = math.tanh %121 : vector<1x128xf32>
    %123 = arith.truncf %122 : vector<1x128xf32> to vector<1x128xbf16>
    %c0_154 = arith.constant 0 : index
    %c0_155 = arith.constant 0 : index
    %124 = vector.load %arg12[%c0_154, %c0_155] : memref<128x128xbf16, #tpu.memory_space<vmem>>, vector<128x128xbf16>
    %cst_156 = arith.constant dense<0.000000e+00> : vector<1x128xf32>
    %125 = tpu.matmul %123, %124, %cst_156 {dimension_numbers = #tpu.dot_dimension_numbers<[1], [0], [0], [1], [0, 0, 1, 1], [], []>} : vector<1x128xbf16>, vector<128x128xbf16>, vector<1x128xf32> -> vector<1x128xf32>
    %c0_157 = arith.constant 0 : index
    %c0_158 = arith.constant 0 : index
    %126 = vector.load %arg13[%c0_157, %c0_158] : memref<1x128xf32, #tpu.memory_space<vmem>>, vector<1x128xf32>
    %127 = arith.addf %125, %126 : vector<1x128xf32>
    %128 = vector.shape_cast %127 : vector<1x128xf32> to vector<1x1x128xf32>
    %c0_159 = arith.constant 0 : index
    %c0_160 = arith.constant 0 : index
    %c0_161 = arith.constant 0 : index
    %129 = vector.load %arg14[%c0_159, %c0_160, %c0_161] : memref<1x1x128xf32, #tpu.memory_space<vmem>>, vector<1x1x128xf32>
    tpu.vector_store %arg14[%c0_159, %c0_160, %c0_161], %128 {strides = array<i32>} : memref<1x1x128xf32, #tpu.memory_space<vmem>>, vector<1x1x128xf32>,
    return
  }
  func.func @transform_0(%arg0: i32) -> (i32, i32, i32) {
    %c0_i32 = arith.constant 0 : i32
    %c0_i32_0 = arith.constant 0 : i32
    %c0_i32_1 = arith.constant 0 : i32
    return %arg0, %c0_i32, %c0_i32_0 : i32, i32, i32
  }
  func.func @transform_1(%arg0: i32) -> (i32, i32, i32) {
    %c0_i32 = arith.constant 0 : i32
    %c0_i32_0 = arith.constant 0 : i32
    %c0_i32_1 = arith.constant 0 : i32
    return %arg0, %c0_i32, %c0_i32_0 : i32, i32, i32
  }
  func.func @transform_2(%arg0: i32) -> (i32, i32, i32) {
    %c0_i32 = arith.constant 0 : i32
    %c0_i32_0 = arith.constant 0 : i32
    %c0_i32_1 = arith.constant 0 : i32
    %c0_i32_2 = arith.constant 0 : i32
    return %c0_i32, %c0_i32_0, %c0_i32_1 : i32, i32, i32
  }
  func.func @transform_3(%arg0: i32) -> (i32, i32) {
    %c0_i32 = arith.constant 0 : i32
    %c0_i32_0 = arith.constant 0 : i32
    %c0_i32_1 = arith.constant 0 : i32
    return %c0_i32, %c0_i32_0 : i32, i32
  }
  func.func @transform_4(%arg0: i32) -> (i32, i32) {
    %c0_i32 = arith.constant 0 : i32
    %c0_i32_0 = arith.constant 0 : i32
    %c0_i32_1 = arith.constant 0 : i32
    return %c0_i32, %c0_i32_0 : i32, i32
  }
  func.func @transform_5(%arg0: i32) -> (i32, i32, i32) {
    %c0_i32 = arith.constant 0 : i32
    %c0_i32_0 = arith.constant 0 : i32
    %c0_i32_1 = arith.constant 0 : i32
    %c0_i32_2 = arith.constant 0 : i32
    return %c0_i32, %c0_i32_0, %c0_i32_1 : i32, i32, i32
  }
  func.func @transform_6(%arg0: i32) -> (i32, i32, i32) {
    %c0_i32 = arith.constant 0 : i32
    %c0_i32_0 = arith.constant 0 : i32
    %c0_i32_1 = arith.constant 0 : i32
    %c0_i32_2 = arith.constant 0 : i32
    return %c0_i32, %c0_i32_0, %c0_i32_1 : i32, i32, i32
  }
  func.func @transform_7(%arg0: i32) -> (i32, i32) {
    %c0_i32 = arith.constant 0 : i32
    %c0_i32_0 = arith.constant 0 : i32
    %c0_i32_1 = arith.constant 0 : i32
    return %c0_i32, %c0_i32_0 : i32, i32
  }
  func.func @transform_8(%arg0: i32) -> (i32, i32) {
    %c0_i32 = arith.constant 0 : i32
    %c0_i32_0 = arith.constant 0 : i32
    %c0_i32_1 = arith.constant 0 : i32
    return %c0_i32, %c0_i32_0 : i32, i32
  }
  func.func @transform_9(%arg0: i32) -> (i32, i32) {
    %c0_i32 = arith.constant 0 : i32
    %c0_i32_0 = arith.constant 0 : i32
    %c0_i32_1 = arith.constant 0 : i32
    return %c0_i32, %c0_i32_0 : i32, i32
  }
  func.func @transform_10(%arg0: i32) -> (i32, i32) {
    %c0_i32 = arith.constant 0 : i32
    %c0_i32_0 = arith.constant 0 : i32
    %c0_i32_1 = arith.constant 0 : i32
    return %c0_i32, %c0_i32_0 : i32, i32
  }
  func.func @transform_11(%arg0: i32) -> (i32, i32) {
    %c0_i32 = arith.constant 0 : i32
    %c0_i32_0 = arith.constant 0 : i32
    %c0_i32_1 = arith.constant 0 : i32
    return %c0_i32, %c0_i32_0 : i32, i32
  }
  func.func @transform_12(%arg0: i32) -> (i32, i32) {
    %c0_i32 = arith.constant 0 : i32
    %c0_i32_0 = arith.constant 0 : i32
    %c0_i32_1 = arith.constant 0 : i32
    return %c0_i32, %c0_i32_0 : i32, i32
  }
  func.func @transform_13(%arg0: i32) -> (i32, i32, i32) {
    %c0_i32 = arith.constant 0 : i32
    %c0_i32_0 = arith.constant 0 : i32
    %c0_i32_1 = arith.constant 0 : i32
    return %arg0, %c0_i32, %c0_i32_0 : i32, i32, i32
  }
}

module attributes {stable_mosaic.version = 11 : i64} {
  func.func @_char_cnn_fused_kernel(%arg0: i32, %arg1: memref<8x8x8xbf16, #tpu.memory_space<vmem>>, %arg2: memref<1x8x16xbf16, #tpu.memory_space<vmem>>, %arg3: memref<5x8x128xbf16, #tpu.memory_space<vmem>>, %arg4: memref<1x128xf32, #tpu.memory_space<vmem>>, %arg5: memref<1x128xf32, #tpu.memory_space<vmem>>, %arg6: memref<5x16x128xbf16, #tpu.memory_space<vmem>>, %arg7: memref<5x128x128xbf16, #tpu.memory_space<vmem>>, %arg8: memref<1x128xf32, #tpu.memory_space<vmem>>, %arg9: memref<1x128xf32, #tpu.memory_space<vmem>>, %arg10: memref<128x128xbf16, #tpu.memory_space<vmem>>, %arg11: memref<1x128xf32, #tpu.memory_space<vmem>>, %arg12: memref<128x128xbf16, #tpu.memory_space<vmem>>, %arg13: memref<1x128xf32, #tpu.memory_space<vmem>>, %arg14: memref<1x1x128xf32, #tpu.memory_space<vmem>>, %arg15: memref<8x13x8xbf16, #tpu.memory_space<vmem>>, %arg16: memref<1x13x16xbf16, #tpu.memory_space<vmem>>, %arg17: memref<1x13x128xbf16, #tpu.memory_space<vmem>>) attributes {dimension_semantics = [#tpu.dimension_semantics<parallel>], iteration_bounds = array<i64: 2>, scalar_prefetch = 0 : i64, scratch_operands = 3 : i64, tpu.core_type = #tpu.core_type<tc>, window_params = [{transform_indices = @transform_0, window_bounds = array<i64: 8, 8, 8>}, {transform_indices = @transform_1, window_bounds = array<i64: 1, 8, 16>}, {pipeline_mode = #tpu.pipeline_mode<synchronous>, transform_indices = @transform_2, window_bounds = array<i64: 5, 8, 128>}, {pipeline_mode = #tpu.pipeline_mode<synchronous>, transform_indices = @transform_3, window_bounds = array<i64: 1, 128>}, {pipeline_mode = #tpu.pipeline_mode<synchronous>, transform_indices = @transform_4, window_bounds = array<i64: 1, 128>}, {pipeline_mode = #tpu.pipeline_mode<synchronous>, transform_indices = @transform_5, window_bounds = array<i64: 5, 16, 128>}, {pipeline_mode = #tpu.pipeline_mode<synchronous>, transform_indices = @transform_6, window_bounds = array<i64: 5, 128, 128>}, {pipeline_mode = #tpu.pipeline_mode<synchronous>, transform_indices = @transform_7, window_bounds = array<i64: 1, 128>}, {pipeline_mode = #tpu.pipeline_mode<synchronous>, transform_indices = @transform_8, window_bounds = array<i64: 1, 128>}, {pipeline_mode = #tpu.pipeline_mode<synchronous>, transform_indices = @transform_9, window_bounds = array<i64: 128, 128>}, {pipeline_mode = #tpu.pipeline_mode<synchronous>, transform_indices = @transform_10, window_bounds = array<i64: 1, 128>}, {pipeline_mode = #tpu.pipeline_mode<synchronous>, transform_indices = @transform_11, window_bounds = array<i64: 128, 128>}, {pipeline_mode = #tpu.pipeline_mode<synchronous>, transform_indices = @transform_12, window_bounds = array<i64: 1, 128>}, {transform_indices = @transform_13, window_bounds = array<i64: 1, 1, 128>}]} {
    %cst = arith.constant 0.000000e+00 : bf16
    %0 = vector.broadcast %cst : bf16 to vector<8x2x8xbf16>
    %c0 = arith.constant 0 : index
    %c0_0 = arith.constant 0 : index
    %c0_1 = arith.constant 0 : index
    %1 = vector.load %arg15[%c0, %c0_0, %c0_1] : memref<8x13x8xbf16, #tpu.memory_space<vmem>>, vector<8x2x8xbf16>
    tpu.vector_store %arg15[%c0, %c0_0, %c0_1], %0 {strides = array<i32>} : memref<8x13x8xbf16, #tpu.memory_space<vmem>>, vector<8x2x8xbf16>,
    %cst_2 = arith.constant 0.000000e+00 : bf16
    %2 = vector.broadcast %cst_2 : bf16 to vector<8x3x8xbf16>
    %c0_3 = arith.constant 0 : index
    %c10 = arith.constant 10 : index
    %c0_4 = arith.constant 0 : index
    %3 = vector.load %arg15[%c0_3, %c10, %c0_4] : memref<8x13x8xbf16, #tpu.memory_space<vmem>>, vector<8x3x8xbf16>
    tpu.vector_store %arg15[%c0_3, %c10, %c0_4], %2 {strides = array<i32>} : memref<8x13x8xbf16, #tpu.memory_space<vmem>>, vector<8x3x8xbf16>,
    %cst_5 = arith.constant 0.000000e+00 : bf16
    %4 = vector.broadcast %cst_5 : bf16 to vector<1x2x16xbf16>
    %c0_6 = arith.constant 0 : index
    %c0_7 = arith.constant 0 : index
    %c0_8 = arith.constant 0 : index
    %5 = vector.load %arg16[%c0_6, %c0_7, %c0_8] : memref<1x13x16xbf16, #tpu.memory_space<vmem>>, vector<1x2x16xbf16>
    tpu.vector_store %arg16[%c0_6, %c0_7, %c0_8], %4 {strides = array<i32>} : memref<1x13x16xbf16, #tpu.memory_space<vmem>>, vector<1x2x16xbf16>,
    %cst_9 = arith.constant 0.000000e+00 : bf16
    %6 = vector.broadcast %cst_9 : bf16 to vector<1x3x16xbf16>
    %c0_10 = arith.constant 0 : index
    %c10_11 = arith.constant 10 : index
    %c0_12 = arith.constant 0 : index
    %7 = vector.load %arg16[%c0_10, %c10_11, %c0_12] : memref<1x13x16xbf16, #tpu.memory_space<vmem>>, vector<1x3x16xbf16>
    tpu.vector_store %arg16[%c0_10, %c10_11, %c0_12], %6 {strides = array<i32>} : memref<1x13x16xbf16, #tpu.memory_space<vmem>>, vector<1x3x16xbf16>,
    %cst_13 = arith.constant 0.000000e+00 : bf16
    %8 = vector.broadcast %cst_13 : bf16 to vector<1x2x128xbf16>
    %c0_14 = arith.constant 0 : index
    %c0_15 = arith.constant 0 : index
    %c0_16 = arith.constant 0 : index
    %9 = vector.load %arg17[%c0_14, %c0_15, %c0_16] : memref<1x13x128xbf16, #tpu.memory_space<vmem>>, vector<1x2x128xbf16>
    tpu.vector_store %arg17[%c0_14, %c0_15, %c0_16], %8 {strides = array<i32>} : memref<1x13x128xbf16, #tpu.memory_space<vmem>>, vector<1x2x128xbf16>,
    %cst_17 = arith.constant 0.000000e+00 : bf16
    %10 = vector.broadcast %cst_17 : bf16 to vector<1x3x128xbf16>
    %c0_18 = arith.constant 0 : index
    %c10_19 = arith.constant 10 : index
    %c0_20 = arith.constant 0 : index
    %11 = vector.load %arg17[%c0_18, %c10_19, %c0_20] : memref<1x13x128xbf16, #tpu.memory_space<vmem>>, vector<1x3x128xbf16>
    tpu.vector_store %arg17[%c0_18, %c10_19, %c0_20], %10 {strides = array<i32>} : memref<1x13x128xbf16, #tpu.memory_space<vmem>>, vector<1x3x128xbf16>,
    %c0_21 = arith.constant 0 : index
    %c0_22 = arith.constant 0 : index
    %c0_23 = arith.constant 0 : index
    %12 = vector.load %arg1[%c0_21, %c0_22, %c0_23] : memref<8x8x8xbf16, #tpu.memory_space<vmem>>, vector<8x8x8xbf16>
    %c0_24 = arith.constant 0 : index
    %c2 = arith.constant 2 : index
    %c0_25 = arith.constant 0 : index
    %13 = vector.load %arg15[%c0_24, %c2, %c0_25] : memref<8x13x8xbf16, #tpu.memory_space<vmem>>, vector<8x8x8xbf16>
    tpu.vector_store %arg15[%c0_24, %c2, %c0_25], %12 {strides = array<i32>} : memref<8x13x8xbf16, #tpu.memory_space<vmem>>, vector<8x8x8xbf16>,
    %c0_26 = arith.constant 0 : index
    %c0_27 = arith.constant 0 : index
    %c0_28 = arith.constant 0 : index
    %14 = vector.load %arg15[%c0_26, %c0_27, %c0_28] : memref<8x13x8xbf16, #tpu.memory_space<vmem>>, vector<8x9x8xbf16>
    %c0_29 = arith.constant 0 : index
    %c0_30 = arith.constant 0 : index
    %c0_31 = arith.constant 0 : index
    %15 = vector.load %arg3[%c0_29, %c0_30, %c0_31] : memref<5x8x128xbf16, #tpu.memory_space<vmem>>, vector<1x8x128xbf16>
    %16 = vector.shape_cast %15 : vector<1x8x128xbf16> to vector<8x128xbf16>
    %cst_32 = arith.constant dense<0.000000e+00> : vector<8x9x128xf32>
    %17 = tpu.matmul %14, %16, %cst_32 {dimension_numbers = #tpu.dot_dimension_numbers<[2], [0], [0, 1], [1], [0, 0, 0, 1, 1, 1], [], []>} : vector<8x9x8xbf16>, vector<8x128xbf16>, vector<8x9x128xf32> -> vector<8x9x128xf32>
    %c0_33 = arith.constant 0 : index
    %c1 = arith.constant 1 : index
    %c0_34 = arith.constant 0 : index
    %18 = vector.load %arg15[%c0_33, %c1, %c0_34] : memref<8x13x8xbf16, #tpu.memory_space<vmem>>, vector<8x9x8xbf16>
    %c1_35 = arith.constant 1 : index
    %c0_36 = arith.constant 0 : index
    %c0_37 = arith.constant 0 : index
    %19 = vector.load %arg3[%c1_35, %c0_36, %c0_37] : memref<5x8x128xbf16, #tpu.memory_space<vmem>>, vector<1x8x128xbf16>
    %20 = vector.shape_cast %19 : vector<1x8x128xbf16> to vector<8x128xbf16>
    %cst_38 = arith.constant dense<0.000000e+00> : vector<8x9x128xf32>
    %21 = tpu.matmul %18, %20, %cst_38 {dimension_numbers = #tpu.dot_dimension_numbers<[2], [0], [0, 1], [1], [0, 0, 0, 1, 1, 1], [], []>} : vector<8x9x8xbf16>, vector<8x128xbf16>, vector<8x9x128xf32> -> vector<8x9x128xf32>
    %22 = arith.addf %17, %21 : vector<8x9x128xf32>
    %c0_39 = arith.constant 0 : index
    %c2_40 = arith.constant 2 : index
    %c0_41 = arith.constant 0 : index
    %23 = vector.load %arg15[%c0_39, %c2_40, %c0_41] : memref<8x13x8xbf16, #tpu.memory_space<vmem>>, vector<8x9x8xbf16>
    %c2_42 = arith.constant 2 : index
    %c0_43 = arith.constant 0 : index
    %c0_44 = arith.constant 0 : index
    %24 = vector.load %arg3[%c2_42, %c0_43, %c0_44] : memref<5x8x128xbf16, #tpu.memory_space<vmem>>, vector<1x8x128xbf16>
    %25 = vector.shape_cast %24 : vector<1x8x128xbf16> to vector<8x128xbf16>
    %cst_45 = arith.constant dense<0.000000e+00> : vector<8x9x128xf32>
    %26 = tpu.matmul %23, %25, %cst_45 {dimension_numbers = #tpu.dot_dimension_numbers<[2], [0], [0, 1], [1], [0, 0, 0, 1, 1, 1], [], []>} : vector<8x9x8xbf16>, vector<8x128xbf16>, vector<8x9x128xf32> -> vector<8x9x128xf32>
    %27 = arith.addf %22, %26 : vector<8x9x128xf32>
    %c0_46 = arith.constant 0 : index
    %c3 = arith.constant 3 : index
    %c0_47 = arith.constant 0 : index
    %28 = vector.load %arg15[%c0_46, %c3, %c0_47] : memref<8x13x8xbf16, #tpu.memory_space<vmem>>, vector<8x9x8xbf16>
    %c3_48 = arith.constant 3 : index
    %c0_49 = arith.constant 0 : index
    %c0_50 = arith.constant 0 : index
    %29 = vector.load %arg3[%c3_48, %c0_49, %c0_50] : memref<5x8x128xbf16, #tpu.memory_space<vmem>>, vector<1x8x128xbf16>
    %30 = vector.shape_cast %29 : vector<1x8x128xbf16> to vector<8x128xbf16>
    %cst_51 = arith.constant dense<0.000000e+00> : vector<8x9x128xf32>
    %31 = tpu.matmul %28, %30, %cst_51 {dimension_numbers = #tpu.dot_dimension_numbers<[2], [0], [0, 1], [1], [0, 0, 0, 1, 1, 1], [], []>} : vector<8x9x8xbf16>, vector<8x128xbf16>, vector<8x9x128xf32> -> vector<8x9x128xf32>
    %32 = arith.addf %27, %31 : vector<8x9x128xf32>
    %c0_52 = arith.constant 0 : index
    %c4 = arith.constant 4 : index
    %c0_53 = arith.constant 0 : index
    %33 = vector.load %arg15[%c0_52, %c4, %c0_53] : memref<8x13x8xbf16, #tpu.memory_space<vmem>>, vector<8x9x8xbf16>
    %c4_54 = arith.constant 4 : index
    %c0_55 = arith.constant 0 : index
    %c0_56 = arith.constant 0 : index
    %34 = vector.load %arg3[%c4_54, %c0_55, %c0_56] : memref<5x8x128xbf16, #tpu.memory_space<vmem>>, vector<1x8x128xbf16>
    %35 = vector.shape_cast %34 : vector<1x8x128xbf16> to vector<8x128xbf16>
    %cst_57 = arith.constant dense<0.000000e+00> : vector<8x9x128xf32>
    %36 = tpu.matmul %33, %35, %cst_57 {dimension_numbers = #tpu.dot_dimension_numbers<[2], [0], [0, 1], [1], [0, 0, 0, 1, 1, 1], [], []>} : vector<8x9x8xbf16>, vector<8x128xbf16>, vector<8x9x128xf32> -> vector<8x9x128xf32>
    %37 = arith.addf %32, %36 : vector<8x9x128xf32>
    %38 = vector.extract_strided_slice %37 {offsets = [0, 0, 0], sizes = [8, 8, 128], strides = [1, 1, 1]} : vector<8x9x128xf32> to vector<8x8x128xf32>
    %cst_58 = arith.constant dense<0xFF800000> : vector<8x128xf32>
    %39 = vector.multi_reduction <maximumf>, %38, %cst_58 [1] : vector<8x8x128xf32> to vector<8x128xf32>
    %40 = vector.extract_strided_slice %37 {offsets = [0, 8, 0], sizes = [8, 1, 128], strides = [1, 1, 1]} : vector<8x9x128xf32> to vector<8x1x128xf32>
    %c0_59 = arith.constant 0 : index
    %c0_60 = arith.constant 0 : index
    %41 = vector.load %arg5[%c0_59, %c0_60] : memref<1x128xf32, #tpu.memory_space<vmem>>, vector<1x128xf32>
    %42 = vector.shape_cast %41 : vector<1x128xf32> to vector<1x1x128xf32>
    %43 = vector.broadcast %42 : vector<1x1x128xf32> to vector<8x1x128xf32>
    %44 = arith.addf %40, %43 : vector<8x1x128xf32>
    %cst_61 = arith.constant dense<0xFF800000> : vector<8x128xf32>
    %45 = vector.multi_reduction <maximumf>, %44, %cst_61 [1] : vector<8x1x128xf32> to vector<8x128xf32>
    %46 = arith.maximumf %39, %45 : vector<8x128xf32>
    %c0_62 = arith.constant 0 : index
    %c0_63 = arith.constant 0 : index
    %47 = vector.load %arg4[%c0_62, %c0_63] : memref<1x128xf32, #tpu.memory_space<vmem>>, vector<1x128xf32>
    %48 = vector.broadcast %47 : vector<1x128xf32> to vector<8x128xf32>
    %49 = arith.addf %46, %48 : vector<8x128xf32>
    %50 = math.tanh %49 : vector<8x128xf32>
    %51 = arith.truncf %50 : vector<8x128xf32> to vector<8x128xbf16>
    %52 = vector.shape_cast %51 : vector<8x128xbf16> to vector<1x8x128xbf16>
    %c0_64 = arith.constant 0 : index
    %c2_65 = arith.constant 2 : index
    %c0_66 = arith.constant 0 : index
    %53 = vector.load %arg17[%c0_64, %c2_65, %c0_66] : memref<1x13x128xbf16, #tpu.memory_space<vmem>>, vector<1x8x128xbf16>
    tpu.vector_store %arg17[%c0_64, %c2_65, %c0_66], %52 {strides = array<i32>} : memref<1x13x128xbf16, #tpu.memory_space<vmem>>, vector<1x8x128xbf16>,
    %c0_67 = arith.constant 0 : index
    %c0_68 = arith.constant 0 : index
    %c0_69 = arith.constant 0 : index
    %54 = vector.load %arg2[%c0_67, %c0_68, %c0_69] : memref<1x8x16xbf16, #tpu.memory_space<vmem>>, vector<1x8x16xbf16>
    %c0_70 = arith.constant 0 : index
    %c2_71 = arith.constant 2 : index
    %c0_72 = arith.constant 0 : index
    %55 = vector.load %arg16[%c0_70, %c2_71, %c0_72] : memref<1x13x16xbf16, #tpu.memory_space<vmem>>, vector<1x8x16xbf16>
    tpu.vector_store %arg16[%c0_70, %c2_71, %c0_72], %54 {strides = array<i32>} : memref<1x13x16xbf16, #tpu.memory_space<vmem>>, vector<1x8x16xbf16>,
    %c0_73 = arith.constant 0 : index
    %c0_74 = arith.constant 0 : index
    %c0_75 = arith.constant 0 : index
    %56 = vector.load %arg16[%c0_73, %c0_74, %c0_75] : memref<1x13x16xbf16, #tpu.memory_space<vmem>>, vector<1x9x16xbf16>
    %c0_76 = arith.constant 0 : index
    %c0_77 = arith.constant 0 : index
    %c0_78 = arith.constant 0 : index
    %57 = vector.load %arg6[%c0_76, %c0_77, %c0_78] : memref<5x16x128xbf16, #tpu.memory_space<vmem>>, vector<1x16x128xbf16>
    %58 = vector.shape_cast %57 : vector<1x16x128xbf16> to vector<16x128xbf16>
    %cst_79 = arith.constant dense<0.000000e+00> : vector<1x9x128xf32>
    %59 = tpu.matmul %56, %58, %cst_79 {dimension_numbers = #tpu.dot_dimension_numbers<[2], [0], [0, 1], [1], [0, 0, 0, 1, 1, 1], [], []>} : vector<1x9x16xbf16>, vector<16x128xbf16>, vector<1x9x128xf32> -> vector<1x9x128xf32>
    %c0_80 = arith.constant 0 : index
    %c0_81 = arith.constant 0 : index
    %c0_82 = arith.constant 0 : index
    %60 = vector.load %arg17[%c0_80, %c0_81, %c0_82] : memref<1x13x128xbf16, #tpu.memory_space<vmem>>, vector<1x9x128xbf16>
    %c0_83 = arith.constant 0 : index
    %c0_84 = arith.constant 0 : index
    %c0_85 = arith.constant 0 : index
    %61 = vector.load %arg7[%c0_83, %c0_84, %c0_85] : memref<5x128x128xbf16, #tpu.memory_space<vmem>>, vector<1x128x128xbf16>
    %62 = vector.shape_cast %61 : vector<1x128x128xbf16> to vector<128x128xbf16>
    %cst_86 = arith.constant dense<0.000000e+00> : vector<1x9x128xf32>
    %63 = tpu.matmul %60, %62, %cst_86 {dimension_numbers = #tpu.dot_dimension_numbers<[2], [0], [0, 1], [1], [0, 0, 0, 1, 1, 1], [], []>} : vector<1x9x128xbf16>, vector<128x128xbf16>, vector<1x9x128xf32> -> vector<1x9x128xf32>
    %64 = arith.addf %59, %63 : vector<1x9x128xf32>
    %c0_87 = arith.constant 0 : index
    %c1_88 = arith.constant 1 : index
    %c0_89 = arith.constant 0 : index
    %65 = vector.load %arg16[%c0_87, %c1_88, %c0_89] : memref<1x13x16xbf16, #tpu.memory_space<vmem>>, vector<1x9x16xbf16>
    %c1_90 = arith.constant 1 : index
    %c0_91 = arith.constant 0 : index
    %c0_92 = arith.constant 0 : index
    %66 = vector.load %arg6[%c1_90, %c0_91, %c0_92] : memref<5x16x128xbf16, #tpu.memory_space<vmem>>, vector<1x16x128xbf16>
    %67 = vector.shape_cast %66 : vector<1x16x128xbf16> to vector<16x128xbf16>
    %cst_93 = arith.constant dense<0.000000e+00> : vector<1x9x128xf32>
    %68 = tpu.matmul %65, %67, %cst_93 {dimension_numbers = #tpu.dot_dimension_numbers<[2], [0], [0, 1], [1], [0, 0, 0, 1, 1, 1], [], []>} : vector<1x9x16xbf16>, vector<16x128xbf16>, vector<1x9x128xf32> -> vector<1x9x128xf32>
    %c0_94 = arith.constant 0 : index
    %c1_95 = arith.constant 1 : index
    %c0_96 = arith.constant 0 : index
    %69 = vector.load %arg17[%c0_94, %c1_95, %c0_96] : memref<1x13x128xbf16, #tpu.memory_space<vmem>>, vector<1x9x128xbf16>
    %c1_97 = arith.constant 1 : index
    %c0_98 = arith.constant 0 : index
    %c0_99 = arith.constant 0 : index
    %70 = vector.load %arg7[%c1_97, %c0_98, %c0_99] : memref<5x128x128xbf16, #tpu.memory_space<vmem>>, vector<1x128x128xbf16>
    %71 = vector.shape_cast %70 : vector<1x128x128xbf16> to vector<128x128xbf16>
    %cst_100 = arith.constant dense<0.000000e+00> : vector<1x9x128xf32>
    %72 = tpu.matmul %69, %71, %cst_100 {dimension_numbers = #tpu.dot_dimension_numbers<[2], [0], [0, 1], [1], [0, 0, 0, 1, 1, 1], [], []>} : vector<1x9x128xbf16>, vector<128x128xbf16>, vector<1x9x128xf32> -> vector<1x9x128xf32>
    %73 = arith.addf %68, %72 : vector<1x9x128xf32>
    %74 = arith.addf %64, %73 : vector<1x9x128xf32>
    %c0_101 = arith.constant 0 : index
    %c2_102 = arith.constant 2 : index
    %c0_103 = arith.constant 0 : index
    %75 = vector.load %arg16[%c0_101, %c2_102, %c0_103] : memref<1x13x16xbf16, #tpu.memory_space<vmem>>, vector<1x9x16xbf16>
    %c2_104 = arith.constant 2 : index
    %c0_105 = arith.constant 0 : index
    %c0_106 = arith.constant 0 : index
    %76 = vector.load %arg6[%c2_104, %c0_105, %c0_106] : memref<5x16x128xbf16, #tpu.memory_space<vmem>>, vector<1x16x128xbf16>
    %77 = vector.shape_cast %76 : vector<1x16x128xbf16> to vector<16x128xbf16>
    %cst_107 = arith.constant dense<0.000000e+00> : vector<1x9x128xf32>
    %78 = tpu.matmul %75, %77, %cst_107 {dimension_numbers = #tpu.dot_dimension_numbers<[2], [0], [0, 1], [1], [0, 0, 0, 1, 1, 1], [], []>} : vector<1x9x16xbf16>, vector<16x128xbf16>, vector<1x9x128xf32> -> vector<1x9x128xf32>
    %c0_108 = arith.constant 0 : index
    %c2_109 = arith.constant 2 : index
    %c0_110 = arith.constant 0 : index
    %79 = vector.load %arg17[%c0_108, %c2_109, %c0_110] : memref<1x13x128xbf16, #tpu.memory_space<vmem>>, vector<1x9x128xbf16>
    %c2_111 = arith.constant 2 : index
    %c0_112 = arith.constant 0 : index
    %c0_113 = arith.constant 0 : index
    %80 = vector.load %arg7[%c2_111, %c0_112, %c0_113] : memref<5x128x128xbf16, #tpu.memory_space<vmem>>, vector<1x128x128xbf16>
    %81 = vector.shape_cast %80 : vector<1x128x128xbf16> to vector<128x128xbf16>
    %cst_114 = arith.constant dense<0.000000e+00> : vector<1x9x128xf32>
    %82 = tpu.matmul %79, %81, %cst_114 {dimension_numbers = #tpu.dot_dimension_numbers<[2], [0], [0, 1], [1], [0, 0, 0, 1, 1, 1], [], []>} : vector<1x9x128xbf16>, vector<128x128xbf16>, vector<1x9x128xf32> -> vector<1x9x128xf32>
    %83 = arith.addf %78, %82 : vector<1x9x128xf32>
    %84 = arith.addf %74, %83 : vector<1x9x128xf32>
    %c0_115 = arith.constant 0 : index
    %c3_116 = arith.constant 3 : index
    %c0_117 = arith.constant 0 : index
    %85 = vector.load %arg16[%c0_115, %c3_116, %c0_117] : memref<1x13x16xbf16, #tpu.memory_space<vmem>>, vector<1x9x16xbf16>
    %c3_118 = arith.constant 3 : index
    %c0_119 = arith.constant 0 : index
    %c0_120 = arith.constant 0 : index
    %86 = vector.load %arg6[%c3_118, %c0_119, %c0_120] : memref<5x16x128xbf16, #tpu.memory_space<vmem>>, vector<1x16x128xbf16>
    %87 = vector.shape_cast %86 : vector<1x16x128xbf16> to vector<16x128xbf16>
    %cst_121 = arith.constant dense<0.000000e+00> : vector<1x9x128xf32>
    %88 = tpu.matmul %85, %87, %cst_121 {dimension_numbers = #tpu.dot_dimension_numbers<[2], [0], [0, 1], [1], [0, 0, 0, 1, 1, 1], [], []>} : vector<1x9x16xbf16>, vector<16x128xbf16>, vector<1x9x128xf32> -> vector<1x9x128xf32>
    %c0_122 = arith.constant 0 : index
    %c3_123 = arith.constant 3 : index
    %c0_124 = arith.constant 0 : index
    %89 = vector.load %arg17[%c0_122, %c3_123, %c0_124] : memref<1x13x128xbf16, #tpu.memory_space<vmem>>, vector<1x9x128xbf16>
    %c3_125 = arith.constant 3 : index
    %c0_126 = arith.constant 0 : index
    %c0_127 = arith.constant 0 : index
    %90 = vector.load %arg7[%c3_125, %c0_126, %c0_127] : memref<5x128x128xbf16, #tpu.memory_space<vmem>>, vector<1x128x128xbf16>
    %91 = vector.shape_cast %90 : vector<1x128x128xbf16> to vector<128x128xbf16>
    %cst_128 = arith.constant dense<0.000000e+00> : vector<1x9x128xf32>
    %92 = tpu.matmul %89, %91, %cst_128 {dimension_numbers = #tpu.dot_dimension_numbers<[2], [0], [0, 1], [1], [0, 0, 0, 1, 1, 1], [], []>} : vector<1x9x128xbf16>, vector<128x128xbf16>, vector<1x9x128xf32> -> vector<1x9x128xf32>
    %93 = arith.addf %88, %92 : vector<1x9x128xf32>
    %94 = arith.addf %84, %93 : vector<1x9x128xf32>
    %c0_129 = arith.constant 0 : index
    %c4_130 = arith.constant 4 : index
    %c0_131 = arith.constant 0 : index
    %95 = vector.load %arg16[%c0_129, %c4_130, %c0_131] : memref<1x13x16xbf16, #tpu.memory_space<vmem>>, vector<1x9x16xbf16>
    %c4_132 = arith.constant 4 : index
    %c0_133 = arith.constant 0 : index
    %c0_134 = arith.constant 0 : index
    %96 = vector.load %arg6[%c4_132, %c0_133, %c0_134] : memref<5x16x128xbf16, #tpu.memory_space<vmem>>, vector<1x16x128xbf16>
    %97 = vector.shape_cast %96 : vector<1x16x128xbf16> to vector<16x128xbf16>
    %cst_135 = arith.constant dense<0.000000e+00> : vector<1x9x128xf32>
    %98 = tpu.matmul %95, %97, %cst_135 {dimension_numbers = #tpu.dot_dimension_numbers<[2], [0], [0, 1], [1], [0, 0, 0, 1, 1, 1], [], []>} : vector<1x9x16xbf16>, vector<16x128xbf16>, vector<1x9x128xf32> -> vector<1x9x128xf32>
    %c0_136 = arith.constant 0 : index
    %c4_137 = arith.constant 4 : index
    %c0_138 = arith.constant 0 : index
    %99 = vector.load %arg17[%c0_136, %c4_137, %c0_138] : memref<1x13x128xbf16, #tpu.memory_space<vmem>>, vector<1x9x128xbf16>
    %c4_139 = arith.constant 4 : index
    %c0_140 = arith.constant 0 : index
    %c0_141 = arith.constant 0 : index
    %100 = vector.load %arg7[%c4_139, %c0_140, %c0_141] : memref<5x128x128xbf16, #tpu.memory_space<vmem>>, vector<1x128x128xbf16>
    %101 = vector.shape_cast %100 : vector<1x128x128xbf16> to vector<128x128xbf16>
    %cst_142 = arith.constant dense<0.000000e+00> : vector<1x9x128xf32>
    %102 = tpu.matmul %99, %101, %cst_142 {dimension_numbers = #tpu.dot_dimension_numbers<[2], [0], [0, 1], [1], [0, 0, 0, 1, 1, 1], [], []>} : vector<1x9x128xbf16>, vector<128x128xbf16>, vector<1x9x128xf32> -> vector<1x9x128xf32>
    %103 = arith.addf %98, %102 : vector<1x9x128xf32>
    %104 = arith.addf %94, %103 : vector<1x9x128xf32>
    %105 = vector.extract_strided_slice %104 {offsets = [0, 0, 0], sizes = [1, 8, 128], strides = [1, 1, 1]} : vector<1x9x128xf32> to vector<1x8x128xf32>
    %cst_143 = arith.constant dense<0xFF800000> : vector<1x128xf32>
    %106 = vector.multi_reduction <maximumf>, %105, %cst_143 [1] : vector<1x8x128xf32> to vector<1x128xf32>
    %107 = vector.extract_strided_slice %104 {offsets = [0, 8, 0], sizes = [1, 1, 128], strides = [1, 1, 1]} : vector<1x9x128xf32> to vector<1x1x128xf32>
    %c0_144 = arith.constant 0 : index
    %c0_145 = arith.constant 0 : index
    %108 = vector.load %arg9[%c0_144, %c0_145] : memref<1x128xf32, #tpu.memory_space<vmem>>, vector<1x128xf32>
    %109 = vector.shape_cast %108 : vector<1x128xf32> to vector<1x1x128xf32>
    %110 = arith.addf %107, %109 : vector<1x1x128xf32>
    %cst_146 = arith.constant dense<0xFF800000> : vector<1x128xf32>
    %111 = vector.multi_reduction <maximumf>, %110, %cst_146 [1] : vector<1x1x128xf32> to vector<1x128xf32>
    %112 = arith.maximumf %106, %111 : vector<1x128xf32>
    %c0_147 = arith.constant 0 : index
    %c0_148 = arith.constant 0 : index
    %113 = vector.load %arg8[%c0_147, %c0_148] : memref<1x128xf32, #tpu.memory_space<vmem>>, vector<1x128xf32>
    %114 = arith.addf %112, %113 : vector<1x128xf32>
    %115 = math.tanh %114 : vector<1x128xf32>
    %116 = math.tanh %115 : vector<1x128xf32>
    %117 = arith.truncf %116 : vector<1x128xf32> to vector<1x128xbf16>
    %c0_149 = arith.constant 0 : index
    %c0_150 = arith.constant 0 : index
    %118 = vector.load %arg10[%c0_149, %c0_150] : memref<128x128xbf16, #tpu.memory_space<vmem>>, vector<128x128xbf16>
    %cst_151 = arith.constant dense<0.000000e+00> : vector<1x128xf32>
    %119 = tpu.matmul %117, %118, %cst_151 {dimension_numbers = #tpu.dot_dimension_numbers<[1], [0], [0], [1], [0, 0, 1, 1], [], []>} : vector<1x128xbf16>, vector<128x128xbf16>, vector<1x128xf32> -> vector<1x128xf32>
    %c0_152 = arith.constant 0 : index
    %c0_153 = arith.constant 0 : index
    %120 = vector.load %arg11[%c0_152, %c0_153] : memref<1x128xf32, #tpu.memory_space<vmem>>, vector<1x128xf32>
    %121 = arith.addf %119, %120 : vector<1x128xf32>
    %122 = math.tanh %121 : vector<1x128xf32>
    %123 = arith.truncf %122 : vector<1x128xf32> to vector<1x128xbf16>
    %c0_154 = arith.constant 0 : index
    %c0_155 = arith.constant 0 : index
    %124 = vector.load %arg12[%c0_154, %c0_155] : memref<128x128xbf16, #tpu.memory_space<vmem>>, vector<128x128xbf16>
    %cst_156 = arith.constant dense<0.000000e+00> : vector<1x128xf32>
    %125 = tpu.matmul %123, %124, %cst_156 {dimension_numbers = #tpu.dot_dimension_numbers<[1], [0], [0], [1], [0, 0, 1, 1], [], []>} : vector<1x128xbf16>, vector<128x128xbf16>, vector<1x128xf32> -> vector<1x128xf32>
    %c0_157 = arith.constant 0 : index
    %c0_158 = arith.constant 0 : index
    %126 = vector.load %arg13[%c0_157, %c0_158] : memref<1x128xf32, #tpu.memory_space<vmem>>, vector<1x128xf32>
    %127 = arith.addf %125, %126 : vector<1x128xf32>
    %128 = vector.shape_cast %127 : vector<1x128xf32> to vector<1x1x128xf32>
    %c0_159 = arith.constant 0 : index
    %c0_160 = arith.constant 0 : index
    %c0_161 = arith.constant 0 : index
    %129 = vector.load %arg14[%c0_159, %c0_160, %c0_161] : memref<1x1x128xf32, #tpu.memory_space<vmem>>, vector<1x1x128xf32>
    tpu.vector_store %arg14[%c0_159, %c0_160, %c0_161], %128 {strides = array<i32>} : memref<1x1x128xf32, #tpu.memory_space<vmem>>, vector<1x1x128xf32>,
    return
  }
  func.func @transform_0(%arg0: i32) -> (i32, i32, i32) {
    %c0_i32 = arith.constant 0 : i32
    %c0_i32_0 = arith.constant 0 : i32
    %c0_i32_1 = arith.constant 0 : i32
    return %arg0, %c0_i32, %c0_i32_0 : i32, i32, i32
  }
  func.func @transform_1(%arg0: i32) -> (i32, i32, i32) {
    %c0_i32 = arith.constant 0 : i32
    %c0_i32_0 = arith.constant 0 : i32
    %c0_i32_1 = arith.constant 0 : i32
    return %arg0, %c0_i32, %c0_i32_0 : i32, i32, i32
  }
  func.func @transform_2(%arg0: i32) -> (i32, i32, i32) {
    %c0_i32 = arith.constant 0 : i32
    %c0_i32_0 = arith.constant 0 : i32
    %c0_i32_1 = arith.constant 0 : i32
    %c0_i32_2 = arith.constant 0 : i32
    return %c0_i32, %c0_i32_0, %c0_i32_1 : i32, i32, i32
  }
  func.func @transform_3(%arg0: i32) -> (i32, i32) {
    %c0_i32 = arith.constant 0 : i32
    %c0_i32_0 = arith.constant 0 : i32
    %c0_i32_1 = arith.constant 0 : i32
    return %c0_i32, %c0_i32_0 : i32, i32
  }
  func.func @transform_4(%arg0: i32) -> (i32, i32) {
    %c0_i32 = arith.constant 0 : i32
    %c0_i32_0 = arith.constant 0 : i32
    %c0_i32_1 = arith.constant 0 : i32
    return %c0_i32, %c0_i32_0 : i32, i32
  }
  func.func @transform_5(%arg0: i32) -> (i32, i32, i32) {
    %c0_i32 = arith.constant 0 : i32
    %c0_i32_0 = arith.constant 0 : i32
    %c0_i32_1 = arith.constant 0 : i32
    %c0_i32_2 = arith.constant 0 : i32
    return %c0_i32, %c0_i32_0, %c0_i32_1 : i32, i32, i32
  }
  func.func @transform_6(%arg0: i32) -> (i32, i32, i32) {
    %c0_i32 = arith.constant 0 : i32
    %c0_i32_0 = arith.constant 0 : i32
    %c0_i32_1 = arith.constant 0 : i32
    %c0_i32_2 = arith.constant 0 : i32
    return %c0_i32, %c0_i32_0, %c0_i32_1 : i32, i32, i32
  }
  func.func @transform_7(%arg0: i32) -> (i32, i32) {
    %c0_i32 = arith.constant 0 : i32
    %c0_i32_0 = arith.constant 0 : i32
    %c0_i32_1 = arith.constant 0 : i32
    return %c0_i32, %c0_i32_0 : i32, i32
  }
  func.func @transform_8(%arg0: i32) -> (i32, i32) {
    %c0_i32 = arith.constant 0 : i32
    %c0_i32_0 = arith.constant 0 : i32
    %c0_i32_1 = arith.constant 0 : i32
    return %c0_i32, %c0_i32_0 : i32, i32
  }
  func.func @transform_9(%arg0: i32) -> (i32, i32) {
    %c0_i32 = arith.constant 0 : i32
    %c0_i32_0 = arith.constant 0 : i32
    %c0_i32_1 = arith.constant 0 : i32
    return %c0_i32, %c0_i32_0 : i32, i32
  }
  func.func @transform_10(%arg0: i32) -> (i32, i32) {
    %c0_i32 = arith.constant 0 : i32
    %c0_i32_0 = arith.constant 0 : i32
    %c0_i32_1 = arith.constant 0 : i32
    return %c0_i32, %c0_i32_0 : i32, i32
  }
  func.func @transform_11(%arg0: i32) -> (i32, i32) {
    %c0_i32 = arith.constant 0 : i32
    %c0_i32_0 = arith.constant 0 : i32
    %c0_i32_1 = arith.constant 0 : i32
    return %c0_i32, %c0_i32_0 : i32, i32
  }
  func.func @transform_12(%arg0: i32) -> (i32, i32) {
    %c0_i32 = arith.constant 0 : i32
    %c0_i32_0 = arith.constant 0 : i32
    %c0_i32_1 = arith.constant 0 : i32
    return %c0_i32, %c0_i32_0 : i32, i32
  }
  func.func @transform_13(%arg0: i32) -> (i32, i32, i32) {
    %c0_i32 = arith.constant 0 : i32
    %c0_i32_0 = arith.constant 0 : i32
    %c0_i32_1 = arith.constant 0 : i32
    return %arg0, %c0_i32, %c0_i32_0 : i32, i32, i32
  }
}

</mosaic_0001>

<bundles_post_ra>
// kernel: tpu_custom_call.1
= control target key start
LH: loop header
LB: loop body
LE: loop exit
PB: predicated region body
PF: predicated region fallthrough
CT: control target
= control target key end

     0   :  { %s12451_s0 = inlined_call_operand.hbm [shape: bf16[16,8,8], index: 0, kind: input, shape index: {}]   ;;  %s12452_s1 = inlined_call_operand.hbm [shape: bf16[2,8,16], index: 1, kind: input, shape index: {}]   ;;  %s12453_s2 = inlined_call_operand.hbm [shape: bf16[5,8,128], index: 2, kind: input, shape index: {}]   ;;  %s12454_s3 = inlined_call_operand.hbm [shape: f32[1,128], index: 3, kind: input, shape index: {}]   ;;  %s12455_s4 = inlined_call_operand.hbm [shape: f32[1,128], index: 4, kind: input, shape index: {}]   ;;  %s12456_s5 = inlined_call_operand.hbm [shape: bf16[5,16,128], index: 5, kind: input, shape index: {}]   ;;  %s12457_s6 = inlined_call_operand.hbm [shape: bf16[5,128,128], index: 6, kind: input, shape index: {}]   ;;  %s12458_s7 = inlined_call_operand.hbm [shape: f32[1,128], index: 7, kind: input, shape index: {}]   ;;  %s12459_s8 = inlined_call_operand.hbm [shape: f32[1,128], index: 8, kind: input, shape index: {}]   ;;  %s12460_s9 = inlined_call_operand.hbm [shape: bf16[128,128], index: 9, kind: input, shape index: {}]   ;;  %s12461_s10 = inlined_call_operand.hbm [shape: f32[1,128], index: 10, kind: input, shape index: {}]   ;;  %s12462_s11 = inlined_call_operand.hbm [shape: bf16[128,128], index: 11, kind: input, shape index: {}]   ;;  %s12463_s12 = inlined_call_operand.hbm [shape: f32[1,128], index: 12, kind: input, shape index: {}]   ;;  %s12464_s13 = inlined_call_operand.hbm [shape: f32[2,1,128], index: 13, kind: output, shape index: {}]  }
   0x1   :  { %12539 = sst [smem:[#allocation88_spill]] %s12451_s0 }
   0x2   :  { %12540 = sst [smem:[#allocation89_spill]] %s12452_s1 }
   0x3   :  { %12541 = sst [smem:[#allocation90_spill]] %s12453_s2 }
   0x4   :  { %12542 = sst [smem:[#allocation91_spill]] %s12454_s3 }
   0x5   :  { %12543 = sst [smem:[#allocation92_spill]] %s12455_s4 }
   0x6   :  { %12544 = sst [smem:[#allocation93_spill]] %s12456_s5 }
   0x7   :  { %12545 = sst [smem:[#allocation94_spill]] %s12457_s6 }
   0x8   :  { %12546 = sst [smem:[#allocation95_spill]] %s12458_s7 }
   0x9   :  { %12547 = sst [smem:[#allocation96_spill]] %s12459_s8 }
   0xa   :  { %12548 = sst [smem:[#allocation97_spill]] %s12460_s9 }
   0xb   :  { %12549 = sst [smem:[#allocation98_spill]] %s12464_s13 }
   0xc   :  { %18 = vsyncpa [#allocation6], 0 }
   0xd   :  { %20 = vsyncpa [#allocation6 + $0x1], 0 }
   0xe   :  { %21 = vsyncpa [#allocation9], 0 }
   0xf   :  { %23 = vsyncpa [#allocation9 + $0x1], 0 }
  0x10   :  { %24 = vsyncpa [#allocation12], 0 }
  0x11   :  { %25 = vsyncpa [#allocation15], 0 }
  0x12   :  { %26 = vsyncpa [#allocation18], 0 }
  0x13   :  { %27 = vsyncpa [#allocation21], 0 }
  0x14   :  { %28 = vsyncpa [#allocation24], 0 }
  0x15   :  { %29 = vsyncpa [#allocation7], 0 }
  0x16   :  { %31 = vsyncpa [#allocation7 + $0x1], 0  ;;  %s10115_s25 = smov 0   ;;  %s10117_s26 = smov 0  }
  0x17   :  { %s10119_s27 = smov 0   ;;  %s10121_s28 = smov 0  }
  0x18 LB: > { %s10025_s29 = smov [#allocation10]   ;;  %s10136_s14 = sadd.s32 4294967295, %s10023_s28   ;;  %s10023_s28 = sphi %s10121_s28, %s12802_s28   ;;  %s10019_s27 = sphi %s10119_s27, %s12801_s27   ;;  %s10015_s26 = sphi %s10117_s26, %s12800_s26   ;;  %s10011_s25 = sphi %s10115_s25, %s12799_s25  }
  0x19   : > { %s363_s30 = sshll.u32 %s10025_s29, 4  ;;  %12550 = sst [smem:[#allocation36_spill]] %s10136_s14  ;;  %s10141_s30 = int_to_ptr.vmem [resolvable:$true] %s363_s30 }
  0x1a   : > { %p8585_p0 = scmp.ge.s32.totalorder %s10023_s28, 1  ;;  %p12472_p1 = scmp.eq.s32.totalorder %s10136_s14, 0 }
  0x1b   : > { %p351_p2 = scmp.lt.s32.totalorder %s10023_s28, 3  ;;  %s10026_s16 = smov [#allocation11]  }
  0x1c   : > { %s377_s17 = sshll.u32 %s10026_s16, 4  ;;  %s10027_s19 = smov [#allocation14]   ;;  %s10156_s17 = int_to_ptr.vmem [resolvable:$true] %s377_s17 }
  0x1d   : > { %p10143_p3 = pnand %p8585_p0, %p351_p2  ;;  %s398_s20 = sshll.u32 %s10027_s19, 4  ;;  %s10158_s20 = int_to_ptr.vmem [resolvable:$true] %s398_s20 }
  0x1e   : > { %s12554_s2 = sld [smem:[#allocation90_spill]] }
  0x1f   : > { %s12551_s15 = scalar_select %p10143_p3, 1, 0 }
  0x20   : > { %p9354_p5 = pneg %p10143_p3 }
  0x21   : > { %12552 = sst [smem:[#allocation37_spill]] %s12551_s15 }
  0x22   : > { %p10152_p6 = pnand %p9354_p5, %p12472_p1 }
  0x24   : > { %s9561_s23 = scalar_lea.hbm %s12554_s2, 320  ;;  %p10168_p8 = pneg %p10152_p6 }
  0x25   : > { %p9562_p7 = scmp.ne.s32.totalorder %s12554_s2, %s9561_s23  ;;  %p9568_p11 = scmp.lt.u32.totalorder %s9561_s23, %s12554_s2 }
  0x27   : > { %p9564_p9 = pnand %p10168_p8, %p9562_p7 }
  0x29   : > { %p9565_p10 = pneg %p9564_p9 }
  0x2b   : > { %p9570_p12 = pnand %p9568_p11, %p9565_p10 }
  0x2d   : > { %9573 = shalt.err (!%p9570_p12)
}
  0x2e   : > { %s9574_s21 = scalar_lea.vmem %s10141_s30, 320  ;;  %p9582_p5 = scmp.lt.s32.totalorder %s10141_s30, %s10141_s30 }
  0x2f   : > { %p9575_p13 = scmp.ne.s32.totalorder %s10141_s30, %s9574_s21  ;;  %p9583_p4 = scmp.lt.s32.totalorder %s9574_s21, %s9574_s21 }
  0x31   : > { %p9577_p0 = pnand %p9575_p13, %p10168_p8  ;;  %p9584_p7 = por %p9583_p4, %p9582_p5 }
  0x33   : > { %p9578_p2 = pneg %p9577_p0 }
  0x35   : > { %p9585_p9 = pnand %p9584_p7, %p9578_p2 }
  0x37   : > { %9588 = shalt.err (!%p9585_p9)
}
  0x38   : > { %s12474_s22 = smov 64   ;;  %s12475_s13 = smov 4  }
  0x39   : > { %9357 = dma.hbm_to_vmem [thread:$0]  (!%p10152_p6), %s12554_s2, 320, %s10141_s30, [#allocation9], %s12474_s22, %s12474_s22, %s12475_s13  }
  0x3a   : > { %s12556_s3 = sld [smem:[#allocation91_spill]] }
  0x40   : > { %s9589_s21 = scalar_lea.hbm %s12556_s3, 16 }
  0x41   : > { %p9590_p4 = scmp.ne.s32.totalorder %s12556_s3, %s9589_s21  ;;  %p9596_p12 = scmp.lt.u32.totalorder %s9589_s21, %s12556_s3 }
  0x43   : > { %p9592_p10 = pnand %p9590_p4, %p10168_p8 }
  0x45   : > { %p9593_p11 = pneg %p9592_p10 }
  0x47   : > { %p9598_p13 = pnand %p9596_p12, %p9593_p11 }
  0x49   : > { %9601 = shalt.err (!%p9598_p13)
}
  0x4a   : > { %s9602_s30 = scalar_lea.vmem %s10156_s17, 16  ;;  %s9609_s1 = scalar_lea.vmem %s10156_s17, 32 }
  0x4b   : > { %p9603_p0 = scmp.ne.s32.totalorder %s10156_s17, %s9602_s30  ;;  %p9610_p7 = scmp.lt.s32.totalorder %s10156_s17, %s10156_s17 }
  0x4c   : > { %p9611_p9 = scmp.lt.s32.totalorder %s9609_s1, %s9602_s30 }
  0x4d   : > { %p9605_p2 = pnand %p9603_p0, %p10168_p8 }
  0x4e   : > { %p9612_p4 = por %p9611_p9, %p9610_p7 }
  0x4f   : > { %p9606_p5 = pneg %p9605_p2 }
  0x51   : > { %p9613_p10 = pnand %p9612_p4, %p9606_p5 }
  0x53   : > { %9616 = shalt.err (!%p9613_p10)
}
  0x54   : > { %9360 = dma.hbm_to_vmem [thread:$0]  (!%p10152_p6), %s12556_s3, 16, %s10156_s17, [#allocation12]  }
  0x55   : > { %s12557_s5 = sld [smem:[#allocation93_spill]] }
  0x5b   : > { %s9617_s24 = scalar_lea.hbm %s12557_s5, 640 }
  0x5c   : > { %p9618_p11 = scmp.ne.s32.totalorder %s12557_s5, %s9617_s24  ;;  %p9624_p0 = scmp.lt.u32.totalorder %s9617_s24, %s12557_s5 }
  0x5e   : > { %p9620_p12 = pnand %p9618_p11, %p10168_p8 }
  0x60   : > { %p9621_p13 = pneg %p9620_p12 }
  0x62   : > { %p9626_p2 = pnand %p9624_p0, %p9621_p13 }
  0x64   : > { %9629 = shalt.err (!%p9626_p2)
}
  0x65   : > { %s9630_s17 = scalar_lea.vmem %s10158_s20, 640  ;;  %p9638_p4 = scmp.lt.s32.totalorder %s10158_s20, %s10158_s20 }
  0x66   : > { %p9631_p5 = scmp.ne.s32.totalorder %s10158_s20, %s9630_s17  ;;  %p9639_p10 = scmp.lt.s32.totalorder %s9630_s17, %s9630_s17 }
  0x68   : > { %p9633_p7 = pnand %p9631_p5, %p10168_p8  ;;  %p9640_p11 = por %p9639_p10, %p9638_p4 }
  0x6a   : > { %p9634_p9 = pneg %p9633_p7 }
  0x6c   : > { %p9641_p12 = pnand %p9640_p11, %p9634_p9 }
  0x6e   : > { %9644 = shalt.err (!%p9641_p12)
}
  0x6f   : > { %9366 = dma.hbm_to_vmem [thread:$0]  (!%p10152_p6), %s12557_s5, 640, %s10158_s20, [#allocation15], %s12474_s22, %s12474_s22, %s12475_s13  }
  0x70   : > { %s10030_s14 = smov [#allocation17]   ;;  %s10031_s23 = smov [#allocation20]  }
  0x71   : > { %s425_s15 = sshll.u32 %s10030_s14, 4  ;;  %s446_s24 = sshll.u32 %s10031_s23, 4  ;;  %s426_s15 = int_to_ptr.vmem [resolvable:$true] %s425_s15  ;;  %s447_s24 = int_to_ptr.vmem [resolvable:$true] %s446_s24 }
  0x72   : > { %s12558_s7 = sld [smem:[#allocation95_spill]] }
  0x78   : > { %s9645_s21 = scalar_lea.hbm %s12558_s7, 16 }
  0x79   : > { %p9646_p13 = scmp.ne.s32.totalorder %s12558_s7, %s9645_s21  ;;  %p9652_p5 = scmp.lt.u32.totalorder %s9645_s21, %s12558_s7 }
  0x7b   : > { %p9648_p0 = pnand %p9646_p13, %p10168_p8 }
  0x7d   : > { %p9649_p2 = pneg %p9648_p0 }
  0x7f   : > { %p9654_p7 = pnand %p9652_p5, %p9649_p2 }
  0x81   : > { %9657 = shalt.err (!%p9654_p7)
}
  0x82   : > { %s9658_s20 = scalar_lea.vmem %s426_s15, 16  ;;  %s9665_s0 = scalar_lea.vmem %s426_s15, 32 }
  0x83   : > { %p9659_p9 = scmp.ne.s32.totalorder %s426_s15, %s9658_s20  ;;  %p9666_p11 = scmp.lt.s32.totalorder %s426_s15, %s426_s15 }
  0x84   : > { %p9667_p12 = scmp.lt.s32.totalorder %s9665_s0, %s9658_s20 }
  0x85   : > { %p9661_p4 = pnand %p9659_p9, %p10168_p8 }
  0x86   : > { %p9668_p1 = por %p9667_p12, %p9666_p11 }
  0x87   : > { %p9662_p10 = pneg %p9661_p4 }
  0x89   : > { %p9669_p3 = pnand %p9668_p1, %p9662_p10 }
  0x8b   : > { %9672 = shalt.err (!%p9669_p3)
}
  0x8c   : > { %9372 = dma.hbm_to_vmem [thread:$0]  (!%p10152_p6), %s12558_s7, 16, %s426_s15, [#allocation18]  }
  0x8d   : > { %s12559_s9 = sld [smem:[#allocation97_spill]] }
  0x93   : > { %s9673_s19 = scalar_lea.hbm %s12559_s9, 1024 }
  0x94   : > { %p9674_p13 = scmp.ne.s32.totalorder %s12559_s9, %s9673_s19  ;;  %p9680_p3 = scmp.lt.u32.totalorder %s9673_s19, %s12559_s9 }
  0x96   : > { %p9676_p0 = pnand %p9674_p13, %p10168_p8 }
  0x98   : > { %p9677_p1 = pneg %p9676_p0 }
  0x9a   : > { %p9682_p2 = pnand %p9680_p3, %p9677_p1 }
  0x9c   : > { %9685 = shalt.err (!%p9682_p2)
}
  0x9d   : > { %s9686_s20 = scalar_lea.vmem %s447_s24, 1024  ;;  %p9694_p4 = scmp.lt.s32.totalorder %s447_s24, %s447_s24 }
  0x9e   : > { %p9687_p5 = scmp.ne.s32.totalorder %s447_s24, %s9686_s20  ;;  %p9695_p10 = scmp.lt.s32.totalorder %s9686_s20, %s9686_s20 }
  0xa0   : > { %p9689_p7 = pnand %p9687_p5, %p10168_p8  ;;  %p9696_p11 = por %p9695_p10, %p9694_p4 }
  0xa2   : > { %p9690_p9 = pneg %p9689_p7 }
  0xa4   : > { %p9697_p12 = pnand %p9696_p11, %p9690_p9 }
  0xa6   : > { %9700 = shalt.err (!%p9697_p12)
}
  0xa7   : > { %9378 = dma.hbm_to_vmem [thread:$0]  (!%p10152_p6), %s12559_s9, 1024, %s447_s24, [#allocation21], %s12474_s22, %s12474_s22, %s12475_s13  }
  0xa8   : > { %s10032_s14 = smov [#allocation23]   ;;  %s10033_s2 = smov [#allocation13]  }
  0xa9   : > { %s470_s23 = sshll.u32 %s10032_s14, 4  ;;  %s388_s29 = sshll.u32 %s10033_s2, 4  ;;  %s471_s23 = int_to_ptr.vmem [resolvable:$true] %s470_s23  ;;  %s389_s29 = int_to_ptr.vmem [resolvable:$true] %s388_s29 }
  0xaa   : > { %s9701_s30 = scalar_lea.hbm %s12462_s11, 1024 }
  0xab   : > { %p9702_p13 = scmp.ne.s32.totalorder %s12462_s11, %s9701_s30  ;;  %p9708_p3 = scmp.lt.u32.totalorder %s9701_s30, %s12462_s11 }
  0xad   : > { %p9704_p0 = pnand %p9702_p13, %p10168_p8 }
  0xaf   : > { %p9705_p1 = pneg %p9704_p0 }
  0xb1   : > { %p9710_p2 = pnand %p9708_p3, %p9705_p1 }
  0xb3   : > { %9713 = shalt.err (!%p9710_p2)
}
  0xb4   : > { %s9714_s24 = scalar_lea.vmem %s471_s23, 1024  ;;  %p9722_p4 = scmp.lt.s32.totalorder %s471_s23, %s471_s23 }
  0xb5   : > { %p9715_p5 = scmp.ne.s32.totalorder %s471_s23, %s9714_s24  ;;  %p9723_p10 = scmp.lt.s32.totalorder %s9714_s24, %s9714_s24 }
  0xb7   : > { %p9717_p7 = pnand %p9715_p5, %p10168_p8  ;;  %p9724_p11 = por %p9723_p10, %p9722_p4 }
  0xb9   : > { %p9718_p9 = pneg %p9717_p7 }
  0xbb   : > { %p9725_p12 = pnand %p9724_p11, %p9718_p9 }
  0xbd   : > { %9728 = shalt.err (!%p9725_p12)
}
  0xbe   : > { %9384 = dma.hbm_to_vmem [thread:$0]  (!%p10152_p6), %s12462_s11, 1024, %s471_s23, [#allocation24], %s12474_s22, %s12474_s22, %s12475_s13  }
  0xbf   : > { %s12560_s4 = sld [smem:[#allocation92_spill]] }
  0xc5   : > { %s9729_s21 = scalar_lea.hbm %s12560_s4, 16 }
  0xc6   : > { %p9730_p13 = scmp.ne.s32.totalorder %s12560_s4, %s9729_s21  ;;  %p9736_p3 = scmp.lt.u32.totalorder %s9729_s21, %s12560_s4 }
  0xc8   : > { %p9732_p0 = pnand %p9730_p13, %p10168_p8 }
  0xca   : > { %p9733_p1 = pneg %p9732_p0 }
  0xcc   : > { %p9738_p2 = pnand %p9736_p3, %p9733_p1 }
  0xce   : > { %9741 = shalt.err (!%p9738_p2)
}
  0xcf   : > { %s9742_s15 = scalar_lea.vmem %s389_s29, 16  ;;  %s9749_s23 = scalar_lea.vmem %s389_s29, 32 }
  0xd0   : > { %p9743_p5 = scmp.ne.s32.totalorder %s389_s29, %s9742_s15  ;;  %p9750_p4 = scmp.lt.s32.totalorder %s389_s29, %s389_s29 }
  0xd1   : > { %p9751_p10 = scmp.lt.s32.totalorder %s9749_s23, %s9742_s15 }
  0xd2   : > { %p9745_p7 = pnand %p9743_p5, %p10168_p8 }
  0xd3   : > { %p9752_p11 = por %p9751_p10, %p9750_p4 }
  0xd4   : > { %p9746_p9 = pneg %p9745_p7 }
  0xd6   : > { %p9753_p12 = pnand %p9752_p11, %p9746_p9 }
  0xd8   : > { %9756 = shalt.err (!%p9753_p12)
}
  0xd9   : > { %9363 = dma.hbm_to_vmem [thread:$0]  (!%p10152_p6), %s12560_s4, 16, %s389_s29, [#allocation12]  }
  0xda   : > { %s10034_s14 = smov [#allocation16]   ;;  %s10035_s19 = smov [#allocation19]  }
  0xdb   : > { %s411_s2 = sshll.u32 %s10034_s14, 4  ;;  %s436_s21 = sshll.u32 %s10035_s19, 4  ;;  %s412_s2 = int_to_ptr.vmem [resolvable:$true] %s411_s2  ;;  %s437_s21 = int_to_ptr.vmem [resolvable:$true] %s436_s21 }
  0xdc   : > { %s12561_s6 = sld [smem:[#allocation94_spill]] }
  0xe2   : > { %s9757_s1 = scalar_lea.hbm %s12561_s6, 5120 }
  0xe3   : > { %p9758_p13 = scmp.ne.s32.totalorder %s12561_s6, %s9757_s1  ;;  %p9764_p3 = scmp.lt.u32.totalorder %s9757_s1, %s12561_s6 }
  0xe5   : > { %p9760_p0 = pnand %p9758_p13, %p10168_p8 }
  0xe7   : > { %p9761_p1 = pneg %p9760_p0 }
  0xe9   : > { %p9766_p2 = pnand %p9764_p3, %p9761_p1 }
  0xeb   : > { %9769 = shalt.err (!%p9766_p2)
}
  0xec   : > { %s9770_s29 = scalar_lea.vmem %s412_s2, 5120  ;;  %p9778_p4 = scmp.lt.s32.totalorder %s412_s2, %s412_s2 }
  0xed   : > { %p9771_p5 = scmp.ne.s32.totalorder %s412_s2, %s9770_s29  ;;  %p9779_p10 = scmp.lt.s32.totalorder %s9770_s29, %s9770_s29 }
  0xef   : > { %p9773_p7 = pnand %p9771_p5, %p10168_p8  ;;  %p9780_p11 = por %p9779_p10, %p9778_p4 }
  0xf1   : > { %p9774_p9 = pneg %p9773_p7 }
  0xf3   : > { %p9781_p12 = pnand %p9780_p11, %p9774_p9 }
  0xf5   : > { %9784 = shalt.err (!%p9781_p12)
}
  0xf6   : > { %9369 = dma.hbm_to_vmem [thread:$0]  (!%p10152_p6), %s12561_s6, 5120, %s412_s2, [#allocation15], %s12474_s22, %s12474_s22, %s12475_s13  }
  0xf7   : > { %s12562_s8 = sld [smem:[#allocation96_spill]] }
  0xfd   : > { %s9785_s17 = scalar_lea.hbm %s12562_s8, 16 }
  0xfe   : > { %p9786_p13 = scmp.ne.s32.totalorder %s12562_s8, %s9785_s17  ;;  %p9792_p3 = scmp.lt.u32.totalorder %s9785_s17, %s12562_s8 }
 0x100   : > { %p9788_p0 = pnand %p9786_p13, %p10168_p8 }
 0x102   : > { %p9789_p1 = pneg %p9788_p0 }
 0x104   : > { %p9794_p2 = pnand %p9792_p3, %p9789_p1 }
 0x106   : > { %9797 = shalt.err (!%p9794_p2)
}
 0x107   : > { %s9798_s24 = scalar_lea.vmem %s437_s21, 16  ;;  %s9805_s2 = scalar_lea.vmem %s437_s21, 32 }
 0x108   : > { %p9799_p5 = scmp.ne.s32.totalorder %s437_s21, %s9798_s24  ;;  %p9806_p4 = scmp.lt.s32.totalorder %s437_s21, %s437_s21 }
 0x109   : > { %p9807_p10 = scmp.lt.s32.totalorder %s9805_s2, %s9798_s24 }
 0x10a   : > { %p9801_p7 = pnand %p9799_p5, %p10168_p8 }
 0x10b   : > { %p9808_p11 = por %p9807_p10, %p9806_p4 }
 0x10c   : > { %p9802_p9 = pneg %p9801_p7 }
 0x10e   : > { %p9809_p12 = pnand %p9808_p11, %p9802_p9 }
 0x110   : > { %9812 = shalt.err (!%p9809_p12)
}
 0x111   : > { %9375 = dma.hbm_to_vmem [thread:$0]  (!%p10152_p6), %s12562_s8, 16, %s437_s21, [#allocation18]  }
 0x112   : > { %s10036_s14 = smov [#allocation22]   ;;  %s10037_s30 = smov [#allocation25]  }
 0x113   : > { %s460_s19 = sshll.u32 %s10036_s14, 4  ;;  %s484_s17 = sshll.u32 %s10037_s30, 4  ;;  %s461_s19 = int_to_ptr.vmem [resolvable:$true] %s460_s19  ;;  %s485_s17 = int_to_ptr.vmem [resolvable:$true] %s484_s17 }
 0x114   : > { %s9813_s15 = scalar_lea.hbm %s12461_s10, 16 }
 0x115   : > { %p9814_p13 = scmp.ne.s32.totalorder %s12461_s10, %s9813_s15  ;;  %p9820_p3 = scmp.lt.u32.totalorder %s9813_s15, %s12461_s10 }
 0x117   : > { %p9816_p0 = pnand %p9814_p13, %p10168_p8 }
 0x119   : > { %p9817_p1 = pneg %p9816_p0 }
 0x11b   : > { %p9822_p2 = pnand %p9820_p3, %p9817_p1 }
 0x11d   : > { %9825 = shalt.err (!%p9822_p2)
}
 0x11e   : > { %s9826_s21 = scalar_lea.vmem %s461_s19, 16  ;;  %s9833_s0 = scalar_lea.vmem %s461_s19, 32 }
 0x11f   : > { %p9827_p5 = scmp.ne.s32.totalorder %s461_s19, %s9826_s21  ;;  %p9834_p4 = scmp.lt.s32.totalorder %s461_s19, %s461_s19 }
 0x120   : > { %p9835_p10 = scmp.lt.s32.totalorder %s9833_s0, %s9826_s21 }
 0x121   : > { %p9829_p7 = pnand %p9827_p5, %p10168_p8 }
 0x122   : > { %p9836_p11 = por %p9835_p10, %p9834_p4 }
 0x123   : > { %p9830_p9 = pneg %p9829_p7 }
 0x125   : > { %p9837_p12 = pnand %p9836_p11, %p9830_p9 }
 0x127   : > { %9840 = shalt.err (!%p9837_p12)
}
 0x128   : > { %9381 = dma.hbm_to_vmem [thread:$0]  (!%p10152_p6), %s12461_s10, 16, %s461_s19, [#allocation21]  }
 0x129   : > { %s9841_s15 = scalar_lea.hbm %s12463_s12, 16 }
 0x12a   : > { %p9842_p13 = scmp.ne.s32.totalorder %s12463_s12, %s9841_s15  ;;  %p9848_p3 = scmp.lt.u32.totalorder %s9841_s15, %s12463_s12 }
 0x12c   : > { %p9844_p0 = pnand %p9842_p13, %p10168_p8 }
 0x12e   : > { %p9845_p1 = pneg %p9844_p0 }
 0x130   : > { %p9850_p2 = pnand %p9848_p3, %p9845_p1 }
 0x132   : > { %9853 = shalt.err (!%p9850_p2)
}
 0x133   : > { %s9854_s21 = scalar_lea.vmem %s485_s17, 16  ;;  %s9861_s19 = scalar_lea.vmem %s485_s17, 32 }
 0x134   : > { %p9855_p5 = scmp.ne.s32.totalorder %s485_s17, %s9854_s21  ;;  %p9862_p4 = scmp.lt.s32.totalorder %s485_s17, %s485_s17 }
 0x135   : > { %p9863_p10 = scmp.lt.s32.totalorder %s9861_s19, %s9854_s21 }
 0x136   : > { %p9857_p7 = pnand %p9855_p5, %p10168_p8 }
 0x137   : > { %p9864_p11 = por %p9863_p10, %p9862_p4 }
 0x138   : > { %p9858_p9 = pneg %p9857_p7 }
 0x13a   : > { %p9865_p12 = pnand %p9864_p11, %p9858_p9 }
 0x13c   : > { %9868 = shalt.err (!%p9865_p12)
}
 0x13d   : > { %s12563_s16 = sld [smem:[#allocation36_spill]]  ;;  %s8584_s30 = sadd.s32 4294967294, %s10023_s28  }
 0x13e   : > { %9387 = dma.hbm_to_vmem [thread:$0]  (!%p10152_p6), %s12463_s12, 16, %s485_s17, [#allocation24]  }
 0x13f   : > { %s10397_s18 = sadd.s32 1, %s10023_s28   ;;  %s44_s1 = sadd.s32 1, %s10019_s27 }
 0x140   : > { %s41_s20 = ssub.s32 %s10023_s28, %s10397_s18  ;;  %p51_p8 = scmp.ne.s32.totalorder %s10019_s27, %s10015_s26 }
 0x141   : > { %p42_p13 = scmp.eq.s32.totalorder %s41_s20, 0  ;;  %p52_p0 = scmp.eq.s32.totalorder %s10023_s28, 0 }
 0x142   : > { %p57_p1 = scmp.ne.s32.totalorder %s10015_s26, %s10011_s25  ;;  %p344_p9 = scmp.eq.s32.totalorder %s8584_s30, 1 }
 0x143   : > { %p338_p3 = scmp.eq.s32.totalorder %s12563_s16, 1  ;;  %p53_p2 = por %p52_p0, %p51_p8 }
 0x144   : > { %s10409_s15 = scalar_select %p42_p13, %s10019_s27, %s44_s1  }
 0x145   : > { %p12564_p5 = scmp.eq.s32.totalorder %s12563_s16, 0  ;;  %p10417_p6 = por %p338_p3, %p51_p8 }
 0x146   : > { %p9410_p4 = scmp.lt.s32.totalorder %s10023_s28, 2  ;;  %s10423_s24 = sand.u32 1, %s10019_s27  }
 0x147   : > { %p10413_p7 = por %p12564_p5, %p57_p1  ;;  %p10425_p10 = por %p344_p9, %p57_p1 }
 0x148   : > { %s12566_s23 = scalar_select %p10417_p6, 1, 0 }
 0x149   : > { %s12565_s17 = scalar_select %p10413_p7, 1, 0 }
 0x14a   : > { %s12567_s2 = scalar_select %p10425_p10, 1, 0 }
 0x14b   : > { %s8598_s29 = sshll.u32 %s10423_s24, 5  ;;  %s8892_s21 = sshll.u32 %s10023_s28, 9 }
 0x14c   : > { %s12568_s14 = sld [smem:[#allocation88_spill]]  ;;  %s499_s30 = scalar_lea.vmem [#allocation5], %s8598_s29 }
 0x14d   : > { %s506_s1 = sshll.u32 %s499_s30, 4  ;;  %p10436_p11 = pnand %p9410_p4, %p53_p2  ;;  %s10440_s1 = int_to_ptr.vmem [resolvable:$true] %s506_s1 }
 0x14e   : > { %s496_s13 = scalar_lea.sflag [#allocation6], %s10423_s24 }
 0x14f   : > { %p9871_p8 = pneg %p10436_p11 }
 0x152   : > { %s10434_s16 = scalar_lea.hbm %s12568_s14, %s8892_s21  ;;  %s9874_s19 = scalar_lea.hbm %s12568_s14, 1024 }
 0x153   : > { %s9869_s3 = scalar_lea.hbm %s10434_s16, 512  ;;  %p9875_p1 = scmp.lt.u32.totalorder %s10434_s16, %s12568_s14 }
 0x154   : > { %p9870_p12 = scmp.ne.s32.totalorder %s10434_s16, %s9869_s3  ;;  %p9876_p3 = scmp.lt.u32.totalorder %s9874_s19, %s9869_s3 }
 0x155   : > { %p9878_p5 = scmp.lt.u32.totalorder %s9869_s3, %s10434_s16 }
 0x156   : > { %p9872_p13 = pnand %p9871_p8, %p9870_p12  ;;  %p9877_p2 = por %p9876_p3, %p9875_p1 }
 0x158   : > { %p9873_p0 = pneg %p9872_p13  ;;  %p9879_p9 = por %p9878_p5, %p9877_p2 }
 0x15a   : > { %p9880_p4 = pnand %p9879_p9, %p9873_p0 }
 0x15c   : > { %9883 = shalt.err (!%p9880_p4)
}
 0x15d   : > { %s9884_s22 = scalar_lea.vmem %s10440_s1, 512  ;;  %s10038_s29 = smov [#allocation5]  }
 0x15e   : > { %p9885_p12 = scmp.ne.s32.totalorder %s10440_s1, %s9884_s22  ;;  %s9889_s21 = sshll.u32 %s10038_s29, 4  ;;  %s9890_s21 = int_to_ptr.vmem [resolvable:$false] %s9889_s21 }
 0x15f   : > { %s9891_s0 = scalar_lea.vmem %s9890_s21, 1024  ;;  %p9892_p6 = scmp.lt.s32.totalorder %s10440_s1, %s9890_s21 }
 0x160   : > { %p9887_p13 = pnand %p9885_p12, %p9871_p8  ;;  %p9893_p1 = scmp.lt.s32.totalorder %s9891_s0, %s9884_s22 }
 0x162   : > { %p9888_p10 = pneg %p9887_p13  ;;  %p9894_p3 = por %p9893_p1, %p9892_p6 }
 0x164   : > { %p9895_p2 = pnand %p9894_p3, %p9888_p10 }
 0x166   : > { %9898 = shalt.err (!%p9895_p2)
}
 0x167   : > { %s12570_s3 = smov 4   ;;  %s12571_s19 = smov 64  }
 0x168   : > { %9391 = dma.hbm_to_vmem [thread:$0]  (!%p10436_p11), %s10434_s16, 512, %s10440_s1, %s496_s13, %s12571_s19, %s12571_s19, %s12570_s3  }
 0x169   : > { %s8601_s30 = sshll.u32 %s10423_s24, 2  ;;  %s8602_s29 = sshll.u32 %s10023_s28, 6 }
 0x16a   : > { %s12572_s0 = sld [smem:[#allocation89_spill]]  ;;  %s520_s5 = scalar_lea.vmem [#allocation8], %s8601_s30 }
 0x16b   : > { %s527_s6 = sshll.u32 %s520_s5, 4  ;;  %s12573_s7 = sand.u32 1, %s10023_s28   ;;  %s528_s6 = int_to_ptr.vmem [resolvable:$true] %s527_s6 }
 0x16c   : > { %s517_s8 = scalar_lea.sflag [#allocation9], %s12573_s7 }
 0x170   : > { %s10479_s4 = scalar_lea.hbm %s12572_s0, %s8602_s29  ;;  %s9904_s16 = scalar_lea.hbm %s12572_s0, 128 }
 0x171   : > { %s9899_s9 = scalar_lea.hbm %s10479_s4, 64  ;;  %p9905_p5 = scmp.lt.u32.totalorder %s10479_s4, %s12572_s0 }
 0x172   : > { %p9900_p6 = scmp.ne.s32.totalorder %s10479_s4, %s9899_s9  ;;  %p9906_p9 = scmp.lt.u32.totalorder %s9904_s16, %s9899_s9 }
 0x173   : > { %p9908_p12 = scmp.lt.u32.totalorder %s9899_s9, %s10479_s4 }
 0x174   : > { %p9902_p10 = pnand %p9900_p6, %p9871_p8  ;;  %p9907_p4 = por %p9906_p9, %p9905_p5 }
 0x176   : > { %p9903_p0 = pneg %p9902_p10  ;;  %p9909_p13 = por %p9908_p12, %p9907_p4 }
 0x178   : > { %p9910_p1 = pnand %p9909_p13, %p9903_p0 }
 0x17a   : > { %9913 = shalt.err (!%p9910_p1)
}
 0x17b   : > { %s9914_s5 = scalar_lea.vmem %s528_s6, 64  ;;  %s10039_s7 = smov [#allocation8]  }
 0x17c   : > { %p9915_p3 = scmp.ne.s32.totalorder %s528_s6, %s9914_s5  ;;  %s9919_s19 = sshll.u32 %s10039_s7, 4  ;;  %s9920_s19 = int_to_ptr.vmem [resolvable:$false] %s9919_s19 }
 0x17d   : > { %s9921_s30 = scalar_lea.vmem %s9920_s19, 128  ;;  %p9922_p10 = scmp.lt.s32.totalorder %s528_s6, %s9920_s19 }
 0x17e   : > { %p9917_p2 = pnand %p9915_p3, %p9871_p8  ;;  %p9923_p7 = scmp.lt.s32.totalorder %s9921_s30, %s9914_s5 }
 0x180   : > { %p9918_p6 = pneg %p9917_p2  ;;  %p9924_p5 = por %p9923_p7, %p9922_p10 }
 0x182   : > { %p9925_p9 = pnand %p9924_p5, %p9918_p6 }
 0x184   : > { %9928 = shalt.err (!%p9925_p9)
}
 0x185   : > { %9394 = dma.hbm_to_vmem [thread:$0]  (!%p10436_p11), %s10479_s4, 64, %s528_s6, %s517_s8  }
 0x186   : > { %s12574_s9 = sld [smem:[#allocation37_spill]] }
 0x18c   : > { %p12575_p0 = scmp.ne.s32.totalorder %s12574_s9, 0 }
 0x18e   : > { %536 = sbr.rel (%p12575_p0) target bundleno = 1815 (0x717), region = 72 }
 0x195   : > { %s10505_s29 = sand.u32 1, %s10015_s26   ;;  %p12576_p7 = scmp.ne.s32.totalorder %s12565_s17, 0 }
 0x196   : > { %s8604_s22 = sshll.u32 %s10505_s29, 5  ;;  %s539_s21 = scalar_lea.sflag [#allocation6], %s10505_s29 }
 0x197   : > { %s10509_s13 = scalar_lea.vmem [#allocation5], %s8604_s22 }
 0x198   : > { %9974 = dma.done.wait (%p12576_p7), %s539_s21, 512  }
 0x199   : > { %9976 = vsyncadd (%p12576_p7), %s539_s21, 4294966784  ;;  %s12577_s20 = sld [smem:[#allocation36_spill]]  ;;  %s8605_s6 = sshll.u32 %s10505_s29, 2 }
 0x19a   : > { %s10517_s24 = scalar_lea.vmem [#allocation8], %s8605_s6 }
 0x19f   : > { %s547_s4 = sand.u32 1, %s12577_s20  }
 0x1a0   : > { %s548_s8 = scalar_lea.sflag [#allocation9], %s547_s4 }
 0x1a1   : > { %9978 = dma.done.wait (%p12576_p7), %s548_s8, 64  }
 0x1a2   : > { %9980 = vsyncadd (%p12576_p7), %s548_s8, 4294967232  ;;  %p12578_p11 = scmp.eq.s32.totalorder %s12577_s20, 0 }
 0x1a4   : > { %9982 = dma.done.wait (%p12578_p11), [#allocation9], 320   ;;  %p12579_p8 = pmov %p12578_p11 }
 0x1a6   : > { %9984 = vsyncadd (%p12579_p8), [#allocation9], 4294966976  ;;  %p12580_p4 = pmov %p12579_p8 }
 0x1a8   : > { %9986 = dma.done.wait (%p12580_p4), [#allocation12], 32   ;;  %p12581_p12 = pmov %p12580_p4 }
 0x1a9   : > { %p12582_p13 = pmov %p12580_p4 }
 0x1aa   : > { %9988 = vsyncadd (%p12581_p12), [#allocation12], 4294967264 }
 0x1ab   : > { %9990 = dma.done.wait (%p12582_p13), [#allocation15], 5760   ;;  %p12583_p1 = pmov %p12580_p4 }
 0x1ad   : > { %9992 = vsyncadd (%p12583_p1), [#allocation15], 4294961536  ;;  %p12584_p3 = pmov %p12583_p1 }
 0x1ae   : > { %p12585_p2 = pmov %p12583_p1 }
 0x1af   : > { %9994 = dma.done.wait (%p12584_p3), [#allocation18], 32  }
 0x1b0   : > { %9996 = vsyncadd (%p12585_p2), [#allocation18], 4294967264  ;;  %p12586_p6 = pmov %p12583_p1 }
 0x1b1   : > { %p12587_p10 = pmov %p12583_p1 }
 0x1b2   : > { %9998 = dma.done.wait (%p12586_p6), [#allocation21], 1040  }
 0x1b3   : > { %10000 = vsyncadd (%p12587_p10), [#allocation21], 4294966256  ;;  %p12588_p5 = pmov %p12583_p1 }
 0x1b4   : > { %p12589_p9 = pmov %p12583_p1 }
 0x1b5   : > { %10002 = dma.done.wait (%p12588_p5), [#allocation24], 1040  }
 0x1b6   : > { %10004 = vsyncadd (%p12589_p9), [#allocation24], 4294966256  ;;  %vm644_vm0 = vcmask 57344   ;;  %v12482_v0 = vmov 0.0   ;;  %vm10041_vm1 = vmmov 0   ;;  %v12478_v1 = vmov 0  }
 0x1b7   : > { %9004 = vmatprep.subr.bf16.mxu0 %v12482_v0  ;;  %9048 = vmatprep.subr.bf16.mxu1 %v12482_v0  ;;  %645 = vst.msk [vmem:[#allocation2] sm:$0x1] %vm644_vm0, %v12478_v1  ;;  %646 = vst.msk [vmem:[#allocation2 + $0x8] sm:$0x1] %vm644_vm0, %v12478_v1  ;;  %vm653_vm2 = vcmask 59393   ;;  %vm1441_vm4 = vcmask 1043456   ;;  %v804_v4 = vlaneseq }
 0x1b8   : > { %9006 = vmatprep.mubr.msk.bf16.mxu0 %vm10041_vm1, %v12482_v0  ;;  %647 = vst.msk [vmem:[#allocation2 + $0x10] sm:$0x1] %vm644_vm0, %v12478_v1  ;;  %648 = vst.msk [vmem:[#allocation2 + $0x18] sm:$0x1] %vm644_vm0, %v12478_v1  ;;  %9050 = vmatprep.mubr.msk.bf16.mxu1 %vm10041_vm1, %v12482_v0  ;;  %vm654_vm3 = vsmask.f32 2304 }
 0x1b9   : > { %649 = vst.msk [vmem:[#allocation2 + $0x20] sm:$0x1] %vm644_vm0, %v12478_v1  ;;  %650 = vst.msk [vmem:[#allocation2 + $0x28] sm:$0x1] %vm644_vm0, %v12478_v1  ;;  %v10043_v2 = vmov 1966171168  }
 0x1ba   : > { %651 = vst.msk [vmem:[#allocation2 + $0x30] sm:$0x1] %vm644_vm0, %v12478_v1  ;;  %652 = vst.msk [vmem:[#allocation2 + $0x38] sm:$0x1] %vm644_vm0, %v12478_v1  ;;  %v802_v3 = vunpack.c.l.s4 %v10043_v2  ;;  %vm741_vm5 = vcmask 60417   ;;  %v805_v15 = vshrl.u32 %v804_v4, 7 }
 0x1bb   : > { %687 = vst [vmem:[#allocation4] sm:$0x1] %v12478_v1  ;;  %vm10571_vm6 = vmand %vm653_vm2, %vm654_vm3  ;;  %v776_v6 = vld [vmem:[#allocation10 + $0x4] sm:$0xf]  ;;  %v2410_v7 = vld [vmem:[#allocation10 + $0x8] sm:$0xf] }
 0x1bc   : > { %v693_v8 = vld [vmem:[%s10509_s13] sm:$0xf]  ;;  %v1443_v9 = vsel %vm1441_vm4, %v776_v6, 0  ;;  %v3139_v10 = vsel %vm1441_vm4, %v2410_v7, 0  ;;  %v694_v11 = vld [vmem:[%s10509_s13 + $0x4] sm:$0xf]  ;;  %v803_v14 = vunpack.c.0.s8 %v802_v3 }
 0x1bd   : > { %v709_v12 = vrot.slane %v693_v8, 7  ;;  %9005 = vmatpush3.bf16.msra.mxu0 %v1443_v9  ;;  %9049 = vmatpush3.bf16.msra.mxu1 %v3139_v10  ;;  %v711_v13 = vrot.slane %v694_v11, 7  ;;  %v656_v16 = vld [vmem:[#allocation2 + $0x4] sm:$0x6]  ;;  %v659_v19 = vld [vmem:[#allocation2 + $0xc] sm:$0x6] }
 0x1be   : > { %9026 = vmatprep.subr.bf16.mxu0 %v12482_v0  ;;  %v657_v18 = vsel %vm10571_vm6, 0, %v656_v16  ;;  %9070 = vmatprep.subr.bf16.mxu1 %v12482_v0  ;;  %v660_v20 = vsel %vm10571_vm6, 0, %v659_v19  ;;  %v695_v22 = vld [vmem:[%s10509_s13 + $0x8] sm:$0xf]  ;;  %v696_v23 = vld [vmem:[%s10509_s13 + $0xc] sm:$0xf]  ;;  %v10591_v28 = vsub.s32 %v803_v14, %v805_v15 }
 0x1bf   : > { %v710_v17 = vrot.slane %v709_v12, 4  ;;  %742 = vst.msk [vmem:[#allocation2] sm:$0xe] %vm741_vm5, %v709_v12  ;;  %744 = vst.msk [vmem:[#allocation2 + $0x8] sm:$0xe] %vm741_vm5, %v711_v13  ;;  %v712_v21 = vrot.slane %v711_v13, 4 }
 0x1c0   : > { %658 = vst [vmem:[#allocation2 + $0x4] sm:$0x6] %v657_v18  ;;  %661 = vst [vmem:[#allocation2 + $0xc] sm:$0x6] %v660_v20  ;;  %v713_v24 = vrot.slane %v695_v22, 7  ;;  %v715_v25 = vrot.slane %v696_v23, 7 }
 0x1c1   : > { %743 = vst.msk [vmem:[#allocation2 + $0x4] sm:$0x1] %vm644_vm0, %v710_v17  ;;  %v662_v26 = vld [vmem:[#allocation2 + $0x14] sm:$0x6]  ;;  %v697_v27 = vld [vmem:[%s10509_s13 + $0x10] sm:$0xf] }
 0x1c2   : > { %745 = vst.msk [vmem:[#allocation2 + $0xc] sm:$0x1] %vm644_vm0, %v712_v21  ;;  %v663_v29 = vsel %vm10571_vm6, 0, %v662_v26  ;;  %v698_v30 = vld [vmem:[%s10509_s13 + $0x14] sm:$0xf]  ;;  %v717_v31 = vrot.slane %v697_v27, 7 }
 0x1c3   : > { %v665_v32 = vld [vmem:[#allocation2 + $0x1c] sm:$0x6]  ;;  %v774_v33 = vld [vmem:[#allocation10] sm:$0xf]  ;;  %v714_v34 = vrot.slane %v713_v24, 4  ;;  %v716_v35 = vrot.slane %v715_v25, 4 }
 0x1c4   : > { %746 = vst.msk [vmem:[#allocation2 + $0x10] sm:$0xe] %vm741_vm5, %v713_v24  ;;  %748 = vst.msk [vmem:[#allocation2 + $0x18] sm:$0xe] %vm741_vm5, %v715_v25  ;;  %v719_v36 = vrot.slane %v698_v30, 7  ;;  %v666_v37 = vsel %vm10571_vm6, 0, %v665_v32 }
 0x1c5   : > { %664 = vst [vmem:[#allocation2 + $0x14] sm:$0x6] %v663_v29  ;;  %v668_v38 = vld [vmem:[#allocation2 + $0x24] sm:$0x6]  ;;  %v718_v39 = vrot.slane %v717_v31, 4  ;;  %v10622_v57 = vsel %vm1441_vm4, %v774_v33, 0 }
 0x1c6   : > { %750 = vst.msk [vmem:[#allocation2 + $0x20] sm:$0xe] %vm741_vm5, %v717_v31  ;;  %667 = vst [vmem:[#allocation2 + $0x1c] sm:$0x6] %v666_v37  ;;  %v669_v40 = vsel %vm10571_vm6, 0, %v668_v38  ;;  %v720_v43 = vrot.slane %v719_v36, 4 }
 0x1c7   : > { %v699_v41 = vld [vmem:[%s10509_s13 + $0x18] sm:$0xf]  ;;  %v700_v42 = vld [vmem:[%s10509_s13 + $0x1c] sm:$0xf]  ;;  %747 = vst.msk [vmem:[#allocation2 + $0x14] sm:$0x1] %vm644_vm0, %v714_v34 }
 0x1c8   : > { %749 = vst.msk [vmem:[#allocation2 + $0x1c] sm:$0x1] %vm644_vm0, %v716_v35  ;;  %670 = vst [vmem:[#allocation2 + $0x24] sm:$0x6] %v669_v40  ;;  %v721_v44 = vrot.slane %v699_v41, 7  ;;  %v723_v45 = vrot.slane %v700_v42, 7 }
 0x1c9   : > { %752 = vst.msk [vmem:[#allocation2 + $0x28] sm:$0xe] %vm741_vm5, %v719_v36  ;;  %v671_v46 = vld [vmem:[#allocation2 + $0x2c] sm:$0x6]  ;;  %vm1425_vm7 = vcmask 64512   ;;  %vm7237_vm8 = vcmask 1043459  }
 0x1ca   : > { %v8617_v47 = vld.sshfl [vmem:[#allocation2] sm:$0x33 pattern:$0x75316420]  ;;  %751 = vst.msk [vmem:[#allocation2 + $0x24] sm:$0x1] %vm644_vm0, %v718_v39 }
 0x1cb   : > { %v672_v48 = vsel %vm10571_vm6, 0, %v671_v46  ;;  %v8619_v49 = vld.sshfl [vmem:[#allocation2 + $0x8] sm:$0x33 pattern:$0x75316420]  ;;  %v800_v50 = vcombine.high %v8617_v47, %v8617_v47  ;;  %v10613_v51 = vrot.slane %v8617_v47, %v10591_v28  ;;  %v722_v52 = vrot.slane %v721_v44, 4 }
 0x1cc   : > { %753 = vst.msk [vmem:[#allocation2 + $0x2c] sm:$0x1] %vm644_vm0, %v720_v43  ;;  %673 = vst [vmem:[#allocation2 + $0x2c] sm:$0x6] %v672_v48  ;;  %v724_v53 = vrot.slane %v723_v45, 4  ;;  %v838_v55 = vcombine.high %v8619_v49, %v8619_v49  ;;  %v10619_v56 = vrot.slane %v8619_v49, %v10591_v28  ;;  %vm7240_vm9 = vcmask 1044484  }
 0x1cd   : > { %754 = vst.msk [vmem:[#allocation2 + $0x30] sm:$0xe] %vm741_vm5, %v721_v44  ;;  %756 = vst.msk [vmem:[#allocation2 + $0x38] sm:$0xe] %vm741_vm5, %v723_v45  ;;  %v10625_v58 = vrot.slane %v800_v50, %v10591_v28  ;;  %v815_v59 = vcombine.high %v10613_v51, %v10613_v51  ;;  %v1097_v61 = vunpack.i.h.s16 %v10613_v51  ;;  %vm7243_vm10 = vcmask 1045509   ;;  %s8889_s17 = sshll.u32 %s12577_s20, 4 }
 0x1ce   : > { %v8618_v54 = vld.sshfl [vmem:[#allocation2 + $0x4] sm:$0x1 pattern:$0x75316420]  ;;  %755 = vst.msk [vmem:[#allocation2 + $0x34] sm:$0x1] %vm644_vm0, %v722_v52  ;;  %v10634_v63 = vrot.slane %v838_v55, %v10591_v28  ;;  %v1106_v2 = vunpack.i.h.s16 %v10619_v56 }
 0x1cf   : > { %v830_v60 = vrot.slane %v8618_v54, %v10591_v28  ;;  %v8683_v62 = vld.sshfl [vmem:[#allocation2] sm:$0x32 pattern:$0x75316420]  ;;  %757 = vst.msk [vmem:[#allocation2 + $0x3c] sm:$0x1] %vm644_vm0, %v724_v53  ;;  %v816_v6 = vcombine.high %v10625_v58, %v10625_v58  ;;  %v1099_v7 = vunpack.i.h.s16 %v10625_v58  ;;  %v1101_v8 = vunpack.i.h.s16 %v815_v59 }
 0x1d0   : > { %v2434_v3 = vcombine.high %v8683_v62, %v8683_v62  ;;  %v2441_v4 = vrot.slane %v8683_v62, %v10591_v28  ;;  %v8633_v10 = vpack.i.b16 %v10625_v58, %v1097_v61  ;;  %v8649_v11 = vcombine.high %v10619_v56, %v10634_v63  ;;  %v8684_v14 = vld.sshfl [vmem:[#allocation2 + $0x4] sm:$0x11 pattern:$0x75316420]  ;;  %s641_s16 = scalar_lea.vmem [#allocation26], %s10505_s29  ;;  %s12795_s7 = sld [smem:[#allocation98_spill]] }
 0x1d1   : > { %v1105_v9 = vunpack.i.h.s16 %v830_v60  ;;  %v8656_v12 = vpack.i.b16 %v10619_v56, %v830_v60  ;;  %v8657_v13 = vpack.i.b16 %v10634_v63, %v1106_v2  ;;  %v1103_v15 = vunpack.i.h.s16 %v816_v6  ;;  %v8685_v19 = vld.sshfl [vmem:[#allocation2 + $0x8] sm:$0x32 pattern:$0x75316420]  ;;  %s8391_s1 = sshll.u32 %s641_s16, 4  ;;  %s8379_s30 = scalar_lea.sflag [#allocation7], %s10505_s29  ;;  %s12409_s1 = int_to_ptr.vmem [resolvable:$true] %s8391_s1 }
 0x1d2   : > { %v8634_v16 = vpack.i.b16 %v815_v59, %v1099_v7  ;;  %v8635_v17 = vpack.i.b16 %v816_v6, %v1101_v8  ;;  %v1236_v20 = vrot.slane %v8649_v11, %v10591_v28  ;;  %v10650_v22 = vrot.slane %v2434_v3, %v10591_v28  ;;  %v10655_v27 = vld.sshfl [vmem:[#allocation2 + $0xc] sm:$0x11 pattern:$0x75316420]  ;;  %s9929_s9 = scalar_lea.vmem %s12409_s1, 16  ;;  %p12796_p7 = scmp.ne.s32.totalorder %s12566_s23, 0 }
 0x1d3   : > { %v1173_v18 = vpack.i.b16 %v1106_v2, %v1105_v9  ;;  %v10647_v21 = vcombine.low %v8656_v12, %v8657_v13  ;;  %v10652_v23 = vcombine.high %v2441_v4, %v2441_v4  ;;  %v8636_v24 = vpack.i.b16 %v830_v60, %v1103_v15  ;;  %v8620_v34 = vld.sshfl [vmem:[#allocation2 + $0xc] sm:$0x1 pattern:$0x75316420]  ;;  %p9930_p0 = scmp.ne.s32.totalorder %s12409_s1, %s9929_s9  ;;  %s10044_s22 = smov [#allocation26]  }
 0x1d4   : > { %v1205_v25 = vcombine.low %v8633_v10, %v8634_v16  ;;  %v2458_v29 = vcombine.high %v8684_v14, %v8684_v14  ;;  %v10659_v30 = vcombine.high %v10650_v22, %v10650_v22  ;;  %v10662_v31 = vrot.slane %v8684_v14, %v10591_v28  ;;  %v8621_v46 = vld.sshfl [vmem:[#allocation2 + $0x10] sm:$0x33 pattern:$0x75316420]  ;;  %s9933_s21 = sshll.u32 %s10044_s22, 4  ;;  %s9934_s21 = int_to_ptr.vmem [resolvable:$false] %s9933_s21 }
 0x1d5   : > { %v1207_v26 = vcombine.low %v1173_v18, %v10634_v63  ;;  %v2480_v32 = vcombine.high %v8685_v19, %v8685_v19  ;;  %v2487_v33 = vrot.slane %v8685_v19, %v10591_v28  ;;  %v1206_v35 = vcombine.low %v8635_v17, %v8636_v24  ;;  %v8622_v53 = vld.sshfl [vmem:[#allocation2 + $0x14] sm:$0x1 pattern:$0x75316420]  ;;  %p9931_p11 = pnand %p9930_p0, %p12796_p7  ;;  %s9935_s13 = scalar_lea.vmem %s9934_s21, 32 }
 0x1d6   : > { %v1215_v36 = vrot.slane %v1205_v25, %v10591_v28  ;;  %v10668_v38 = vrot.slane %v2458_v29, %v10591_v28  ;;  %v10677_v41 = vrot.slane %v10655_v27, %v10591_v28  ;;  %v2903_v42 = vcombine.low %v10650_v22, %v10652_v23  ;;  %v8623_v3 = vld.sshfl [vmem:[#allocation2 + $0x18] sm:$0x33 pattern:$0x75316420]  ;;  %s12407_s19 = scalar_lea.hbm %s12795_s7, %s8889_s17  ;;  %p9936_p4 = scmp.lt.s32.totalorder %s12409_s1, %s9934_s21 }
 0x1d7   : > { %v1229_v37 = vrot.slane %v1207_v26, %v10591_v28  ;;  %v10671_v39 = vrot.slane %v2480_v32, %v10591_v28  ;;  %v10673_v40 = vcombine.high %v2487_v33, %v2487_v33  ;;  %v1222_v43 = vrot.slane %v1206_v35, %v10591_v28  ;;  %p9932_p8 = pneg %p9931_p11  ;;  %p9937_p12 = scmp.lt.s32.totalorder %s9935_s13, %s9929_s9 }
 0x1d8   : > { %v2904_v45 = vcombine.low %v10659_v30, %v10662_v31  ;;  %v10685_v47 = vrot.slane %v8620_v34, %v10591_v28  ;;  %v2913_v59 = vrot.slane %v2903_v42, %v10591_v28  ;;  %v876_v4 = vcombine.high %v8621_v46, %v8621_v46 }
 0x1d9   : > { %v1238_v44 = vcombine.low %v1229_v37, %v1236_v20  ;;  %v10689_v48 = vcombine.high %v10671_v39, %v10671_v39  ;;  %v12481_v49 = vunpack.i.h.s16 %v10671_v39  ;;  %v2807_v50 = vunpack.i.h.s16 %v10673_v40  ;;  %v8687_v37 = vld.sshfl [vmem:[#allocation2 + $0x10] sm:$0x32 pattern:$0x75316420]  ;;  %p9938_p13 = por %p9937_p12, %p9936_p4 }
 0x1da   : > { %v8699_v52 = vpack.i.b16 %v10671_v39, %v10668_v38  ;;  %v1237_v54 = vcombine.low %v1215_v36, %v1222_v43  ;;  %v2920_v60 = vrot.slane %v2904_v45, %v10591_v28  ;;  %v10705_v8 = vrot.slane %v8621_v46, %v10591_v28 }
 0x1db   : > { %v1252_v55 = vrot.slane %v1238_v44, %v10591_v28  ;;  %v2809_v61 = vunpack.i.h.s16 %v10689_v48  ;;  %v8700_v62 = vpack.i.b16 %v10673_v40, %v12481_v49  ;;  %v8701_v2 = vpack.i.b16 %v10689_v48, %v2807_v50  ;;  %p9939_p1 = pnand %p9938_p13, %p9932_p8 }
 0x1dc   : > { %v1245_v6 = vrot.slane %v1237_v54, %v10591_v28  ;;  %v2935_v7 = vcombine.low %v2913_v59, %v2920_v60  ;;  %v10708_v9 = vrot.slane %v8622_v53, %v10591_v28  ;;  %v10712_v12 = vrot.slane %v876_v4, %v10591_v28  ;;  %v8689_v60 = vld.sshfl [vmem:[#allocation2 + $0x18] sm:$0x32 pattern:$0x75316420] }
 0x1dd   : > { %v8702_v10 = vpack.i.b16 %v10677_v41, %v2809_v61  ;;  %v2905_v11 = vcombine.low %v8699_v52, %v8700_v62  ;;  %v914_v13 = vcombine.high %v8623_v3, %v8623_v3  ;;  %v10717_v16 = vcombine.high %v10705_v8, %v10705_v8  ;;  %v8688_v52 = vld.sshfl [vmem:[#allocation2 + $0x14] sm:$0x11 pattern:$0x75316420] }
 0x1de   : > { %v1253_v14 = vcombine.low %v1245_v6, %v1252_v55  ;;  %v2943_v15 = vrot.slane %v2935_v7, %v10591_v28  ;;  %v10720_v17 = vrot.slane %v8623_v3, %v10591_v28  ;;  %v10725_v20 = vcombine.high %v10712_v12, %v10712_v12 }
 0x1df   : > { %v2906_v18 = vcombine.low %v8701_v2, %v8702_v10  ;;  %v2927_v19 = vrot.slane %v2905_v11, %v10591_v28  ;;  %v10728_v24 = vrot.slane %v914_v13, %v10591_v28  ;;  %v1115_v26 = vunpack.i.h.s16 %v10705_v8 }
 0x1e0   : > { %9007 = vmatmul.mubr.msk.bf16.vlgmr.msra.gmra.mrb[0].mxu0 %vm1425_vm7, %v1253_v14  ;;  %v10733_v25 = vcombine.high %v10720_v17, %v10720_v17  ;;  %v1117_v29 = vunpack.i.h.s16 %v10712_v12  ;;  %v1119_v32 = vunpack.i.h.s16 %v10717_v16  ;;  %v1121_v34 = vunpack.i.h.s16 %v10725_v20 }
 0x1e1   : > { %9027 = vmatpush3.bf16.msra.mxu0 %v10622_v57  ;;  %v2934_v33 = vrot.slane %v2906_v18, %v10591_v28  ;;  %9010 = vmatprep.mubr.msk.bf16.mxu0 %vm10041_vm1, %v12482_v0  ;;  %v1123_v35 = vunpack.i.h.s16 %v10708_v9  ;;  %v12480_v36 = vunpack.i.h.s16 %v10720_v17  ;;  %v8637_v42 = vpack.i.b16 %v10712_v12, %v1115_v26 }
 0x1e2   : > { %v8638_v43 = vpack.i.b16 %v10717_v16, %v1117_v29  ;;  %v8639_v44 = vpack.i.b16 %v10725_v20, %v1119_v32  ;;  %v1257_v57 = vcombine.low %v10728_v24, %v10733_v25  ;;  %9092 = vmatprep.subr.bf16.mxu0 %v12482_v0  ;;  %v8640_v46 = vpack.i.b16 %v10708_v9, %v1121_v34 }
 0x1e3   : > { %v2936_v45 = vcombine.low %v2927_v19, %v2934_v33  ;;  %v1182_v50 = vpack.i.b16 %v12480_v36, %v1123_v35  ;;  %v2504_v53 = vcombine.high %v10655_v27, %v10655_v27  ;;  %v1254_v54 = vcombine.low %v10685_v47, %v8637_v42  ;;  %v8624_v19 = vld.sshfl [vmem:[#allocation2 + $0x1c] sm:$0x1 pattern:$0x75316420] }
 0x1e4   : > { %v1255_v55 = vcombine.low %v8638_v43, %v8639_v44  ;;  %v1285_v59 = vrot.slane %v1257_v57, %v10591_v28  ;;  %v2526_v61 = vcombine.high %v8687_v37, %v8687_v37  ;;  %v10763_v4 = vrot.slane %v8687_v37, %v10591_v28  ;;  %v8625_v37 = vld.sshfl [vmem:[#allocation2 + $0x20] sm:$0x33 pattern:$0x75316420] }
 0x1e5   : > { %v2950_v62 = vrot.slane %v2936_v45, %v10591_v28  ;;  %v1256_v2 = vcombine.low %v8640_v46, %v1182_v50  ;;  %v10760_v3 = vrot.slane %v2504_v53, %v10591_v28  ;;  %v1264_v6 = vrot.slane %v1254_v54, %v10591_v28  ;;  %v8626_v54 = vld.sshfl [vmem:[#allocation2 + $0x24] sm:$0x1 pattern:$0x75316420] }
 0x1e6   : > { %v1271_v27 = vrot.slane %v1255_v55, %v10591_v28  ;;  %v10768_v7 = vrot.slane %v2526_v61, %v10591_v28  ;;  %v2550_v10 = vcombine.high %v8688_v52, %v8688_v52  ;;  %v10772_v14 = vrot.slane %v8688_v52, %v10591_v28  ;;  %v8627_v61 = vld.sshfl [vmem:[#allocation2 + $0x28] sm:$0x33 pattern:$0x75316420] }
 0x1e7   : > { %v2951_v11 = vcombine.low %v2943_v15, %v2950_v62  ;;  %v1278_v13 = vrot.slane %v1256_v2, %v10591_v28  ;;  %v2572_v18 = vcombine.high %v8689_v60, %v8689_v60  ;;  %v10778_v32 = vrot.slane %v8689_v60, %v10591_v28 }
 0x1e8   : > { %v1286_v26 = vcombine.low %v1264_v6, %v1271_v27  ;;  %v10775_v29 = vrot.slane %v2550_v10, %v10591_v28  ;;  %v2811_v33 = vunpack.i.h.s16 %v10677_v41  ;;  %v8719_v35 = vcombine.high %v10763_v4, %v10768_v7 }
 0x1e9   : > { %9051 = vmatmul.mubr.msk.bf16.vlgmr.msra.gmra.mrb[0].mxu1 %vm1425_vm7, %v2951_v11  ;;  %v1287_v34 = vcombine.low %v1278_v13, %v1285_v59  ;;  %v10783_v15 = vrot.slane %v2572_v18, %v10591_v28  ;;  %v10789_v42 = vcombine.high %v10728_v24, %v10728_v24  ;;  %v2587_v44 = vcombine.high %v10778_v32, %v10778_v32 }
 0x1ea   : > { %v1294_v43 = vrot.slane %v1286_v26, %v10591_v28  ;;  %9054 = vmatprep.mubr.msk.bf16.mxu1 %vm10041_vm1, %v12482_v0  ;;  %v8703_v57 = vpack.i.b16 %v10760_v3, %v2811_v33  ;;  %v10798_v45 = vrot.slane %v8624_v19, %v10591_v28  ;;  %v2969_v60 = vrot.slane %v8719_v35, %v10591_v28 }
 0x1eb   : > { %12592 = vst [vmem:[#allocation38_spill] sm:$0xff] %v10789_v42  ;;  %v1301_v46 = vrot.slane %v1287_v34, %v10591_v28  ;;  %v10803_v50 = vcombine.high %v10783_v15, %v10783_v15  ;;  %v12479_v52 = vunpack.i.h.s16 %v10783_v15  ;;  %v8704_v53 = vpack.i.b16 %v10783_v15, %v10775_v29 }
 0x1ec   : > { %12593 = vst [vmem:[#allocation39_spill] sm:$0xff] %v10798_v45  ;;  %v2825_v55 = vunpack.i.h.s16 %v2587_v44  ;;  %v2952_v59 = vcombine.low %v8703_v57, %v10768_v7  ;;  %v952_v62 = vcombine.high %v8625_v37, %v8625_v37  ;;  %v10814_v10 = vrot.slane %v8625_v37, %v10591_v28 }
 0x1ed   : > { %v1302_v2 = vcombine.low %v1294_v43, %v1301_v46  ;;  %v8705_v6 = vpack.i.b16 %v2587_v44, %v12479_v52  ;;  %v2954_v27 = vcombine.low %v10772_v14, %v8704_v53  ;;  %v10822_v19 = vrot.slane %v8626_v54, %v10591_v28 }
 0x1ee   : > { %12594 = vst [vmem:[#allocation40_spill] sm:$0xff] %v10814_v10  ;;  %v8706_v11 = vpack.i.b16 %v10803_v50, %v2825_v55  ;;  %v2962_v13 = vrot.slane %v2952_v59, %v10591_v28  ;;  %v10819_v18 = vrot.slane %v952_v62, %v10591_v28  ;;  %v967_v33 = vcombine.high %v10814_v10, %v10814_v10  ;;  %v8690_v59 = vld.sshfl [vmem:[#allocation2 + $0x1c] sm:$0x11 pattern:$0x75316420] }
 0x1ef   : > { %12596 = vst [vmem:[#allocation42_spill] sm:$0xff] %v10822_v19  ;;  %9011 = vmatmul.mubr.msk.bf16.gmra.mrb[4].mxu0 %vm1425_vm7, %v1302_v2  ;;  %v2976_v26 = vrot.slane %v2954_v27, %v10591_v28  ;;  %v990_v34 = vcombine.high %v8627_v61, %v8627_v61  ;;  %v10829_v35 = vrot.slane %v8627_v61, %v10591_v28  ;;  %v1133_v57 = vunpack.i.h.s16 %v10814_v10 }
 0x1f0   : > { %12595 = vst [vmem:[#allocation41_spill] sm:$0xff] %v10819_v18  ;;  %v2955_v37 = vcombine.low %v8705_v6, %v8706_v11  ;;  %v2984_v43 = vcombine.low %v2962_v13, %v2969_v60  ;;  %9014 = vmatprep.mubr.msk.bf16.mxu0 %vm10041_vm1, %v12482_v0  ;;  %v968_v44 = vcombine.high %v10819_v18, %v10819_v18  ;;  %v1135_v53 = vunpack.i.h.s16 %v10819_v18  ;;  %v8691_v6 = vld.sshfl [vmem:[#allocation2 + $0x20] sm:$0x32 pattern:$0x75316420] }
 0x1f1   : > { %12597 = vst [vmem:[#allocation43_spill] sm:$0xff] %v10829_v35  ;;  %v10837_v46 = vrot.slane %v990_v34, %v10591_v28  ;;  %v1137_v54 = vunpack.i.h.s16 %v967_v33  ;;  %v1141_v55 = vunpack.i.h.s16 %v10822_v19  ;;  %v12486_v2 = vunpack.i.h.s16 %v10829_v35 }
 0x1f2   : > { %v2983_v61 = vrot.slane %v2955_v37, %v10591_v28  ;;  %v2992_v60 = vrot.slane %v2984_v43, %v10591_v28  ;;  %v1139_v62 = vunpack.i.h.s16 %v968_v44  ;;  %v8641_v27 = vpack.i.b16 %v10819_v18, %v1133_v57  ;;  %v8692_v37 = vld.sshfl [vmem:[#allocation2 + $0x24] sm:$0x11 pattern:$0x75316420] }
 0x1f3   : > { %12598 = vst [vmem:[#allocation44_spill] sm:$0xff] %v10837_v46  ;;  %v8642_v11 = vpack.i.b16 %v967_v33, %v1135_v53  ;;  %v8643_v13 = vpack.i.b16 %v968_v44, %v1137_v54  ;;  %v1303_v34 = vcombine.low %v10789_v42, %v10798_v45  ;;  %v1191_v36 = vpack.i.b16 %v12486_v2, %v1141_v55 }
 0x1f4   : > { %v2985_v1 = vcombine.low %v2976_v26, %v2983_v61  ;;  %v8644_v52 = vpack.i.b16 %v10822_v19, %v1139_v62  ;;  %v2596_v49 = vcombine.high %v8690_v59, %v8690_v59  ;;  %v10852_v10 = vrot.slane %v8690_v59, %v10591_v28  ;;  %v8693_v26 = vld.sshfl [vmem:[#allocation2 + $0x28] sm:$0x32 pattern:$0x75316420] }
 0x1f5   : > { %v1304_v43 = vcombine.low %v8641_v27, %v8642_v11  ;;  %v1313_v0 = vrot.slane %v1303_v34, %v10591_v28  ;;  %v2618_v57 = vcombine.high %v8691_v6, %v8691_v6  ;;  %v1306_v53 = vcombine.low %v1191_v36, %v10837_v46  ;;  %v8628_v36 = vld.sshfl [vmem:[#allocation2 + $0x2c] sm:$0x1 pattern:$0x75316420] }
 0x1f6   : > { %12599 = vst [vmem:[#allocation45_spill] sm:$0xff] %v10852_v10  ;;  %v2999_v33 = vrot.slane %v2985_v1, %v10591_v28  ;;  %v1305_v44 = vcombine.low %v8643_v13, %v8644_v52  ;;  %v10857_v54 = vrot.slane %v2596_v49, %v10591_v28  ;;  %v2625_v61 = vrot.slane %v8691_v6, %v10591_v28 }
 0x1f7   : > { %v1320_v55 = vrot.slane %v1304_v43, %v10591_v28  ;;  %v10862_v62 = vrot.slane %v2618_v57, %v10591_v28  ;;  %v2642_v27 = vcombine.high %v8692_v37, %v8692_v37  ;;  %v1334_v1 = vrot.slane %v1306_v53, %v10591_v28  ;;  %v8629_v43 = vld.sshfl [vmem:[#allocation2 + $0x30] sm:$0x33 pattern:$0x75316420] }
 0x1f8   : > { %12600 = vst [vmem:[#allocation46_spill] sm:$0xff] %v10857_v54  ;;  %v3000_v59 = vcombine.low %v2992_v60, %v2999_v33  ;;  %v1327_v11 = vrot.slane %v1305_v44, %v10591_v28  ;;  %v10867_v52 = vrot.slane %v8692_v37, %v10591_v28  ;;  %v10869_v49 = vcombine.high %v2625_v61, %v2625_v61  ;;  %v8630_v44 = vld.sshfl [vmem:[#allocation2 + $0x34] sm:$0x1 pattern:$0x75316420] }
 0x1f9   : > { %12601 = vst [vmem:[#allocation47_spill] sm:$0xff] %v10862_v62  ;;  %v1335_v13 = vcombine.low %v1313_v0, %v1320_v55  ;;  %v10873_v34 = vcombine.high %v10862_v62, %v10862_v62  ;;  %v10876_v6 = vrot.slane %v2642_v27, %v10591_v28  ;;  %v2664_v57 = vcombine.high %v8693_v26, %v8693_v26  ;;  %v10881_v0 = vld.sshfl [vmem:[#allocation2 + $0x38] sm:$0x33 pattern:$0x75316420] }
 0x1fa   : > { %12602 = vst [vmem:[#allocation48_spill] sm:$0xff] %v10867_v52  ;;  %12603 = vst [vmem:[#allocation49_spill] sm:$0xff] %v10869_v49  ;;  %9055 = vmatmul.mubr.msk.bf16.gmra.mrb[4].mxu1 %vm1425_vm7, %v3000_v59  ;;  %v1336_v60 = vcombine.low %v1327_v11, %v1334_v1  ;;  %v2671_v33 = vrot.slane %v8693_v26, %v10591_v28  ;;  %v2827_v37 = vunpack.i.h.s16 %v10803_v50  ;;  %v12606_v55 = vmov 0.0   ;;  %v674_v11 = vld [vmem:[#allocation2 + $0x34] sm:$0x6] }
 0x1fb   : > { %12604 = vst [vmem:[#allocation50_spill] sm:$0xff] %v10873_v34  ;;  %12605 = vst [vmem:[#allocation51_spill] sm:$0xff] %v10876_v6  ;;  %v1343_v53 = vrot.slane %v1335_v13, %v10591_v28  ;;  %9058 = vmatprep.mubr.msk.bf16.mxu1 %vm10041_vm1, %v12606_v55  ;;  %v2829_v61 = vunpack.i.h.s16 %v10852_v10  ;;  %v3002_v27 = vcombine.low %v10862_v62, %v10869_v49  ;;  %vm680_vm11 = vcmask 122880  }
 0x1fc   : > { %v3003_v59 = vcombine.low %v10873_v34, %v10867_v52  ;;  %v1350_v26 = vrot.slane %v1336_v60, %v10591_v28  ;;  %v10893_v50 = vrot.slane %v2664_v57, %v10591_v28  ;;  %v10895_v1 = vcombine.high %v2671_v33, %v2671_v33 }
 0x1fd   : > { %v8707_v13 = vpack.i.b16 %v10852_v10, %v2827_v37  ;;  %v8708_v2 = vpack.i.b16 %v10857_v54, %v2829_v61  ;;  %v3018_v18 = vrot.slane %v3002_v27, %v10591_v28  ;;  %v10902_v49 = vrot.slane %v8628_v36, %v10591_v28 }
 0x1fe   : > { %v3025_v45 = vrot.slane %v3003_v59, %v10591_v28  ;;  %v1351_v52 = vcombine.low %v1343_v53, %v1350_v26  ;;  %v12497_v34 = vunpack.i.h.s16 %v10893_v50  ;;  %v8709_v60 = vpack.i.b16 %v10893_v50, %v10876_v6  ;;  %v8694_v26 = vld.sshfl [vmem:[#allocation2 + $0x2c] sm:$0x11 pattern:$0x75316420] }
 0x1ff   : > { %12607 = vst [vmem:[#allocation52_spill] sm:$0xff] %v10902_v49  ;;  %v1028_v57 = vcombine.high %v8629_v43, %v8629_v43  ;;  %v3001_v33 = vcombine.low %v8707_v13, %v8708_v2  ;;  %v10908_v62 = vrot.slane %v8629_v43, %v10591_v28  ;;  %v10911_v37 = vrot.slane %v8630_v44, %v10591_v28 }
 0x200   : > { %v10915_v61 = vrot.slane %v10881_v0, %v10591_v28  ;;  %9015 = vmatmul.mubr.msk.bf16.gmra.mrb[8].mxu0 %vm1425_vm7, %v1351_v52  ;;  %v8710_v36 = vpack.i.b16 %v10895_v1, %v12497_v34  ;;  %v8650_v2 = vcombine.high %v10829_v35, %v10837_v46  ;;  %v675_v43 = vsel %vm10571_vm6, 0, %v674_v11  ;;  %v8695_v34 = vld.sshfl [vmem:[#allocation2 + $0x30] sm:$0x32 pattern:$0x75316420] }
 0x201   : > { %12608 = vst [vmem:[#allocation53_spill] sm:$0xff] %v10908_v62  ;;  %v10922_v53 = vrot.slane %v1028_v57, %v10591_v28  ;;  %v3011_v44 = vrot.slane %v3001_v33, %v10591_v28  ;;  %9018 = vmatprep.mubr.msk.bf16.mxu0 %vm10041_vm1, %v12606_v55  ;;  %v10933_v52 = vcombine.high %v10908_v62, %v10908_v62  ;;  %v1151_v27 = vunpack.i.h.s16 %v10908_v62  ;;  %v8697_v46 = vld.sshfl [vmem:[#allocation2 + $0x38] sm:$0x32 pattern:$0x75316420] }
 0x202   : > { %v1159_v59 = vunpack.i.h.s16 %v10911_v37  ;;  %676 = vst [vmem:[#allocation2 + $0x34] sm:$0x6] %v675_v43  ;;  %v3004_v13 = vcombine.low %v8709_v60, %v8710_v36  ;;  %v12511_v33 = vunpack.i.h.s16 %v10915_v61  ;;  %v1362_v62 = vrot.slane %v8650_v2, %v10591_v28 }
 0x203   : > { %12609 = vst [vmem:[#allocation54_spill] sm:$0xff] %v10922_v53  ;;  %v10939_v57 = vcombine.high %v10922_v53, %v10922_v53  ;;  %v1153_v11 = vunpack.i.h.s16 %v10922_v53  ;;  %v3033_v10 = vcombine.low %v3011_v44, %v3018_v18  ;;  %v1155_v54 = vunpack.i.h.s16 %v10933_v52 }
 0x204   : > { %v8645_v6 = vpack.i.b16 %v10922_v53, %v1151_v27  ;;  %v3032_v43 = vrot.slane %v3004_v13, %v10591_v28  ;;  %v1200_v35 = vpack.i.b16 %v12511_v33, %v1159_v59  ;;  %v10956_v27 = vcombine.high %v10893_v50, %v10893_v50 }
 0x205   : > { %12610 = vst [vmem:[#allocation55_spill] sm:$0xff] %v10939_v57  ;;  %v1157_v60 = vunpack.i.h.s16 %v10939_v57  ;;  %v8646_v36 = vpack.i.b16 %v10933_v52, %v1153_v11  ;;  %v3041_v19 = vrot.slane %v3033_v10, %v10591_v28  ;;  %v8647_v18 = vpack.i.b16 %v10939_v57, %v1155_v54 }
 0x206   : > { %v1353_v44 = vcombine.low %v10902_v49, %v8645_v6  ;;  %12611 = vst [vmem:[#allocation56_spill] sm:$0xff] %v10956_v27  ;;  %v3034_v2 = vcombine.low %v3025_v45, %v3032_v43  ;;  %v2688_v53 = vcombine.high %v8694_v26, %v8694_v26  ;;  %v10960_v42 = vrot.slane %v8694_v26, %v10591_v28 }
 0x207   : > { %v8648_v13 = vpack.i.b16 %v10911_v37, %v1157_v60  ;;  %v1354_v11 = vcombine.low %v8646_v36, %v8647_v18  ;;  %v2710_v33 = vcombine.high %v8695_v34, %v8695_v34  ;;  %v10964_v10 = vrot.slane %v8695_v34, %v10591_v28 }
 0x208   : > { %12612 = vst [vmem:[#allocation57_spill] sm:$0xff] %v10960_v42  ;;  %v1369_v59 = vrot.slane %v1353_v44, %v10591_v28  ;;  %v3048_v54 = vrot.slane %v3034_v2, %v10591_v28  ;;  %v10968_v49 = vrot.slane %v2688_v53, %v10591_v28  ;;  %v2756_v45 = vcombine.high %v8697_v46, %v8697_v46  ;;  %v8632_v2 = vld.sshfl [vmem:[#allocation2 + $0x3c] sm:$0x1 pattern:$0x75316420] }
 0x209   : > { %12613 = vst [vmem:[#allocation58_spill] sm:$0xff] %v10964_v10  ;;  %v1355_v6 = vcombine.low %v8648_v13, %v1200_v35  ;;  %v8696_v57 = vld.sshfl [vmem:[#allocation2 + $0x34] sm:$0x11 pattern:$0x75316420]  ;;  %v1376_v43 = vrot.slane %v1354_v11, %v10591_v28  ;;  %v10972_v26 = vrot.slane %v2710_v33, %v10591_v28  ;;  %v2845_v33 = vunpack.i.h.s16 %v10956_v27 }
 0x20a   : > { %v1384_v60 = vcombine.low %v1362_v62, %v1369_v59  ;;  %v2734_v36 = vcombine.high %v8696_v57, %v8696_v57  ;;  %v3049_v18 = vcombine.low %v3041_v19, %v3048_v54  ;;  %v10976_v34 = vrot.slane %v8696_v57, %v10591_v28  ;;  %v677_v53 = vld [vmem:[#allocation2 + $0x3c] sm:$0x6] }
 0x20b   : > { %v1383_v44 = vrot.slane %v1355_v6, %v10591_v28  ;;  %v10979_v35 = vrot.slane %v2756_v45, %v10591_v28  ;;  %v2843_v62 = vunpack.i.h.s16 %v10895_v1  ;;  %v2847_v57 = vunpack.i.h.s16 %v10960_v42 }
 0x20c   : > { %v1392_v13 = vrot.slane %v1384_v60, %v10591_v28  ;;  %v10983_v11 = vrot.slane %v2734_v36, %v10591_v28  ;;  %9059 = vmatmul.mubr.msk.bf16.gmra.mrb[8].mxu1 %vm1425_vm7, %v3049_v18  ;;  %v8720_v59 = vcombine.high %v10964_v10, %v10972_v26  ;;  %v1066_v54 = vcombine.high %v10881_v0, %v10881_v0  ;;  %v3824_v10 = vld [vmem:[#allocation10 + $0xc] sm:$0xf] }
 0x20d   : > { %v1385_v19 = vcombine.low %v1376_v43, %v1383_v44  ;;  %9062 = vmatprep.mubr.msk.bf16.mxu1 %vm10041_vm1, %v12606_v55  ;;  %v8711_v6 = vpack.i.b16 %v10956_v27, %v2843_v62  ;;  %v8712_v45 = vpack.i.b16 %v10960_v42, %v2845_v33  ;;  %v11001_v43 = vcombine.high %v10915_v61, %v10915_v61 }
 0x20e   : > { %12614 = vst [vmem:[#allocation59_spill] sm:$0xff] %v10983_v11  ;;  %v8714_v60 = vpack.i.b16 %v10979_v35, %v10983_v11  ;;  %v8713_v18 = vpack.i.b16 %v10968_v49, %v2847_v57  ;;  %v3074_v0 = vrot.slane %v8720_v59, %v10591_v28  ;;  %v11007_v44 = vrot.slane %v1066_v54, %v10591_v28 }
 0x20f   : > { %12615 = vst [vmem:[#allocation60_spill] sm:$0xff] %v11001_v43  ;;  %v1399_v36 = vrot.slane %v1385_v19, %v10591_v28  ;;  %v3050_v62 = vcombine.low %v8711_v6, %v8712_v45  ;;  %v11011_v27 = vrot.slane %v8632_v2, %v10591_v28  ;;  %v678_v42 = vsel %vm10571_vm6, 0, %v677_v53 }
 0x210   : > { %12616 = vst [vmem:[#allocation61_spill] sm:$0xff] %v11007_v44  ;;  %v3053_v33 = vcombine.low %v10976_v34, %v8714_v60  ;;  %v3051_v19 = vcombine.low %v8713_v18, %v10972_v26  ;;  %v11018_v57 = vcombine.high %v11007_v44, %v11007_v44  ;;  %v1401_v59 = vcombine.low %v11007_v44, %v11001_v43 }
 0x211   : > { %12617 = vst [vmem:[#allocation62_spill] sm:$0xff] %v11011_v27  ;;  %v1400_v11 = vcombine.low %v1392_v13, %v1399_v36  ;;  %679 = vst [vmem:[#allocation2 + $0x3c] sm:$0x6] %v678_v42  ;;  %v3060_v54 = vrot.slane %v3050_v62, %v10591_v28  ;;  %v11025_v2 = vrot.slane %v8697_v46, %v10591_v28  ;;  %v12521_v42 = vunpack.i.h.s16 %v10979_v35 }
 0x212   : > { %12618 = vst [vmem:[#allocation63_spill] sm:$0xff] %v11018_v57  ;;  %v3081_v6 = vrot.slane %v3053_v33, %v10591_v28  ;;  %v2772_v5 = vcombine.high %v10979_v35, %v10979_v35  ;;  %v3067_v53 = vrot.slane %v3051_v19, %v10591_v28  ;;  %v1402_v13 = vcombine.low %v11018_v57, %v11011_v27 }
 0x213   : > { %12619 = vst [vmem:[#allocation64_spill] sm:$0xff] %v11025_v2  ;;  %9019 = vmatmul.mubr.msk.bf16.gmra.mrb[12].mxu0 %vm1425_vm7, %v1400_v11  ;;  %v1409_v45 = vrot.slane %v1401_v59, %v10591_v28  ;;  %v2771_v46 = vcombine.high %v11025_v2, %v11025_v2  ;;  %v4553_v18 = vsel %vm1441_vm4, %v3824_v10, 0  ;;  %v853_v33 = vcombine.high %v10619_v56, %v10619_v56 }
 0x214   : > { %v3083_v60 = vcombine.low %v3074_v0, %v3081_v6  ;;  %9022 = vmatprep.mubr.msk.bf16.mxu0 %vm10041_vm1, %v12606_v55  ;;  %v2863_v36 = vunpack.i.h.s16 %v2772_v5  ;;  %v3082_v11 = vcombine.low %v3060_v54, %v3067_v53  ;;  %v1416_v62 = vrot.slane %v1402_v13, %v10591_v28  ;;  %9071 = vmatpush3.bf16.msra.mxu1 %v4553_v18 }
 0x215   : > { %v854_v19 = vcombine.high %v10634_v63, %v10634_v63  ;;  %v2861_v59 = vunpack.i.h.s16 %v2771_v46  ;;  %v8715_v6 = vpack.i.b16 %v2771_v46, %v12521_v42  ;;  %v1108_v2 = vunpack.i.h.s16 %v10634_v63  ;;  %9114 = vmatprep.subr.bf16.mxu1 %v12606_v55  ;;  %v5238_v42 = vld [vmem:[#allocation10 + $0x10] sm:$0xf] }
 0x216   : > { %v3097_v0 = vrot.slane %v3083_v60, %v10591_v28  ;;  %v3090_v10 = vrot.slane %v3082_v11, %v10591_v28  ;;  %v1417_v54 = vcombine.low %v1409_v45, %v1416_v62  ;;  %v1110_v53 = vunpack.i.h.s16 %v853_v33 }
 0x217   : > { %v1561_v56 = vcombine.low %v10613_v51, %v10625_v58  ;;  %v8716_v18 = vpack.i.b16 %v2772_v5, %v2861_v59  ;;  %v8658_v27 = vpack.i.b16 %v853_v33, %v1108_v2  ;;  %v8676_v60 = vcombine.high %v10613_v51, %v10625_v58 }
 0x218   : > { %v8698_v13 = vld.sshfl [vmem:[#allocation2 + $0x3c] sm:$0x11 pattern:$0x75316420]  ;;  %v1585_v46 = vrot.slane %v10647_v21, %v10591_v28  ;;  %v3098_v63 = vcombine.low %v3090_v10, %v3097_v0  ;;  %v1424_v57 = vrot.slane %v1417_v54, %v10591_v28  ;;  %v8659_v62 = vpack.i.b16 %v854_v19, %v1110_v53 }
 0x219   : > { %v2780_v43 = vcombine.high %v8698_v13, %v8698_v13  ;;  %v11059_v45 = vrot.slane %v8698_v13, %v10591_v28  ;;  %v3099_v11 = vcombine.low %v8715_v6, %v8716_v18  ;;  %v1571_v44 = vrot.slane %v1561_v56, %v10591_v28 }
 0x21a   : > { %v1578_v2 = vrot.slane %v8676_v60, %v10591_v28  ;;  %9063 = vmatmul.mubr.msk.bf16.gmra.mrb[12].mxu1 %vm1425_vm7, %v3098_v63  ;;  %v5975_v5 = vsel %vm1441_vm4, %v5238_v42, 0  ;;  %v1564_v0 = vcombine.low %v8658_v27, %v8659_v62  ;;  %v4211_v6 = vunpack.i.h.s16 %v10652_v23 }
 0x21b   : > { %9023 = vmatmul.mubr.msk.bf16.gmra.mrb[16].mxu0 %vm1425_vm7, %v1424_v57  ;;  %v11066_v51 = vrot.slane %v2780_v43, %v10591_v28  ;;  %v2865_v58 = vunpack.i.h.s16 %v11059_v45  ;;  %v8717_v21 = vpack.i.b16 %v11059_v45, %v2863_v36  ;;  %9066 = vmatprep.mubr.msk.bf16.mxu1 %vm10041_vm1, %v12606_v55  ;;  %v3107_v33 = vrot.slane %v3099_v11, %v10591_v28 }
 0x21c   : > { %9028 = vmatprep.mubr.msk.bf16.mxu0 %vm10041_vm1, %v12606_v55  ;;  %v1593_v59 = vcombine.low %v1571_v44, %v1578_v2  ;;  %v4209_v57 = vunpack.i.h.s16 %v10650_v22  ;;  %v4213_v36 = vunpack.i.h.s16 %v10659_v30  ;;  %v4215_v42 = vunpack.i.h.s16 %v10662_v31 }
 0x21d   : > { %v8718_v43 = vpack.i.b16 %v11066_v51, %v2865_v58  ;;  %v1592_v10 = vrot.slane %v1564_v0, %v10591_v28  ;;  %v4217_v53 = vunpack.i.h.s16 %v10668_v38  ;;  %v8743_v44 = vpack.i.b16 %v10659_v30, %v4211_v6 }
 0x21e   : > { %v1601_v54 = vrot.slane %v1593_v59, %v10591_v28  ;;  %v8742_v56 = vpack.i.b16 %v10652_v23, %v4209_v57  ;;  %v8744_v22 = vpack.i.b16 %v10662_v31, %v4213_v36  ;;  %v8745_v13 = vpack.i.b16 %v10668_v38, %v4215_v42 }
 0x21f   : > { %v3100_v27 = vcombine.low %v8717_v21, %v8718_v43  ;;  %v1594_v18 = vcombine.low %v1585_v46, %v1592_v10  ;;  %v12620_v60 = vunpack.i.h.s16 %v10671_v39  ;;  %v4320_v11 = vcombine.low %v10689_v48, %v10677_v41 }
 0x220   : > { %v1112_v62 = vunpack.i.h.s16 %v854_v19  ;;  %v4317_v58 = vcombine.low %v8742_v56, %v8743_v44  ;;  %v4318_v0 = vcombine.low %v8744_v22, %v8745_v13  ;;  %v1126_v23 = vunpack.i.h.s16 %v10728_v24 }
 0x221   : > { %v4285_v63 = vpack.i.b16 %v12620_v60, %v4217_v53  ;;  %v3114_v2 = vrot.slane %v3100_v27, %v10591_v28  ;;  %v1608_v30 = vrot.slane %v1594_v18, %v10591_v28  ;;  %v4348_v38 = vrot.slane %v4320_v11, %v10591_v28 }
 0x222   : > { %v8660_v46 = vpack.i.b16 %v10685_v47, %v1112_v62  ;;  %v4327_v21 = vrot.slane %v4317_v58, %v10591_v28  ;;  %v4334_v41 = vrot.slane %v4318_v0, %v10591_v28  ;;  %v8661_v48 = vpack.i.b16 %v10720_v17, %v10708_v9 }
 0x223   : > { %v4319_v31 = vcombine.low %v4285_v63, %v10673_v40  ;;  %v3115_v39 = vcombine.low %v3107_v33, %v3114_v2  ;;  %v1609_v19 = vcombine.low %v1601_v54, %v1608_v30  ;;  %v12621_v57 = vunpack.i.h.s16 %v10720_v17 }
 0x224   : > { %v8663_v40 = vpack.i.b16 %v10733_v25, %v1126_v23  ;;  %v4349_v47 = vcombine.low %v4327_v21, %v4334_v41  ;;  %v1610_v33 = vcombine.low %v8660_v46, %v10705_v8  ;;  %v1611_v36 = vcombine.low %v10712_v12, %v10717_v16  ;;  %v12625_v21 = vld [vmem:[#allocation43_spill] sm:$0xff] }
 0x225   : > { %v4341_v59 = vrot.slane %v4319_v31, %v10591_v28  ;;  %v8662_v43 = vpack.i.b16 %v10728_v24, %v12621_v57  ;;  %v3122_v6 = vrot.slane %v3115_v39, %v10591_v28  ;;  %9029 = vmatmul.mubr.msk.bf16.vlgmr.msra.gmra.mrb[0].mxu0 %vm1425_vm7, %v1609_v19  ;;  %v1612_v42 = vcombine.low %v10725_v20, %v8661_v48  ;;  %v12624_v39 = vld [vmem:[#allocation42_spill] sm:$0xff] }
 0x226   : > { %v3955_v17 = vcombine.high %v10763_v4, %v10763_v4  ;;  %9093 = vmatpush3.bf16.msra.mxu0 %v5975_v5  ;;  %v4357_v24 = vrot.slane %v4349_v47, %v10591_v28  ;;  %v1620_v54 = vrot.slane %v1610_v33, %v10591_v28  ;;  %v1627_v8 = vrot.slane %v1611_v36, %v10591_v28 }
 0x227   : > { %v4350_v9 = vcombine.low %v4341_v59, %v4348_v38  ;;  %v1613_v10 = vcombine.low %v8662_v43, %v8663_v40  ;;  %9067 = vmatmul.mubr.msk.bf16.gmra.mrb[16].mxu1 %vm1425_vm7, %v3122_v6  ;;  %v4227_v12 = vunpack.i.h.s16 %v10768_v7  ;;  %9032 = vmatprep.mubr.msk.bf16.mxu0 %vm10041_vm1, %v12606_v55  ;;  %v1634_v20 = vrot.slane %v1612_v42, %v10591_v28  ;;  %v12627_v59 = vld [vmem:[#allocation44_spill] sm:$0xff]  ;;  %v12628_v43 = vld [vmem:[#allocation39_spill] sm:$0xff]  ;;  %v12629_v40 = vld [vmem:[#allocation41_spill] sm:$0xff] }
 0x228   : > { %9072 = vmatprep.mubr.msk.bf16.mxu1 %vm10041_vm1, %v12606_v55  ;;  %v4229_v5 = vunpack.i.h.s16 %v3955_v17  ;;  %v1642_v53 = vcombine.low %v1620_v54, %v1627_v8  ;;  %v3956_v56 = vcombine.high %v10768_v7, %v10768_v7  ;;  %v4233_v27 = vunpack.i.h.s16 %v10772_v14  ;;  %9140 = vmatprep.subr.bf16.mxu0 %v12606_v55  ;;  %v12630_v6 = vld [vmem:[#allocation40_spill] sm:$0xff]  ;;  %v12631_v42 = vld [vmem:[#allocation47_spill] sm:$0xff]  ;;  %v12632_v8 = vld [vmem:[#allocation49_spill] sm:$0xff] }
 0x229   : > { %v4364_v16 = vrot.slane %v4350_v9, %v10591_v28  ;;  %v1641_v4 = vrot.slane %v1613_v10, %v10591_v28  ;;  %v4235_v44 = vunpack.i.h.s16 %v10775_v29  ;;  %v8746_v18 = vpack.i.b16 %v3955_v17, %v4227_v12 }
 0x22a   : > { %v8758_v60 = vcombine.high %v10778_v32, %v10783_v15  ;;  %v1650_v63 = vrot.slane %v1642_v53, %v10591_v28  ;;  %v4231_v11 = vunpack.i.h.s16 %v3956_v56  ;;  %v8747_v62 = vpack.i.b16 %v3956_v56, %v4229_v5  ;;  %v12623_v32 = vld [vmem:[#allocation38_spill] sm:$0xff] }
 0x22b   : > { %v4365_v22 = vcombine.low %v4357_v24, %v4364_v16  ;;  %v1643_v13 = vcombine.low %v1634_v20, %v1641_v4  ;;  %v8749_v2 = vpack.i.b16 %v10775_v29, %v4233_v27  ;;  %v12622_v58 = vunpack.i.h.s16 %v10783_v15  ;;  %v12633_v5 = vld [vmem:[#allocation50_spill] sm:$0xff] }
 0x22c   : > { %v4366_v23 = vcombine.low %v10760_v3, %v8746_v18  ;;  %v4397_v30 = vrot.slane %v8758_v60, %v10591_v28  ;;  %v8748_v31 = vpack.i.b16 %v10772_v14, %v4231_v11  ;;  %v1128_v38 = vunpack.i.h.s16 %v10733_v25 }
 0x22d   : > { %v1657_v7 = vrot.slane %v1643_v13, %v10591_v28  ;;  %v4294_v0 = vpack.i.b16 %v12622_v58, %v4235_v44  ;;  %v1130_v46 = vunpack.i.h.s16 %v12623_v32  ;;  %v8666_v41 = vpack.i.b16 %v12625_v21, %v12624_v39  ;;  %v12634_v44 = vld [vmem:[#allocation48_spill] sm:$0xff]  ;;  %v12635_v13 = vld [vmem:[#allocation51_spill] sm:$0xff] }
 0x22e   : > { %v4376_v19 = vrot.slane %v4366_v23, %v10591_v28  ;;  %v12626_v15 = vunpack.i.h.s16 %v12625_v21  ;;  %v4367_v3 = vcombine.low %v8747_v62, %v8748_v31  ;;  %v8664_v14 = vpack.i.b16 %v12623_v32, %v1128_v38  ;;  %v12637_v38 = vld [vmem:[#allocation46_spill] sm:$0xff]  ;;  %v12638_v32 = vld [vmem:[#allocation45_spill] sm:$0xff] }
 0x22f   : > { %v1658_v48 = vcombine.low %v1650_v63, %v1657_v7  ;;  %v4368_v29 = vcombine.low %v8749_v2, %v4294_v0  ;;  %9073 = vmatmul.mubr.msk.bf16.vlgmr.msra.gmra.mrb[20].mxu1 %vm1425_vm7, %v4365_v22  ;;  %v8665_v25 = vpack.i.b16 %v12628_v43, %v1130_v46  ;;  %v1660_v47 = vcombine.low %v12630_v6, %v12629_v40 }
 0x230   : > { %v8667_v57 = vpack.i.b16 %v12627_v59, %v12626_v15  ;;  %9076 = vmatprep.mubr.msk.bf16.mxu1 %vm10041_vm1, %v12606_v55  ;;  %v8677_v36 = vcombine.high %v12630_v6, %v12629_v40  ;;  %v4245_v10 = vunpack.i.h.s16 %v12631_v42  ;;  %v4383_v17 = vrot.slane %v4367_v3, %v10591_v28 }
 0x231   : > { %9033 = vmatmul.mubr.msk.bf16.gmra.mrb[4].mxu0 %vm1425_vm7, %v1658_v48  ;;  %v4390_v33 = vrot.slane %v4368_v29, %v10591_v28  ;;  %v1659_v24 = vcombine.low %v8664_v14, %v8665_v25  ;;  %v1676_v54 = vrot.slane %v1660_v47, %v10591_v28  ;;  %v4247_v12 = vunpack.i.h.s16 %v12632_v8 }
 0x232   : > { %v1662_v9 = vcombine.low %v8666_v41, %v8667_v57  ;;  %9036 = vmatprep.mubr.msk.bf16.mxu0 %vm10041_vm1, %v12606_v55  ;;  %v1683_v20 = vrot.slane %v8677_v36, %v10591_v28  ;;  %v4249_v53 = vunpack.i.h.s16 %v12633_v5  ;;  %v4398_v56 = vcombine.low %v4376_v19, %v4383_v17 }
 0x233   : > { %v4399_v16 = vcombine.low %v4390_v33, %v4397_v30  ;;  %v1669_v27 = vrot.slane %v1659_v24, %v10591_v28  ;;  %v4251_v22 = vunpack.i.h.s16 %v12634_v44  ;;  %v4253_v18 = vunpack.i.h.s16 %v12635_v13 }
 0x234   : > { %v1690_v4 = vrot.slane %v1662_v9, %v10591_v28  ;;  %v8750_v11 = vpack.i.b16 %v12632_v8, %v4245_v10  ;;  %v8751_v62 = vpack.i.b16 %v12633_v5, %v4247_v12  ;;  %v4406_v2 = vrot.slane %v4398_v56, %v10591_v28  ;;  %v12639_v9 = vld [vmem:[#allocation54_spill] sm:$0xff]  ;;  %v12642_v12 = vld [vmem:[#allocation55_spill] sm:$0xff] }
 0x235   : > { %v4413_v60 = vrot.slane %v4399_v16, %v10591_v28  ;;  %v1691_v7 = vcombine.low %v1669_v27, %v1676_v54  ;;  %v8752_v58 = vpack.i.b16 %v12634_v44, %v4249_v53  ;;  %v8753_v0 = vpack.i.b16 %v12635_v13, %v4251_v22  ;;  %v12640_v10 = vld [vmem:[#allocation58_spill] sm:$0xff]  ;;  %v12641_v54 = vld [vmem:[#allocation52_spill] sm:$0xff]  ;;  %v12643_v53 = vld [vmem:[#allocation53_spill] sm:$0xff] }
 0x236   : > { %v1692_v63 = vcombine.low %v1683_v20, %v1690_v4  ;;  %v12636_v30 = vunpack.i.h.s16 %v10893_v50  ;;  %v4415_v46 = vcombine.low %v12638_v32, %v12637_v38  ;;  %v4416_v39 = vcombine.low %v8750_v11, %v8751_v62  ;;  %v12646_v32 = vld [vmem:[#allocation57_spill] sm:$0xff] }
 0x237   : > { %v4414_v41 = vcombine.low %v4406_v2, %v4413_v60  ;;  %v1699_v48 = vrot.slane %v1691_v7, %v10591_v28  ;;  %v4417_v29 = vcombine.low %v8752_v58, %v8753_v0  ;;  %v1005_v19 = vcombine.high %v12625_v21, %v12625_v21  ;;  %v12644_v60 = vld [vmem:[#allocation59_spill] sm:$0xff] }
 0x238   : > { %v1706_v23 = vrot.slane %v1692_v63, %v10591_v28  ;;  %v4303_v31 = vpack.i.b16 %v12636_v30, %v4253_v18  ;;  %v4425_v57 = vrot.slane %v4415_v46, %v10591_v28  ;;  %v4432_v3 = vrot.slane %v4416_v39, %v10591_v28  ;;  %v12647_v46 = vld [vmem:[#allocation56_spill] sm:$0xff] }
 0x239   : > { %v1006_v50 = vcombine.high %v12627_v59, %v12627_v59  ;;  %9077 = vmatmul.mubr.msk.bf16.gmra.mrb[24].mxu1 %vm1425_vm7, %v4414_v41  ;;  %v4439_v43 = vrot.slane %v4417_v29, %v10591_v28  ;;  %v1144_v25 = vunpack.i.h.s16 %v12627_v59  ;;  %v1146_v40 = vunpack.i.h.s16 %v1005_v19  ;;  %v12648_v29 = vld [vmem:[#allocation61_spill] sm:$0xff] }
 0x23a   : > { %v4418_v15 = vcombine.low %v4303_v31, %v10895_v1  ;;  %v1707_v14 = vcombine.low %v1699_v48, %v1706_v23  ;;  %9080 = vmatprep.mubr.msk.bf16.mxu1 %vm10041_vm1, %v12606_v55  ;;  %v4447_v21 = vcombine.low %v4425_v57, %v4432_v3  ;;  %v8671_v47 = vpack.i.b16 %v10915_v61, %v10911_v37 }
 0x23b   : > { %v1148_v6 = vunpack.i.h.s16 %v1006_v50  ;;  %v8668_v33 = vpack.i.b16 %v1005_v19, %v1144_v25  ;;  %v8669_v36 = vpack.i.b16 %v1006_v50, %v1146_v40  ;;  %v1710_v42 = vcombine.low %v12639_v9, %v10933_v52 }
 0x23c   : > { %v4446_v1 = vrot.slane %v4418_v15, %v10591_v28  ;;  %9037 = vmatmul.mubr.msk.bf16.gmra.mrb[8].mxu0 %vm1425_vm7, %v1707_v14  ;;  %v4139_v59 = vcombine.high %v12640_v10, %v12640_v10  ;;  %v4455_v24 = vrot.slane %v4447_v21, %v10591_v28  ;;  %v1711_v37 = vcombine.low %v12642_v12, %v8671_v47  ;;  %v12649_v15 = vld [vmem:[#allocation60_spill] sm:$0xff]  ;;  %v8765_v47 = vld.sshfl [vmem:[#allocation2] sm:$0x22 pattern:$0x75316420] }
 0x23d   : > { %9040 = vmatprep.mubr.msk.bf16.mxu0 %vm10041_vm1, %v12606_v55  ;;  %v8670_v8 = vpack.i.b16 %v12641_v54, %v1148_v6  ;;  %v1708_v16 = vcombine.low %v8668_v33, %v8669_v36  ;;  %v1732_v20 = vrot.slane %v1710_v42, %v10591_v28  ;;  %v4140_v4 = vcombine.high %v10972_v26, %v10972_v26  ;;  %v12652_v42 = vld [vmem:[#allocation62_spill] sm:$0xff] }
 0x23e   : > { %v4448_v17 = vcombine.low %v4439_v43, %v4446_v1  ;;  %v4263_v52 = vunpack.i.h.s16 %v10972_v26  ;;  %v1739_v27 = vrot.slane %v1711_v37, %v10591_v28  ;;  %v4265_v44 = vunpack.i.h.s16 %v4139_v59  ;;  %v12650_v43 = vld [vmem:[#allocation63_spill] sm:$0xff] }
 0x23f   : > { %v1709_v56 = vcombine.low %v8670_v8, %v12643_v53  ;;  %v1718_v22 = vrot.slane %v1708_v16, %v10591_v28  ;;  %v4267_v13 = vunpack.i.h.s16 %v4140_v4  ;;  %v4269_v18 = vunpack.i.h.s16 %v10976_v34  ;;  %v8767_v16 = vld.sshfl [vmem:[#allocation2 + $0x8] sm:$0x22 pattern:$0x75316420] }
 0x240   : > { %v4462_v5 = vrot.slane %v4448_v17, %v10591_v28  ;;  %v4271_v63 = vunpack.i.h.s16 %v12644_v60  ;;  %v1741_v2 = vcombine.low %v1732_v20, %v1739_v27  ;;  %v8754_v7 = vpack.i.b16 %v4139_v59, %v4263_v52 }
 0x241   : > { %v1725_v62 = vrot.slane %v1709_v56, %v10591_v28  ;;  %v8755_v26 = vpack.i.b16 %v4140_v4, %v4265_v44  ;;  %v8756_v58 = vpack.i.b16 %v10976_v34, %v4267_v13  ;;  %v8757_v0 = vpack.i.b16 %v12644_v60, %v4269_v18 }
 0x242   : > { %v4463_v11 = vcombine.low %v4455_v24, %v4462_v5  ;;  %v12645_v23 = vunpack.i.h.s16 %v10979_v35  ;;  %v1755_v38 = vrot.slane %v1741_v2, %v10591_v28  ;;  %v4464_v39 = vcombine.low %v12647_v46, %v12646_v32  ;;  %v12653_v24 = vld [vmem:[#allocation64_spill] sm:$0xff] }
 0x243   : > { %v1740_v31 = vcombine.low %v1718_v22, %v1725_v62  ;;  %v4465_v41 = vcombine.low %v10968_v49, %v8754_v7  ;;  %v4466_v48 = vcombine.low %v8755_v26, %v8756_v58  ;;  %v1162_v19 = vunpack.i.h.s16 %v12648_v29 }
 0x244   : > { %v4312_v30 = vpack.i.b16 %v12645_v23, %v4271_v63  ;;  %9081 = vmatmul.mubr.msk.bf16.gmra.mrb[28].mxu1 %vm1425_vm7, %v4463_v11  ;;  %v1164_v57 = vunpack.i.h.s16 %v12649_v15  ;;  %v4474_v50 = vrot.slane %v4464_v39, %v10591_v28  ;;  %v1166_v25 = vunpack.i.h.s16 %v12650_v43  ;;  %v8769_v23 = vld.sshfl [vmem:[#allocation2 + $0x10] sm:$0x22 pattern:$0x75316420] }
 0x245   : > { %9084 = vmatprep.mubr.msk.bf16.mxu1 %vm10041_vm1, %v12606_v55  ;;  %v1748_v3 = vrot.slane %v1740_v31, %v10591_v28  ;;  %v4481_v14 = vrot.slane %v4465_v41, %v10591_v28  ;;  %v4488_v40 = vrot.slane %v4466_v48, %v10591_v28  ;;  %v12651_v1 = vunpack.i.h.s16 %v10915_v61  ;;  %v8766_v61 = vld.sshfl [vmem:[#allocation2 + $0x4] sm:$0x13 pattern:$0x75316420] }
 0x246   : > { %v4467_v34 = vcombine.low %v8757_v0, %v4312_v30  ;;  %v8673_v6 = vpack.i.b16 %v12649_v15, %v1162_v19  ;;  %v8674_v9 = vpack.i.b16 %v12650_v43, %v1164_v57  ;;  %v8675_v10 = vpack.i.b16 %v12652_v42, %v1166_v25  ;;  %v8771_v15 = vld.sshfl [vmem:[#allocation2 + $0x18] sm:$0x22 pattern:$0x75316420] }
 0x247   : > { %v8672_v21 = vpack.i.b16 %v12648_v29, %v12651_v1  ;;  %v1756_v33 = vcombine.low %v1748_v3, %v1755_v38  ;;  %v4496_v36 = vcombine.low %v4474_v50, %v4481_v14  ;;  %v8759_v54 = vcombine.high %v12653_v24, %v10979_v35  ;;  %v8773_v24 = vld.sshfl [vmem:[#allocation2 + $0x20] sm:$0x22 pattern:$0x75316420] }
 0x248   : > { %v4495_v49 = vrot.slane %v4467_v34, %v10591_v28  ;;  %v4514_v8 = vcombine.low %v11059_v45, %v11066_v51  ;;  %v1758_v37 = vcombine.low %v8674_v9, %v8675_v10  ;;  %v5262_v20 = vcombine.high %v8765_v47, %v8765_v47  ;;  %v8768_v51 = vld.sshfl [vmem:[#allocation2 + $0xc] sm:$0x13 pattern:$0x75316420] }
 0x249   : > { %v1757_v17 = vcombine.low %v8672_v21, %v8673_v6  ;;  %9041 = vmatmul.mubr.msk.bf16.gmra.mrb[12].mxu0 %vm1425_vm7, %v1756_v33  ;;  %v4504_v12 = vrot.slane %v4496_v36, %v10591_v28  ;;  %v5269_v4 = vrot.slane %v8765_v47, %v10591_v28  ;;  %v4521_v5 = vrot.slane %v8759_v54, %v10591_v28  ;;  %v8770_v34 = vld.sshfl [vmem:[#allocation2 + $0x14] sm:$0x13 pattern:$0x75316420] }
 0x24a   : > { %v4497_v59 = vcombine.low %v4488_v40, %v4495_v49  ;;  %9044 = vmatprep.mubr.msk.bf16.mxu0 %vm10041_vm1, %v12606_v55  ;;  %v4528_v45 = vrot.slane %v4514_v8, %v10591_v28  ;;  %v1772_v53 = vrot.slane %v1758_v37, %v10591_v28  ;;  %v5276_v56 = vrot.slane %v5262_v20, %v10591_v28  ;;  %v8772_v33 = vld.sshfl [vmem:[#allocation2 + $0x1c] sm:$0x13 pattern:$0x75316420] }
 0x24b   : > { %v1765_v35 = vrot.slane %v1757_v17, %v10591_v28  ;;  %v5286_v27 = vcombine.high %v8766_v61, %v8766_v61  ;;  %v5293_v44 = vrot.slane %v8766_v61, %v10591_v28  ;;  %v5309_v18 = vcombine.high %v8767_v16, %v8767_v16 }
 0x24c   : > { %v4511_v52 = vrot.slane %v4497_v59, %v10591_v28  ;;  %v4529_v13 = vcombine.low %v4521_v5, %v4528_v45  ;;  %v5316_v60 = vrot.slane %v8767_v16, %v10591_v28  ;;  %v5333_v2 = vcombine.high %v8768_v51, %v8768_v51 }
 0x24d   : > { %v1773_v63 = vcombine.low %v1765_v35, %v1772_v53  ;;  %v5300_v11 = vrot.slane %v5286_v27, %v10591_v28  ;;  %v5301_v62 = vcombine.high %v5293_v44, %v5293_v44  ;;  %v5323_v26 = vrot.slane %v5309_v18, %v10591_v28 }
 0x24e   : > { %v4512_v22 = vcombine.low %v4504_v12, %v4511_v52  ;;  %v4536_v7 = vrot.slane %v4529_v13, %v10591_v28  ;;  %v5324_v58 = vcombine.high %v5316_v60, %v5316_v60  ;;  %v5340_v0 = vrot.slane %v8768_v51, %v10591_v28 }
 0x24f   : > { %v1780_v30 = vrot.slane %v1773_v63, %v10591_v28  ;;  %v5347_v31 = vrot.slane %v5333_v2, %v10591_v28  ;;  %v8801_v38 = vcombine.high %v5269_v4, %v5276_v56  ;;  %v5740_v32 = vcombine.low %v5293_v44, %v5300_v11  ;;  %v8774_v56 = vld.sshfl [vmem:[#allocation2 + $0x24] sm:$0x13 pattern:$0x75316420] }
 0x250   : > { %9085 = vmatmul.mubr.msk.bf16.gmra.mrb[32].mxu1 %vm1425_vm7, %v4512_v22  ;;  %v5325_v46 = vcombine.high %v5323_v26, %v5323_v26  ;;  %v5641_v39 = vunpack.i.h.s16 %v5324_v58  ;;  %v5645_v41 = vunpack.i.h.s16 %v5340_v0  ;;  %v8781_v48 = vpack.i.b16 %v5324_v58, %v5301_v62  ;;  %v8775_v63 = vld.sshfl [vmem:[#allocation2 + $0x28] sm:$0x22 pattern:$0x75316420] }
 0x251   : > { %9088 = vmatprep.mubr.msk.bf16.mxu1 %vm10041_vm1, %v12606_v55  ;;  %9045 = vmatmul.mubr.msk.bf16.gmra.mrb[16].mxu0 %vm1425_vm7, %v1780_v30  ;;  %v5749_v29 = vrot.slane %v8801_v38, %v10591_v28  ;;  %v5756_v19 = vrot.slane %v5740_v32, %v10591_v28  ;;  %v5348_v57 = vcombine.high %v5340_v0, %v5340_v0  ;;  %v5647_v16 = vunpack.i.h.s16 %v5347_v31 }
 0x252   : > { %v5356_v3 = vcombine.high %v8769_v23, %v8769_v23  ;;  %9094 = vmatprep.mubr.msk.bf16.mxu0 %vm10041_vm1, %v12606_v55  ;;  %v5643_v50 = vunpack.i.h.s16 %v5325_v46  ;;  %v8782_v14 = vpack.i.b16 %v5325_v46, %v5641_v39  ;;  %v8784_v43 = vpack.i.b16 %v5347_v31, %v5645_v41 }
 0x253   : > { %v5363_v25 = vrot.slane %v8769_v23, %v10591_v28  ;;  %v5771_v40 = vcombine.low %v5749_v29, %v5756_v19  ;;  %v5380_v1 = vcombine.high %v8770_v34, %v8770_v34  ;;  %v5387_v21 = vrot.slane %v8770_v34, %v10591_v28 }
 0x254   : > { %v5370_v49 = vrot.slane %v5356_v3, %v10591_v28  ;;  %v8783_v6 = vpack.i.b16 %v5340_v0, %v5643_v50  ;;  %v5741_v47 = vcombine.low %v8781_v48, %v8782_v14  ;;  %v5403_v9 = vcombine.high %v8771_v15, %v8771_v15 }
 0x255   : > { %v5371_v36 = vcombine.high %v5363_v25, %v5363_v25  ;;  %v5779_v42 = vrot.slane %v5771_v40, %v10591_v28  ;;  %v5394_v59 = vrot.slane %v5380_v1, %v10591_v28  ;;  %v5395_v17 = vcombine.high %v5387_v21, %v5387_v21 }
 0x256   : > { %v5372_v10 = vcombine.high %v5370_v49, %v5370_v49  ;;  %v5742_v54 = vcombine.low %v8783_v6, %v8784_v43  ;;  %v5763_v8 = vrot.slane %v5741_v47, %v10591_v28  ;;  %v5410_v61 = vrot.slane %v8771_v15, %v10591_v28  ;;  %v8776_v43 = vld.sshfl [vmem:[#allocation2 + $0x2c] sm:$0x13 pattern:$0x75316420] }
 0x257   : > { %v5417_v12 = vrot.slane %v5403_v9, %v10591_v28  ;;  %v5434_v37 = vrot.slane %v8772_v33, %v10591_v28  ;;  %v5427_v4 = vcombine.high %v8772_v33, %v8772_v33  ;;  %v5450_v45 = vcombine.high %v8773_v24, %v8773_v24 }
 0x258   : > { %9089 = vmatmul.mubr.msk.bf16.gmra.mrb[36].mxu1 %vm1425_vm7, %v4536_v7  ;;  %v5789_v20 = vcombine.low %v5372_v10, %v5387_v21  ;;  %v5770_v52 = vrot.slane %v5742_v54, %v10591_v28  ;;  %v5418_v35 = vcombine.high %v5410_v61, %v5410_v61  ;;  %v8785_v51 = vpack.i.b16 %v5348_v57, %v5647_v16  ;;  %v8777_v21 = vld.sshfl [vmem:[#allocation2 + $0x30] sm:$0x22 pattern:$0x75316420] }
 0x259   : > { %9130 = vmatprep.mubr.msk.bf16.mxu1 %vm10041_vm1, %v12606_v55  ;;  %v5419_v5 = vcombine.high %v5417_v12, %v5417_v12  ;;  %v5441_v27 = vrot.slane %v5427_v4, %v10591_v28  ;;  %v5442_v44 = vcombine.high %v5434_v37, %v5434_v37  ;;  %v5457_v62 = vrot.slane %v8773_v24, %v10591_v28  ;;  %v8779_v10 = vld.sshfl [vmem:[#allocation2 + $0x38] sm:$0x22 pattern:$0x75316420] }
 0x25a   : > { %v5805_v53 = vrot.slane %v5789_v20, %v10591_v28  ;;  %v5772_v22 = vcombine.low %v5763_v8, %v5770_v52  ;;  %v5659_v13 = vunpack.i.h.s16 %v5418_v35  ;;  %v8786_v60 = vpack.i.b16 %v5418_v35, %v5395_v17  ;;  %v8778_v61 = vld.sshfl [vmem:[#allocation2 + $0x34] sm:$0x13 pattern:$0x75316420] }
 0x25b   : > { %v5661_v18 = vunpack.i.h.s16 %v5419_v5  ;;  %v5788_v11 = vcombine.low %v8785_v51, %v5371_v36  ;;  %v5464_v2 = vrot.slane %v5450_v45, %v10591_v28  ;;  %v5474_v7 = vcombine.high %v8774_v56, %v8774_v56 }
 0x25c   : > { %v5786_v26 = vrot.slane %v5772_v22, %v10591_v28  ;;  %v8787_v58 = vpack.i.b16 %v5419_v5, %v5659_v13  ;;  %v5790_v23 = vcombine.low %v5394_v59, %v8786_v60  ;;  %v5481_v31 = vrot.slane %v8774_v56, %v10591_v28 }
 0x25d   : > { %v8788_v0 = vpack.i.b16 %v5434_v37, %v5661_v18  ;;  %v5798_v30 = vrot.slane %v5788_v11, %v10591_v28  ;;  %v5488_v38 = vrot.slane %v5474_v7, %v10591_v28  ;;  %v5497_v32 = vcombine.high %v8775_v63, %v8775_v63 }
 0x25e   : > { %v5787_v46 = vcombine.low %v5779_v42, %v5786_v26  ;;  %v5812_v41 = vrot.slane %v5790_v23, %v10591_v28  ;;  %v5504_v48 = vrot.slane %v8775_v63, %v10591_v28  ;;  %v5489_v29 = vcombine.high %v5481_v31, %v5481_v31 }
 0x25f   : > { %v5791_v39 = vcombine.low %v8787_v58, %v8788_v0  ;;  %v5820_v34 = vcombine.low %v5798_v30, %v5805_v53  ;;  %v5511_v19 = vrot.slane %v5497_v32, %v10591_v28  ;;  %v5663_v15 = vunpack.i.h.s16 %v5434_v37 }
 0x260   : > { %9095 = vmatmul.mubr.msk.bf16.vlgmr.msra.gmra.mrb[20].mxu0 %vm1425_vm7, %v5787_v46  ;;  %v5512_v3 = vcombine.high %v5504_v48, %v5504_v48  ;;  %v5665_v50 = vunpack.i.h.s16 %v5441_v27  ;;  %v8802_v14 = vcombine.high %v5457_v62, %v5464_v2  ;;  %v5839_v1 = vcombine.low %v5481_v31, %v5488_v38  ;;  %v8780_v2 = vld.sshfl [vmem:[#allocation2 + $0x3c] sm:$0x13 pattern:$0x75316420] }
 0x261   : > { %v5819_v57 = vrot.slane %v5791_v39, %v10591_v28  ;;  %9098 = vmatprep.mubr.msk.bf16.mxu0 %vm10041_vm1, %v12606_v55  ;;  %v5828_v25 = vrot.slane %v5820_v34, %v10591_v28  ;;  %v5513_v40 = vcombine.high %v5511_v19, %v5511_v19  ;;  %v8789_v49 = vpack.i.b16 %v5441_v27, %v5663_v15 }
 0x262   : > { %v5677_v47 = vunpack.i.h.s16 %v5512_v3  ;;  %v8790_v33 = vpack.i.b16 %v5442_v44, %v5665_v50  ;;  %v8791_v36 = vpack.i.b16 %v5512_v3, %v5489_v29  ;;  %v5854_v9 = vrot.slane %v8802_v14, %v10591_v28 }
 0x263   : > { %v5821_v6 = vcombine.low %v5812_v41, %v5819_v57  ;;  %v5861_v42 = vrot.slane %v5839_v1, %v10591_v28  ;;  %v5521_v59 = vcombine.high %v8776_v43, %v8776_v43  ;;  %v5528_v17 = vrot.slane %v8776_v43, %v10591_v28 }
 0x264   : > { %v8792_v54 = vpack.i.b16 %v5513_v40, %v5677_v47  ;;  %v5837_v8 = vcombine.low %v8789_v49, %v8790_v33  ;;  %v5544_v12 = vcombine.high %v8777_v21, %v8777_v21  ;;  %v5551_v20 = vrot.slane %v8777_v21, %v10591_v28 }
 0x265   : > { %v5835_v24 = vrot.slane %v5821_v6, %v10591_v28  ;;  %v5535_v37 = vrot.slane %v5521_v59, %v10591_v28  ;;  %v5536_v16 = vcombine.high %v5528_v17, %v5528_v17  ;;  %v5568_v4 = vcombine.high %v8778_v61, %v8778_v61 }
 0x266   : > { %v5840_v35 = vcombine.low %v8791_v36, %v8792_v54  ;;  %v5847_v5 = vrot.slane %v5837_v8, %v10591_v28  ;;  %v5558_v45 = vrot.slane %v5544_v12, %v10591_v28  ;;  %v5559_v51 = vcombine.high %v5551_v20, %v5551_v20 }
 0x267   : > { %v5836_v52 = vcombine.low %v5828_v25, %v5835_v24  ;;  %v5575_v53 = vrot.slane %v8778_v61, %v10591_v28  ;;  %v5582_v56 = vrot.slane %v5568_v4, %v10591_v28  ;;  %v5598_v27 = vrot.slane %v8779_v10, %v10591_v28 }
 0x268   : > { %v5868_v44 = vrot.slane %v5840_v35, %v10591_v28  ;;  %v5869_v22 = vcombine.low %v5847_v5, %v5854_v9  ;;  %v5560_v13 = vcombine.high %v5558_v45, %v5558_v45  ;;  %v5679_v18 = vunpack.i.h.s16 %v5513_v40 }
 0x269   : > { %9099 = vmatmul.mubr.msk.bf16.gmra.mrb[24].mxu0 %vm1425_vm7, %v5836_v52  ;;  %v5583_v60 = vcombine.high %v5575_v53, %v5575_v53  ;;  %v5606_v63 = vcombine.high %v5598_v27, %v5598_v27  ;;  %v5681_v11 = vunpack.i.h.s16 %v5528_v17  ;;  %v5683_v62 = vunpack.i.h.s16 %v5535_v37 }
 0x26a   : > { %9102 = vmatprep.mubr.msk.bf16.mxu0 %vm10041_vm1, %v12606_v55  ;;  %v5870_v7 = vcombine.low %v5861_v42, %v5868_v44  ;;  %v5877_v26 = vrot.slane %v5869_v22, %v10591_v28  ;;  %v8793_v58 = vpack.i.b16 %v5528_v17, %v5679_v18  ;;  %v5888_v0 = vcombine.low %v5560_v13, %v5575_v53 }
 0x26b   : > { %v8794_v23 = vpack.i.b16 %v5535_v37, %v5681_v11  ;;  %v8795_v30 = vpack.i.b16 %v5536_v16, %v5683_v62  ;;  %v8796_v31 = vpack.i.b16 %v5606_v63, %v5583_v60  ;;  %v5591_v38 = vcombine.high %v8779_v10, %v8779_v10 }
 0x26c   : > { %v5884_v32 = vrot.slane %v5870_v7, %v10591_v28  ;;  %v5910_v46 = vrot.slane %v5888_v0, %v10591_v28  ;;  %v5615_v39 = vcombine.high %v8780_v2, %v8780_v2  ;;  %v5622_v41 = vrot.slane %v8780_v2, %v10591_v28 }
 0x26d   : > { %v5886_v48 = vcombine.low %v8793_v58, %v8794_v23  ;;  %v5887_v34 = vcombine.low %v8795_v30, %v5559_v51  ;;  %v5889_v29 = vcombine.low %v5582_v56, %v8796_v31  ;;  %v5605_v19 = vrot.slane %v5591_v38, %v10591_v28 }
 0x26e   : > { %v5885_v15 = vcombine.low %v5877_v26, %v5884_v32  ;;  %v5629_v57 = vrot.slane %v5615_v39, %v10591_v28  ;;  %v5630_v3 = vcombine.high %v5622_v41, %v5622_v41  ;;  %v5695_v50 = vunpack.i.h.s16 %v5606_v63 }
 0x26f   : > { %v5896_v14 = vrot.slane %v5886_v48, %v10591_v28  ;;  %v5903_v43 = vrot.slane %v5887_v34, %v10591_v28  ;;  %v5917_v25 = vrot.slane %v5889_v29, %v10591_v28  ;;  %v5607_v40 = vcombine.high %v5605_v19, %v5605_v19 }
 0x270   : > { %v5699_v49 = vunpack.i.h.s16 %v5622_v41  ;;  %v5701_v1 = vunpack.i.h.s16 %v5629_v57  ;;  %vm7266_vm12 = vcmask 125953   ;;  %vm7246_vm13 = vcmask 1046534  }
 0x271   : > { %9103 = vmatmul.mubr.msk.bf16.gmra.mrb[28].mxu0 %vm1425_vm7, %v5885_v15  ;;  %v5918_v21 = vcombine.low %v5896_v14, %v5903_v43  ;;  %v5919_v6 = vcombine.low %v5910_v46, %v5917_v25  ;;  %v5697_v47 = vunpack.i.h.s16 %v5607_v40  ;;  %v8797_v33 = vpack.i.b16 %v5607_v40, %v5695_v50 }
 0x272   : > { %9106 = vmatprep.mubr.msk.bf16.mxu0 %vm10041_vm1, %v12606_v55  ;;  %v8799_v36 = vpack.i.b16 %v5629_v57, %v5699_v49  ;;  %v8800_v9 = vpack.i.b16 %v5630_v3, %v5701_v1  ;;  %vm682_vm14 = vcmask 124929   ;;  %vm688_vm0 = vcmask 1042433  }
 0x273   : > { %v5926_v42 = vrot.slane %v5918_v21, %v10591_v28  ;;  %v5933_v10 = vrot.slane %v5919_v6, %v10591_v28  ;;  %v8798_v59 = vpack.i.b16 %v5622_v41, %v5697_v47  ;;  %vm683_vm15 = vmand %vm682_vm14, %vm654_vm3  ;;  %vm7249_vm4 = vcmask 1047559  }
 0x274   : > { %v5936_v17 = vcombine.low %v8799_v36, %v8800_v9  ;;  %vm689_vm2 = vmand %vm688_vm0, %vm654_vm3  ;;  %vm7252_vm3 = vcmask 1041409   ;;  %vm7397_vm5 = vcmask 130048  }
 0x275   : > { %v5934_v24 = vcombine.low %v5926_v42, %v5933_v10  ;;  %v5935_v54 = vcombine.low %v8797_v33, %v8798_v59 }
 0x276   : > { %v5950_v8 = vrot.slane %v5936_v17, %v10591_v28 }
 0x277   : > { %v5943_v61 = vrot.slane %v5935_v54, %v10591_v28 }
 0x279   : > { %9107 = vmatmul.mubr.msk.bf16.gmra.mrb[32].mxu0 %vm1425_vm7, %v5934_v24  ;;  %v5951_v12 = vcombine.low %v5943_v61, %v5950_v8 }
 0x27a   : > { %9110 = vmatprep.mubr.msk.bf16.mxu0 %vm10041_vm1, %v12606_v55 }
 0x27b   : > { %v5958_v37 = vrot.slane %v5951_v12, %v10591_v28 }
 0x281   : > { %9111 = vmatmul.mubr.msk.bf16.gmra.mrb[36].mxu0 %vm1425_vm7, %v5958_v37 }
 0x282   : > { %9156 = vmatprep.mubr.msk.bf16.mxu0 %vm10041_vm1, %v12606_v55 }
 0x2bc   : > { %v3175_v16 = vpop.f32.mrb[0].mxu1 }
 0x2bd   : > { %v9052_v20 = vpop.f32.mrb[1].mxu1  ;;  %v3222_v53 = vcombine.high %v3175_v16, %v3175_v16  ;;  %v3229_v56 = vrot.slane %v3175_v16, %v10591_v28 }
 0x2be   : > { %v3178_v4 = vpop.f32.mrb[2].mxu1 }
 0x2bf   : > { %v9053_v52 = vpop.f32.mrb[3].mxu1  ;;  %v3271_v27 = vcombine.high %v3178_v4, %v3178_v4  ;;  %v3236_v44 = vrot.slane %v3222_v53, %v10591_v28  ;;  %v3237_v22 = vcombine.high %v3229_v56, %v3229_v56  ;;  %v3278_v13 = vrot.slane %v3178_v4, %v10591_v28 }
 0x2c0   : > { %v11349_v62 = vrot.slane %v3229_v56, %v10591_v28 }
 0x2c1   : > { %v3285_v63 = vrot.slane %v3271_v27, %v10591_v28  ;;  %v3238_v26 = vcombine.high %v3236_v44, %v3236_v44  ;;  %v11353_v58 = vrot.slane %v3236_v44, %v10591_v28  ;;  %v11356_v30 = vrot.slane %v3237_v22, %v10591_v28 }
 0x2c2   : > { %v3286_v31 = vcombine.high %v3278_v13, %v3278_v13  ;;  %v11360_v46 = vrot.slane %v3278_v13, %v10591_v28  ;;  %v3267_v41 = vcombine.high %v11349_v62, %v11349_v62 }
 0x2c3   : > { %v3287_v32 = vcombine.high %v3285_v63, %v3285_v63  ;;  %v11366_v34 = vrot.slane %v3238_v26, %v10591_v28  ;;  %v3268_v29 = vcombine.high %v11353_v58, %v11353_v58  ;;  %v11371_v19 = vrot.slane %v3285_v63, %v10591_v28 }
 0x2c4   : > { %v3269_v57 = vcombine.high %v11356_v30, %v11356_v30  ;;  %v11377_v3 = vrot.slane %v3286_v31, %v10591_v28 }
 0x2c5   : > { %v11380_v43 = vrot.slane %v3287_v32, %v10591_v28  ;;  %v3270_v33 = vcombine.high %v11366_v34, %v11366_v34 }
 0x2cd   : > { %v3183_v35 = vpop.f32.mrb[4].mxu1 }
 0x2ce   : > { %v9056_v5 = vpop.f32.mrb[5].mxu1  ;;  %v3320_v18 = vcombine.high %v3183_v35, %v3183_v35  ;;  %v3327_v2 = vrot.slane %v3183_v35, %v10591_v28 }
 0x2cf   : > { %v3186_v45 = vpop.f32.mrb[6].mxu1 }
 0x2d0   : > { %v9057_v51 = vpop.f32.mrb[7].mxu1  ;;  %v3369_v0 = vcombine.high %v3186_v45, %v3186_v45  ;;  %v3334_v38 = vrot.slane %v3320_v18, %v10591_v28  ;;  %v3376_v39 = vrot.slane %v3186_v45, %v10591_v28  ;;  %v3335_v48 = vcombine.high %v3327_v2, %v3327_v2 }
 0x2d1   : > { %v11385_v1 = vrot.slane %v3327_v2, %v10591_v28 }
 0x2d2   : > { %v3383_v15 = vrot.slane %v3369_v0, %v10591_v28  ;;  %v3336_v50 = vcombine.high %v3334_v38, %v3334_v38  ;;  %v3384_v40 = vcombine.high %v3376_v39, %v3376_v39  ;;  %v11388_v21 = vrot.slane %v3334_v38, %v10591_v28 }
 0x2d3   : > { %v11391_v6 = vrot.slane %v3335_v48, %v10591_v28  ;;  %v11394_v47 = vrot.slane %v3376_v39, %v10591_v28 }
 0x2d4   : > { %v3385_v9 = vcombine.high %v3383_v15, %v3383_v15  ;;  %v11402_v10 = vrot.slane %v3336_v50, %v10591_v28  ;;  %v11405_v59 = vrot.slane %v3383_v15, %v10591_v28  ;;  %v11414_v61 = vrot.slane %v3384_v40, %v10591_v28 }
 0x2d6   : > { %v11426_v35 = vrot.slane %v3385_v9, %v10591_v28 }
 0x2df   : > { %v3191_v60 = vpop.f32.mrb[8].mxu1 }
 0x2e0   : > { %v9060_v11 = vpop.f32.mrb[9].mxu1  ;;  %v3418_v14 = vcombine.high %v3191_v60, %v3191_v60  ;;  %v3425_v42 = vrot.slane %v3191_v60, %v10591_v28 }
 0x2e1   : > { %v3194_v7 = vpop.f32.mrb[10].mxu1 }
 0x2e2   : > { %v9061_v23 = vpop.f32.mrb[11].mxu1  ;;  %v3467_v49 = vcombine.high %v3194_v7, %v3194_v7  ;;  %v3432_v17 = vrot.slane %v3418_v14, %v10591_v28  ;;  %v3474_v24 = vrot.slane %v3194_v7, %v10591_v28  ;;  %v3433_v5 = vcombine.high %v3425_v42, %v3425_v42 }
 0x2e3   : > { %v11437_v7 = vrot.slane %v3425_v42, %v10591_v28 }
 0x2e4   : > { %v3481_v12 = vrot.slane %v3467_v49, %v10591_v28  ;;  %v3434_v44 = vcombine.high %v3432_v17, %v3432_v17  ;;  %v3482_v22 = vcombine.high %v3474_v24, %v3474_v24  ;;  %v11440_v26 = vrot.slane %v3432_v17, %v10591_v28 }
 0x2e5   : > { %v11446_v38 = vrot.slane %v3433_v5, %v10591_v28  ;;  %v11449_v32 = vrot.slane %v3474_v24, %v10591_v28 }
 0x2e6   : > { %v3483_v60 = vcombine.high %v3481_v12, %v3481_v12  ;;  %v11452_v48 = vrot.slane %v3434_v44, %v10591_v28  ;;  %v11455_v15 = vrot.slane %v3481_v12, %v10591_v28  ;;  %v11458_v50 = vrot.slane %v3482_v22, %v10591_v28 }
 0x2e8   : > { %v11462_v40 = vrot.slane %v3483_v60, %v10591_v28 }
 0x2ed   : > { %v3199_v52 = vpop.f32.mrb[12].mxu1 }
 0x2ee   : > { %v3516_v45 = vcombine.high %v3199_v52, %v3199_v52  ;;  %v3523_v51 = vrot.slane %v3199_v52, %v10591_v28  ;;  %v9064_v53 = vpop.f32.mrb[13].mxu1 }
 0x2ef   : > { %v3202_v13 = vpop.f32.mrb[14].mxu1 }
 0x2f0   : > { %v3530_v63 = vrot.slane %v3516_v45, %v10591_v28  ;;  %v3565_v11 = vcombine.high %v3202_v13, %v3202_v13  ;;  %v9065_v2 = vpop.f32.mrb[15].mxu1  ;;  %v3531_v0 = vcombine.high %v3523_v51, %v3523_v51  ;;  %v3572_v23 = vrot.slane %v3202_v13, %v10591_v28 }
 0x2f1   : > { %v11465_v49 = vrot.slane %v3523_v51, %v10591_v28 }
 0x2f2   : > { %v3532_v39 = vcombine.high %v3530_v63, %v3530_v63  ;;  %v3579_v14 = vrot.slane %v3565_v11, %v10591_v28  ;;  %v11468_v9 = vrot.slane %v3530_v63, %v10591_v28  ;;  %v3580_v42 = vcombine.high %v3572_v23, %v3572_v23 }
 0x2f3   : > { %v11475_v12 = vrot.slane %v3531_v0, %v10591_v28  ;;  %v11478_v52 = vrot.slane %v3572_v23, %v10591_v28 }
 0x2f4   : > { %v11485_v51 = vrot.slane %v3532_v39, %v10591_v28  ;;  %v3581_v53 = vcombine.high %v3579_v14, %v3579_v14  ;;  %v11494_v60 = vrot.slane %v3579_v14, %v10591_v28  ;;  %v11503_v0 = vrot.slane %v3580_v42, %v10591_v28 }
 0x2f6   : > { %12654 = vst [vmem:[#allocation38_spill] sm:$0xff] %v11494_v60  ;;  %v11513_v2 = vrot.slane %v3581_v53, %v10591_v28 }
 0x2f8   : > { %v1833_v23 = vpop.f32.mrb[0].mxu0  ;;  %12655 = vst [vmem:[#allocation42_spill] sm:$0xff] %v11513_v2 }
 0x2f9   : > { %v1880_v22 = vcombine.high %v1833_v23, %v1833_v23  ;;  %v1887_v63 = vrot.slane %v1833_v23, %v10591_v28  ;;  %v9030_v45 = vpop.f32.mrb[1].mxu0 }
 0x2fa   : > { %v3207_v13 = vpop.f32.mrb[16].mxu1  ;;  %v1836_v24 = vpop.f32.mrb[2].mxu0 }
 0x2fb   : > { %v3614_v42 = vcombine.high %v3207_v13, %v3207_v13  ;;  %v3621_v44 = vrot.slane %v3207_v13, %v10591_v28  ;;  %v9068_v5 = vpop.f32.mrb[17].mxu1  ;;  %v1894_v14 = vrot.slane %v1880_v22, %v10591_v28  ;;  %v1895_v17 = vcombine.high %v1887_v63, %v1887_v63  ;;  %v9031_v31 = vpop.f32.mrb[3].mxu0 }
 0x2fc   : > { %v1903_v23 = vrot.slane %v1887_v63, %v10591_v28  ;;  %v3210_v45 = vpop.f32.mrb[18].mxu1  ;;  %v1936_v11 = vrot.slane %v1836_v24, %v10591_v28 }
 0x2fd   : > { %v3628_v53 = vrot.slane %v3614_v42, %v10591_v28  ;;  %v3629_v18 = vcombine.high %v3621_v44, %v3621_v44  ;;  %v11524_v13 = vrot.slane %v3621_v44, %v10591_v28  ;;  %v9069_v5 = vpop.f32.mrb[19].mxu1  ;;  %v1896_v27 = vcombine.high %v1894_v14, %v1894_v14 }
 0x2fe   : > { %v1910_v39 = vrot.slane %v1894_v14, %v10591_v28  ;;  %v1917_v22 = vrot.slane %v1895_v17, %v10591_v28  ;;  %v1925_v4 = vcombine.high %v1903_v23, %v1903_v23  ;;  %v1929_v45 = vcombine.high %v1836_v24, %v1836_v24 }
 0x2ff   : > { %12656 = vst [vmem:[#allocation43_spill] sm:$0xff] %v11524_v13  ;;  %v3630_v31 = vcombine.high %v3628_v53, %v3628_v53  ;;  %v1924_v42 = vrot.slane %v1896_v27, %v10591_v28  ;;  %v3735_v44 = vadd.f32 %v11349_v62, %v1903_v23  ;;  %v11534_v5 = vrot.slane %v3628_v53, %v10591_v28 }
 0x300   : > { %v1926_v56 = vcombine.high %v1910_v39, %v1910_v39  ;;  %v1927_v20 = vcombine.high %v1917_v22, %v1917_v22  ;;  %v11537_v14 = vrot.slane %v3629_v18, %v10591_v28  ;;  %v3736_v63 = vadd.f32 %v11356_v30, %v1917_v22 }
 0x301   : > { %v1928_v16 = vcombine.high %v1924_v42, %v1924_v42  ;;  %v3737_v27 = vadd.f32 %v3267_v41, %v1925_v4  ;;  %v3739_v23 = vadd.f32 %v11353_v58, %v1910_v39  ;;  %v11550_v18 = vrot.slane %v3630_v31, %v10591_v28 }
 0x302   : > { %v3738_v24 = vadd.f32 %v3269_v57, %v1927_v20  ;;  %v4589_v53 = vpop.f32.mrb[20].mxu1  ;;  %v3740_v37 = vadd.f32 %v11366_v34, %v1924_v42  ;;  %v3741_v22 = vadd.f32 %v3268_v29, %v1926_v56  ;;  %v1943_v17 = vrot.slane %v1929_v45, %v10591_v28 }
 0x303   : > { %v9074_v62 = vpop.f32.mrb[21].mxu1  ;;  %v3742_v30 = vadd.f32 %v3270_v33, %v1928_v16  ;;  %v1944_v57 = vcombine.high %v1936_v11, %v1936_v11  ;;  %v1952_v20 = vrot.slane %v1936_v11, %v10591_v28  ;;  %v4636_v4 = vcombine.high %v4589_v53, %v4589_v53 }
 0x304   : > { %v11557_v41 = vpop.f32.mrb[4].mxu0  ;;  %v4592_v39 = vpop.f32.mrb[22].mxu1  ;;  %v1945_v42 = vcombine.high %v1943_v17, %v1943_v17  ;;  %v1959_v8 = vrot.slane %v1943_v17, %v10591_v28  ;;  %v4643_v58 = vrot.slane %v4589_v53, %v10591_v28 }
 0x305   : > { %v9034_v31 = vpop.f32.mrb[5].mxu0  ;;  %v4685_v29 = vcombine.high %v4592_v39, %v4592_v39  ;;  %v9075_v56 = vpop.f32.mrb[23].mxu1  ;;  %v1966_v62 = vrot.slane %v1944_v57, %v10591_v28  ;;  %v1974_v54 = vcombine.high %v1952_v20, %v1952_v20  ;;  %v3743_v34 = vadd.f32 %v11360_v46, %v1952_v20 }
 0x306   : > { %v11565_v45 = vpop.f32.mrb[6].mxu0  ;;  %v4650_v33 = vrot.slane %v4636_v4, %v10591_v28  ;;  %v1973_v11 = vrot.slane %v1945_v42, %v10591_v28  ;;  %v1975_v31 = vcombine.high %v1959_v8, %v1959_v8  ;;  %v3747_v36 = vadd.f32 %v11371_v19, %v1959_v8 }
 0x307   : > { %v9035_v16 = vpop.f32.mrb[7].mxu0  ;;  %v4651_v17 = vcombine.high %v4643_v58, %v4643_v58  ;;  %v1976_v25 = vcombine.high %v1966_v62, %v1966_v62  ;;  %v3744_v53 = vadd.f32 %v11377_v3, %v1966_v62  ;;  %v12657_v56 = vcombine.high %v11360_v46, %v11360_v46 }
 0x308   : > { %v4652_v57 = vcombine.high %v4650_v33, %v4650_v33  ;;  %v1977_v13 = vcombine.high %v1973_v11, %v1973_v11  ;;  %v3748_v20 = vadd.f32 %v11380_v43, %v1973_v11  ;;  %v12658_v4 = vcombine.high %v11371_v19, %v11371_v19 }
 0x309   : > { %v3745_v55 = vadd.f32 %v12657_v56, %v1974_v54  ;;  %v4659_v42 = vrot.slane %v4643_v58, %v10591_v28  ;;  %v12659_v8 = vcombine.high %v11377_v3, %v11377_v3  ;;  %v4666_v62 = vrot.slane %v4650_v33, %v10591_v28 }
 0x30a   : > { %v3749_v16 = vadd.f32 %v12658_v4, %v1975_v31  ;;  %v4673_v60 = vrot.slane %v4651_v17, %v10591_v28  ;;  %v4680_v46 = vrot.slane %v4652_v57, %v10591_v28  ;;  %v12660_v54 = vcombine.high %v11380_v43, %v11380_v43 }
 0x30b   : > { %v3746_v2 = vadd.f32 %v12659_v8, %v1976_v25  ;;  %v4681_v56 = vcombine.high %v4659_v42, %v4659_v42  ;;  %v11592_v19 = vadd.f32 %v4659_v42, %v3735_v44  ;;  %v4692_v58 = vrot.slane %v4592_v39, %v10591_v28 }
 0x30c   : > { %v11590_v11 = vadd.f32 %v12660_v54, %v1977_v13  ;;  %v4682_v31 = vcombine.high %v4666_v62, %v4666_v62  ;;  %v4683_v4 = vcombine.high %v4673_v60, %v4673_v60  ;;  %v4684_v3 = vcombine.high %v4680_v46, %v4680_v46  ;;  %v11597_v33 = vpop.f32.mrb[24].mxu1 }
 0x30d   : > { %12661 = vst [vmem:[#allocation44_spill] sm:$0xff] %v11592_v19  ;;  %v11595_v25 = vadd.f32 %v4673_v60, %v3736_v63  ;;  %v11599_v17 = vadd.f32 %v4681_v56, %v3737_v27  ;;  %v11601_v57 = vadd.f32 %v4666_v62, %v3739_v23  ;;  %v11603_v8 = vadd.f32 %v4680_v46, %v3740_v37  ;;  %v9078_v13 = vpop.f32.mrb[25].mxu1 }
 0x30e   : > { %v4699_v43 = vrot.slane %v4685_v29, %v10591_v28  ;;  %v11606_v44 = vadd.f32 %v4683_v4, %v3738_v24  ;;  %v11608_v42 = vadd.f32 %v4682_v31, %v3741_v22  ;;  %v11610_v39 = vadd.f32 %v4684_v3, %v3742_v30  ;;  %v11612_v60 = vpop.f32.mrb[26].mxu1 }
 0x30f   : > { %12662 = vst [vmem:[#allocation39_spill] sm:$0xff] %v11595_v25  ;;  %12663 = vst [vmem:[#allocation41_spill] sm:$0xff] %v11599_v17  ;;  %v4700_v54 = vcombine.high %v4692_v58, %v4692_v58  ;;  %v11614_v63 = vpop.f32.mrb[8].mxu0  ;;  %v4708_v23 = vrot.slane %v4692_v58, %v10591_v28  ;;  %v1978_v29 = vcombine.high %v11557_v41, %v11557_v41  ;;  %v9079_v24 = vpop.f32.mrb[27].mxu1 }
 0x310   : > { %12664 = vst [vmem:[#allocation40_spill] sm:$0xff] %v11601_v57  ;;  %12665 = vst [vmem:[#allocation47_spill] sm:$0xff] %v11603_v8  ;;  %v4701_v27 = vcombine.high %v4699_v43, %v4699_v43  ;;  %v4715_v37 = vrot.slane %v4699_v43, %v10591_v28  ;;  %v9038_v62 = vpop.f32.mrb[9].mxu0  ;;  %v1985_v30 = vrot.slane %v11557_v41, %v10591_v28 }
 0x311   : > { %12666 = vst [vmem:[#allocation49_spill] sm:$0xff] %v11606_v44  ;;  %12667 = vst [vmem:[#allocation50_spill] sm:$0xff] %v11608_v42  ;;  %v4722_v22 = vrot.slane %v4700_v54, %v10591_v28  ;;  %v2027_v46 = vcombine.high %v11565_v45, %v11565_v45  ;;  %v2034_v56 = vrot.slane %v11565_v45, %v10591_v28  ;;  %v11627_v31 = vpop.f32.mrb[10].mxu0 }
 0x312   : > { %12668 = vst [vmem:[#allocation48_spill] sm:$0xff] %v11610_v39  ;;  %v11630_v58 = vrot.slane %v4701_v27, %v10591_v28  ;;  %v4730_v4 = vcombine.high %v4708_v23, %v4708_v23  ;;  %v4731_v3 = vcombine.high %v4715_v37, %v4715_v37  ;;  %v11632_v43 = vadd.f32 %v4708_v23, %v3743_v34  ;;  %v9039_v13 = vpop.f32.mrb[11].mxu0 }
 0x313   : > { %v4732_v54 = vcombine.high %v4722_v22, %v4722_v22  ;;  %v11634_v62 = vadd.f32 %v4722_v22, %v3744_v53  ;;  %v11636_v41 = vadd.f32 %v4715_v37, %v3747_v36  ;;  %v1992_v24 = vrot.slane %v1978_v29, %v10591_v28 }
 0x314   : > { %12669 = vst [vmem:[#allocation51_spill] sm:$0xff] %v11632_v43  ;;  %v11641_v39 = vadd.f32 %v4730_v4, %v3745_v55  ;;  %v11644_v27 = vadd.f32 %v11630_v58, %v3748_v20  ;;  %v11646_v42 = vadd.f32 %v4731_v3, %v3749_v16  ;;  %v1993_v23 = vcombine.high %v1985_v30, %v1985_v30 }
 0x315   : > { %12670 = vst [vmem:[#allocation46_spill] sm:$0xff] %v11634_v62  ;;  %12671 = vst [vmem:[#allocation45_spill] sm:$0xff] %v11636_v41  ;;  %v11648_v34 = vadd.f32 %v4732_v54, %v3746_v2  ;;  %v1994_v13 = vcombine.high %v1992_v24, %v1992_v24  ;;  %v2001_v53 = vrot.slane %v1985_v30, %v10591_v28 }
 0x316   : > { %12672 = vst [vmem:[#allocation54_spill] sm:$0xff] %v11641_v39  ;;  %12673 = vst [vmem:[#allocation58_spill] sm:$0xff] %v11644_v27  ;;  %v2008_v36 = vrot.slane %v1992_v24, %v10591_v28  ;;  %v2041_v37 = vrot.slane %v2027_v46, %v10591_v28  ;;  %v2042_v29 = vcombine.high %v2034_v56, %v2034_v56 }
 0x317   : > { %12674 = vst [vmem:[#allocation52_spill] sm:$0xff] %v11646_v42  ;;  %12675 = vst [vmem:[#allocation55_spill] sm:$0xff] %v11648_v34  ;;  %v2050_v22 = vrot.slane %v2034_v56, %v10591_v28  ;;  %v11654_v55 = vpop.f32.mrb[28].mxu1  ;;  %v2015_v20 = vrot.slane %v1993_v23, %v10591_v28  ;;  %v2022_v16 = vrot.slane %v1994_v13, %v10591_v28 }
 0x318   : > { %v2023_v4 = vcombine.high %v2001_v53, %v2001_v53  ;;  %v3751_v2 = vadd.f32 %v11385_v1, %v2001_v53  ;;  %v9082_v3 = vpop.f32.mrb[29].mxu1  ;;  %v2024_v54 = vcombine.high %v2008_v36, %v2008_v36  ;;  %v11660_v30 = vadd.f32 %v11388_v21, %v2008_v36 }
 0x319   : > { %v2043_v24 = vcombine.high %v2041_v37, %v2041_v37  ;;  %v2057_v46 = vrot.slane %v2041_v37, %v10591_v28  ;;  %v11663_v45 = vpop.f32.mrb[30].mxu1  ;;  %v2025_v56 = vcombine.high %v2015_v20, %v2015_v20  ;;  %v2026_v42 = vcombine.high %v2022_v16, %v2022_v16 }
 0x31a   : > { %v3752_v27 = vadd.f32 %v11391_v6, %v2015_v20  ;;  %v12676_v23 = vcombine.high %v11385_v1, %v11385_v1  ;;  %v9083_v41 = vpop.f32.mrb[31].mxu1  ;;  %v3756_v53 = vadd.f32 %v11402_v10, %v2022_v16  ;;  %v12677_v36 = vcombine.high %v11388_v21, %v11388_v21 }
 0x31b   : > { %v2064_v34 = vrot.slane %v2042_v29, %v10591_v28  ;;  %v2071_v37 = vrot.slane %v2043_v24, %v10591_v28  ;;  %v12678_v39 = vcombine.high %v11391_v6, %v11391_v6  ;;  %v12679_v20 = vcombine.high %v11402_v10, %v11402_v10 }
 0x31c   : > { %v3753_v13 = vadd.f32 %v12676_v23, %v2023_v4  ;;  %v3757_v3 = vadd.f32 %v12677_v36, %v2024_v54  ;;  %v2072_v41 = vcombine.high %v2050_v22, %v2050_v22  ;;  %v2073_v4 = vcombine.high %v2057_v46, %v2057_v46  ;;  %v11685_v29 = vpop.f32.mrb[12].mxu0 }
 0x31d   : > { %v3754_v62 = vadd.f32 %v12678_v39, %v2025_v56  ;;  %v11681_v1 = vadd.f32 %v12679_v20, %v2026_v42  ;;  %v2074_v16 = vcombine.high %v2064_v34, %v2064_v34  ;;  %v2075_v23 = vcombine.high %v2071_v37, %v2071_v37  ;;  %v9042_v36 = vpop.f32.mrb[13].mxu0 }
 0x31e   : > { %v3759_v21 = vadd.f32 %v11394_v47, %v2050_v22  ;;  %v3760_v54 = vadd.f32 %v11414_v61, %v2064_v34  ;;  %v12680_v24 = vcombine.high %v11394_v47, %v11394_v47  ;;  %v3763_v39 = vadd.f32 %v11405_v59, %v2057_v46 }
 0x31f   : > { %v3764_v10 = vadd.f32 %v11426_v35, %v2071_v37  ;;  %v12681_v42 = vcombine.high %v11405_v59, %v11405_v59  ;;  %v12682_v22 = vcombine.high %v11414_v61, %v11414_v61  ;;  %v12683_v34 = vcombine.high %v11426_v35, %v11426_v35  ;;  %v11707_v37 = vpop.f32.mrb[14].mxu0 }
 0x320   : > { %v3761_v6 = vadd.f32 %v12680_v24, %v2072_v41  ;;  %v4734_v47 = vcombine.high %v11597_v33, %v11597_v33  ;;  %v4741_v46 = vrot.slane %v11597_v33, %v10591_v28  ;;  %v4783_v61 = vcombine.high %v11612_v60, %v11612_v60 }
 0x321   : > { %v3765_v56 = vadd.f32 %v12681_v42, %v2073_v4  ;;  %v3762_v20 = vadd.f32 %v12682_v22, %v2074_v16  ;;  %v11701_v43 = vadd.f32 %v12683_v34, %v2075_v23  ;;  %v4790_v41 = vrot.slane %v11612_v60, %v10591_v28  ;;  %v9043_v4 = vpop.f32.mrb[15].mxu0 }
 0x322   : > { %v2076_v35 = vcombine.high %v11614_v63, %v11614_v63  ;;  %v4748_v16 = vrot.slane %v4734_v47, %v10591_v28  ;;  %v4749_v23 = vcombine.high %v4741_v46, %v4741_v46  ;;  %v4757_v33 = vrot.slane %v4741_v46, %v10591_v28 }
 0x323   : > { %12684 = vst [vmem:[#allocation53_spill] sm:$0xff] %v11701_v43  ;;  %v2083_v24 = vrot.slane %v11614_v63, %v10591_v28  ;;  %v4797_v42 = vrot.slane %v4783_v61, %v10591_v28  ;;  %v4798_v36 = vcombine.high %v4790_v41, %v4790_v41  ;;  %v4806_v22 = vrot.slane %v4790_v41, %v10591_v28  ;;  %v11724_v60 = vpop.f32.mrb[32].mxu1 }
 0x324   : > { %v2090_v34 = vrot.slane %v2076_v35, %v10591_v28  ;;  %v4750_v59 = vcombine.high %v4748_v16, %v4748_v16  ;;  %v4764_v4 = vrot.slane %v4748_v16, %v10591_v28  ;;  %v4771_v47 = vrot.slane %v4749_v23, %v10591_v28  ;;  %v9086_v44 = vpop.f32.mrb[33].mxu1  ;;  %v11737_v16 = vpop.f32.mrb[16].mxu0 }
 0x325   : > { %v4779_v43 = vcombine.high %v4757_v33, %v4757_v33  ;;  %v11728_v46 = vadd.f32 %v4757_v33, %v3751_v2  ;;  %v4799_v17 = vcombine.high %v4797_v42, %v4797_v42  ;;  %v4813_v63 = vrot.slane %v4797_v42, %v10591_v28  ;;  %v11732_v8 = vpop.f32.mrb[34].mxu1  ;;  %v9046_v42 = vpop.f32.mrb[17].mxu0 }
 0x326   : > { %v4820_v61 = vrot.slane %v4798_v36, %v10591_v28  ;;  %v4778_v41 = vrot.slane %v4750_v59, %v10591_v28  ;;  %v4780_v35 = vcombine.high %v4764_v4, %v4764_v4  ;;  %v4781_v57 = vcombine.high %v4771_v47, %v4771_v47  ;;  %v9087_v23 = vpop.f32.mrb[35].mxu1 }
 0x327   : > { %12685 = vst [vmem:[#allocation59_spill] sm:$0xff] %v11728_v46  ;;  %v11735_v25 = vadd.f32 %v4771_v47, %v3752_v27  ;;  %v11739_v19 = vadd.f32 %v4779_v43, %v3753_v13  ;;  %v11742_v44 = vadd.f32 %v4764_v4, %v11660_v30  ;;  %v11745_v2 = vrot.slane %v4799_v17, %v10591_v28  ;;  %v1868_v47 = vpop.f32.mrb[18].mxu0 }
 0x328   : > { %v4828_v33 = vcombine.high %v4806_v22, %v4806_v22  ;;  %v4782_v36 = vcombine.high %v4778_v41, %v4778_v41  ;;  %v11747_v46 = vadd.f32 %v4781_v57, %v3754_v62  ;;  %v11749_v59 = vadd.f32 %v4778_v41, %v3756_v53  ;;  %v9047_v13 = vpop.f32.mrb[19].mxu0 }
 0x329   : > { %12686 = vst [vmem:[#allocation57_spill] sm:$0xff] %v11735_v25  ;;  %12687 = vst [vmem:[#allocation56_spill] sm:$0xff] %v11745_v2  ;;  %v11751_v27 = vadd.f32 %v4780_v35, %v3757_v3  ;;  %v4829_v25 = vcombine.high %v4813_v63, %v4813_v63  ;;  %v4830_v23 = vcombine.high %v4820_v61, %v4820_v61 }
 0x32a   : > { %v11753_v43 = vadd.f32 %v4806_v22, %v3759_v21  ;;  %v2125_v30 = vcombine.high %v11627_v31, %v11627_v31  ;;  %v11758_v17 = vadd.f32 %v4782_v36, %v11681_v1  ;;  %v11760_v4 = vadd.f32 %v4820_v61, %v3760_v54 }
 0x32b   : > { %v11762_v57 = vadd.f32 %v4828_v33, %v3761_v6  ;;  %v11764_v62 = vadd.f32 %v4813_v63, %v3763_v39  ;;  %v11766_v53 = vadd.f32 %v4830_v23, %v3762_v20  ;;  %v11769_v3 = vadd.f32 %v11745_v2, %v3764_v10  ;;  %v11773_v41 = vpop.f32.mrb[36].mxu1 }
 0x32c   : > { %v11771_v21 = vadd.f32 %v4829_v25, %v3765_v56  ;;  %v2091_v22 = vcombine.high %v2083_v24, %v2083_v24  ;;  %v2092_v35 = vcombine.high %v2090_v34, %v2090_v34  ;;  %v2099_v1 = vrot.slane %v2083_v24, %v10591_v28  ;;  %v9090_v39 = vpop.f32.mrb[37].mxu1 }
 0x32d   : > { %12688 = vst [vmem:[#allocation61_spill] sm:$0xff] %v11764_v62  ;;  %12689 = vst [vmem:[#allocation60_spill] sm:$0xff] %v11766_v53  ;;  %v2106_v54 = vrot.slane %v2090_v34, %v10591_v28  ;;  %v2132_v6 = vrot.slane %v11627_v31, %v10591_v28  ;;  %v2139_v63 = vrot.slane %v2125_v30, %v10591_v28  ;;  %v4624_v56 = vpop.f32.mrb[38].mxu1 }
 0x32e   : > { %12690 = vst [vmem:[#allocation63_spill] sm:$0xff] %v11769_v3  ;;  %12691 = vst [vmem:[#allocation62_spill] sm:$0xff] %v11771_v21  ;;  %v2113_v20 = vrot.slane %v2091_v22, %v10591_v28  ;;  %v4832_v25 = vcombine.high %v11654_v55, %v11654_v55  ;;  %v4839_v10 = vrot.slane %v11654_v55, %v10591_v28  ;;  %v9091_v42 = vpop.f32.mrb[39].mxu1 }
 0x32f   : > { %v2120_v61 = vrot.slane %v2092_v35, %v10591_v28  ;;  %v2121_v24 = vcombine.high %v2099_v1, %v2099_v1  ;;  %v2122_v33 = vcombine.high %v2106_v54, %v2106_v54  ;;  %v3767_v34 = vadd.f32 %v11437_v7, %v2099_v1 }
 0x330   : > { %v2123_v31 = vcombine.high %v2113_v20, %v2113_v20  ;;  %v3768_v36 = vadd.f32 %v11446_v38, %v2113_v20  ;;  %v3771_v47 = vadd.f32 %v11440_v26, %v2106_v54  ;;  %v2140_v23 = vcombine.high %v2132_v6, %v2132_v6 }
 0x331   : > { %v2124_v30 = vcombine.high %v2120_v61, %v2120_v61  ;;  %v12692_v13 = vcombine.high %v11437_v7, %v11437_v7  ;;  %v3772_v55 = vadd.f32 %v11452_v48, %v2120_v61  ;;  %v12693_v35 = vcombine.high %v11440_v26, %v11440_v26 }
 0x332   : > { %v12694_v1 = vcombine.high %v11446_v38, %v11446_v38  ;;  %v2141_v42 = vcombine.high %v2139_v63, %v2139_v63  ;;  %v2148_v20 = vrot.slane %v2132_v6, %v10591_v28  ;;  %v2155_v54 = vrot.slane %v2139_v63, %v10591_v28 }
 0x333   : > { %v3769_v22 = vadd.f32 %v12692_v13, %v2121_v24  ;;  %v3773_v39 = vadd.f32 %v12693_v35, %v2122_v33  ;;  %v12695_v21 = vcombine.high %v11452_v48, %v11452_v48  ;;  %v2162_v24 = vrot.slane %v2140_v23, %v10591_v28 }
 0x334   : > { %v3770_v56 = vadd.f32 %v12694_v1, %v2123_v31  ;;  %v4846_v61 = vrot.slane %v4832_v25, %v10591_v28  ;;  %v4847_v13 = vcombine.high %v4839_v10, %v4839_v10  ;;  %v2169_v26 = vrot.slane %v2141_v42, %v10591_v28  ;;  %v11817_v42 = vpop.f32.mrb[20].mxu0 }
 0x335   : > { %v3774_v7 = vadd.f32 %v12695_v21, %v2124_v30  ;;  %v2170_v33 = vcombine.high %v2148_v20, %v2148_v20  ;;  %v2171_v35 = vcombine.high %v2155_v54, %v2155_v54  ;;  %v3775_v38 = vadd.f32 %v11449_v32, %v2148_v20 }
 0x336   : > { %v2172_v31 = vcombine.high %v2162_v24, %v2162_v24  ;;  %v3776_v6 = vadd.f32 %v11458_v50, %v2162_v24  ;;  %v3779_v63 = vadd.f32 %v11455_v15, %v2155_v54  ;;  %v4848_v1 = vcombine.high %v4846_v61, %v4846_v61 }
 0x337   : > { %v2173_v3 = vcombine.high %v2169_v26, %v2169_v26  ;;  %v12696_v48 = vcombine.high %v11449_v32, %v11449_v32  ;;  %v3780_v25 = vadd.f32 %v11462_v40, %v2169_v26  ;;  %v12697_v23 = vcombine.high %v11455_v15, %v11455_v15  ;;  %v9096_v32 = vpop.f32.mrb[21].mxu0 }
 0x338   : > { %v12698_v20 = vcombine.high %v11458_v50, %v11458_v50  ;;  %v4855_v54 = vrot.slane %v4839_v10, %v10591_v28  ;;  %v4862_v62 = vrot.slane %v4846_v61, %v10591_v28  ;;  %v4869_v53 = vrot.slane %v4847_v13, %v10591_v28 }
 0x339   : > { %v3777_v21 = vadd.f32 %v12696_v48, %v2170_v33  ;;  %v3781_v30 = vadd.f32 %v12697_v23, %v2171_v35  ;;  %v12699_v26 = vcombine.high %v11462_v40, %v11462_v40  ;;  %v4876_v15 = vrot.slane %v4848_v1, %v10591_v28 }
 0x33a   : > { %v3778_v24 = vadd.f32 %v12698_v20, %v2172_v31  ;;  %v4881_v35 = vcombine.high %v11663_v45, %v11663_v45  ;;  %v4888_v50 = vrot.slane %v11663_v45, %v10591_v28  ;;  %v11835_v31 = vpop.f32.mrb[22].mxu0  ;;  %v4877_v10 = vcombine.high %v4855_v54, %v4855_v54 }
 0x33b   : > { %v11828_v33 = vadd.f32 %v12699_v26, %v2173_v3  ;;  %v4878_v61 = vcombine.high %v4862_v62, %v4862_v62  ;;  %v4879_v48 = vcombine.high %v4869_v53, %v4869_v53  ;;  %v11837_v13 = vadd.f32 %v4855_v54, %v3767_v34  ;;  %v9097_v23 = vpop.f32.mrb[23].mxu0 }
 0x33c   : > { %v4880_v20 = vcombine.high %v4876_v15, %v4876_v15  ;;  %v11839_v40 = vadd.f32 %v4869_v53, %v3768_v36  ;;  %v11841_v3 = vadd.f32 %v4862_v62, %v3771_v47  ;;  %v11843_v1 = vadd.f32 %v4876_v15, %v3772_v55  ;;  %v11866_v15 = vpop.f32.mrb[24].mxu0 }
 0x33d   : > { %12700 = vst [vmem:[#allocation64_spill] sm:$0xff] %v11828_v33  ;;  %v11845_v32 = vadd.f32 %v4877_v10, %v3769_v22  ;;  %v11847_v26 = vadd.f32 %v4879_v48, %v3770_v56  ;;  %v11849_v45 = vadd.f32 %v4878_v61, %v3773_v39  ;;  %v4895_v33 = vrot.slane %v4881_v35, %v10591_v28 }
 0x33e   : > { %v11852_v2 = vadd.f32 %v4880_v20, %v3774_v7  ;;  %v4896_v34 = vcombine.high %v4888_v50, %v4888_v50  ;;  %v4904_v54 = vrot.slane %v4888_v50, %v10591_v28  ;;  %v2174_v53 = vcombine.high %v11685_v29, %v11685_v29 }
 0x33f   : > { %12701 = vst [vmem:[#allocation65_spill] sm:$0xff] %v11847_v26  ;;  %12702 = vst [vmem:[#allocation66_spill] sm:$0xff] %v11849_v45  ;;  %v4897_v62 = vcombine.high %v4895_v33, %v4895_v33  ;;  %v4911_v36 = vrot.slane %v4895_v33, %v10591_v28  ;;  %v2181_v47 = vrot.slane %v11685_v29, %v10591_v28  ;;  %v9100_v29 = vpop.f32.mrb[25].mxu0 }
 0x340   : > { %12703 = vst [vmem:[#allocation67_spill] sm:$0xff] %v11852_v2  ;;  %v2223_v22 = vcombine.high %v11707_v37, %v11707_v37  ;;  %v4918_v55 = vrot.slane %v4896_v34, %v10591_v28  ;;  %v4926_v39 = vcombine.high %v4904_v54, %v4904_v54  ;;  %v11863_v56 = vadd.f32 %v4904_v54, %v3775_v38  ;;  %v11877_v38 = vpop.f32.mrb[26].mxu0 }
 0x341   : > { %v2188_v7 = vrot.slane %v2174_v53, %v10591_v28  ;;  %v11869_v35 = vrot.slane %v4897_v62, %v10591_v28  ;;  %v4927_v50 = vcombine.high %v4911_v36, %v4911_v36  ;;  %v11871_v33 = vadd.f32 %v4911_v36, %v3779_v63  ;;  %v9101_v62 = vpop.f32.mrb[27].mxu0 }
 0x342   : > { %12704 = vst [vmem:[#allocation68_spill] sm:$0xff] %v11863_v56  ;;  %v2189_v10 = vcombine.high %v2181_v47, %v2181_v47  ;;  %v4928_v61 = vcombine.high %v4918_v55, %v4918_v55  ;;  %v11873_v48 = vadd.f32 %v4918_v55, %v3776_v6  ;;  %v11875_v23 = vadd.f32 %v4926_v39, %v3777_v21 }
 0x343   : > { %12705 = vst [vmem:[#allocation69_spill] sm:$0xff] %v11871_v33  ;;  %v2190_v20 = vcombine.high %v2188_v7, %v2188_v7  ;;  %v11882_v54 = vadd.f32 %v11869_v35, %v3780_v25  ;;  %v11884_v53 = vadd.f32 %v4927_v50, %v3781_v30  ;;  %v2197_v63 = vrot.slane %v2181_v47, %v10591_v28 }
 0x344   : > { %12706 = vst [vmem:[#allocation70_spill] sm:$0xff] %v11873_v48  ;;  %12707 = vst [vmem:[#allocation71_spill] sm:$0xff] %v11875_v23  ;;  %v11887_v36 = vadd.f32 %v4928_v61, %v3778_v24  ;;  %v2204_v6 = vrot.slane %v2188_v7, %v10591_v28  ;;  %v2211_v21 = vrot.slane %v2189_v10, %v10591_v28 }
 0x345   : > { %12708 = vst [vmem:[#allocation72_spill] sm:$0xff] %v11882_v54  ;;  %12709 = vst [vmem:[#allocation73_spill] sm:$0xff] %v11884_v53  ;;  %v2218_v55 = vrot.slane %v2190_v20, %v10591_v28  ;;  %v2219_v39 = vcombine.high %v2197_v63, %v2197_v63  ;;  %v3783_v29 = vadd.f32 %v11465_v49, %v2197_v63 }
 0x346   : > { %12710 = vst [vmem:[#allocation74_spill] sm:$0xff] %v11887_v36  ;;  %v2230_v25 = vrot.slane %v11707_v37, %v10591_v28  ;;  %v2237_v30 = vrot.slane %v2223_v22, %v10591_v28  ;;  %v2220_v50 = vcombine.high %v2204_v6, %v2204_v6  ;;  %v2221_v34 = vcombine.high %v2211_v21, %v2211_v21 }
 0x347   : > { %v2222_v47 = vcombine.high %v2218_v55, %v2218_v55  ;;  %v3784_v24 = vadd.f32 %v11475_v12, %v2211_v21  ;;  %v12711_v7 = vcombine.high %v11465_v49, %v11465_v49  ;;  %v3787_v10 = vadd.f32 %v11468_v9, %v2204_v6  ;;  %v11911_v49 = vpop.f32.mrb[28].mxu0 }
 0x348   : > { %v3788_v20 = vadd.f32 %v11485_v51, %v2218_v55  ;;  %v2238_v62 = vcombine.high %v2230_v25, %v2230_v25  ;;  %v12712_v63 = vcombine.high %v11475_v12, %v11475_v12  ;;  %v12713_v22 = vcombine.high %v11468_v9, %v11468_v9 }
 0x349   : > { %v3785_v61 = vadd.f32 %v12711_v7, %v2219_v39  ;;  %v12714_v21 = vcombine.high %v11485_v51, %v11485_v51  ;;  %v2239_v36 = vcombine.high %v2237_v30, %v2237_v30  ;;  %v2246_v6 = vrot.slane %v2230_v25, %v10591_v28 }
 0x34a   : > { %v3786_v37 = vadd.f32 %v12712_v63, %v2221_v34  ;;  %v3789_v53 = vadd.f32 %v12713_v22, %v2220_v50  ;;  %v2253_v55 = vrot.slane %v2237_v30, %v10591_v28  ;;  %v2260_v39 = vrot.slane %v2238_v62, %v10591_v28  ;;  %v9104_v34 = vpop.f32.mrb[29].mxu0 }
 0x34b   : > { %v3790_v54 = vadd.f32 %v12714_v21, %v2222_v47  ;;  %v4930_v12 = vcombine.high %v11724_v60, %v11724_v60  ;;  %v2267_v9 = vrot.slane %v2239_v36, %v10591_v28  ;;  %v4937_v50 = vrot.slane %v11724_v60, %v10591_v28  ;;  %v11925_v25 = vpop.f32.mrb[30].mxu0  ;;  %v12715_v34 = vld [vmem:[#allocation38_spill] sm:$0xff] }
 0x34c   : > { %v4979_v51 = vcombine.high %v11732_v8, %v11732_v8  ;;  %v4986_v47 = vrot.slane %v11732_v8, %v10591_v28  ;;  %v2268_v30 = vcombine.high %v2246_v6, %v2246_v6  ;;  %v2269_v7 = vcombine.high %v2253_v55, %v2253_v55  ;;  %v9105_v22 = vpop.f32.mrb[31].mxu0  ;;  %v12716_v60 = vld [vmem:[#allocation42_spill] sm:$0xff] }
 0x34d   : > { %v2270_v62 = vcombine.high %v2260_v39, %v2260_v39  ;;  %v3791_v63 = vadd.f32 %v11478_v52, %v2246_v6  ;;  %v2271_v21 = vcombine.high %v2267_v9, %v2267_v9  ;;  %v3792_v36 = vadd.f32 %v11503_v0, %v2260_v39 }
 0x34e   : > { %v3795_v33 = vadd.f32 %v12715_v34, %v2253_v55  ;;  %v3796_v23 = vadd.f32 %v12716_v60, %v2267_v9  ;;  %v12717_v48 = vcombine.high %v11478_v52, %v11478_v52  ;;  %v12718_v8 = vcombine.high %v11503_v0, %v11503_v0 }
 0x34f   : > { %v12719_v45 = vcombine.high %v12715_v34, %v12715_v34  ;;  %v4944_v22 = vrot.slane %v4930_v12, %v10591_v28  ;;  %v12720_v39 = vcombine.high %v12716_v60, %v12716_v60  ;;  %v4945_v9 = vcombine.high %v4937_v50, %v4937_v50  ;;  %v11953_v60 = vpop.f32.mrb[32].mxu0 }
 0x350   : > { %v3793_v56 = vadd.f32 %v12717_v48, %v2268_v30  ;;  %v3794_v2 = vadd.f32 %v12718_v8, %v2270_v62  ;;  %v4953_v26 = vrot.slane %v4937_v50, %v10591_v28  ;;  %v4993_v52 = vrot.slane %v4979_v51, %v10591_v28  ;;  %12723 = vst [vmem:[#allocation75_spill] sm:$0xff] %v11953_v60 }
 0x351   : > { %v3797_v6 = vadd.f32 %v12719_v45, %v2269_v7  ;;  %v11944_v55 = vadd.f32 %v12720_v39, %v2271_v21  ;;  %v4946_v48 = vcombine.high %v4944_v22, %v4944_v22  ;;  %v4960_v0 = vrot.slane %v4944_v22, %v10591_v28  ;;  %v9108_v39 = vpop.f32.mrb[33].mxu0 }
 0x352   : > { %v4994_v30 = vcombine.high %v4986_v47, %v4986_v47  ;;  %v5002_v62 = vrot.slane %v4986_v47, %v10591_v28  ;;  %v4967_v45 = vrot.slane %v4945_v9, %v10591_v28  ;;  %v4975_v7 = vcombine.high %v4953_v26, %v4953_v26 }
 0x353   : > { %12721 = vst [vmem:[#allocation38_spill] sm:$0xff] %v11944_v55  ;;  %v11951_v12 = vadd.f32 %v4953_v26, %v3783_v29  ;;  %v4995_v34 = vcombine.high %v4993_v52, %v4993_v52  ;;  %v4974_v21 = vrot.slane %v4946_v48, %v10591_v28  ;;  %v4976_v8 = vcombine.high %v4960_v0, %v4960_v0  ;;  %v11964_v26 = vpop.f32.mrb[34].mxu0 }
 0x354   : > { %v11956_v50 = vadd.f32 %v4960_v0, %v3787_v10  ;;  %v5009_v51 = vrot.slane %v4993_v52, %v10591_v28  ;;  %v4977_v22 = vcombine.high %v4967_v45, %v4967_v45  ;;  %v11959_v55 = vadd.f32 %v4967_v45, %v3784_v24  ;;  %12724 = vst [vmem:[#allocation76_spill] sm:$0xff] %v11964_v26  ;;  %v9109_v48 = vpop.f32.mrb[35].mxu0 }
 0x355   : > { %12722 = vst [vmem:[#allocation42_spill] sm:$0xff] %v11951_v12  ;;  %v11961_v47 = vadd.f32 %v4975_v7, %v3785_v61  ;;  %v5016_v9 = vrot.slane %v4994_v30, %v10591_v28  ;;  %v4978_v29 = vcombine.high %v4974_v21, %v4974_v21  ;;  %v11966_v12 = vadd.f32 %v4974_v21, %v3788_v20 }
 0x356   : > { %v11968_v60 = vadd.f32 %v4976_v8, %v3789_v53  ;;  %v11971_v10 = vrot.slane %v4995_v34, %v10591_v28  ;;  %v11973_v52 = vadd.f32 %v4977_v22, %v3786_v37  ;;  %v5024_v0 = vcombine.high %v5002_v62, %v5002_v62 }
 0x357   : > { %v5025_v24 = vcombine.high %v5009_v51, %v5009_v51  ;;  %v5026_v45 = vcombine.high %v5016_v9, %v5016_v9  ;;  %v11977_v30 = vadd.f32 %v4978_v29, %v3790_v54  ;;  %v11979_v7 = vadd.f32 %v5002_v62, %v3791_v63 }
 0x358   : > { %v11981_v20 = vadd.f32 %v5016_v9, %v3792_v36  ;;  %v11983_v53 = vadd.f32 %v5024_v0, %v3793_v56  ;;  %v11987_v34 = vadd.f32 %v5009_v51, %v3795_v33  ;;  %v11990_v37 = vadd.f32 %v11971_v10, %v3796_v23  ;;  %v12008_v36 = vpop.f32.mrb[36].mxu0 }
 0x359   : > { %12725 = vst [vmem:[#allocation77_spill] sm:$0xff] %v11979_v7  ;;  %v11985_v21 = vadd.f32 %v5026_v45, %v3794_v2  ;;  %v11992_v8 = vadd.f32 %v5025_v24, %v3797_v6  ;;  %v2272_v39 = vcombine.high %v11737_v16, %v11737_v16  ;;  %v2279_v54 = vrot.slane %v11737_v16, %v10591_v28  ;;  %v9112_v22 = vpop.f32.mrb[37].mxu0 }
 0x35a   : > { %12726 = vst [vmem:[#allocation78_spill] sm:$0xff] %v11981_v20  ;;  %12727 = vst [vmem:[#allocation79_spill] sm:$0xff] %v11983_v53  ;;  %v5028_v63 = vcombine.high %v11773_v41, %v11773_v41  ;;  %v5035_v2 = vrot.slane %v11773_v41, %v10591_v28  ;;  %v6058_v56 = vcombine.high %v11817_v42, %v11817_v42 }
 0x35b   : > { %12728 = vst [vmem:[#allocation80_spill] sm:$0xff] %v11985_v21  ;;  %12729 = vst [vmem:[#allocation81_spill] sm:$0xff] %v11987_v34  ;;  %v6065_v33 = vrot.slane %v11817_v42, %v10591_v28  ;;  %v6107_v23 = vcombine.high %v11835_v31, %v11835_v31  ;;  %v2286_v6 = vrot.slane %v2272_v39, %v10591_v28  ;;  %v6046_v42 = vpop.f32.mrb[38].mxu0  ;;  %v12733_v21 = vld [vmem:[#allocation43_spill] sm:$0xff] }
 0x35c   : > { %12730 = vst [vmem:[#allocation82_spill] sm:$0xff] %v11990_v37  ;;  %12731 = vst [vmem:[#allocation83_spill] sm:$0xff] %v11992_v8  ;;  %v2287_v16 = vcombine.high %v2279_v54, %v2279_v54  ;;  %v2295_v62 = vrot.slane %v2279_v54, %v10591_v28  ;;  %v5042_v51 = vrot.slane %v5028_v63, %v10591_v28  ;;  %v9113_v39 = vpop.f32.mrb[39].mxu0 }
 0x35d   : > { %12732 = vst [vmem:[#allocation84_spill] sm:$0xff] %v12008_v36  ;;  %v5043_v41 = vcombine.high %v5035_v2, %v5035_v2  ;;  %v5051_v9 = vrot.slane %v5035_v2, %v10591_v28  ;;  %v6072_v29 = vrot.slane %v6058_v56, %v10591_v28  ;;  %v6073_v48 = vcombine.high %v6065_v33, %v6065_v33 }
 0x35e   : > { %v2288_v0 = vcombine.high %v2286_v6, %v2286_v6  ;;  %v2302_v24 = vrot.slane %v2286_v6, %v10591_v28  ;;  %v2309_v45 = vrot.slane %v2287_v16, %v10591_v28  ;;  %v2317_v61 = vcombine.high %v2295_v62, %v2295_v62 }
 0x35f   : > { %v3799_v8 = vadd.f32 %v12733_v21, %v2295_v62  ;;  %v5044_v54 = vcombine.high %v5042_v51, %v5042_v51  ;;  %v5058_v63 = vrot.slane %v5042_v51, %v10591_v28  ;;  %v5065_v22 = vrot.slane %v5043_v41, %v10591_v28 }
 0x360   : > { %v2316_v2 = vrot.slane %v2288_v0, %v10591_v28  ;;  %v2318_v37 = vcombine.high %v2302_v24, %v2302_v24  ;;  %v2319_v56 = vcombine.high %v2309_v45, %v2309_v45  ;;  %v3800_v42 = vadd.f32 %v11537_v14, %v2309_v45 }
 0x361   : > { %v12734_v6 = vcombine.high %v12733_v21, %v12733_v21  ;;  %v3803_v16 = vadd.f32 %v11534_v5, %v2302_v24  ;;  %v5072_v39 = vrot.slane %v5044_v54, %v10591_v28  ;;  %v5073_v62 = vcombine.high %v5051_v9, %v5051_v9 }
 0x362   : > { %v2320_v20 = vcombine.high %v2316_v2, %v2316_v2  ;;  %v12735_v51 = vcombine.high %v11537_v14, %v11537_v14  ;;  %v3804_v0 = vadd.f32 %v11550_v18, %v2316_v2  ;;  %v12736_v34 = vcombine.high %v11534_v5, %v11534_v5 }
 0x363   : > { %v3801_v53 = vadd.f32 %v12734_v6, %v2317_v61  ;;  %v5074_v7 = vcombine.high %v5058_v63, %v5058_v63  ;;  %v5075_v36 = vcombine.high %v5065_v22, %v5065_v22  ;;  %v5076_v21 = vcombine.high %v5072_v39, %v5072_v39 }
 0x364   : > { %v3802_v41 = vadd.f32 %v12735_v51, %v2319_v56  ;;  %v3805_v45 = vadd.f32 %v12736_v34, %v2318_v37  ;;  %v12034_v61 = vadd.f32 %v5051_v9, %v3799_v8  ;;  %v12737_v24 = vcombine.high %v11550_v18, %v11550_v18  ;;  %v12745_v51 = vld [vmem:[#allocation40_spill] sm:$0xff] }
 0x365   : > { %v12039_v6 = vadd.f32 %v5065_v22, %v3800_v42  ;;  %v12041_v26 = vadd.f32 %v5073_v62, %v3801_v53  ;;  %v12043_v14 = vadd.f32 %v5058_v63, %v3803_v16  ;;  %v12047_v56 = vadd.f32 %v5072_v39, %v3804_v0  ;;  %v12744_v62 = vld [vmem:[#allocation39_spill] sm:$0xff] }
 0x366   : > { %v3806_v54 = vadd.f32 %v12737_v24, %v2320_v20  ;;  %v12045_v2 = vadd.f32 %v5075_v36, %v3802_v41  ;;  %v12049_v5 = vadd.f32 %v5074_v7, %v3805_v45  ;;  %v6074_v34 = vcombine.high %v6072_v29, %v6072_v29  ;;  %v12746_v0 = vld [vmem:[#allocation47_spill] sm:$0xff] }
 0x367   : > { %12738 = vst [vmem:[#allocation43_spill] sm:$0xff] %v12043_v14  ;;  %12739 = vst [vmem:[#allocation85_spill] sm:$0xff] %v12047_v56  ;;  %v6081_v8 = vrot.slane %v6065_v33, %v10591_v28  ;;  %v6088_v18 = vrot.slane %v6072_v29, %v10591_v28  ;;  %v6095_v20 = vrot.slane %v6073_v48, %v10591_v28  ;;  %v12743_v33 = vld [vmem:[#allocation44_spill] sm:$0xff] }
 0x368   : > { %12740 = vst [vmem:[#allocation86_spill] sm:$0xff] %v12049_v5  ;;  %v12051_v37 = vadd.f32 %v5076_v21, %v3806_v54  ;;  %v6102_v53 = vrot.slane %v6074_v34, %v10591_v28  ;;  %v6114_v9 = vrot.slane %v11835_v31, %v10591_v28  ;;  %v6121_v36 = vrot.slane %v6107_v23, %v10591_v28  ;;  %v12747_v31 = vld [vmem:[#allocation41_spill] sm:$0xff]  ;;  %v12749_v54 = vld [vmem:[#allocation50_spill] sm:$0xff] }
 0x369   : > { %v12742_v7 = vcombine.high %v11630_v58, %v11630_v58  ;;  %v6103_v22 = vcombine.high %v6081_v8, %v6081_v8  ;;  %v6104_v42 = vcombine.high %v6088_v18, %v6088_v18  ;;  %v6105_v16 = vcombine.high %v6095_v20, %v6095_v20  ;;  %v12748_v23 = vld [vmem:[#allocation49_spill] sm:$0xff] }
 0x36a   : > { %12741 = vst [vmem:[#allocation87_spill] sm:$0xff] %v12051_v37  ;;  %v6571_v39 = vadd.f32 %v6081_v8, %v12743_v33  ;;  %v6106_v29 = vcombine.high %v6102_v53, %v6102_v53  ;;  %v6572_v48 = vadd.f32 %v6095_v20, %v12744_v62  ;;  %v6575_v41 = vadd.f32 %v6088_v18, %v12745_v51 }
 0x36b   : > { %v5164_v63 = vadd.f32 %v12742_v7, %v11590_v11  ;;  %v6576_v45 = vadd.f32 %v6102_v53, %v12746_v0  ;;  %v6573_v21 = vadd.f32 %v6103_v22, %v12747_v31  ;;  %v6574_v24 = vadd.f32 %v6105_v16, %v12748_v23  ;;  %v12750_v11 = vld [vmem:[#allocation48_spill] sm:$0xff]  ;;  %v12753_v23 = vld [vmem:[#allocation54_spill] sm:$0xff] }
 0x36c   : > { %v6577_v34 = vadd.f32 %v6104_v42, %v12749_v54  ;;  %v6122_v58 = vcombine.high %v6114_v9, %v6114_v9  ;;  %v6578_v7 = vadd.f32 %v6106_v29, %v12750_v11  ;;  %v6707_v37 = vcombine.low %v6571_v39, %v6572_v48  ;;  %v9472_v31 = vld [vmem:[#allocation16] sm:$0xff]   ;;  %v12756_v11 = vld [vmem:[#allocation58_spill] sm:$0xff] }
 0x36d   : > { %v6709_v5 = vcombine.low %v6575_v41, %v6576_v45  ;;  %v6123_v56 = vcombine.high %v6121_v36, %v6121_v36  ;;  %v6708_v8 = vcombine.low %v6573_v21, %v6574_v24  ;;  %v6130_v33 = vrot.slane %v6114_v9, %v10591_v28  ;;  %v12751_v9 = vld [vmem:[#allocation51_spill] sm:$0xff]  ;;  %v12755_v54 = vld [vmem:[#allocation45_spill] sm:$0xff]  ;;  %9115 = vmatpush3.bf16.msra.mxu1 %v9472_v31 }
 0x36e   : > { %v6137_v20 = vrot.slane %v6121_v36, %v10591_v28  ;;  %v6144_v18 = vrot.slane %v6122_v58, %v10591_v28  ;;  %v6710_v53 = vcombine.low %v6577_v34, %v6578_v7  ;;  %v6717_v22 = vrot.slane %v6707_v37, %v10591_v28  ;;  %v12752_v36 = vld [vmem:[#allocation46_spill] sm:$0xff]  ;;  %v12754_v24 = vld [vmem:[#allocation55_spill] sm:$0xff]  ;;  %v9475_v34 = vld [vmem:[#allocation16 + $0x40] sm:$0xff]  }
 0x36f   : > { %v6731_v16 = vrot.slane %v6709_v5, %v10591_v28  ;;  %v6151_v42 = vrot.slane %v6123_v56, %v10591_v28  ;;  %v6724_v62 = vrot.slane %v6708_v8, %v10591_v28  ;;  %v6152_v29 = vcombine.high %v6130_v33, %v6130_v33  ;;  %v12757_v8 = vld [vmem:[#allocation52_spill] sm:$0xff]  ;;  %9141 = vmatpush3.bf16.msra.mxu0 %v9475_v34  ;;  %v12759_v34 = vld [vmem:[#allocation59_spill] sm:$0xff] }
 0x370   : > { %v6153_v39 = vcombine.high %v6137_v20, %v6137_v20  ;;  %v6154_v48 = vcombine.high %v6144_v18, %v6144_v18  ;;  %v6738_v51 = vrot.slane %v6710_v53, %v10591_v28  ;;  %v6579_v0 = vadd.f32 %v6130_v33, %v12751_v9  ;;  %v9473_v53 = vld [vmem:[#allocation16 + $0x8] sm:$0xff]  }
 0x371   : > { %v6155_v41 = vcombine.high %v6151_v42, %v6151_v42  ;;  %v6580_v45 = vadd.f32 %v6144_v18, %v12752_v36  ;;  %v6739_v21 = vcombine.low %v6717_v22, %v6724_v62  ;;  %v6581_v37 = vadd.f32 %v6152_v29, %v12753_v23  ;;  %v12088_v36 = vld [vmem:[#allocation13] sm:$0x1] }
 0x372   : > { %v6582_v5 = vadd.f32 %v6154_v48, %v12754_v24  ;;  %v6583_v56 = vadd.f32 %v6137_v20, %v12755_v54  ;;  %v6740_v58 = vcombine.low %v6731_v16, %v6738_v51  ;;  %v6584_v7 = vadd.f32 %v6151_v42, %v12756_v11 }
 0x373   : > { %v6585_v14 = vadd.f32 %v6153_v39, %v12757_v8  ;;  %v6747_v33 = vrot.slane %v6739_v21, %v10591_v28  ;;  %v6756_v9 = vcombine.low %v6580_v45, %v6581_v37  ;;  %v6156_v22 = vcombine.high %v11866_v15, %v11866_v15  ;;  %v9477_v39 = vld [vmem:[#allocation16 + $0x48] sm:$0xff]  }
 0x374   : > { %v6757_v18 = vcombine.low %v6582_v5, %v6583_v56  ;;  %v12758_v62 = vmov 0.0   ;;  %v6754_v20 = vrot.slane %v6740_v58, %v10591_v28  ;;  %v6163_v42 = vrot.slane %v11866_v15, %v10591_v28  ;;  %v9474_v15 = vld [vmem:[#allocation16 + $0x10] sm:$0xff]  }
 0x375   : > { %9116 = vmatprep.subr.bf16.mxu1 %v12758_v62  ;;  %v6758_v16 = vcombine.low %v6584_v7, %v6585_v14  ;;  %v6586_v29 = vadd.f32 %v6155_v41, %v5164_v63  ;;  %v6766_v48 = vrot.slane %v6756_v9, %v10591_v28  ;;  %v6170_v45 = vrot.slane %v6156_v22, %v10591_v28  ;;  %v9479_v58 = vld [vmem:[#allocation16 + $0x50] sm:$0xff]  }
 0x376   : > { %v6773_v51 = vrot.slane %v6757_v18, %v10591_v28  ;;  %9142 = vmatprep.subr.bf16.mxu0 %v12758_v62  ;;  %v6755_v31 = vcombine.low %v6747_v33, %v6754_v20  ;;  %v12101_v21 = vadd.f32 %v12088_v36, %v6579_v0  ;;  %v6171_v23 = vcombine.high %v6163_v42, %v6163_v42  ;;  %v12760_v18 = vld [vmem:[#allocation57_spill] sm:$0xff] }
 0x377   : > { %v6179_v14 = vrot.slane %v6163_v42, %v10591_v28  ;;  %9117 = vmatpush3.bf16.msra.mxu1 %v9473_v53  ;;  %v6172_v41 = vcombine.high %v6170_v45, %v6170_v45  ;;  %v6186_v37 = vrot.slane %v6170_v45, %v10591_v28  ;;  %v6780_v24 = vrot.slane %v6758_v16, %v10591_v28  ;;  %v9476_v16 = vld [vmem:[#allocation16 + $0x18] sm:$0xff]  }
 0x378   : > { %v6788_v63 = vcombine.low %v6766_v48, %v6773_v51  ;;  %9118 = vmatprep.subr.bf16.mxu1 %v12758_v62  ;;  %v7107_v5 = vrot.slane %v6755_v31, 4  ;;  %v6193_v54 = vrot.slane %v6171_v23, %v10591_v28  ;;  %9143 = vmatpush3.bf16.msra.mxu0 %v9477_v39  ;;  %v6205_v53 = vcombine.high %v11877_v38, %v11877_v38 }
 0x379   : > { %v6201_v56 = vcombine.high %v6179_v14, %v6179_v14  ;;  %v6587_v0 = vadd.f32 %v6179_v14, %v12759_v34  ;;  %v6200_v11 = vrot.slane %v6172_v41, %v10591_v28  ;;  %v6202_v7 = vcombine.high %v6186_v37, %v6186_v37  ;;  %9144 = vmatprep.subr.bf16.mxu0 %v12758_v62 }
 0x37a   : > { %v6591_v8 = vadd.f32 %v6186_v37, %v11742_v44  ;;  %v7108_v33 = vmax.f32 %v6755_v31, %v7107_v5  ;;  %v6203_v9 = vcombine.high %v6193_v54, %v6193_v54  ;;  %v12115_v22 = vadd.f32 %v6193_v54, %v12760_v18 }
 0x37b   : > { %v6589_v20 = vadd.f32 %v6201_v56, %v11739_v19  ;;  %9119 = vmatpush3.bf16.msra.mxu1 %v9474_v15  ;;  %v6204_v42 = vcombine.high %v6200_v11, %v6200_v11  ;;  %v6592_v39 = vadd.f32 %v6200_v11, %v11749_v59  ;;  %v6593_v48 = vadd.f32 %v6202_v7, %v11751_v27  ;;  %v9481_v19 = vld [vmem:[#allocation16 + $0x58] sm:$0xff]   ;;  %v9483_v11 = vld [vmem:[#allocation16 + $0x60] sm:$0xff]  }
 0x37c   : > { %v6759_v44 = vcombine.low %v6586_v29, %v6587_v0  ;;  %9120 = vmatprep.subr.bf16.mxu1 %v12758_v62  ;;  %v6796_v51 = vrot.slane %v6788_v63, %v10591_v28  ;;  %v7109_v45 = vrot.slane %v7108_v33, 2  ;;  %v6590_v31 = vadd.f32 %v6203_v9, %v11747_v46  ;;  %9145 = vmatpush3.bf16.msra.mxu0 %v9479_v58  ;;  %v9478_v46 = vld [vmem:[#allocation16 + $0x20] sm:$0xff]  }
 0x37d   : > { %v6212_v23 = vrot.slane %v11877_v38, %v10591_v28  ;;  %v6594_v14 = vadd.f32 %v6204_v42, %v11758_v17  ;;  %v6806_v59 = vcombine.low %v6591_v8, %v6592_v39  ;;  %v6219_v27 = vrot.slane %v6205_v53, %v10591_v28  ;;  %9146 = vmatprep.subr.bf16.mxu0 %v12758_v62  ;;  %v12139_v42 = vld [vmem:[#allocation11] ss:$0 sm:$0xff] }
 0x37e   : > { %v6787_v15 = vrot.slane %v6759_v44, %v10591_v28  ;;  %v7110_v29 = vmax.f32 %v7108_v33, %v7109_v45  ;;  %v6805_v41 = vcombine.low %v6589_v20, %v6590_v31  ;;  %v12761_v45 = vld [vmem:[#allocation56_spill] sm:$0xff] }
 0x37f   : > { %v6220_v63 = vcombine.high %v6212_v23, %v6212_v23  ;;  %v6228_v37 = vrot.slane %v6212_v23, %v10591_v28  ;;  %9121 = vmatpush3.bf16.msra.mxu1 %v9476_v16  ;;  %v6807_v38 = vcombine.low %v6593_v48, %v6594_v14  ;;  %v6822_v54 = vrot.slane %v6806_v59, %v10591_v28  ;;  %v9480_v16 = vld [vmem:[#allocation16 + $0x28] sm:$0xff]   ;;  %v12762_v23 = vld [vmem:[#allocation60_spill] sm:$0xff] }
 0x380   : > { %v6789_v5 = vcombine.low %v6780_v24, %v6787_v15  ;;  %v6221_v56 = vcombine.high %v6219_v27, %v6219_v27  ;;  %9122 = vmatprep.subr.bf16.mxu1 %v12758_v62  ;;  %v7111_v17 = vrot.slane %v7110_v29, 1  ;;  %v6815_v34 = vrot.slane %v6805_v41, %v10591_v28  ;;  %9147 = vmatpush3.bf16.msra.mxu0 %v9481_v19  ;;  %v12763_v14 = vld [vmem:[#allocation61_spill] sm:$0xff] }
 0x381   : > { %v6235_v0 = vrot.slane %v6219_v27, %v10591_v28  ;;  %v6242_v58 = vrot.slane %v6220_v63, %v10591_v28  ;;  %v6250_v24 = vcombine.high %v6228_v37, %v6228_v37  ;;  %v6595_v53 = vadd.f32 %v6228_v37, %v11753_v43  ;;  %9148 = vmatprep.subr.bf16.mxu0 %v12758_v62  ;;  %v9484_v59 = vld [vmem:[#allocation16 + $0x68] sm:$0xff]  }
 0x382   : > { %v6803_v7 = vrot.slane %v6789_v5, %v10591_v28  ;;  %v6249_v8 = vrot.slane %v6221_v56, %v10591_v28  ;;  %v7112_v33 = vmax.f32 %v7110_v29, %v7111_v17  ;;  %v6837_v9 = vcombine.low %v6815_v34, %v6822_v54  ;;  %v9482_v5 = vld [vmem:[#allocation16 + $0x30] sm:$0xff]  }
 0x383   : > { %v6251_v18 = vcombine.high %v6235_v0, %v6235_v0  ;;  %v6252_v20 = vcombine.high %v6242_v58, %v6242_v58  ;;  %9123 = vmatpush3.bf16.msra.mxu1 %v9478_v46  ;;  %v6596_v48 = vadd.f32 %v6242_v58, %v11760_v4  ;;  %v12143_v44 = vadd.f32 %v6250_v24, %v11762_v57  ;;  %v12765_v4 = vld [vmem:[#allocation62_spill] sm:$0xff]  ;;  %v12766_v58 = vld [vmem:[#allocation53_spill] sm:$0xff] }
 0x384   : > { %v6804_v39 = vcombine.low %v6796_v51, %v6803_v7  ;;  %9124 = vmatprep.subr.bf16.mxu1 %v12758_v62  ;;  %v4831_v43 = vcombine.high %v12761_v45, %v12761_v45  ;;  %v7164_v31 = vmax.f32 %v7112_v33, %v12101_v21  ;;  %v6599_v15 = vadd.f32 %v6235_v0, %v12763_v14  ;;  %v12764_v51 = vld [vmem:[#allocation63_spill] sm:$0xff] }
 0x385   : > { %v6598_v19 = vadd.f32 %v6252_v20, %v12762_v23  ;;  %9149 = vmatpush3.bf16.msra.mxu0 %v9483_v11  ;;  %v6600_v29 = vadd.f32 %v6249_v8, %v12764_v51  ;;  %v6601_v41 = vadd.f32 %v6251_v18, %v12765_v4  ;;  %v6808_v57 = vcombine.low %v6595_v53, %v6596_v48  ;;  %v9486_v7 = vld [vmem:[#allocation16 + $0x70] sm:$0xff]   ;;  %v9485_v48 = vld [vmem:[#allocation16 + $0x38] sm:$0xff]  }
 0x386   : > { %v7113_v27 = vrot.slane %v6804_v39, 4  ;;  %9150 = vmatprep.subr.bf16.mxu0 %v12758_v62  ;;  %v7179_v63 = vadd.f32 %v12139_v42, %v7164_v31  ;;  %v6253_v37 = vcombine.high %v6249_v8, %v6249_v8  ;;  %v6829_v46 = vrot.slane %v6807_v38, %v10591_v28  ;;  %v9489_v14 = vld [vmem:[#allocation16 + $0x78] sm:$0xff]  }
 0x387   : > { %v6854_v21 = vcombine.low %v6598_v19, %v6599_v15  ;;  %9125 = vmatpush3.bf16.msra.mxu1 %v9480_v16  ;;  %v4929_v54 = vcombine.high %v11869_v35, %v11869_v35  ;;  %v6836_v17 = vrot.slane %v6808_v57, %v10591_v28  ;;  %v6855_v34 = vcombine.low %v6600_v29, %v6601_v41 }
 0x388   : > { %v7114_v56 = vmax.f32 %v6804_v39, %v7113_v27  ;;  %9126 = vmatprep.subr.bf16.mxu1 %v12758_v62  ;;  %9539 = vtanh.f32 %v7179_v63  ;;  %v5180_v11 = vadd.f32 %v4831_v43, %v12766_v58  ;;  %v6254_v38 = vcombine.high %v11911_v49, %v11911_v49  ;;  %v12767_v58 = vld [vmem:[#allocation65_spill] sm:$0xff] }
 0x389   : > { %v6864_v0 = vrot.slane %v6854_v21, %v10591_v28  ;;  %9151 = vmatpush3.bf16.msra.mxu0 %v9484_v59  ;;  %v6838_v24 = vcombine.low %v6829_v46, %v6836_v17  ;;  %v6871_v53 = vrot.slane %v6855_v34, %v10591_v28  ;;  %v6261_v33 = vrot.slane %v11911_v49, %v10591_v28 }
 0x38a   : > { %v7115_v8 = vrot.slane %v7114_v56, 2  ;;  %9152 = vmatprep.subr.bf16.mxu0 %v12758_v62  ;;  %v6845_v18 = vrot.slane %v6837_v9, %v10591_v28  ;;  %v7157_v20 = vadd.f32 %v12088_v36, %v12115_v22  ;;  %v6268_v16 = vrot.slane %v6254_v38, %v10591_v28 }
 0x38b   : > { %v6602_v39 = vadd.f32 %v6253_v37, %v5180_v11  ;;  %9127 = vmatpush3.bf16.msra.mxu1 %v9482_v5  ;;  %v6852_v43 = vrot.slane %v6838_v24, %v10591_v28  ;;  %v6886_v31 = vcombine.low %v6864_v0, %v6871_v53  ;;  %v6269_v23 = vcombine.high %v6261_v33, %v6261_v33  ;;  %v12768_v11 = vld [vmem:[#allocation66_spill] sm:$0xff] }
 0x38c   : > { %v7116_v45 = vmax.f32 %v7114_v56, %v7115_v8  ;;  %9128 = vmatprep.subr.bf16.mxu1 %v12758_v62  ;;  %v6270_v49 = vcombine.high %v6268_v16, %v6268_v16  ;;  %v6277_v19 = vrot.slane %v6261_v33, %v10591_v28  ;;  %v6284_v9 = vrot.slane %v6268_v16, %v10591_v28 }
 0x38d   : > { %v6303_v22 = vcombine.high %v11925_v25, %v11925_v25  ;;  %9153 = vmatpush3.bf16.msra.mxu0 %v9486_v7  ;;  %v6853_v59 = vcombine.low %v6845_v18, %v6852_v43  ;;  %v6291_v27 = vrot.slane %v6269_v23, %v10591_v28  ;;  %v6310_v51 = vrot.slane %v11925_v25, %v10591_v28 }
 0x38e   : > { %v7117_v15 = vrot.slane %v7116_v45, 1  ;;  %9154 = vmatprep.subr.bf16.mxu0 %v12758_v62  ;;  %v6298_v29 = vrot.slane %v6270_v49, %v10591_v28  ;;  %v6299_v4 = vcombine.high %v6277_v19, %v6277_v19  ;;  %v6300_v41 = vcombine.high %v6284_v9, %v6284_v9 }
 0x38f   : > { %v6603_v57 = vadd.f32 %v6277_v19, %v11837_v13  ;;  %9129 = vmatpush3.bf16.msra.mxu1 %v9485_v48  ;;  %v7119_v37 = vrot.slane %v6853_v59, 4  ;;  %v6301_v46 = vcombine.high %v6291_v27, %v6291_v27  ;;  %v6604_v21 = vadd.f32 %v6291_v27, %v11839_v40  ;;  %v12769_v40 = vld [vmem:[#allocation67_spill] sm:$0xff] }
 0x390   : > { %v7118_v63 = vmax.f32 %v7116_v45, %v7117_v15  ;;  %9134 = vmatprep.subr.bf16.mxu1 %v12758_v62  ;;  %v6302_v5 = vcombine.high %v6298_v29, %v6298_v29  ;;  %v6605_v56 = vadd.f32 %v6299_v4, %v11845_v32  ;;  %v6607_v25 = vadd.f32 %v6284_v9, %v11841_v3 }
 0x391   : > { %v6608_v17 = vadd.f32 %v6298_v29, %v11843_v1  ;;  %9155 = vmatpush3.bf16.msra.mxu0 %v9489_v14  ;;  %v7120_v0 = vmax.f32 %v6853_v59, %v7119_v37  ;;  %v6606_v13 = vadd.f32 %v6301_v46, %v12767_v58  ;;  %v6609_v38 = vadd.f32 %v6300_v41, %v12768_v11  ;;  %v12770_v37 = vld [vmem:[#allocation68_spill] sm:$0xff]  ;;  %v12773_v11 = vld [vmem:[#allocation69_spill] sm:$0xff] }
 0x392   : > { %v7165_v34 = vmax.f32 %v7118_v63, %v7157_v20  ;;  %9186 = vmatprep.subr.bf16.mxu0 %v12758_v62  ;;  %v9540_v7 = vpop.eup %9539  ;;  %v6610_v8 = vadd.f32 %v6302_v5, %v12769_v40  ;;  %v6856_v24 = vcombine.low %v6602_v39, %v6603_v57  ;;  %v6857_v53 = vcombine.low %v6604_v21, %v6605_v56  ;;  %v12771_v56 = vld [vmem:[#allocation70_spill] sm:$0xff] }
 0x393   : > { %v6903_v33 = vcombine.low %v6607_v25, %v6608_v17  ;;  %v8893_v32 = vpack.c.bf16 %v9540_v7, %v9540_v7  ;;  %v7121_v18 = vrot.slane %v7120_v0, 2  ;;  %v7158_v1 = vadd.f32 %v12088_v36, %v12143_v44  ;;  %v12774_v40 = vld [vmem:[#allocation74_spill] sm:$0xff] }
 0x394   : > { %v7180_v3 = vadd.f32 %v12139_v42, %v7165_v34  ;;  %v6894_v20 = vrot.slane %v6886_v31, %v10591_v28  ;;  %v6878_v16 = vrot.slane %v6856_v24, %v10591_v28  ;;  %v6885_v48 = vrot.slane %v6857_v53, %v10591_v28  ;;  %v12775_v24 = vld [vmem:[#allocation72_spill] sm:$0xff] }
 0x395   : > { %v6904_v45 = vcombine.low %v6609_v38, %v6610_v8  ;;  %v7122_v43 = vmax.f32 %v7120_v0, %v7121_v18  ;;  %v6913_v39 = vrot.slane %v6903_v33, %v10591_v28  ;;  %v6317_v23 = vrot.slane %v6303_v22, %v10591_v28  ;;  %v12772_v0 = vld [vmem:[#allocation71_spill] sm:$0xff]  ;;  %v12776_v33 = vld [vmem:[#allocation73_spill] sm:$0xff] }
 0x396   : > { %9541 = vtanh.f32 %v7180_v3  ;;  %v6887_v49 = vcombine.low %v6878_v16, %v6885_v48  ;;  %v6318_v9 = vcombine.high %v6310_v51, %v6310_v51  ;;  %v6326_v14 = vrot.slane %v6310_v51, %v10591_v28 }
 0x397   : > { %v6920_v19 = vrot.slane %v6904_v45, %v10591_v28  ;;  %v12203_v44 = vunpack.c.l.b16 %v8893_v32  ;;  %v7123_v31 = vrot.slane %v7122_v43, 1  ;;  %v6319_v15 = vcombine.high %v6317_v23, %v6317_v23 }
 0x398   : > { %v6333_v59 = vrot.slane %v6317_v23, %v10591_v28  ;;  %v6901_v27 = vrot.slane %v6887_v49, %v10591_v28  ;;  %v6340_v4 = vrot.slane %v6318_v9, %v10591_v28  ;;  %v6348_v41 = vcombine.high %v6326_v14, %v6326_v14 }
 0x399   : > { %v6935_v29 = vcombine.low %v6913_v39, %v6920_v19  ;;  %v7124_v57 = vmax.f32 %v7122_v43, %v7123_v31  ;;  %v6347_v22 = vrot.slane %v6319_v15, %v10591_v28  ;;  %v6611_v46 = vadd.f32 %v6326_v14, %v12770_v37  ;;  %v12777_v43 = vld [vmem:[#allocation64_spill] sm:$0xff]  ;;  %v12778_v19 = vld [vmem:[#allocation75_spill] sm:$0xff] }
 0x39a   : > { %v6349_v63 = vcombine.high %v6333_v59, %v6333_v59  ;;  %v5027_v51 = vcombine.high %v11971_v10, %v11971_v10  ;;  %v6902_v21 = vcombine.low %v6894_v20, %v6901_v27  ;;  %v6350_v5 = vcombine.high %v6340_v4, %v6340_v4 }
 0x39b   : > { %v6612_v25 = vadd.f32 %v6340_v4, %v12771_v56  ;;  %v7166_v17 = vmax.f32 %v7124_v57, %v7158_v1  ;;  %v6351_v34 = vcombine.high %v6347_v22, %v6347_v22  ;;  %v6613_v58 = vadd.f32 %v6348_v41, %v12772_v0 }
 0x39c   : > { %v6615_v38 = vadd.f32 %v6333_v59, %v12773_v11  ;;  %v7125_v7 = vrot.slane %v6902_v21, 4  ;;  %v6614_v8 = vadd.f32 %v6350_v5, %v12774_v40  ;;  %v6616_v53 = vadd.f32 %v6347_v22, %v12775_v24 }
 0x39d   : > { %v6617_v32 = vadd.f32 %v6349_v63, %v12776_v33  ;;  %v7235_v3 = vrot.slane %v12203_v44, 6  ;;  %v7181_v18 = vadd.f32 %v12139_v42, %v7166_v17  ;;  %v7159_v20 = vadd.f32 %v12088_v36, %v6606_v13 }
 0x39e   : > { %v6905_v16 = vcombine.low %v6611_v46, %v6612_v25  ;;  %v7126_v1 = vmax.f32 %v6902_v21, %v7125_v7  ;;  %v6906_v48 = vcombine.low %v6613_v58, %v6614_v8  ;;  %v5196_v39 = vadd.f32 %v4929_v54, %v12777_v43  ;;  %v12779_v25 = vld [vmem:[#allocation42_spill] sm:$0xff] }
 0x39f   : > { %v6952_v45 = vcombine.low %v6616_v53, %v6617_v32  ;;  %9543 = vtanh.f32 %v7181_v18  ;;  %v6352_v9 = vcombine.high %v12778_v19, %v12778_v19  ;;  %v6359_v14 = vrot.slane %v12778_v19, %v10591_v28 }
 0x3a0   : > { %v9542_v23 = vpop.eup %9541  ;;  %v6927_v49 = vrot.slane %v6905_v16, %v10591_v28  ;;  %v7127_v44 = vrot.slane %v7126_v1, 2  ;;  %v6934_v31 = vrot.slane %v6906_v48, %v10591_v28  ;;  %v6618_v15 = vadd.f32 %v6351_v34, %v5196_v39 }
 0x3a1   : > { %v8894_v13 = vpack.c.bf16 %v9542_v23, %v9542_v23  ;;  %v6943_v59 = vrot.slane %v6935_v29, %v10591_v28  ;;  %v6366_v35 = vrot.slane %v6352_v9, %v10591_v28  ;;  %v6367_v54 = vcombine.high %v6359_v14, %v6359_v14 }
 0x3a2   : > { %v6375_v27 = vrot.slane %v6359_v14, %v10591_v28  ;;  %v7128_v41 = vmax.f32 %v7126_v1, %v7127_v44  ;;  %v6936_v57 = vcombine.low %v6927_v49, %v6934_v31  ;;  %v12235_v22 = vadd.f32 %v12088_v36, %v6615_v38 }
 0x3a3   : > { %v7228_v4 = vunpack.c.l.b16 %v8894_v13  ;;  %v6368_v63 = vcombine.high %v6366_v35, %v6366_v35  ;;  %v6382_v37 = vrot.slane %v6366_v35, %v10591_v28  ;;  %v6389_v46 = vrot.slane %v6367_v54, %v10591_v28 }
 0x3a4   : > { %v6397_v21 = vcombine.high %v6375_v27, %v6375_v27  ;;  %v7129_v56 = vrot.slane %v7128_v41, 1  ;;  %v6950_v29 = vrot.slane %v6936_v57, %v10591_v28  ;;  %v6619_v17 = vadd.f32 %v6375_v27, %v12779_v25  ;;  %v12781_v27 = vld [vmem:[#allocation38_spill] sm:$0xff] }
 0x3a5   : > { %v7236_v5 = vrot.slane %v7228_v4, 5  ;;  %v6396_v34 = vrot.slane %v6368_v63, %v10591_v28  ;;  %v6398_v0 = vcombine.high %v6382_v37, %v6382_v37  ;;  %v6399_v58 = vcombine.high %v6389_v46, %v6389_v46 }
 0x3a6   : > { %v6620_v11 = vadd.f32 %v6389_v46, %v11959_v55  ;;  %v7130_v7 = vmax.f32 %v7128_v41, %v7129_v56  ;;  %v6951_v40 = vcombine.low %v6943_v59, %v6950_v29  ;;  %v6621_v8 = vadd.f32 %v6397_v21, %v11961_v47  ;;  %v12782_v56 = vld [vmem:[#allocation84_spill] sm:$0xff] }
 0x3a7   : > { %v7238_v38 = vsel %vm7237_vm8, %v7236_v5, %v7235_v3  ;;  %v6400_v24 = vcombine.high %v6396_v34, %v6396_v34  ;;  %v6622_v53 = vadd.f32 %v6399_v58, %v11973_v52  ;;  %v6623_v33 = vadd.f32 %v6382_v37, %v11956_v50  ;;  %v12783_v58 = vld [vmem:[#allocation77_spill] sm:$0xff] }
 0x3a8   : > { %v6624_v32 = vadd.f32 %v6396_v34, %v11966_v12  ;;  %v7167_v18 = vmax.f32 %v7130_v7, %v7159_v20  ;;  %v7131_v16 = vrot.slane %v6951_v40, 4  ;;  %v6625_v1 = vadd.f32 %v6398_v0, %v11968_v60  ;;  %v12780_v60 = vld [vmem:[#allocation76_spill] sm:$0xff]  ;;  %v12784_v7 = vld [vmem:[#allocation81_spill] sm:$0xff] }
 0x3a9   : > { %v6953_v48 = vcombine.low %v6618_v15, %v6619_v17  ;;  %v9544_v43 = vpop.eup %9543  ;;  %v6626_v55 = vadd.f32 %v6400_v24, %v11977_v30  ;;  %v6954_v3 = vcombine.low %v6620_v11, %v6621_v8  ;;  %v6955_v39 = vcombine.low %v6622_v53, %v6623_v33  ;;  %v12785_v24 = vld [vmem:[#allocation78_spill] sm:$0xff] }
 0x3aa   : > { %v6962_v23 = vrot.slane %v6952_v45, %v10591_v28  ;;  %v8895_v47 = vpack.c.bf16 %v9544_v43, %v9544_v43  ;;  %v7182_v49 = vadd.f32 %v12139_v42, %v7167_v18  ;;  %v7132_v52 = vmax.f32 %v6951_v40, %v7131_v16  ;;  %v12786_v18 = vld [vmem:[#allocation79_spill] sm:$0xff] }
 0x3ab   : > { %v6969_v50 = vrot.slane %v6953_v48, %v10591_v28  ;;  %v6976_v12 = vrot.slane %v6954_v3, %v10591_v28  ;;  %v6983_v20 = vrot.slane %v6955_v39, %v10591_v28  ;;  %v7001_v19 = vcombine.low %v6625_v1, %v6626_v55  ;;  %v12787_v1 = vld [vmem:[#allocation82_spill] sm:$0xff]  ;;  %v12788_v43 = vld [vmem:[#allocation83_spill] sm:$0xff]  ;;  %v12789_v39 = vld [vmem:[#allocation80_spill] sm:$0xff] }
 0x3ac   : > { %v6401_v9 = vcombine.high %v12780_v60, %v12780_v60  ;;  %v7229_v14 = vunpack.c.l.b16 %v8895_v47  ;;  %9545 = vtanh.f32 %v7182_v49  ;;  %v7133_v30 = vrot.slane %v7132_v52, 2 }
 0x3ad   : > { %v6984_v13 = vcombine.low %v6962_v23, %v6969_v50  ;;  %v6985_v44 = vcombine.low %v6976_v12, %v6983_v20  ;;  %v12258_v45 = vadd.f32 %v12088_v36, %v6624_v32  ;;  %v6408_v31 = vrot.slane %v12780_v60, %v10591_v28 }
 0x3ae   : > { %v6415_v15 = vrot.slane %v6401_v9, %v10591_v28  ;;  %v7239_v59 = vrot.slane %v7229_v14, 4  ;;  %v7134_v35 = vmax.f32 %v7132_v52, %v7133_v30  ;;  %v5212_v4 = vadd.f32 %v5027_v51, %v12781_v27 }
 0x3af   : > { %v6992_v54 = vrot.slane %v6984_v13, %v10591_v28  ;;  %v6999_v41 = vrot.slane %v6985_v44, %v10591_v28  ;;  %v6416_v57 = vcombine.high %v6408_v31, %v6408_v31  ;;  %v6424_v37 = vrot.slane %v6408_v31, %v10591_v28 }
 0x3b0   : > { %v6417_v63 = vcombine.high %v6415_v15, %v6415_v15  ;;  %v7241_v46 = vsel %vm7240_vm9, %v7239_v59, %v7238_v38  ;;  %v7135_v21 = vrot.slane %v7134_v35, 1  ;;  %v6431_v5 = vrot.slane %v6415_v15, %v10591_v28 }
 0x3b1   : > { %v6450_v29 = vcombine.high %v12782_v56, %v12782_v56  ;;  %v7000_v25 = vcombine.low %v6992_v54, %v6999_v41  ;;  %v6438_v17 = vrot.slane %v6416_v57, %v10591_v28  ;;  %v6446_v51 = vcombine.high %v6424_v37, %v6424_v37 }
 0x3b2   : > { %v6445_v10 = vrot.slane %v6417_v63, %v10591_v28  ;;  %v7136_v34 = vmax.f32 %v7134_v35, %v7135_v21  ;;  %v6447_v0 = vcombine.high %v6431_v5, %v6431_v5  ;;  %v6627_v11 = vadd.f32 %v6424_v37, %v12783_v58 }
 0x3b3   : > { %v6631_v40 = vadd.f32 %v6431_v5, %v12784_v7  ;;  %v7137_v38 = vrot.slane %v7000_v25, 4  ;;  %v6448_v8 = vcombine.high %v6438_v17, %v6438_v17  ;;  %v6628_v53 = vadd.f32 %v6438_v17, %v12785_v24  ;;  %v12790_v24 = vld [vmem:[#allocation43_spill] sm:$0xff] }
 0x3b4   : > { %v7011_v33 = vrot.slane %v7001_v19, %v10591_v28  ;;  %v7168_v32 = vmax.f32 %v7136_v34, %v12235_v22  ;;  %v6629_v16 = vadd.f32 %v6446_v51, %v12786_v18  ;;  %v6632_v48 = vadd.f32 %v6445_v10, %v12787_v1 }
 0x3b5   : > { %v12284_v55 = vadd.f32 %v6447_v0, %v12788_v43  ;;  %v7138_v3 = vmax.f32 %v7000_v25, %v7137_v38  ;;  %v6630_v23 = vadd.f32 %v6448_v8, %v12789_v39  ;;  %v7002_v47 = vcombine.low %v6627_v11, %v6628_v53 }
 0x3b6   : > { %v6457_v49 = vrot.slane %v12782_v56, %v10591_v28  ;;  %v9546_v52 = vpop.eup %9545  ;;  %v7183_v50 = vadd.f32 %v12139_v42, %v7168_v32  ;;  %v6449_v12 = vcombine.high %v6445_v10, %v6445_v10  ;;  %v7004_v20 = vcombine.low %v6631_v40, %v6632_v48  ;;  %v12792_v32 = vld [vmem:[#allocation86_spill] sm:$0xff] }
 0x3b7   : > { %v6464_v22 = vrot.slane %v6450_v29, %v10591_v28  ;;  %v8896_v19 = vpack.c.bf16 %v9546_v52, %v9546_v52  ;;  %v7139_v60 = vrot.slane %v7138_v3, 2  ;;  %v7003_v9 = vcombine.low %v6629_v16, %v6630_v23  ;;  %v12793_v16 = vld [vmem:[#allocation87_spill] sm:$0xff] }
 0x3b8   : > { %v7018_v14 = vrot.slane %v7002_v47, %v10591_v28  ;;  %9547 = vtanh.f32 %v7183_v50  ;;  %v7032_v30 = vrot.slane %v7004_v20, %v10591_v28  ;;  %v6465_v13 = vcombine.high %v6457_v49, %v6457_v49 }
 0x3b9   : > { %v6466_v44 = vcombine.high %v6464_v22, %v6464_v22  ;;  %v7230_v31 = vunpack.c.l.b16 %v8896_v19  ;;  %v7140_v15 = vmax.f32 %v7138_v3, %v7139_v60  ;;  %v7025_v59 = vrot.slane %v7003_v9, %v10591_v28  ;;  %v684_v60 = vld [vmem:[#allocation3 + $0x4] sm:$0x6] }
 0x3ba   : > { %v7033_v35 = vcombine.low %v7011_v33, %v7018_v14  ;;  %v6473_v54 = vrot.slane %v6457_v49, %v10591_v28  ;;  %v6480_v27 = vrot.slane %v6464_v22, %v10591_v28  ;;  %v6487_v41 = vrot.slane %v6465_v13, %v10591_v28  ;;  %v12791_v33 = vld [vmem:[#allocation85_spill] sm:$0xff] }
 0x3bb   : > { %v6494_v57 = vrot.slane %v6466_v44, %v10591_v28  ;;  %v7242_v63 = vrot.slane %v7230_v31, 3  ;;  %v7141_v37 = vrot.slane %v7140_v15, 1  ;;  %v7034_v21 = vcombine.low %v7025_v59, %v7032_v30  ;;  %v690_v30 = vld [vmem:[#allocation4 + $0x4] sm:$0x6] }
 0x3bc   : > { %v7041_v5 = vrot.slane %v7033_v35, %v10591_v28  ;;  %v6495_v56 = vcombine.high %v6473_v54, %v6473_v54  ;;  %v6496_v29 = vcombine.high %v6480_v27, %v6480_v27  ;;  %v6497_v25 = vcombine.high %v6487_v41, %v6487_v41 }
 0x3bd   : > { %v6498_v17 = vcombine.high %v6494_v57, %v6494_v57  ;;  %v7244_v10 = vsel %vm7243_vm10, %v7242_v63, %v7241_v46  ;;  %v7142_v51 = vmax.f32 %v7140_v15, %v7141_v37  ;;  %v7048_v34 = vrot.slane %v7034_v21, %v10591_v28 }
 0x3be   : > { %v6634_v0 = vadd.f32 %v6449_v12, %v5212_v4  ;;  %v6635_v58 = vadd.f32 %v6473_v54, %v12034_v61  ;;  %v6636_v11 = vadd.f32 %v6487_v41, %v12039_v6  ;;  %v6637_v7 = vadd.f32 %v6495_v56, %v12041_v26  ;;  %v7260_v26 = vld [vmem:[%s10517_s24] sm:$0xf] }
 0x3bf   : > { %v6638_v40 = vadd.f32 %v6497_v25, %v12045_v2  ;;  %v7169_v38 = vmax.f32 %v7142_v51, %v12258_v45  ;;  %v7049_v8 = vcombine.low %v7041_v5, %v7048_v34  ;;  %v6639_v53 = vadd.f32 %v6480_v27, %v12790_v24 }
 0x3c0   : > { %v6640_v46 = vadd.f32 %v6494_v57, %v12791_v33  ;;  %v6641_v18 = vadd.f32 %v6496_v29, %v12792_v32  ;;  %v6642_v4 = vadd.f32 %v6498_v17, %v12793_v16  ;;  %v7050_v1 = vcombine.low %v6634_v0, %v6635_v58 }
 0x3c1   : > { %v7051_v48 = vcombine.low %v6636_v11, %v6637_v7  ;;  %v7184_v61 = vadd.f32 %v12139_v42, %v7169_v38  ;;  %v7143_v6 = vrot.slane %v7049_v8, 4  ;;  %v7052_v43 = vcombine.low %v6638_v40, %v6639_v53 }
 0x3c2   : > { %v9548_v3 = vpop.eup %9547  ;;  %v7053_v2 = vcombine.low %v6640_v46, %v6641_v18  ;;  %v7060_v45 = vrot.slane %v7050_v1, %v10591_v28  ;;  %v7262_v12 = vrot.slane %v7260_v26, 7  ;;  %v12794_v19 = vmov 0   ;;  %v9488_v1 = vld [vmem:[#allocation14] sm:$0xff]  }
 0x3c3   : > { %v7067_v39 = vrot.slane %v7051_v48, %v10591_v28  ;;  %v8897_v23 = vpack.c.bf16 %v9548_v3, %v9548_v3  ;;  %9549 = vtanh.f32 %v7184_v61  ;;  %v7144_v47 = vmax.f32 %v7049_v8, %v7143_v6  ;;  %681 = vst.msk [vmem:[#allocation3] sm:$0x1] %vm680_vm11, %v12794_v19  ;;  %v9492_v6 = vld [vmem:[#allocation14 + $0x10] sm:$0xff]   ;;  %v9491_v3 = vld [vmem:[#allocation14 + $0x8] sm:$0xff]   ;;  %v9500_v19 = vld [vmem:[#allocation16 + $0xd8] sm:$0xff]  }
 0x3c4   : > { %v7074_v49 = vrot.slane %v7052_v43, %v10591_v28  ;;  %v7081_v52 = vrot.slane %v7053_v2, %v10591_v28  ;;  %v7263_v14 = vrot.slane %v7262_v12, 4  ;;  %7267 = vst.msk [vmem:[#allocation3] sm:$0xe] %vm7266_vm12, %v7262_v12  ;;  %v685_v59 = vsel %vm683_vm15, 0, %v684_v60  ;;  %v9497_v12 = vld [vmem:[#allocation16 + $0x88] sm:$0xff]   ;;  %v9501_v60 = vld [vmem:[#allocation16 + $0x98] sm:$0xff]  }
 0x3c5   : > { %v7082_v50 = vcombine.low %v7060_v45, %v7067_v39  ;;  %v7231_v20 = vunpack.c.l.b16 %v8897_v23  ;;  %v7145_v22 = vrot.slane %v7144_v47, 2  ;;  %686 = vst [vmem:[#allocation3 + $0x4] sm:$0x6] %v685_v59  ;;  %v691_v27 = vsel %vm689_vm2, 0, %v690_v30  ;;  %v9504_v30 = vld [vmem:[#allocation16 + $0xe8] sm:$0xff]  }
 0x3c6   : > { %v7083_v9 = vcombine.low %v7074_v49, %v7081_v52  ;;  %7268 = vst.msk [vmem:[#allocation3 + $0x4] sm:$0x1] %vm680_vm11, %v7263_v14  ;;  %692 = vst [vmem:[#allocation4 + $0x4] sm:$0x6] %v691_v27  ;;  %v7162_v63 = vadd.f32 %v12088_v36, %v12284_v55  ;;  %v7163_v7 = vadd.f32 %v12088_v36, %v6642_v4  ;;  %v9495_v52 = vld [vmem:[#allocation16 + $0x80] sm:$0xff]  }
 0x3c7   : > { %v7245_v13 = vrot.slane %v7231_v20, 2  ;;  %v7146_v44 = vmax.f32 %v7144_v47, %v7145_v22  ;;  %v7090_v31 = vrot.slane %v7082_v50, %v10591_v28  ;;  %v9494_v47 = vld [vmem:[#allocation16 + $0xc0] sm:$0xff]   ;;  %v9496_v50 = vld [vmem:[#allocation16 + $0xc8] sm:$0xff]   ;;  %v9498_v20 = vld [vmem:[#allocation16 + $0xd0] sm:$0xff]  }
 0x3c8   : > { %v7097_v15 = vrot.slane %v7083_v9, %v10591_v28  ;;  %v9499_v22 = vld [vmem:[#allocation16 + $0x90] sm:$0xff]   ;;  %v9502_v9 = vld [vmem:[#allocation16 + $0xe0] sm:$0xff]  }
 0x3c9   : > { %v7247_v35 = vsel %vm7246_vm13, %v7245_v13, %v7244_v10  ;;  %v7147_v54 = vrot.slane %v7146_v44, 1  ;;  %v9503_v14 = vld [vmem:[#allocation16 + $0xa0] sm:$0xff]  }
 0x3ca   : > { %v7098_v41 = vcombine.low %v7090_v31, %v7097_v15  ;;  %v9506_v31 = vld [vmem:[#allocation16 + $0xf0] sm:$0xff]  }
 0x3cb   : > { %v7148_v57 = vmax.f32 %v7146_v44, %v7147_v54  ;;  %v9505_v44 = vld [vmem:[#allocation16 + $0xa8] sm:$0xff]   ;;  %v9508_v54 = vld [vmem:[#allocation16 + $0xf8] sm:$0xff]  }
 0x3cc   : > { %v7149_v37 = vrot.slane %v7098_v41, 4 }
 0x3cd   : > { %v9550_v21 = vpop.eup %9549  ;;  %v7170_v5 = vmax.f32 %v7148_v57, %v7162_v63  ;;  %v9490_v61 = vld [vmem:[#allocation3] sm:$0x1f]   ;;  %v9509_v57 = vld [vmem:[#allocation16 + $0xb8] sm:$0xff]  }
 0x3ce   : > { %v8898_v28 = vpack.c.bf16 %v9550_v21, %v9550_v21  ;;  %v7150_v56 = vmax.f32 %v7098_v41, %v7149_v37  ;;  %v7561_v26 = vshll.u32 %v9490_v61, 16  ;;  %v12332_v2 = vld [vmem:[#allocation3] sm:$0x3e]   ;;  %v7559_v45 = vshrl.u32 %v9490_v61, 16  ;;  %v9519_v63 = vld [vmem:[#allocation14 + $0x20] sm:$0xff]  }
 0x3cf   : > { %v7185_v58 = vadd.f32 %v12139_v42, %v7170_v5  ;;  %v7742_v23 = vrot.slane %v12332_v2, 1  ;;  %v7914_v21 = vshrl.u32 %v12332_v2, 16  ;;  %v7917_v5 = vshll.u32 %v12332_v2, 16 }
 0x3d0   : > { %v7232_v29 = vunpack.c.l.b16 %v8898_v28  ;;  %v7151_v25 = vrot.slane %v7150_v56, 2  ;;  %v7563_v39 = vrot.slane %v7561_v26, 1  ;;  %v9511_v28 = vld [vmem:[#allocation14 + $0x18] sm:$0xff]   ;;  %v9530_v26 = vld [vmem:[#allocation20 + $0x38] sm:$0xff]  }
 0x3d1   : > { %9551 = vtanh.f32 %v7185_v58  ;;  %v9514_v58 = vld [vmem:[#allocation16 + $0x110] sm:$0xff]  }
 0x3d2   : > { %v7248_v17 = vrot.slane %v7232_v29, 1  ;;  %v7152_v51 = vmax.f32 %v7150_v56, %v7151_v25  ;;  %v7564_v49 = vor.u32 %v7563_v39, %v7559_v45  ;;  %v9521_v29 = vld [vmem:[#allocation3] sm:$0x7c]   ;;  %v7916_v25 = vrot.slane %v7914_v21, 1 }
 0x3d4   : > { %v7250_v10 = vsel %vm7249_vm4, %v7248_v17, %v7247_v35  ;;  %v7153_v34 = vrot.slane %v7152_v51, 1  ;;  %v9507_v35 = vld [vmem:[#allocation16 + $0xb0] sm:$0xff]   ;;  %v7919_v17 = vrot.slane %v7917_v5, 2 }
 0x3d5   : > { %v7254_v0 = vpack.c.b16 %v7250_v10, %v7250_v10 }
 0x3d6   : > { %v7154_v11 = vmax.f32 %v7152_v51, %v7153_v34  ;;  %v8098_v51 = vrot.slane %v9521_v29, 2  ;;  %v7920_v10 = vor.u32 %v7919_v17, %v7916_v25  ;;  %v9512_v34 = vld [vmem:[#allocation16 + $0x100] sm:$0xff]  }
 0x3d7   : > { %7258 = vst [vmem:[#allocation4] sm:$0xe] %v7254_v0  ;;  %v9513_v0 = vld [vmem:[#allocation16 + $0x108] sm:$0xff]  }
 0x3d8   : > { %v7171_v55 = vmax.f32 %v7154_v11, %v7163_v7  ;;  %v9515_v11 = vld [vmem:[#allocation16 + $0x118] sm:$0xff]   ;;  %v9516_v7 = vld [vmem:[#allocation16 + $0x120] sm:$0xff]  }
 0x3da   : > { %v7186_v40 = vadd.f32 %v12139_v42, %v7171_v55  ;;  %v9517_v55 = vld [vmem:[#allocation16 + $0x128] sm:$0xff]  }
 0x3db   : > { %v9552_v38 = vpop.eup %9551 }
 0x3dc   : > { %9553 = vtanh.f32 %v7186_v40  ;;  %v8899_v24 = vpack.c.bf16 %v9552_v38, %v9552_v38  ;;  %v9518_v40 = vld [vmem:[#allocation16 + $0x130] sm:$0xff]   ;;  %v9520_v38 = vld [vmem:[#allocation16 + $0x138] sm:$0xff]  }
 0x3de   : > { %v7233_v46 = vunpack.c.l.b16 %v8899_v24 }
 0x3e6   : > { %v9554_v8 = vpop.eup %9553 }
 0x3e7   : > { %v8900_v53 = vpack.c.bf16 %v9554_v8, %v9554_v8 }
 0x3e9   : > { %v7234_v33 = vunpack.c.l.b16 %v8900_v53  ;;  %v9523_v53 = vld [vmem:[#allocation20] sm:$0xff]  }
 0x3eb   : > { %v7251_v32 = vrot.slane %v7234_v33, 7  ;;  %v9524_v33 = vld [vmem:[#allocation20 + $0x8] sm:$0xff]  }
 0x3ed   : > { %v7253_v18 = vsel %vm7252_vm3, %v7251_v32, %v7233_v46  ;;  %v9525_v46 = vld [vmem:[#allocation20 + $0x10] sm:$0xff]   ;;  %v9526_v32 = vld [vmem:[#allocation20 + $0x18] sm:$0xff]  }
 0x3ee   : > { %v7255_v16 = vpack.c.b16 %v7253_v18, %v7253_v18  ;;  %v9527_v18 = vld [vmem:[#allocation20 + $0x20] sm:$0xff]  }
 0x3f0   : > { %7259 = vst [vmem:[#allocation4 + $0x4] sm:$0x1] %v7255_v16  ;;  %v9528_v16 = vld [vmem:[#allocation20 + $0x28] sm:$0xff]  }
 0x3f7   : > { %v9487_v48 = vld [vmem:[#allocation4] sm:$0x1f]  }
 0x3f8   : > { %9131 = vmatmul.mubr.bf16.vlgmr.msra.gmra.mrb[40].mxu1 %v9487_v48  ;;  %v7465_v36 = vshll.u32 %v9487_v48, 16  ;;  %v7463_v42 = vshrl.u32 %v9487_v48, 16  ;;  %v9510_v13 = vld [vmem:[#allocation4] sm:$0x3e]  }
 0x3f9   : > { %9135 = vmatpush3.bf16.msra.mxu1 %v9488_v1  ;;  %9136 = vmatprep.mubr.msk.bf16.mxu1 %vm10041_vm1, %v12758_v62  ;;  %v7816_v15 = vshrl.u32 %v9510_v13, 16  ;;  %v7819_v59 = vshll.u32 %v9510_v13, 16  ;;  %v7646_v56 = vrot.slane %v9510_v13, 1  ;;  %v9522_v8 = vld [vmem:[#allocation4] sm:$0x7c]  }
 0x3fa   : > { %v7467_v4 = vrot.slane %v7465_v36, 1  ;;  %9160 = vmatprep.subr.bf16.mxu1 %v12758_v62  ;;  %v8002_v24 = vrot.slane %v9522_v8, 2 }
 0x3fb   : > { %v7818_v27 = vrot.slane %v7816_v15, 1  ;;  %v7821_v41 = vrot.slane %v7819_v59, 2 }
 0x3fc   : > { %v7468_v43 = vor.u32 %v7467_v4, %v7463_v42  ;;  %v9529_v4 = vld [vmem:[#allocation20 + $0x30] sm:$0xff]  }
 0x3fd   : > { %v7822_v37 = vor.u32 %v7821_v41, %v7818_v27 }
 0x3fe   : > { %9157 = vmatmul.mubr.bf16.vlgmr.msra.gmra.mrb[40].mxu0 %v7468_v43 }
 0x3ff   : > { %9187 = vmatpush3.bf16.msra.mxu0 %v9492_v6  ;;  %9188 = vmatprep.mubr.msk.bf16.mxu0 %vm10041_vm1, %v12758_v62 }
 0x400   : > { %9137 = vmatmul.mubr.msk.bf16.vlgmr.msra.gmra.mrb[44].mxu1 %vm7397_vm5, %v9490_v61  ;;  %9192 = vmatprep.subr.bf16.mxu0 %v12758_v62  ;;  %v9531_v61 = vld [vmem:[#allocation23] sm:$0xff]  }
 0x401   : > { %9161 = vmatpush3.bf16.msra.mxu1 %v9491_v3  ;;  %9162 = vmatprep.mubr.msk.bf16.mxu1 %vm10041_vm1, %v12758_v62  ;;  %v9532_v3 = vld [vmem:[#allocation23 + $0x8] sm:$0xff]  }
 0x402   : > { %9166 = vmatprep.subr.bf16.mxu1 %v12758_v62 }
 0x406   : > { %9189 = vmatmul.mubr.msk.bf16.vlgmr.msra.gmra.mrb[44].mxu0 %vm7397_vm5, %v7742_v23 }
 0x407   : > { %9193 = vmatpush3.bf16.msra.mxu0 %v9494_v47  ;;  %9208 = vmatprep.mubr.msk.bf16.mxu0 %vm10041_vm1, %v12758_v62 }
 0x408   : > { %9163 = vmatmul.mubr.msk.bf16.vlgmr.msra.gmra.mrb[48].mxu1 %vm7397_vm5, %v7564_v49  ;;  %9194 = vmatprep.subr.bf16.mxu0 %v12758_v62 }
 0x409   : > { %9167 = vmatpush3.bf16.msra.mxu1 %v9495_v52  ;;  %9182 = vmatprep.mubr.msk.bf16.mxu1 %vm10041_vm1, %v12758_v62 }
 0x40a   : > { %9168 = vmatprep.subr.bf16.mxu1 %v12758_v62 }
 0x40b   : > { %9195 = vmatpush3.bf16.msra.mxu0 %v9496_v50 }
 0x40c   : > { %9196 = vmatprep.subr.bf16.mxu0 %v12758_v62 }
 0x40d   : > { %9169 = vmatpush3.bf16.msra.mxu1 %v9497_v12  ;;  %v9533_v12 = vld [vmem:[#allocation23 + $0x10] sm:$0xff]  }
 0x40e   : > { %9170 = vmatprep.subr.bf16.mxu1 %v12758_v62 }
 0x40f   : > { %9197 = vmatpush3.bf16.msra.mxu0 %v9498_v20 }
 0x410   : > { %9198 = vmatprep.subr.bf16.mxu0 %v12758_v62 }
 0x411   : > { %9171 = vmatpush3.bf16.msra.mxu1 %v9499_v22 }
 0x412   : > { %9172 = vmatprep.subr.bf16.mxu1 %v12758_v62 }
 0x413   : > { %9199 = vmatpush3.bf16.msra.mxu0 %v9500_v19  ;;  %v9534_v19 = vld [vmem:[#allocation23 + $0x18] sm:$0xff]  }
 0x414   : > { %9200 = vmatprep.subr.bf16.mxu0 %v12758_v62 }
 0x415   : > { %9173 = vmatpush3.bf16.msra.mxu1 %v9501_v60 }
 0x416   : > { %9174 = vmatprep.subr.bf16.mxu1 %v12758_v62 }
 0x417   : > { %9201 = vmatpush3.bf16.msra.mxu0 %v9502_v9 }
 0x418   : > { %9202 = vmatprep.subr.bf16.mxu0 %v12758_v62 }
 0x419   : > { %9175 = vmatpush3.bf16.msra.mxu1 %v9503_v14 }
 0x41a   : > { %9176 = vmatprep.subr.bf16.mxu1 %v12758_v62 }
 0x41b   : > { %9203 = vmatpush3.bf16.msra.mxu0 %v9504_v30 }
 0x41c   : > { %9204 = vmatprep.subr.bf16.mxu0 %v12758_v62 }
 0x41d   : > { %9177 = vmatpush3.bf16.msra.mxu1 %v9505_v44 }
 0x41e   : > { %9178 = vmatprep.subr.bf16.mxu1 %v12758_v62 }
 0x41f   : > { %9205 = vmatpush3.bf16.msra.mxu0 %v9506_v31 }
 0x420   : > { %9206 = vmatprep.subr.bf16.mxu0 %v12758_v62 }
 0x421   : > { %9179 = vmatpush3.bf16.msra.mxu1 %v9507_v35 }
 0x422   : > { %9180 = vmatprep.subr.bf16.mxu1 %v12758_v62 }
 0x423   : > { %9207 = vmatpush3.bf16.msra.mxu0 %v9508_v54 }
 0x424   : > { %9238 = vmatprep.subr.bf16.mxu0 %v12758_v62 }
 0x425   : > { %9181 = vmatpush3.bf16.msra.mxu1 %v9509_v57 }
 0x426   : > { %9209 = vmatmul.mubr.bf16.vlgmr.msra.gmra.mrb[48].mxu0 %v7822_v37  ;;  %9212 = vmatprep.subr.bf16.mxu1 %v12758_v62 }
 0x427   : > { %9239 = vmatpush3.bf16.msra.mxu0 %v9519_v63  ;;  %9240 = vmatprep.mubr.msk.bf16.mxu0 %vm10041_vm1, %v12758_v62 }
 0x428   : > { %9183 = vmatmul.mubr.bf16.vlgmr.msra.gmra.mrb[52].mxu1 %v7646_v56  ;;  %9244 = vmatprep.subr.bf16.mxu0 %v12758_v62 }
 0x429   : > { %9213 = vmatpush3.bf16.msra.mxu1 %v9511_v28  ;;  %9214 = vmatprep.mubr.msk.bf16.mxu1 %vm10041_vm1, %v12758_v62 }
 0x42a   : > { %9218 = vmatprep.subr.bf16.mxu1 %v12758_v62 }
 0x42e   : > { %9241 = vmatmul.mubr.msk.bf16.vlgmr.msra.gmra.mrb[52].mxu0 %vm7397_vm5, %v8098_v51 }
 0x42f   : > { %9260 = vmatprep.mubr.msk.bf16.mxu0 %vm10041_vm1, %v12758_v62  ;;  %9245 = vmatpush3.bf16.msra.mxu0 %v9523_v53 }
 0x430   : > { %9215 = vmatmul.mubr.msk.bf16.vlgmr.msra.gmra.mrb[56].mxu1 %vm7397_vm5, %v7920_v10  ;;  %9246 = vmatprep.subr.bf16.mxu0 %v12758_v62 }
 0x431   : > { %9219 = vmatpush3.bf16.msra.mxu1 %v9512_v34  ;;  %9234 = vmatprep.mubr.msk.bf16.mxu1 %vm10041_vm1, %v12758_v62 }
 0x432   : > { %9220 = vmatprep.subr.bf16.mxu1 %v12758_v62 }
 0x433   : > { %9247 = vmatpush3.bf16.msra.mxu0 %v9524_v33 }
 0x434   : > { %9248 = vmatprep.subr.bf16.mxu0 %v12758_v62 }
 0x435   : > { %9221 = vmatpush3.bf16.msra.mxu1 %v9513_v0 }
 0x436   : > { %9222 = vmatprep.subr.bf16.mxu1 %v12758_v62 }
 0x437   : > { %9249 = vmatpush3.bf16.msra.mxu0 %v9525_v46 }
 0x438   : > { %9250 = vmatprep.subr.bf16.mxu0 %v12758_v62 }
 0x439   : > { %9223 = vmatpush3.bf16.msra.mxu1 %v9514_v58 }
 0x43a   : > { %9224 = vmatprep.subr.bf16.mxu1 %v12758_v62 }
 0x43b   : > { %9251 = vmatpush3.bf16.msra.mxu0 %v9526_v32 }
 0x43c   : > { %9252 = vmatprep.subr.bf16.mxu0 %v12758_v62 }
 0x43d   : > { %9225 = vmatpush3.bf16.msra.mxu1 %v9515_v11 }
 0x43e   : > { %9226 = vmatprep.subr.bf16.mxu1 %v12758_v62 }
 0x43f   : > { %9253 = vmatpush3.bf16.msra.mxu0 %v9527_v18 }
 0x440   : > { %9254 = vmatprep.subr.bf16.mxu0 %v12758_v62 }
 0x441   : > { %9227 = vmatpush3.bf16.msra.mxu1 %v9516_v7 }
 0x442   : > { %9228 = vmatprep.subr.bf16.mxu1 %v12758_v62 }
 0x443   : > { %9255 = vmatpush3.bf16.msra.mxu0 %v9528_v16 }
 0x444   : > { %9256 = vmatprep.subr.bf16.mxu0 %v12758_v62 }
 0x445   : > { %9229 = vmatpush3.bf16.msra.mxu1 %v9517_v55 }
 0x446   : > { %9230 = vmatprep.subr.bf16.mxu1 %v12758_v62 }
 0x447   : > { %9257 = vmatpush3.bf16.msra.mxu0 %v9529_v4 }
 0x448   : > { %9258 = vmatprep.subr.bf16.mxu0 %v12758_v62 }
 0x449   : > { %9231 = vmatpush3.bf16.msra.mxu1 %v9518_v40 }
 0x44a   : > { %9232 = vmatprep.subr.bf16.mxu1 %v12758_v62 }
 0x44b   : > { %9259 = vmatpush3.bf16.msra.mxu0 %v9530_v26 }
 0x44d   : > { %9233 = vmatpush3.bf16.msra.mxu1 %v9520_v38 }
 0x44e   : > { %9264 = vmatprep.subr.bf16.mxu1 %v12758_v62 }
 0x450   : > { %9235 = vmatmul.mubr.bf16.vlgmr.msra.gmra.mrb[60].mxu1 %v8002_v24 }
 0x451   : > { %9280 = vmatprep.mubr.msk.bf16.mxu1 %vm10041_vm1, %v12758_v62  ;;  %9265 = vmatpush3.bf16.msra.mxu1 %v9531_v61  ;;  %v8157_v61 = vld [vmem:[#allocation19] sm:$0x1] }
 0x452   : > { %9266 = vmatprep.subr.bf16.mxu1 %v12758_v62 }
 0x455   : > { %9267 = vmatpush3.bf16.msra.mxu1 %v9532_v3  ;;  %v8160_v3 = vld [vmem:[#allocation17] sm:$0x1] }
 0x456   : > { %9268 = vmatprep.subr.bf16.mxu1 %v12758_v62 }
 0x459   : > { %9269 = vmatpush3.bf16.msra.mxu1 %v9533_v12  ;;  %v9538_v12 = vld [vmem:[#allocation23 + $0x38] sm:$0xff]  }
 0x45a   : > { %9270 = vmatprep.subr.bf16.mxu1 %v12758_v62 }
 0x45d   : > { %9271 = vmatpush3.bf16.msra.mxu1 %v9534_v19 }
 0x45e   : > { %9272 = vmatprep.subr.bf16.mxu1 %v12758_v62 }
 0x4cb   : > { %v7379_v1 = vpop.f32.mrb[40].mxu1 }
 0x4cc   : > { %v9132_v48 = vpop.f32.mrb[41].mxu1 }
 0x4cd   : > { %v7382_v36 = vpop.f32.mrb[42].mxu1 }
 0x4ce   : > { %v9133_v42 = vpop.f32.mrb[43].mxu1 }
 0x4d1   : > { %v7552_v6 = vpop.f32.mrb[40].mxu0 }
 0x4d2   : > { %v9158_v43 = vpop.f32.mrb[41].mxu0 }
 0x4d3   : > { %v7435_v2 = vpop.f32.mrb[44].mxu1  ;;  %v7555_v45 = vpop.f32.mrb[42].mxu0 }
 0x4d4   : > { %v7436_v39 = vadd.f32 %v7435_v2, %v7379_v1  ;;  %v9138_v23 = vpop.f32.mrb[45].mxu1  ;;  %v9159_v47 = vpop.f32.mrb[43].mxu0 }
 0x4d5   : > { %v7438_v49 = vpop.f32.mrb[46].mxu1 }
 0x4d6   : > { %v7439_v52 = vadd.f32 %v7438_v49, %v7382_v36  ;;  %v9139_v50 = vpop.f32.mrb[47].mxu1  ;;  %v9535_v49 = vld [vmem:[#allocation23 + $0x20] sm:$0xff]  }
 0x4d7   : > { %9273 = vmatpush3.bf16.msra.mxu1 %v9535_v49  ;;  %v9537_v50 = vld [vmem:[#allocation23 + $0x30] sm:$0xff]  }
 0x4d8   : > { %9274 = vmatprep.subr.bf16.mxu1 %v12758_v62 }
 0x4d9   : > { %v7786_v20 = vpop.f32.mrb[44].mxu0 }
 0x4da   : > { %v9190_v22 = vpop.f32.mrb[45].mxu0 }
 0x4db   : > { %v7608_v60 = vpop.f32.mrb[48].mxu1  ;;  %v7789_v9 = vpop.f32.mrb[46].mxu0 }
 0x4dc   : > { %v7609_v14 = vadd.f32 %v7608_v60, %v7552_v6  ;;  %v9164_v30 = vpop.f32.mrb[49].mxu1  ;;  %v9191_v13 = vpop.f32.mrb[47].mxu0 }
 0x4dd   : > { %v7611_v44 = vpop.f32.mrb[50].mxu1 }
 0x4de   : > { %v7615_v31 = vadd.f32 %v7609_v14, %v7436_v39  ;;  %v7612_v15 = vadd.f32 %v7611_v44, %v7555_v45  ;;  %v9165_v59 = vpop.f32.mrb[51].mxu1  ;;  %v8288_v44 = vld [vmem:[#allocation25] sm:$0x1] }
 0x4e0   : > { %v7616_v35 = vadd.f32 %v7612_v15, %v7439_v52  ;;  %v9536_v52 = vld [vmem:[#allocation23 + $0x28] sm:$0xff]  }
 0x4e1   : > { %9275 = vmatpush3.bf16.msra.mxu1 %v9536_v52 }
 0x4e2   : > { %9276 = vmatprep.subr.bf16.mxu1 %v12758_v62 }
 0x4e5   : > { %9277 = vmatpush3.bf16.msra.mxu1 %v9537_v50 }
 0x4e6   : > { %9278 = vmatprep.subr.bf16.mxu1 %v12758_v62 }
 0x4e9   : > { %9279 = vmatpush3.bf16.msra.mxu1 %v9538_v12 }
 0x4f9   : > { %v7906_v54 = vpop.f32.mrb[48].mxu0 }
 0x4fa   : > { %v9210_v27 = vpop.f32.mrb[49].mxu0 }
 0x4fb   : > { %v7730_v41 = vpop.f32.mrb[52].mxu1  ;;  %v7909_v57 = vpop.f32.mrb[50].mxu0 }
 0x4fc   : > { %v7787_v63 = vadd.f32 %v7786_v20, %v7730_v41  ;;  %v9184_v37 = vpop.f32.mrb[53].mxu1  ;;  %v9211_v21 = vpop.f32.mrb[51].mxu0  ;;  %v8181_v20 = vld [vmem:[#allocation22] sm:$0x1] }
 0x4fd   : > { %v7733_v5 = vpop.f32.mrb[54].mxu1 }
 0x4fe   : > { %v7793_v28 = vadd.f32 %v7787_v63, %v7615_v31  ;;  %v7790_v56 = vadd.f32 %v7789_v9, %v7733_v5  ;;  %v9185_v29 = vpop.f32.mrb[55].mxu1 }
 0x500   : > { %v7794_v25 = vadd.f32 %v7790_v56, %v7616_v35 }
 0x501   : > { %v8142_v17 = vpop.f32.mrb[52].mxu0 }
 0x502   : > { %v9242_v51 = vpop.f32.mrb[53].mxu0 }
 0x503   : > { %v7964_v10 = vpop.f32.mrb[56].mxu1  ;;  %v8145_v34 = vpop.f32.mrb[54].mxu0 }
 0x504   : > { %v7965_v0 = vadd.f32 %v7964_v10, %v7906_v54  ;;  %v9216_v58 = vpop.f32.mrb[57].mxu1  ;;  %v9243_v11 = vpop.f32.mrb[55].mxu0 }
 0x505   : > { %v7967_v7 = vpop.f32.mrb[58].mxu1 }
 0x506   : > { %v7971_v55 = vadd.f32 %v7965_v0, %v7793_v28  ;;  %v7968_v40 = vadd.f32 %v7967_v7, %v7909_v57  ;;  %v9217_v38 = vpop.f32.mrb[59].mxu1 }
 0x508   : > { %v7972_v8 = vadd.f32 %v7968_v40, %v7794_v25 }
 0x523   : > { %v8086_v24 = vpop.f32.mrb[60].mxu1 }
 0x524   : > { %v8143_v53 = vadd.f32 %v8142_v17, %v8086_v24  ;;  %v9236_v33 = vpop.f32.mrb[61].mxu1 }
 0x525   : > { %v8089_v46 = vpop.f32.mrb[62].mxu1 }
 0x526   : > { %v8149_v32 = vadd.f32 %v8143_v53, %v7971_v55  ;;  %v8146_v18 = vadd.f32 %v8145_v34, %v8089_v46  ;;  %v9237_v16 = vpop.f32.mrb[63].mxu1 }
 0x528   : > { %v8151_v1 = vrot.slane %v8149_v32, 4  ;;  %v8150_v48 = vadd.f32 %v8146_v18, %v7972_v8 }
 0x52a   : > { %v8152_v36 = vmax.f32 %v8149_v32, %v8151_v1  ;;  %v8158_v26 = vadd.f32 %v8157_v61, %v8150_v48 }
 0x52c   : > { %v8153_v42 = vrot.slane %v8152_v36, 2 }
 0x52e   : > { %v8154_v4 = vmax.f32 %v8152_v36, %v8153_v42 }
 0x530   : > { %v8155_v6 = vrot.slane %v8154_v4, 1 }
 0x532   : > { %v8156_v43 = vmax.f32 %v8154_v4, %v8155_v6 }
 0x534   : > { %v8159_v2 = vmax.f32 %v8156_v43, %v8158_v26 }
 0x536   : > { %v8161_v45 = vadd.f32 %v8160_v3, %v8159_v2 }
 0x538   : > { %9555 = vtanh.f32 %v8161_v45 }
 0x542   : > { %v9556_v39 = vpop.eup %9555 }
 0x543   : > { %9557 = vtanh.f32 %v9556_v39 }
 0x54d   : > { %v9558_v23 = vpop.eup %9557 }
 0x54e   : > { %v8164_v47 = vpack.c.bf16 %v9558_v23, %v9558_v23 }
 0x550   : > { %9261 = vmatmul.mubr.bf16.vlgmr.msra.gmra.mrb[56].mxu0 %v8164_v47 }
 0x623   : > { %v8264_v22 = vpop.f32.mrb[56].mxu0 }
 0x624   : > { %v8265_v19 = vadd.f32 %v8264_v22, %v8181_v20  ;;  %v9262_v60 = vpop.f32.mrb[57].mxu0 }
 0x625   : > { %v8267_v9 = vpop.f32.mrb[58].mxu0 }
 0x626   : > { %9559 = vtanh.f32 %v8265_v19  ;;  %v9263_v14 = vpop.f32.mrb[59].mxu0 }
 0x630   : > { %v9560_v30 = vpop.eup %9559 }
 0x631   : > { %v8271_v13 = vpack.c.bf16 %v9560_v30, %v9560_v30 }
 0x633   : > { %9281 = vmatmul.mubr.bf16.vlgmr.msra.gmra.mrb[64].mxu1 %v8271_v13 }
 0x706   : > { %v8371_v31 = vpop.f32.mrb[64].mxu1 }
 0x707   : > { %v8372_v15 = vadd.f32 %v8371_v31, %v8288_v44  ;;  %v9282_v62 = vpop.f32.mrb[65].mxu1 }
 0x708   : > { %v8374_v59 = vpop.f32.mrb[66].mxu1 }
 0x709   : > { %8377 = vst [vmem:[%s641_s16] sm:$0x1] %v8372_v15  ;;  %v9283_v35 = vpop.f32.mrb[67].mxu1 }
 0x70a   : > { %9942 = shalt.err (!%p9939_p1)
}
 0x70b   : > { %s9943_s29 = scalar_lea.hbm %s12407_s19, 16  ;;  %s9947_s6 = scalar_lea.hbm %s12795_s7, 32 }
 0x70c   : > { %p9944_p3 = scmp.ne.s32.totalorder %s12407_s19, %s9943_s29  ;;  %p9948_p10 = scmp.lt.u32.totalorder %s12407_s19, %s12795_s7 }
 0x70d   : > { %p9949_p5 = scmp.lt.u32.totalorder %s9947_s6, %s9943_s29  ;;  %p9951_p0 = scmp.lt.u32.totalorder %s9943_s29, %s12407_s19 }
 0x70e   : > { %p9945_p2 = pnand %p9944_p3, %p12796_p7 }
 0x70f   : > { %p9950_p9 = por %p9949_p5, %p9948_p10 }
 0x710   : > { %p9946_p6 = pneg %p9945_p2 }
 0x711   : > { %p9952_p11 = por %p9951_p0, %p9950_p9 }
 0x713   : > { %p9953_p8 = pnand %p9952_p11, %p9946_p6 }
 0x715   : > { %9956 = shalt.err (!%p9953_p8)
}
 0x716   : > { %9352 = dma.vmem_to_hbm [thread:$0]  (%p12796_p7), %s12409_s1, 16, %s12407_s19, %s8379_s30  }
 0x717 PF: > { %s8403_s17 = sand.u32 1, %s10011_s25   ;;  %p12797_p4 = scmp.ne.s32.totalorder %s12567_s2, 0 }
 0x718   : > { %p12798_p12 = scmp.ge.s32.totalorder %s10023_s28, 2  ;;  %s8404_s16 = scalar_lea.sflag [#allocation7], %s8403_s17 }
 0x71a   : > { %p9396_p13 = pnand %p12798_p12, %p12797_p4 }
 0x71c   : > { %10006 = dma.done.wait (!%p9396_p13), %s8404_s16, 16  }
 0x71d   : > { %10008 = vsyncadd (!%p9396_p13), %s8404_s16, 4294967280  ;;  %p34_p1 = scmp.ge.s32.totalorder %s10397_s18, 4   ;;  %s12799_s25 = smov %s10015_s26 }
 0x71e   : > { %s12800_s26 = smov %s10019_s27  ;;  %s12801_s27 = smov %s10409_s15 }
 0x71f   : > { %s12802_s28 = smov %s10397_s18  ;;  %36 = sbr.rel (!%p34_p1) target bundleno = 24 (0x18), region = 186 }
 0x726   :  { %8408 = vsyncpa [#allocation6], 1 }
 0x727   :  { %8410 = vsyncpa [#allocation6 + $0x1], 1 }
 0x728   :  { %8411 = vsyncpa [#allocation9], 1 }
 0x729   :  { %8413 = vsyncpa [#allocation9 + $0x1], 1 }
 0x72a   :  { %8414 = vsyncpa [#allocation12], 1 }
 0x72b   :  { %8415 = vsyncpa [#allocation15], 1 }
 0x72c   :  { %8416 = vsyncpa [#allocation18], 1 }
 0x72d   :  { %8417 = vsyncpa [#allocation21], 1 }
 0x72e   :  { %8418 = vsyncpa [#allocation24], 1 }
 0x72f   :  { %8419 = vsyncpa [#allocation7], 1 }
 0x730   :  { %8421 = vsyncpa [#allocation7 + $0x1], 1 }

// kernel: tpu_custom_call.1
= control target key start
LH: loop header
LB: loop body
LE: loop exit
PB: predicated region body
PF: predicated region fallthrough
CT: control target
= control target key end

     0   :  { %s12451_s0 = inlined_call_operand.hbm [shape: bf16[16,8,8], index: 0, kind: input, shape index: {}]   ;;  %s12452_s1 = inlined_call_operand.hbm [shape: bf16[2,8,16], index: 1, kind: input, shape index: {}]   ;;  %s12453_s2 = inlined_call_operand.hbm [shape: bf16[5,8,128], index: 2, kind: input, shape index: {}]   ;;  %s12454_s3 = inlined_call_operand.hbm [shape: f32[1,128], index: 3, kind: input, shape index: {}]   ;;  %s12455_s4 = inlined_call_operand.hbm [shape: f32[1,128], index: 4, kind: input, shape index: {}]   ;;  %s12456_s5 = inlined_call_operand.hbm [shape: bf16[5,16,128], index: 5, kind: input, shape index: {}]   ;;  %s12457_s6 = inlined_call_operand.hbm [shape: bf16[5,128,128], index: 6, kind: input, shape index: {}]   ;;  %s12458_s7 = inlined_call_operand.hbm [shape: f32[1,128], index: 7, kind: input, shape index: {}]   ;;  %s12459_s8 = inlined_call_operand.hbm [shape: f32[1,128], index: 8, kind: input, shape index: {}]   ;;  %s12460_s9 = inlined_call_operand.hbm [shape: bf16[128,128], index: 9, kind: input, shape index: {}]   ;;  %s12461_s10 = inlined_call_operand.hbm [shape: f32[1,128], index: 10, kind: input, shape index: {}]   ;;  %s12462_s11 = inlined_call_operand.hbm [shape: bf16[128,128], index: 11, kind: input, shape index: {}]   ;;  %s12463_s12 = inlined_call_operand.hbm [shape: f32[1,128], index: 12, kind: input, shape index: {}]   ;;  %s12464_s13 = inlined_call_operand.hbm [shape: f32[2,1,128], index: 13, kind: output, shape index: {}]  }
   0x1   :  { %12539 = sst [smem:[#allocation88_spill]] %s12451_s0 }
   0x2   :  { %12540 = sst [smem:[#allocation89_spill]] %s12452_s1 }
   0x3   :  { %12541 = sst [smem:[#allocation90_spill]] %s12453_s2 }
   0x4   :  { %12542 = sst [smem:[#allocation91_spill]] %s12454_s3 }
   0x5   :  { %12543 = sst [smem:[#allocation92_spill]] %s12455_s4 }
   0x6   :  { %12544 = sst [smem:[#allocation93_spill]] %s12456_s5 }
   0x7   :  { %12545 = sst [smem:[#allocation94_spill]] %s12457_s6 }
   0x8   :  { %12546 = sst [smem:[#allocation95_spill]] %s12458_s7 }
   0x9   :  { %12547 = sst [smem:[#allocation96_spill]] %s12459_s8 }
   0xa   :  { %12548 = sst [smem:[#allocation97_spill]] %s12460_s9 }
   0xb   :  { %12549 = sst [smem:[#allocation98_spill]] %s12464_s13 }
   0xc   :  { %18 = vsyncpa [#allocation6], 0 }
   0xd   :  { %20 = vsyncpa [#allocation6 + $0x1], 0 }
   0xe   :  { %21 = vsyncpa [#allocation9], 0 }
   0xf   :  { %23 = vsyncpa [#allocation9 + $0x1], 0 }
  0x10   :  { %24 = vsyncpa [#allocation12], 0 }
  0x11   :  { %25 = vsyncpa [#allocation15], 0 }
  0x12   :  { %26 = vsyncpa [#allocation18], 0 }
  0x13   :  { %27 = vsyncpa [#allocation21], 0 }
  0x14   :  { %28 = vsyncpa [#allocation24], 0 }
  0x15   :  { %29 = vsyncpa [#allocation7], 0 }
  0x16   :  { %31 = vsyncpa [#allocation7 + $0x1], 0  ;;  %s10115_s25 = smov 0   ;;  %s10117_s26 = smov 0  }
  0x17   :  { %s10119_s27 = smov 0   ;;  %s10121_s28 = smov 0  }
  0x18 LB: > { %s10025_s29 = smov [#allocation10]   ;;  %s10136_s14 = sadd.s32 4294967295, %s10023_s28   ;;  %s10023_s28 = sphi %s10121_s28, %s12802_s28   ;;  %s10019_s27 = sphi %s10119_s27, %s12801_s27   ;;  %s10015_s26 = sphi %s10117_s26, %s12800_s26   ;;  %s10011_s25 = sphi %s10115_s25, %s12799_s25  }
  0x19   : > { %s363_s30 = sshll.u32 %s10025_s29, 4  ;;  %12550 = sst [smem:[#allocation36_spill]] %s10136_s14  ;;  %s10141_s30 = int_to_ptr.vmem [resolvable:$true] %s363_s30 }
  0x1a   : > { %p8585_p0 = scmp.ge.s32.totalorder %s10023_s28, 1  ;;  %p12472_p1 = scmp.eq.s32.totalorder %s10136_s14, 0 }
  0x1b   : > { %p351_p2 = scmp.lt.s32.totalorder %s10023_s28, 3  ;;  %s10026_s16 = smov [#allocation11]  }
  0x1c   : > { %s377_s17 = sshll.u32 %s10026_s16, 4  ;;  %s10027_s19 = smov [#allocation14]   ;;  %s10156_s17 = int_to_ptr.vmem [resolvable:$true] %s377_s17 }
  0x1d   : > { %p10143_p3 = pnand %p8585_p0, %p351_p2  ;;  %s398_s20 = sshll.u32 %s10027_s19, 4  ;;  %s10158_s20 = int_to_ptr.vmem [resolvable:$true] %s398_s20 }
  0x1e   : > { %s12554_s2 = sld [smem:[#allocation90_spill]] }
  0x1f   : > { %s12551_s15 = scalar_select %p10143_p3, 1, 0 }
  0x20   : > { %p9354_p5 = pneg %p10143_p3 }
  0x21   : > { %12552 = sst [smem:[#allocation37_spill]] %s12551_s15 }
  0x22   : > { %p10152_p6 = pnand %p9354_p5, %p12472_p1 }
  0x24   : > { %s9561_s23 = scalar_lea.hbm %s12554_s2, 320  ;;  %p10168_p8 = pneg %p10152_p6 }
  0x25   : > { %p9562_p7 = scmp.ne.s32.totalorder %s12554_s2, %s9561_s23  ;;  %p9568_p11 = scmp.lt.u32.totalorder %s9561_s23, %s12554_s2 }
  0x27   : > { %p9564_p9 = pnand %p10168_p8, %p9562_p7 }
  0x29   : > { %p9565_p10 = pneg %p9564_p9 }
  0x2b   : > { %p9570_p12 = pnand %p9568_p11, %p9565_p10 }
  0x2d   : > { %9573 = shalt.err (!%p9570_p12)
}
  0x2e   : > { %s9574_s21 = scalar_lea.vmem %s10141_s30, 320  ;;  %p9582_p5 = scmp.lt.s32.totalorder %s10141_s30, %s10141_s30 }
  0x2f   : > { %p9575_p13 = scmp.ne.s32.totalorder %s10141_s30, %s9574_s21  ;;  %p9583_p4 = scmp.lt.s32.totalorder %s9574_s21, %s9574_s21 }
  0x31   : > { %p9577_p0 = pnand %p9575_p13, %p10168_p8  ;;  %p9584_p7 = por %p9583_p4, %p9582_p5 }
  0x33   : > { %p9578_p2 = pneg %p9577_p0 }
  0x35   : > { %p9585_p9 = pnand %p9584_p7, %p9578_p2 }
  0x37   : > { %9588 = shalt.err (!%p9585_p9)
}
  0x38   : > { %s12474_s22 = smov 64   ;;  %s12475_s13 = smov 4  }
  0x39   : > { %9357 = dma.hbm_to_vmem [thread:$0]  (!%p10152_p6), %s12554_s2, 320, %s10141_s30, [#allocation9], %s12474_s22, %s12474_s22, %s12475_s13  }
  0x3a   : > { %s12556_s3 = sld [smem:[#allocation91_spill]] }
  0x40   : > { %s9589_s21 = scalar_lea.hbm %s12556_s3, 16 }
  0x41   : > { %p9590_p4 = scmp.ne.s32.totalorder %s12556_s3, %s9589_s21  ;;  %p9596_p12 = scmp.lt.u32.totalorder %s9589_s21, %s12556_s3 }
  0x43   : > { %p9592_p10 = pnand %p9590_p4, %p10168_p8 }
  0x45   : > { %p9593_p11 = pneg %p9592_p10 }
  0x47   : > { %p9598_p13 = pnand %p9596_p12, %p9593_p11 }
  0x49   : > { %9601 = shalt.err (!%p9598_p13)
}
  0x4a   : > { %s9602_s30 = scalar_lea.vmem %s10156_s17, 16  ;;  %s9609_s1 = scalar_lea.vmem %s10156_s17, 32 }
  0x4b   : > { %p9603_p0 = scmp.ne.s32.totalorder %s10156_s17, %s9602_s30  ;;  %p9610_p7 = scmp.lt.s32.totalorder %s10156_s17, %s10156_s17 }
  0x4c   : > { %p9611_p9 = scmp.lt.s32.totalorder %s9609_s1, %s9602_s30 }
  0x4d   : > { %p9605_p2 = pnand %p9603_p0, %p10168_p8 }
  0x4e   : > { %p9612_p4 = por %p9611_p9, %p9610_p7 }
  0x4f   : > { %p9606_p5 = pneg %p9605_p2 }
  0x51   : > { %p9613_p10 = pnand %p9612_p4, %p9606_p5 }
  0x53   : > { %9616 = shalt.err (!%p9613_p10)
}
  0x54   : > { %9360 = dma.hbm_to_vmem [thread:$0]  (!%p10152_p6), %s12556_s3, 16, %s10156_s17, [#allocation12]  }
  0x55   : > { %s12557_s5 = sld [smem:[#allocation93_spill]] }
  0x5b   : > { %s9617_s24 = scalar_lea.hbm %s12557_s5, 640 }
  0x5c   : > { %p9618_p11 = scmp.ne.s32.totalorder %s12557_s5, %s9617_s24  ;;  %p9624_p0 = scmp.lt.u32.totalorder %s9617_s24, %s12557_s5 }
  0x5e   : > { %p9620_p12 = pnand %p9618_p11, %p10168_p8 }
  0x60   : > { %p9621_p13 = pneg %p9620_p12 }
  0x62   : > { %p9626_p2 = pnand %p9624_p0, %p9621_p13 }
  0x64   : > { %9629 = shalt.err (!%p9626_p2)
}
  0x65   : > { %s9630_s17 = scalar_lea.vmem %s10158_s20, 640  ;;  %p9638_p4 = scmp.lt.s32.totalorder %s10158_s20, %s10158_s20 }
  0x66   : > { %p9631_p5 = scmp.ne.s32.totalorder %s10158_s20, %s9630_s17  ;;  %p9639_p10 = scmp.lt.s32.totalorder %s9630_s17, %s9630_s17 }
  0x68   : > { %p9633_p7 = pnand %p9631_p5, %p10168_p8  ;;  %p9640_p11 = por %p9639_p10, %p9638_p4 }
  0x6a   : > { %p9634_p9 = pneg %p9633_p7 }
  0x6c   : > { %p9641_p12 = pnand %p9640_p11, %p9634_p9 }
  0x6e   : > { %9644 = shalt.err (!%p9641_p12)
}
  0x6f   : > { %9366 = dma.hbm_to_vmem [thread:$0]  (!%p10152_p6), %s12557_s5, 640, %s10158_s20, [#allocation15], %s12474_s22, %s12474_s22, %s12475_s13  }
  0x70   : > { %s10030_s14 = smov [#allocation17]   ;;  %s10031_s23 = smov [#allocation20]  }
  0x71   : > { %s425_s15 = sshll.u32 %s10030_s14, 4  ;;  %s446_s24 = sshll.u32 %s10031_s23, 4  ;;  %s426_s15 = int_to_ptr.vmem [resolvable:$true] %s425_s15  ;;  %s447_s24 = int_to_ptr.vmem [resolvable:$true] %s446_s24 }
  0x72   : > { %s12558_s7 = sld [smem:[#allocation95_spill]] }
  0x78   : > { %s9645_s21 = scalar_lea.hbm %s12558_s7, 16 }
  0x79   : > { %p9646_p13 = scmp.ne.s32.totalorder %s12558_s7, %s9645_s21  ;;  %p9652_p5 = scmp.lt.u32.totalorder %s9645_s21, %s12558_s7 }
  0x7b   : > { %p9648_p0 = pnand %p9646_p13, %p10168_p8 }
  0x7d   : > { %p9649_p2 = pneg %p9648_p0 }
  0x7f   : > { %p9654_p7 = pnand %p9652_p5, %p9649_p2 }
  0x81   : > { %9657 = shalt.err (!%p9654_p7)
}
  0x82   : > { %s9658_s20 = scalar_lea.vmem %s426_s15, 16  ;;  %s9665_s0 = scalar_lea.vmem %s426_s15, 32 }
  0x83   : > { %p9659_p9 = scmp.ne.s32.totalorder %s426_s15, %s9658_s20  ;;  %p9666_p11 = scmp.lt.s32.totalorder %s426_s15, %s426_s15 }
  0x84   : > { %p9667_p12 = scmp.lt.s32.totalorder %s9665_s0, %s9658_s20 }
  0x85   : > { %p9661_p4 = pnand %p9659_p9, %p10168_p8 }
  0x86   : > { %p9668_p1 = por %p9667_p12, %p9666_p11 }
  0x87   : > { %p9662_p10 = pneg %p9661_p4 }
  0x89   : > { %p9669_p3 = pnand %p9668_p1, %p9662_p10 }
  0x8b   : > { %9672 = shalt.err (!%p9669_p3)
}
  0x8c   : > { %9372 = dma.hbm_to_vmem [thread:$0]  (!%p10152_p6), %s12558_s7, 16, %s426_s15, [#allocation18]  }
  0x8d   : > { %s12559_s9 = sld [smem:[#allocation97_spill]] }
  0x93   : > { %s9673_s19 = scalar_lea.hbm %s12559_s9, 1024 }
  0x94   : > { %p9674_p13 = scmp.ne.s32.totalorder %s12559_s9, %s9673_s19  ;;  %p9680_p3 = scmp.lt.u32.totalorder %s9673_s19, %s12559_s9 }
  0x96   : > { %p9676_p0 = pnand %p9674_p13, %p10168_p8 }
  0x98   : > { %p9677_p1 = pneg %p9676_p0 }
  0x9a   : > { %p9682_p2 = pnand %p9680_p3, %p9677_p1 }
  0x9c   : > { %9685 = shalt.err (!%p9682_p2)
}
  0x9d   : > { %s9686_s20 = scalar_lea.vmem %s447_s24, 1024  ;;  %p9694_p4 = scmp.lt.s32.totalorder %s447_s24, %s447_s24 }
  0x9e   : > { %p9687_p5 = scmp.ne.s32.totalorder %s447_s24, %s9686_s20  ;;  %p9695_p10 = scmp.lt.s32.totalorder %s9686_s20, %s9686_s20 }
  0xa0   : > { %p9689_p7 = pnand %p9687_p5, %p10168_p8  ;;  %p9696_p11 = por %p9695_p10, %p9694_p4 }
  0xa2   : > { %p9690_p9 = pneg %p9689_p7 }
  0xa4   : > { %p9697_p12 = pnand %p9696_p11, %p9690_p9 }
  0xa6   : > { %9700 = shalt.err (!%p9697_p12)
}
  0xa7   : > { %9378 = dma.hbm_to_vmem [thread:$0]  (!%p10152_p6), %s12559_s9, 1024, %s447_s24, [#allocation21], %s12474_s22, %s12474_s22, %s12475_s13  }
  0xa8   : > { %s10032_s14 = smov [#allocation23]   ;;  %s10033_s2 = smov [#allocation13]  }
  0xa9   : > { %s470_s23 = sshll.u32 %s10032_s14, 4  ;;  %s388_s29 = sshll.u32 %s10033_s2, 4  ;;  %s471_s23 = int_to_ptr.vmem [resolvable:$true] %s470_s23  ;;  %s389_s29 = int_to_ptr.vmem [resolvable:$true] %s388_s29 }
  0xaa   : > { %s9701_s30 = scalar_lea.hbm %s12462_s11, 1024 }
  0xab   : > { %p9702_p13 = scmp.ne.s32.totalorder %s12462_s11, %s9701_s30  ;;  %p9708_p3 = scmp.lt.u32.totalorder %s9701_s30, %s12462_s11 }
  0xad   : > { %p9704_p0 = pnand %p9702_p13, %p10168_p8 }
  0xaf   : > { %p9705_p1 = pneg %p9704_p0 }
  0xb1   : > { %p9710_p2 = pnand %p9708_p3, %p9705_p1 }
  0xb3   : > { %9713 = shalt.err (!%p9710_p2)
}
  0xb4   : > { %s9714_s24 = scalar_lea.vmem %s471_s23, 1024  ;;  %p9722_p4 = scmp.lt.s32.totalorder %s471_s23, %s471_s23 }
  0xb5   : > { %p9715_p5 = scmp.ne.s32.totalorder %s471_s23, %s9714_s24  ;;  %p9723_p10 = scmp.lt.s32.totalorder %s9714_s24, %s9714_s24 }
  0xb7   : > { %p9717_p7 = pnand %p9715_p5, %p10168_p8  ;;  %p9724_p11 = por %p9723_p10, %p9722_p4 }
  0xb9   : > { %p9718_p9 = pneg %p9717_p7 }
  0xbb   : > { %p9725_p12 = pnand %p9724_p11, %p9718_p9 }
  0xbd   : > { %9728 = shalt.err (!%p9725_p12)
}
  0xbe   : > { %9384 = dma.hbm_to_vmem [thread:$0]  (!%p10152_p6), %s12462_s11, 1024, %s471_s23, [#allocation24], %s12474_s22, %s12474_s22, %s12475_s13  }
  0xbf   : > { %s12560_s4 = sld [smem:[#allocation92_spill]] }
  0xc5   : > { %s9729_s21 = scalar_lea.hbm %s12560_s4, 16 }
  0xc6   : > { %p9730_p13 = scmp.ne.s32.totalorder %s12560_s4, %s9729_s21  ;;  %p9736_p3 = scmp.lt.u32.totalorder %s9729_s21, %s12560_s4 }
  0xc8   : > { %p9732_p0 = pnand %p9730_p13, %p10168_p8 }
  0xca   : > { %p9733_p1 = pneg %p9732_p0 }
  0xcc   : > { %p9738_p2 = pnand %p9736_p3, %p9733_p1 }
  0xce   : > { %9741 = shalt.err (!%p9738_p2)
}
  0xcf   : > { %s9742_s15 = scalar_lea.vmem %s389_s29, 16  ;;  %s9749_s23 = scalar_lea.vmem %s389_s29, 32 }
  0xd0   : > { %p9743_p5 = scmp.ne.s32.totalorder %s389_s29, %s9742_s15  ;;  %p9750_p4 = scmp.lt.s32.totalorder %s389_s29, %s389_s29 }
  0xd1   : > { %p9751_p10 = scmp.lt.s32.totalorder %s9749_s23, %s9742_s15 }
  0xd2   : > { %p9745_p7 = pnand %p9743_p5, %p10168_p8 }
  0xd3   : > { %p9752_p11 = por %p9751_p10, %p9750_p4 }
  0xd4   : > { %p9746_p9 = pneg %p9745_p7 }
  0xd6   : > { %p9753_p12 = pnand %p9752_p11, %p9746_p9 }
  0xd8   : > { %9756 = shalt.err (!%p9753_p12)
}
  0xd9   : > { %9363 = dma.hbm_to_vmem [thread:$0]  (!%p10152_p6), %s12560_s4, 16, %s389_s29, [#allocation12]  }
  0xda   : > { %s10034_s14 = smov [#allocation16]   ;;  %s10035_s19 = smov [#allocation19]  }
  0xdb   : > { %s411_s2 = sshll.u32 %s10034_s14, 4  ;;  %s436_s21 = sshll.u32 %s10035_s19, 4  ;;  %s412_s2 = int_to_ptr.vmem [resolvable:$true] %s411_s2  ;;  %s437_s21 = int_to_ptr.vmem [resolvable:$true] %s436_s21 }
  0xdc   : > { %s12561_s6 = sld [smem:[#allocation94_spill]] }
  0xe2   : > { %s9757_s1 = scalar_lea.hbm %s12561_s6, 5120 }
  0xe3   : > { %p9758_p13 = scmp.ne.s32.totalorder %s12561_s6, %s9757_s1  ;;  %p9764_p3 = scmp.lt.u32.totalorder %s9757_s1, %s12561_s6 }
  0xe5   : > { %p9760_p0 = pnand %p9758_p13, %p10168_p8 }
  0xe7   : > { %p9761_p1 = pneg %p9760_p0 }
  0xe9   : > { %p9766_p2 = pnand %p9764_p3, %p9761_p1 }
  0xeb   : > { %9769 = shalt.err (!%p9766_p2)
}
  0xec   : > { %s9770_s29 = scalar_lea.vmem %s412_s2, 5120  ;;  %p9778_p4 = scmp.lt.s32.totalorder %s412_s2, %s412_s2 }
  0xed   : > { %p9771_p5 = scmp.ne.s32.totalorder %s412_s2, %s9770_s29  ;;  %p9779_p10 = scmp.lt.s32.totalorder %s9770_s29, %s9770_s29 }
  0xef   : > { %p9773_p7 = pnand %p9771_p5, %p10168_p8  ;;  %p9780_p11 = por %p9779_p10, %p9778_p4 }
  0xf1   : > { %p9774_p9 = pneg %p9773_p7 }
  0xf3   : > { %p9781_p12 = pnand %p9780_p11, %p9774_p9 }
  0xf5   : > { %9784 = shalt.err (!%p9781_p12)
}
  0xf6   : > { %9369 = dma.hbm_to_vmem [thread:$0]  (!%p10152_p6), %s12561_s6, 5120, %s412_s2, [#allocation15], %s12474_s22, %s12474_s22, %s12475_s13  }
  0xf7   : > { %s12562_s8 = sld [smem:[#allocation96_spill]] }
  0xfd   : > { %s9785_s17 = scalar_lea.hbm %s12562_s8, 16 }
  0xfe   : > { %p9786_p13 = scmp.ne.s32.totalorder %s12562_s8, %s9785_s17  ;;  %p9792_p3 = scmp.lt.u32.totalorder %s9785_s17, %s12562_s8 }
 0x100   : > { %p9788_p0 = pnand %p9786_p13, %p10168_p8 }
 0x102   : > { %p9789_p1 = pneg %p9788_p0 }
 0x104   : > { %p9794_p2 = pnand %p9792_p3, %p9789_p1 }
 0x106   : > { %9797 = shalt.err (!%p9794_p2)
}
 0x107   : > { %s9798_s24 = scalar_lea.vmem %s437_s21, 16  ;;  %s9805_s2 = scalar_lea.vmem %s437_s21, 32 }
 0x108   : > { %p9799_p5 = scmp.ne.s32.totalorder %s437_s21, %s9798_s24  ;;  %p9806_p4 = scmp.lt.s32.totalorder %s437_s21, %s437_s21 }
 0x109   : > { %p9807_p10 = scmp.lt.s32.totalorder %s9805_s2, %s9798_s24 }
 0x10a   : > { %p9801_p7 = pnand %p9799_p5, %p10168_p8 }
 0x10b   : > { %p9808_p11 = por %p9807_p10, %p9806_p4 }
 0x10c   : > { %p9802_p9 = pneg %p9801_p7 }
 0x10e   : > { %p9809_p12 = pnand %p9808_p11, %p9802_p9 }
 0x110   : > { %9812 = shalt.err (!%p9809_p12)
}
 0x111   : > { %9375 = dma.hbm_to_vmem [thread:$0]  (!%p10152_p6), %s12562_s8, 16, %s437_s21, [#allocation18]  }
 0x112   : > { %s10036_s14 = smov [#allocation22]   ;;  %s10037_s30 = smov [#allocation25]  }
 0x113   : > { %s460_s19 = sshll.u32 %s10036_s14, 4  ;;  %s484_s17 = sshll.u32 %s10037_s30, 4  ;;  %s461_s19 = int_to_ptr.vmem [resolvable:$true] %s460_s19  ;;  %s485_s17 = int_to_ptr.vmem [resolvable:$true] %s484_s17 }
 0x114   : > { %s9813_s15 = scalar_lea.hbm %s12461_s10, 16 }
 0x115   : > { %p9814_p13 = scmp.ne.s32.totalorder %s12461_s10, %s9813_s15  ;;  %p9820_p3 = scmp.lt.u32.totalorder %s9813_s15, %s12461_s10 }
 0x117   : > { %p9816_p0 = pnand %p9814_p13, %p10168_p8 }
 0x119   : > { %p9817_p1 = pneg %p9816_p0 }
 0x11b   : > { %p9822_p2 = pnand %p9820_p3, %p9817_p1 }
 0x11d   : > { %9825 = shalt.err (!%p9822_p2)
}
 0x11e   : > { %s9826_s21 = scalar_lea.vmem %s461_s19, 16  ;;  %s9833_s0 = scalar_lea.vmem %s461_s19, 32 }
 0x11f   : > { %p9827_p5 = scmp.ne.s32.totalorder %s461_s19, %s9826_s21  ;;  %p9834_p4 = scmp.lt.s32.totalorder %s461_s19, %s461_s19 }
 0x120   : > { %p9835_p10 = scmp.lt.s32.totalorder %s9833_s0, %s9826_s21 }
 0x121   : > { %p9829_p7 = pnand %p9827_p5, %p10168_p8 }
 0x122   : > { %p9836_p11 = por %p9835_p10, %p9834_p4 }
 0x123   : > { %p9830_p9 = pneg %p9829_p7 }
 0x125   : > { %p9837_p12 = pnand %p9836_p11, %p9830_p9 }
 0x127   : > { %9840 = shalt.err (!%p9837_p12)
}
 0x128   : > { %9381 = dma.hbm_to_vmem [thread:$0]  (!%p10152_p6), %s12461_s10, 16, %s461_s19, [#allocation21]  }
 0x129   : > { %s9841_s15 = scalar_lea.hbm %s12463_s12, 16 }
 0x12a   : > { %p9842_p13 = scmp.ne.s32.totalorder %s12463_s12, %s9841_s15  ;;  %p9848_p3 = scmp.lt.u32.totalorder %s9841_s15, %s12463_s12 }
 0x12c   : > { %p9844_p0 = pnand %p9842_p13, %p10168_p8 }
 0x12e   : > { %p9845_p1 = pneg %p9844_p0 }
 0x130   : > { %p9850_p2 = pnand %p9848_p3, %p9845_p1 }
 0x132   : > { %9853 = shalt.err (!%p9850_p2)
}
 0x133   : > { %s9854_s21 = scalar_lea.vmem %s485_s17, 16  ;;  %s9861_s19 = scalar_lea.vmem %s485_s17, 32 }
 0x134   : > { %p9855_p5 = scmp.ne.s32.totalorder %s485_s17, %s9854_s21  ;;  %p9862_p4 = scmp.lt.s32.totalorder %s485_s17, %s485_s17 }
 0x135   : > { %p9863_p10 = scmp.lt.s32.totalorder %s9861_s19, %s9854_s21 }
 0x136   : > { %p9857_p7 = pnand %p9855_p5, %p10168_p8 }
 0x137   : > { %p9864_p11 = por %p9863_p10, %p9862_p4 }
 0x138   : > { %p9858_p9 = pneg %p9857_p7 }
 0x13a   : > { %p9865_p12 = pnand %p9864_p11, %p9858_p9 }
 0x13c   : > { %9868 = shalt.err (!%p9865_p12)
}
 0x13d   : > { %s12563_s16 = sld [smem:[#allocation36_spill]]  ;;  %s8584_s30 = sadd.s32 4294967294, %s10023_s28  }
 0x13e   : > { %9387 = dma.hbm_to_vmem [thread:$0]  (!%p10152_p6), %s12463_s12, 16, %s485_s17, [#allocation24]  }
 0x13f   : > { %s10397_s18 = sadd.s32 1, %s10023_s28   ;;  %s44_s1 = sadd.s32 1, %s10019_s27 }
 0x140   : > { %s41_s20 = ssub.s32 %s10023_s28, %s10397_s18  ;;  %p51_p8 = scmp.ne.s32.totalorder %s10019_s27, %s10015_s26 }
 0x141   : > { %p42_p13 = scmp.eq.s32.totalorder %s41_s20, 0  ;;  %p52_p0 = scmp.eq.s32.totalorder %s10023_s28, 0 }
 0x142   : > { %p57_p1 = scmp.ne.s32.totalorder %s10015_s26, %s10011_s25  ;;  %p344_p9 = scmp.eq.s32.totalorder %s8584_s30, 1 }
 0x143   : > { %p338_p3 = scmp.eq.s32.totalorder %s12563_s16, 1  ;;  %p53_p2 = por %p52_p0, %p51_p8 }
 0x144   : > { %s10409_s15 = scalar_select %p42_p13, %s10019_s27, %s44_s1  }
 0x145   : > { %p12564_p5 = scmp.eq.s32.totalorder %s12563_s16, 0  ;;  %p10417_p6 = por %p338_p3, %p51_p8 }
 0x146   : > { %p9410_p4 = scmp.lt.s32.totalorder %s10023_s28, 2  ;;  %s10423_s24 = sand.u32 1, %s10019_s27  }
 0x147   : > { %p10413_p7 = por %p12564_p5, %p57_p1  ;;  %p10425_p10 = por %p344_p9, %p57_p1 }
 0x148   : > { %s12566_s23 = scalar_select %p10417_p6, 1, 0 }
 0x149   : > { %s12565_s17 = scalar_select %p10413_p7, 1, 0 }
 0x14a   : > { %s12567_s2 = scalar_select %p10425_p10, 1, 0 }
 0x14b   : > { %s8598_s29 = sshll.u32 %s10423_s24, 5  ;;  %s8892_s21 = sshll.u32 %s10023_s28, 9 }
 0x14c   : > { %s12568_s14 = sld [smem:[#allocation88_spill]]  ;;  %s499_s30 = scalar_lea.vmem [#allocation5], %s8598_s29 }
 0x14d   : > { %s506_s1 = sshll.u32 %s499_s30, 4  ;;  %p10436_p11 = pnand %p9410_p4, %p53_p2  ;;  %s10440_s1 = int_to_ptr.vmem [resolvable:$true] %s506_s1 }
 0x14e   : > { %s496_s13 = scalar_lea.sflag [#allocation6], %s10423_s24 }
 0x14f   : > { %p9871_p8 = pneg %p10436_p11 }
 0x152   : > { %s10434_s16 = scalar_lea.hbm %s12568_s14, %s8892_s21  ;;  %s9874_s19 = scalar_lea.hbm %s12568_s14, 1024 }
 0x153   : > { %s9869_s3 = scalar_lea.hbm %s10434_s16, 512  ;;  %p9875_p1 = scmp.lt.u32.totalorder %s10434_s16, %s12568_s14 }
 0x154   : > { %p9870_p12 = scmp.ne.s32.totalorder %s10434_s16, %s9869_s3  ;;  %p9876_p3 = scmp.lt.u32.totalorder %s9874_s19, %s9869_s3 }
 0x155   : > { %p9878_p5 = scmp.lt.u32.totalorder %s9869_s3, %s10434_s16 }
 0x156   : > { %p9872_p13 = pnand %p9871_p8, %p9870_p12  ;;  %p9877_p2 = por %p9876_p3, %p9875_p1 }
 0x158   : > { %p9873_p0 = pneg %p9872_p13  ;;  %p9879_p9 = por %p9878_p5, %p9877_p2 }
 0x15a   : > { %p9880_p4 = pnand %p9879_p9, %p9873_p0 }
 0x15c   : > { %9883 = shalt.err (!%p9880_p4)
}
 0x15d   : > { %s9884_s22 = scalar_lea.vmem %s10440_s1, 512  ;;  %s10038_s29 = smov [#allocation5]  }
 0x15e   : > { %p9885_p12 = scmp.ne.s32.totalorder %s10440_s1, %s9884_s22  ;;  %s9889_s21 = sshll.u32 %s10038_s29, 4  ;;  %s9890_s21 = int_to_ptr.vmem [resolvable:$false] %s9889_s21 }
 0x15f   : > { %s9891_s0 = scalar_lea.vmem %s9890_s21, 1024  ;;  %p9892_p6 = scmp.lt.s32.totalorder %s10440_s1, %s9890_s21 }
 0x160   : > { %p9887_p13 = pnand %p9885_p12, %p9871_p8  ;;  %p9893_p1 = scmp.lt.s32.totalorder %s9891_s0, %s9884_s22 }
 0x162   : > { %p9888_p10 = pneg %p9887_p13  ;;  %p9894_p3 = por %p9893_p1, %p9892_p6 }
 0x164   : > { %p9895_p2 = pnand %p9894_p3, %p9888_p10 }
 0x166   : > { %9898 = shalt.err (!%p9895_p2)
}
 0x167   : > { %s12570_s3 = smov 4   ;;  %s12571_s19 = smov 64  }
 0x168   : > { %9391 = dma.hbm_to_vmem [thread:$0]  (!%p10436_p11), %s10434_s16, 512, %s10440_s1, %s496_s13, %s12571_s19, %s12571_s19, %s12570_s3  }
 0x169   : > { %s8601_s30 = sshll.u32 %s10423_s24, 2  ;;  %s8602_s29 = sshll.u32 %s10023_s28, 6 }
 0x16a   : > { %s12572_s0 = sld [smem:[#allocation89_spill]]  ;;  %s520_s5 = scalar_lea.vmem [#allocation8], %s8601_s30 }
 0x16b   : > { %s527_s6 = sshll.u32 %s520_s5, 4  ;;  %s12573_s7 = sand.u32 1, %s10023_s28   ;;  %s528_s6 = int_to_ptr.vmem [resolvable:$true] %s527_s6 }
 0x16c   : > { %s517_s8 = scalar_lea.sflag [#allocation9], %s12573_s7 }
 0x170   : > { %s10479_s4 = scalar_lea.hbm %s12572_s0, %s8602_s29  ;;  %s9904_s16 = scalar_lea.hbm %s12572_s0, 128 }
 0x171   : > { %s9899_s9 = scalar_lea.hbm %s10479_s4, 64  ;;  %p9905_p5 = scmp.lt.u32.totalorder %s10479_s4, %s12572_s0 }
 0x172   : > { %p9900_p6 = scmp.ne.s32.totalorder %s10479_s4, %s9899_s9  ;;  %p9906_p9 = scmp.lt.u32.totalorder %s9904_s16, %s9899_s9 }
 0x173   : > { %p9908_p12 = scmp.lt.u32.totalorder %s9899_s9, %s10479_s4 }
 0x174   : > { %p9902_p10 = pnand %p9900_p6, %p9871_p8  ;;  %p9907_p4 = por %p9906_p9, %p9905_p5 }
 0x176   : > { %p9903_p0 = pneg %p9902_p10  ;;  %p9909_p13 = por %p9908_p12, %p9907_p4 }
 0x178   : > { %p9910_p1 = pnand %p9909_p13, %p9903_p0 }
 0x17a   : > { %9913 = shalt.err (!%p9910_p1)
}
 0x17b   : > { %s9914_s5 = scalar_lea.vmem %s528_s6, 64  ;;  %s10039_s7 = smov [#allocation8]  }
 0x17c   : > { %p9915_p3 = scmp.ne.s32.totalorder %s528_s6, %s9914_s5  ;;  %s9919_s19 = sshll.u32 %s10039_s7, 4  ;;  %s9920_s19 = int_to_ptr.vmem [resolvable:$false] %s9919_s19 }
 0x17d   : > { %s9921_s30 = scalar_lea.vmem %s9920_s19, 128  ;;  %p9922_p10 = scmp.lt.s32.totalorder %s528_s6, %s9920_s19 }
 0x17e   : > { %p9917_p2 = pnand %p9915_p3, %p9871_p8  ;;  %p9923_p7 = scmp.lt.s32.totalorder %s9921_s30, %s9914_s5 }
 0x180   : > { %p9918_p6 = pneg %p9917_p2  ;;  %p9924_p5 = por %p9923_p7, %p9922_p10 }
 0x182   : > { %p9925_p9 = pnand %p9924_p5, %p9918_p6 }
 0x184   : > { %9928 = shalt.err (!%p9925_p9)
}
 0x185   : > { %9394 = dma.hbm_to_vmem [thread:$0]  (!%p10436_p11), %s10479_s4, 64, %s528_s6, %s517_s8  }
 0x186   : > { %s12574_s9 = sld [smem:[#allocation37_spill]] }
 0x18c   : > { %p12575_p0 = scmp.ne.s32.totalorder %s12574_s9, 0 }
 0x18e   : > { %536 = sbr.rel (%p12575_p0) target bundleno = 1815 (0x717), region = 72 }
 0x195   : > { %s10505_s29 = sand.u32 1, %s10015_s26   ;;  %p12576_p7 = scmp.ne.s32.totalorder %s12565_s17, 0 }
 0x196   : > { %s8604_s22 = sshll.u32 %s10505_s29, 5  ;;  %s539_s21 = scalar_lea.sflag [#allocation6], %s10505_s29 }
 0x197   : > { %s10509_s13 = scalar_lea.vmem [#allocation5], %s8604_s22 }
 0x198   : > { %9974 = dma.done.wait (%p12576_p7), %s539_s21, 512  }
 0x199   : > { %9976 = vsyncadd (%p12576_p7), %s539_s21, 4294966784  ;;  %s12577_s20 = sld [smem:[#allocation36_spill]]  ;;  %s8605_s6 = sshll.u32 %s10505_s29, 2 }
 0x19a   : > { %s10517_s24 = scalar_lea.vmem [#allocation8], %s8605_s6 }
 0x19f   : > { %s547_s4 = sand.u32 1, %s12577_s20  }
 0x1a0   : > { %s548_s8 = scalar_lea.sflag [#allocation9], %s547_s4 }
 0x1a1   : > { %9978 = dma.done.wait (%p12576_p7), %s548_s8, 64  }
 0x1a2   : > { %9980 = vsyncadd (%p12576_p7), %s548_s8, 4294967232  ;;  %p12578_p11 = scmp.eq.s32.totalorder %s12577_s20, 0 }
 0x1a4   : > { %9982 = dma.done.wait (%p12578_p11), [#allocation9], 320   ;;  %p12579_p8 = pmov %p12578_p11 }
 0x1a6   : > { %9984 = vsyncadd (%p12579_p8), [#allocation9], 4294966976  ;;  %p12580_p4 = pmov %p12579_p8 }
 0x1a8   : > { %9986 = dma.done.wait (%p12580_p4), [#allocation12], 32   ;;  %p12581_p12 = pmov %p12580_p4 }
 0x1a9   : > { %p12582_p13 = pmov %p12580_p4 }
 0x1aa   : > { %9988 = vsyncadd (%p12581_p12), [#allocation12], 4294967264 }
 0x1ab   : > { %9990 = dma.done.wait (%p12582_p13), [#allocation15], 5760   ;;  %p12583_p1 = pmov %p12580_p4 }
 0x1ad   : > { %9992 = vsyncadd (%p12583_p1), [#allocation15], 4294961536  ;;  %p12584_p3 = pmov %p12583_p1 }
 0x1ae   : > { %p12585_p2 = pmov %p12583_p1 }
 0x1af   : > { %9994 = dma.done.wait (%p12584_p3), [#allocation18], 32  }
 0x1b0   : > { %9996 = vsyncadd (%p12585_p2), [#allocation18], 4294967264  ;;  %p12586_p6 = pmov %p12583_p1 }
 0x1b1   : > { %p12587_p10 = pmov %p12583_p1 }
 0x1b2   : > { %9998 = dma.done.wait (%p12586_p6), [#allocation21], 1040  }
 0x1b3   : > { %10000 = vsyncadd (%p12587_p10), [#allocation21], 4294966256  ;;  %p12588_p5 = pmov %p12583_p1 }
 0x1b4   : > { %p12589_p9 = pmov %p12583_p1 }
 0x1b5   : > { %10002 = dma.done.wait (%p12588_p5), [#allocation24], 1040  }
 0x1b6   : > { %10004 = vsyncadd (%p12589_p9), [#allocation24], 4294966256  ;;  %vm644_vm0 = vcmask 57344   ;;  %v12482_v0 = vmov 0.0   ;;  %vm10041_vm1 = vmmov 0   ;;  %v12478_v1 = vmov 0  }
 0x1b7   : > { %9004 = vmatprep.subr.bf16.mxu0 %v12482_v0  ;;  %9048 = vmatprep.subr.bf16.mxu1 %v12482_v0  ;;  %645 = vst.msk [vmem:[#allocation2] sm:$0x1] %vm644_vm0, %v12478_v1  ;;  %646 = vst.msk [vmem:[#allocation2 + $0x8] sm:$0x1] %vm644_vm0, %v12478_v1  ;;  %vm653_vm2 = vcmask 59393   ;;  %vm1441_vm4 = vcmask 1043456   ;;  %v804_v4 = vlaneseq }
 0x1b8   : > { %9006 = vmatprep.mubr.msk.bf16.mxu0 %vm10041_vm1, %v12482_v0  ;;  %647 = vst.msk [vmem:[#allocation2 + $0x10] sm:$0x1] %vm644_vm0, %v12478_v1  ;;  %648 = vst.msk [vmem:[#allocation2 + $0x18] sm:$0x1] %vm644_vm0, %v12478_v1  ;;  %9050 = vmatprep.mubr.msk.bf16.mxu1 %vm10041_vm1, %v12482_v0  ;;  %vm654_vm3 = vsmask.f32 2304 }
 0x1b9   : > { %649 = vst.msk [vmem:[#allocation2 + $0x20] sm:$0x1] %vm644_vm0, %v12478_v1  ;;  %650 = vst.msk [vmem:[#allocation2 + $0x28] sm:$0x1] %vm644_vm0, %v12478_v1  ;;  %v10043_v2 = vmov 1966171168  }
 0x1ba   : > { %651 = vst.msk [vmem:[#allocation2 + $0x30] sm:$0x1] %vm644_vm0, %v12478_v1  ;;  %652 = vst.msk [vmem:[#allocation2 + $0x38] sm:$0x1] %vm644_vm0, %v12478_v1  ;;  %v802_v3 = vunpack.c.l.s4 %v10043_v2  ;;  %vm741_vm5 = vcmask 60417   ;;  %v805_v15 = vshrl.u32 %v804_v4, 7 }
 0x1bb   : > { %687 = vst [vmem:[#allocation4] sm:$0x1] %v12478_v1  ;;  %vm10571_vm6 = vmand %vm653_vm2, %vm654_vm3  ;;  %v776_v6 = vld [vmem:[#allocation10 + $0x4] sm:$0xf]  ;;  %v2410_v7 = vld [vmem:[#allocation10 + $0x8] sm:$0xf] }
 0x1bc   : > { %v693_v8 = vld [vmem:[%s10509_s13] sm:$0xf]  ;;  %v1443_v9 = vsel %vm1441_vm4, %v776_v6, 0  ;;  %v3139_v10 = vsel %vm1441_vm4, %v2410_v7, 0  ;;  %v694_v11 = vld [vmem:[%s10509_s13 + $0x4] sm:$0xf]  ;;  %v803_v14 = vunpack.c.0.s8 %v802_v3 }
 0x1bd   : > { %v709_v12 = vrot.slane %v693_v8, 7  ;;  %9005 = vmatpush3.bf16.msra.mxu0 %v1443_v9  ;;  %9049 = vmatpush3.bf16.msra.mxu1 %v3139_v10  ;;  %v711_v13 = vrot.slane %v694_v11, 7  ;;  %v656_v16 = vld [vmem:[#allocation2 + $0x4] sm:$0x6]  ;;  %v659_v19 = vld [vmem:[#allocation2 + $0xc] sm:$0x6] }
 0x1be   : > { %9026 = vmatprep.subr.bf16.mxu0 %v12482_v0  ;;  %v657_v18 = vsel %vm10571_vm6, 0, %v656_v16  ;;  %9070 = vmatprep.subr.bf16.mxu1 %v12482_v0  ;;  %v660_v20 = vsel %vm10571_vm6, 0, %v659_v19  ;;  %v695_v22 = vld [vmem:[%s10509_s13 + $0x8] sm:$0xf]  ;;  %v696_v23 = vld [vmem:[%s10509_s13 + $0xc] sm:$0xf]  ;;  %v10591_v28 = vsub.s32 %v803_v14, %v805_v15 }
 0x1bf   : > { %v710_v17 = vrot.slane %v709_v12, 4  ;;  %742 = vst.msk [vmem:[#allocation2] sm:$0xe] %vm741_vm5, %v709_v12  ;;  %744 = vst.msk [vmem:[#allocation2 + $0x8] sm:$0xe] %vm741_vm5, %v711_v13  ;;  %v712_v21 = vrot.slane %v711_v13, 4 }
 0x1c0   : > { %658 = vst [vmem:[#allocation2 + $0x4] sm:$0x6] %v657_v18  ;;  %661 = vst [vmem:[#allocation2 + $0xc] sm:$0x6] %v660_v20  ;;  %v713_v24 = vrot.slane %v695_v22, 7  ;;  %v715_v25 = vrot.slane %v696_v23, 7 }
 0x1c1   : > { %743 = vst.msk [vmem:[#allocation2 + $0x4] sm:$0x1] %vm644_vm0, %v710_v17  ;;  %v662_v26 = vld [vmem:[#allocation2 + $0x14] sm:$0x6]  ;;  %v697_v27 = vld [vmem:[%s10509_s13 + $0x10] sm:$0xf] }
 0x1c2   : > { %745 = vst.msk [vmem:[#allocation2 + $0xc] sm:$0x1] %vm644_vm0, %v712_v21  ;;  %v663_v29 = vsel %vm10571_vm6, 0, %v662_v26  ;;  %v698_v30 = vld [vmem:[%s10509_s13 + $0x14] sm:$0xf]  ;;  %v717_v31 = vrot.slane %v697_v27, 7 }
 0x1c3   : > { %v665_v32 = vld [vmem:[#allocation2 + $0x1c] sm:$0x6]  ;;  %v774_v33 = vld [vmem:[#allocation10] sm:$0xf]  ;;  %v714_v34 = vrot.slane %v713_v24, 4  ;;  %v716_v35 = vrot.slane %v715_v25, 4 }
 0x1c4   : > { %746 = vst.msk [vmem:[#allocation2 + $0x10] sm:$0xe] %vm741_vm5, %v713_v24  ;;  %748 = vst.msk [vmem:[#allocation2 + $0x18] sm:$0xe] %vm741_vm5, %v715_v25  ;;  %v719_v36 = vrot.slane %v698_v30, 7  ;;  %v666_v37 = vsel %vm10571_vm6, 0, %v665_v32 }
 0x1c5   : > { %664 = vst [vmem:[#allocation2 + $0x14] sm:$0x6] %v663_v29  ;;  %v668_v38 = vld [vmem:[#allocation2 + $0x24] sm:$0x6]  ;;  %v718_v39 = vrot.slane %v717_v31, 4  ;;  %v10622_v57 = vsel %vm1441_vm4, %v774_v33, 0 }
 0x1c6   : > { %750 = vst.msk [vmem:[#allocation2 + $0x20] sm:$0xe] %vm741_vm5, %v717_v31  ;;  %667 = vst [vmem:[#allocation2 + $0x1c] sm:$0x6] %v666_v37  ;;  %v669_v40 = vsel %vm10571_vm6, 0, %v668_v38  ;;  %v720_v43 = vrot.slane %v719_v36, 4 }
 0x1c7   : > { %v699_v41 = vld [vmem:[%s10509_s13 + $0x18] sm:$0xf]  ;;  %v700_v42 = vld [vmem:[%s10509_s13 + $0x1c] sm:$0xf]  ;;  %747 = vst.msk [vmem:[#allocation2 + $0x14] sm:$0x1] %vm644_vm0, %v714_v34 }
 0x1c8   : > { %749 = vst.msk [vmem:[#allocation2 + $0x1c] sm:$0x1] %vm644_vm0, %v716_v35  ;;  %670 = vst [vmem:[#allocation2 + $0x24] sm:$0x6] %v669_v40  ;;  %v721_v44 = vrot.slane %v699_v41, 7  ;;  %v723_v45 = vrot.slane %v700_v42, 7 }
 0x1c9   : > { %752 = vst.msk [vmem:[#allocation2 + $0x28] sm:$0xe] %vm741_vm5, %v719_v36  ;;  %v671_v46 = vld [vmem:[#allocation2 + $0x2c] sm:$0x6]  ;;  %vm1425_vm7 = vcmask 64512   ;;  %vm7237_vm8 = vcmask 1043459  }
 0x1ca   : > { %v8617_v47 = vld.sshfl [vmem:[#allocation2] sm:$0x33 pattern:$0x75316420]  ;;  %751 = vst.msk [vmem:[#allocation2 + $0x24] sm:$0x1] %vm644_vm0, %v718_v39 }
 0x1cb   : > { %v672_v48 = vsel %vm10571_vm6, 0, %v671_v46  ;;  %v8619_v49 = vld.sshfl [vmem:[#allocation2 + $0x8] sm:$0x33 pattern:$0x75316420]  ;;  %v800_v50 = vcombine.high %v8617_v47, %v8617_v47  ;;  %v10613_v51 = vrot.slane %v8617_v47, %v10591_v28  ;;  %v722_v52 = vrot.slane %v721_v44, 4 }
 0x1cc   : > { %753 = vst.msk [vmem:[#allocation2 + $0x2c] sm:$0x1] %vm644_vm0, %v720_v43  ;;  %673 = vst [vmem:[#allocation2 + $0x2c] sm:$0x6] %v672_v48  ;;  %v724_v53 = vrot.slane %v723_v45, 4  ;;  %v838_v55 = vcombine.high %v8619_v49, %v8619_v49  ;;  %v10619_v56 = vrot.slane %v8619_v49, %v10591_v28  ;;  %vm7240_vm9 = vcmask 1044484  }
 0x1cd   : > { %754 = vst.msk [vmem:[#allocation2 + $0x30] sm:$0xe] %vm741_vm5, %v721_v44  ;;  %756 = vst.msk [vmem:[#allocation2 + $0x38] sm:$0xe] %vm741_vm5, %v723_v45  ;;  %v10625_v58 = vrot.slane %v800_v50, %v10591_v28  ;;  %v815_v59 = vcombine.high %v10613_v51, %v10613_v51  ;;  %v1097_v61 = vunpack.i.h.s16 %v10613_v51  ;;  %vm7243_vm10 = vcmask 1045509   ;;  %s8889_s17 = sshll.u32 %s12577_s20, 4 }
 0x1ce   : > { %v8618_v54 = vld.sshfl [vmem:[#allocation2 + $0x4] sm:$0x1 pattern:$0x75316420]  ;;  %755 = vst.msk [vmem:[#allocation2 + $0x34] sm:$0x1] %vm644_vm0, %v722_v52  ;;  %v10634_v63 = vrot.slane %v838_v55, %v10591_v28  ;;  %v1106_v2 = vunpack.i.h.s16 %v10619_v56 }
 0x1cf   : > { %v830_v60 = vrot.slane %v8618_v54, %v10591_v28  ;;  %v8683_v62 = vld.sshfl [vmem:[#allocation2] sm:$0x32 pattern:$0x75316420]  ;;  %757 = vst.msk [vmem:[#allocation2 + $0x3c] sm:$0x1] %vm644_vm0, %v724_v53  ;;  %v816_v6 = vcombine.high %v10625_v58, %v10625_v58  ;;  %v1099_v7 = vunpack.i.h.s16 %v10625_v58  ;;  %v1101_v8 = vunpack.i.h.s16 %v815_v59 }
 0x1d0   : > { %v2434_v3 = vcombine.high %v8683_v62, %v8683_v62  ;;  %v2441_v4 = vrot.slane %v8683_v62, %v10591_v28  ;;  %v8633_v10 = vpack.i.b16 %v10625_v58, %v1097_v61  ;;  %v8649_v11 = vcombine.high %v10619_v56, %v10634_v63  ;;  %v8684_v14 = vld.sshfl [vmem:[#allocation2 + $0x4] sm:$0x11 pattern:$0x75316420]  ;;  %s641_s16 = scalar_lea.vmem [#allocation26], %s10505_s29  ;;  %s12795_s7 = sld [smem:[#allocation98_spill]] }
 0x1d1   : > { %v1105_v9 = vunpack.i.h.s16 %v830_v60  ;;  %v8656_v12 = vpack.i.b16 %v10619_v56, %v830_v60  ;;  %v8657_v13 = vpack.i.b16 %v10634_v63, %v1106_v2  ;;  %v1103_v15 = vunpack.i.h.s16 %v816_v6  ;;  %v8685_v19 = vld.sshfl [vmem:[#allocation2 + $0x8] sm:$0x32 pattern:$0x75316420]  ;;  %s8391_s1 = sshll.u32 %s641_s16, 4  ;;  %s8379_s30 = scalar_lea.sflag [#allocation7], %s10505_s29  ;;  %s12409_s1 = int_to_ptr.vmem [resolvable:$true] %s8391_s1 }
 0x1d2   : > { %v8634_v16 = vpack.i.b16 %v815_v59, %v1099_v7  ;;  %v8635_v17 = vpack.i.b16 %v816_v6, %v1101_v8  ;;  %v1236_v20 = vrot.slane %v8649_v11, %v10591_v28  ;;  %v10650_v22 = vrot.slane %v2434_v3, %v10591_v28  ;;  %v10655_v27 = vld.sshfl [vmem:[#allocation2 + $0xc] sm:$0x11 pattern:$0x75316420]  ;;  %s9929_s9 = scalar_lea.vmem %s12409_s1, 16  ;;  %p12796_p7 = scmp.ne.s32.totalorder %s12566_s23, 0 }
 0x1d3   : > { %v1173_v18 = vpack.i.b16 %v1106_v2, %v1105_v9  ;;  %v10647_v21 = vcombine.low %v8656_v12, %v8657_v13  ;;  %v10652_v23 = vcombine.high %v2441_v4, %v2441_v4  ;;  %v8636_v24 = vpack.i.b16 %v830_v60, %v1103_v15  ;;  %v8620_v34 = vld.sshfl [vmem:[#allocation2 + $0xc] sm:$0x1 pattern:$0x75316420]  ;;  %p9930_p0 = scmp.ne.s32.totalorder %s12409_s1, %s9929_s9  ;;  %s10044_s22 = smov [#allocation26]  }
 0x1d4   : > { %v1205_v25 = vcombine.low %v8633_v10, %v8634_v16  ;;  %v2458_v29 = vcombine.high %v8684_v14, %v8684_v14  ;;  %v10659_v30 = vcombine.high %v10650_v22, %v10650_v22  ;;  %v10662_v31 = vrot.slane %v8684_v14, %v10591_v28  ;;  %v8621_v46 = vld.sshfl [vmem:[#allocation2 + $0x10] sm:$0x33 pattern:$0x75316420]  ;;  %s9933_s21 = sshll.u32 %s10044_s22, 4  ;;  %s9934_s21 = int_to_ptr.vmem [resolvable:$false] %s9933_s21 }
 0x1d5   : > { %v1207_v26 = vcombine.low %v1173_v18, %v10634_v63  ;;  %v2480_v32 = vcombine.high %v8685_v19, %v8685_v19  ;;  %v2487_v33 = vrot.slane %v8685_v19, %v10591_v28  ;;  %v1206_v35 = vcombine.low %v8635_v17, %v8636_v24  ;;  %v8622_v53 = vld.sshfl [vmem:[#allocation2 + $0x14] sm:$0x1 pattern:$0x75316420]  ;;  %p9931_p11 = pnand %p9930_p0, %p12796_p7  ;;  %s9935_s13 = scalar_lea.vmem %s9934_s21, 32 }
 0x1d6   : > { %v1215_v36 = vrot.slane %v1205_v25, %v10591_v28  ;;  %v10668_v38 = vrot.slane %v2458_v29, %v10591_v28  ;;  %v10677_v41 = vrot.slane %v10655_v27, %v10591_v28  ;;  %v2903_v42 = vcombine.low %v10650_v22, %v10652_v23  ;;  %v8623_v3 = vld.sshfl [vmem:[#allocation2 + $0x18] sm:$0x33 pattern:$0x75316420]  ;;  %s12407_s19 = scalar_lea.hbm %s12795_s7, %s8889_s17  ;;  %p9936_p4 = scmp.lt.s32.totalorder %s12409_s1, %s9934_s21 }
 0x1d7   : > { %v1229_v37 = vrot.slane %v1207_v26, %v10591_v28  ;;  %v10671_v39 = vrot.slane %v2480_v32, %v10591_v28  ;;  %v10673_v40 = vcombine.high %v2487_v33, %v2487_v33  ;;  %v1222_v43 = vrot.slane %v1206_v35, %v10591_v28  ;;  %p9932_p8 = pneg %p9931_p11  ;;  %p9937_p12 = scmp.lt.s32.totalorder %s9935_s13, %s9929_s9 }
 0x1d8   : > { %v2904_v45 = vcombine.low %v10659_v30, %v10662_v31  ;;  %v10685_v47 = vrot.slane %v8620_v34, %v10591_v28  ;;  %v2913_v59 = vrot.slane %v2903_v42, %v10591_v28  ;;  %v876_v4 = vcombine.high %v8621_v46, %v8621_v46 }
 0x1d9   : > { %v1238_v44 = vcombine.low %v1229_v37, %v1236_v20  ;;  %v10689_v48 = vcombine.high %v10671_v39, %v10671_v39  ;;  %v12481_v49 = vunpack.i.h.s16 %v10671_v39  ;;  %v2807_v50 = vunpack.i.h.s16 %v10673_v40  ;;  %v8687_v37 = vld.sshfl [vmem:[#allocation2 + $0x10] sm:$0x32 pattern:$0x75316420]  ;;  %p9938_p13 = por %p9937_p12, %p9936_p4 }
 0x1da   : > { %v8699_v52 = vpack.i.b16 %v10671_v39, %v10668_v38  ;;  %v1237_v54 = vcombine.low %v1215_v36, %v1222_v43  ;;  %v2920_v60 = vrot.slane %v2904_v45, %v10591_v28  ;;  %v10705_v8 = vrot.slane %v8621_v46, %v10591_v28 }
 0x1db   : > { %v1252_v55 = vrot.slane %v1238_v44, %v10591_v28  ;;  %v2809_v61 = vunpack.i.h.s16 %v10689_v48  ;;  %v8700_v62 = vpack.i.b16 %v10673_v40, %v12481_v49  ;;  %v8701_v2 = vpack.i.b16 %v10689_v48, %v2807_v50  ;;  %p9939_p1 = pnand %p9938_p13, %p9932_p8 }
 0x1dc   : > { %v1245_v6 = vrot.slane %v1237_v54, %v10591_v28  ;;  %v2935_v7 = vcombine.low %v2913_v59, %v2920_v60  ;;  %v10708_v9 = vrot.slane %v8622_v53, %v10591_v28  ;;  %v10712_v12 = vrot.slane %v876_v4, %v10591_v28  ;;  %v8689_v60 = vld.sshfl [vmem:[#allocation2 + $0x18] sm:$0x32 pattern:$0x75316420] }
 0x1dd   : > { %v8702_v10 = vpack.i.b16 %v10677_v41, %v2809_v61  ;;  %v2905_v11 = vcombine.low %v8699_v52, %v8700_v62  ;;  %v914_v13 = vcombine.high %v8623_v3, %v8623_v3  ;;  %v10717_v16 = vcombine.high %v10705_v8, %v10705_v8  ;;  %v8688_v52 = vld.sshfl [vmem:[#allocation2 + $0x14] sm:$0x11 pattern:$0x75316420] }
 0x1de   : > { %v1253_v14 = vcombine.low %v1245_v6, %v1252_v55  ;;  %v2943_v15 = vrot.slane %v2935_v7, %v10591_v28  ;;  %v10720_v17 = vrot.slane %v8623_v3, %v10591_v28  ;;  %v10725_v20 = vcombine.high %v10712_v12, %v10712_v12 }
 0x1df   : > { %v2906_v18 = vcombine.low %v8701_v2, %v8702_v10  ;;  %v2927_v19 = vrot.slane %v2905_v11, %v10591_v28  ;;  %v10728_v24 = vrot.slane %v914_v13, %v10591_v28  ;;  %v1115_v26 = vunpack.i.h.s16 %v10705_v8 }
 0x1e0   : > { %9007 = vmatmul.mubr.msk.bf16.vlgmr.msra.gmra.mrb[0].mxu0 %vm1425_vm7, %v1253_v14  ;;  %v10733_v25 = vcombine.high %v10720_v17, %v10720_v17  ;;  %v1117_v29 = vunpack.i.h.s16 %v10712_v12  ;;  %v1119_v32 = vunpack.i.h.s16 %v10717_v16  ;;  %v1121_v34 = vunpack.i.h.s16 %v10725_v20 }
 0x1e1   : > { %9027 = vmatpush3.bf16.msra.mxu0 %v10622_v57  ;;  %v2934_v33 = vrot.slane %v2906_v18, %v10591_v28  ;;  %9010 = vmatprep.mubr.msk.bf16.mxu0 %vm10041_vm1, %v12482_v0  ;;  %v1123_v35 = vunpack.i.h.s16 %v10708_v9  ;;  %v12480_v36 = vunpack.i.h.s16 %v10720_v17  ;;  %v8637_v42 = vpack.i.b16 %v10712_v12, %v1115_v26 }
 0x1e2   : > { %v8638_v43 = vpack.i.b16 %v10717_v16, %v1117_v29  ;;  %v8639_v44 = vpack.i.b16 %v10725_v20, %v1119_v32  ;;  %v1257_v57 = vcombine.low %v10728_v24, %v10733_v25  ;;  %9092 = vmatprep.subr.bf16.mxu0 %v12482_v0  ;;  %v8640_v46 = vpack.i.b16 %v10708_v9, %v1121_v34 }
 0x1e3   : > { %v2936_v45 = vcombine.low %v2927_v19, %v2934_v33  ;;  %v1182_v50 = vpack.i.b16 %v12480_v36, %v1123_v35  ;;  %v2504_v53 = vcombine.high %v10655_v27, %v10655_v27  ;;  %v1254_v54 = vcombine.low %v10685_v47, %v8637_v42  ;;  %v8624_v19 = vld.sshfl [vmem:[#allocation2 + $0x1c] sm:$0x1 pattern:$0x75316420] }
 0x1e4   : > { %v1255_v55 = vcombine.low %v8638_v43, %v8639_v44  ;;  %v1285_v59 = vrot.slane %v1257_v57, %v10591_v28  ;;  %v2526_v61 = vcombine.high %v8687_v37, %v8687_v37  ;;  %v10763_v4 = vrot.slane %v8687_v37, %v10591_v28  ;;  %v8625_v37 = vld.sshfl [vmem:[#allocation2 + $0x20] sm:$0x33 pattern:$0x75316420] }
 0x1e5   : > { %v2950_v62 = vrot.slane %v2936_v45, %v10591_v28  ;;  %v1256_v2 = vcombine.low %v8640_v46, %v1182_v50  ;;  %v10760_v3 = vrot.slane %v2504_v53, %v10591_v28  ;;  %v1264_v6 = vrot.slane %v1254_v54, %v10591_v28  ;;  %v8626_v54 = vld.sshfl [vmem:[#allocation2 + $0x24] sm:$0x1 pattern:$0x75316420] }
 0x1e6   : > { %v1271_v27 = vrot.slane %v1255_v55, %v10591_v28  ;;  %v10768_v7 = vrot.slane %v2526_v61, %v10591_v28  ;;  %v2550_v10 = vcombine.high %v8688_v52, %v8688_v52  ;;  %v10772_v14 = vrot.slane %v8688_v52, %v10591_v28  ;;  %v8627_v61 = vld.sshfl [vmem:[#allocation2 + $0x28] sm:$0x33 pattern:$0x75316420] }
 0x1e7   : > { %v2951_v11 = vcombine.low %v2943_v15, %v2950_v62  ;;  %v1278_v13 = vrot.slane %v1256_v2, %v10591_v28  ;;  %v2572_v18 = vcombine.high %v8689_v60, %v8689_v60  ;;  %v10778_v32 = vrot.slane %v8689_v60, %v10591_v28 }
 0x1e8   : > { %v1286_v26 = vcombine.low %v1264_v6, %v1271_v27  ;;  %v10775_v29 = vrot.slane %v2550_v10, %v10591_v28  ;;  %v2811_v33 = vunpack.i.h.s16 %v10677_v41  ;;  %v8719_v35 = vcombine.high %v10763_v4, %v10768_v7 }
 0x1e9   : > { %9051 = vmatmul.mubr.msk.bf16.vlgmr.msra.gmra.mrb[0].mxu1 %vm1425_vm7, %v2951_v11  ;;  %v1287_v34 = vcombine.low %v1278_v13, %v1285_v59  ;;  %v10783_v15 = vrot.slane %v2572_v18, %v10591_v28  ;;  %v10789_v42 = vcombine.high %v10728_v24, %v10728_v24  ;;  %v2587_v44 = vcombine.high %v10778_v32, %v10778_v32 }
 0x1ea   : > { %v1294_v43 = vrot.slane %v1286_v26, %v10591_v28  ;;  %9054 = vmatprep.mubr.msk.bf16.mxu1 %vm10041_vm1, %v12482_v0  ;;  %v8703_v57 = vpack.i.b16 %v10760_v3, %v2811_v33  ;;  %v10798_v45 = vrot.slane %v8624_v19, %v10591_v28  ;;  %v2969_v60 = vrot.slane %v8719_v35, %v10591_v28 }
 0x1eb   : > { %12592 = vst [vmem:[#allocation38_spill] sm:$0xff] %v10789_v42  ;;  %v1301_v46 = vrot.slane %v1287_v34, %v10591_v28  ;;  %v10803_v50 = vcombine.high %v10783_v15, %v10783_v15  ;;  %v12479_v52 = vunpack.i.h.s16 %v10783_v15  ;;  %v8704_v53 = vpack.i.b16 %v10783_v15, %v10775_v29 }
 0x1ec   : > { %12593 = vst [vmem:[#allocation39_spill] sm:$0xff] %v10798_v45  ;;  %v2825_v55 = vunpack.i.h.s16 %v2587_v44  ;;  %v2952_v59 = vcombine.low %v8703_v57, %v10768_v7  ;;  %v952_v62 = vcombine.high %v8625_v37, %v8625_v37  ;;  %v10814_v10 = vrot.slane %v8625_v37, %v10591_v28 }
 0x1ed   : > { %v1302_v2 = vcombine.low %v1294_v43, %v1301_v46  ;;  %v8705_v6 = vpack.i.b16 %v2587_v44, %v12479_v52  ;;  %v2954_v27 = vcombine.low %v10772_v14, %v8704_v53  ;;  %v10822_v19 = vrot.slane %v8626_v54, %v10591_v28 }
 0x1ee   : > { %12594 = vst [vmem:[#allocation40_spill] sm:$0xff] %v10814_v10  ;;  %v8706_v11 = vpack.i.b16 %v10803_v50, %v2825_v55  ;;  %v2962_v13 = vrot.slane %v2952_v59, %v10591_v28  ;;  %v10819_v18 = vrot.slane %v952_v62, %v10591_v28  ;;  %v967_v33 = vcombine.high %v10814_v10, %v10814_v10  ;;  %v8690_v59 = vld.sshfl [vmem:[#allocation2 + $0x1c] sm:$0x11 pattern:$0x75316420] }
 0x1ef   : > { %12596 = vst [vmem:[#allocation42_spill] sm:$0xff] %v10822_v19  ;;  %9011 = vmatmul.mubr.msk.bf16.gmra.mrb[4].mxu0 %vm1425_vm7, %v1302_v2  ;;  %v2976_v26 = vrot.slane %v2954_v27, %v10591_v28  ;;  %v990_v34 = vcombine.high %v8627_v61, %v8627_v61  ;;  %v10829_v35 = vrot.slane %v8627_v61, %v10591_v28  ;;  %v1133_v57 = vunpack.i.h.s16 %v10814_v10 }
 0x1f0   : > { %12595 = vst [vmem:[#allocation41_spill] sm:$0xff] %v10819_v18  ;;  %v2955_v37 = vcombine.low %v8705_v6, %v8706_v11  ;;  %v2984_v43 = vcombine.low %v2962_v13, %v2969_v60  ;;  %9014 = vmatprep.mubr.msk.bf16.mxu0 %vm10041_vm1, %v12482_v0  ;;  %v968_v44 = vcombine.high %v10819_v18, %v10819_v18  ;;  %v1135_v53 = vunpack.i.h.s16 %v10819_v18  ;;  %v8691_v6 = vld.sshfl [vmem:[#allocation2 + $0x20] sm:$0x32 pattern:$0x75316420] }
 0x1f1   : > { %12597 = vst [vmem:[#allocation43_spill] sm:$0xff] %v10829_v35  ;;  %v10837_v46 = vrot.slane %v990_v34, %v10591_v28  ;;  %v1137_v54 = vunpack.i.h.s16 %v967_v33  ;;  %v1141_v55 = vunpack.i.h.s16 %v10822_v19  ;;  %v12486_v2 = vunpack.i.h.s16 %v10829_v35 }
 0x1f2   : > { %v2983_v61 = vrot.slane %v2955_v37, %v10591_v28  ;;  %v2992_v60 = vrot.slane %v2984_v43, %v10591_v28  ;;  %v1139_v62 = vunpack.i.h.s16 %v968_v44  ;;  %v8641_v27 = vpack.i.b16 %v10819_v18, %v1133_v57  ;;  %v8692_v37 = vld.sshfl [vmem:[#allocation2 + $0x24] sm:$0x11 pattern:$0x75316420] }
 0x1f3   : > { %12598 = vst [vmem:[#allocation44_spill] sm:$0xff] %v10837_v46  ;;  %v8642_v11 = vpack.i.b16 %v967_v33, %v1135_v53  ;;  %v8643_v13 = vpack.i.b16 %v968_v44, %v1137_v54  ;;  %v1303_v34 = vcombine.low %v10789_v42, %v10798_v45  ;;  %v1191_v36 = vpack.i.b16 %v12486_v2, %v1141_v55 }
 0x1f4   : > { %v2985_v1 = vcombine.low %v2976_v26, %v2983_v61  ;;  %v8644_v52 = vpack.i.b16 %v10822_v19, %v1139_v62  ;;  %v2596_v49 = vcombine.high %v8690_v59, %v8690_v59  ;;  %v10852_v10 = vrot.slane %v8690_v59, %v10591_v28  ;;  %v8693_v26 = vld.sshfl [vmem:[#allocation2 + $0x28] sm:$0x32 pattern:$0x75316420] }
 0x1f5   : > { %v1304_v43 = vcombine.low %v8641_v27, %v8642_v11  ;;  %v1313_v0 = vrot.slane %v1303_v34, %v10591_v28  ;;  %v2618_v57 = vcombine.high %v8691_v6, %v8691_v6  ;;  %v1306_v53 = vcombine.low %v1191_v36, %v10837_v46  ;;  %v8628_v36 = vld.sshfl [vmem:[#allocation2 + $0x2c] sm:$0x1 pattern:$0x75316420] }
 0x1f6   : > { %12599 = vst [vmem:[#allocation45_spill] sm:$0xff] %v10852_v10  ;;  %v2999_v33 = vrot.slane %v2985_v1, %v10591_v28  ;;  %v1305_v44 = vcombine.low %v8643_v13, %v8644_v52  ;;  %v10857_v54 = vrot.slane %v2596_v49, %v10591_v28  ;;  %v2625_v61 = vrot.slane %v8691_v6, %v10591_v28 }
 0x1f7   : > { %v1320_v55 = vrot.slane %v1304_v43, %v10591_v28  ;;  %v10862_v62 = vrot.slane %v2618_v57, %v10591_v28  ;;  %v2642_v27 = vcombine.high %v8692_v37, %v8692_v37  ;;  %v1334_v1 = vrot.slane %v1306_v53, %v10591_v28  ;;  %v8629_v43 = vld.sshfl [vmem:[#allocation2 + $0x30] sm:$0x33 pattern:$0x75316420] }
 0x1f8   : > { %12600 = vst [vmem:[#allocation46_spill] sm:$0xff] %v10857_v54  ;;  %v3000_v59 = vcombine.low %v2992_v60, %v2999_v33  ;;  %v1327_v11 = vrot.slane %v1305_v44, %v10591_v28  ;;  %v10867_v52 = vrot.slane %v8692_v37, %v10591_v28  ;;  %v10869_v49 = vcombine.high %v2625_v61, %v2625_v61  ;;  %v8630_v44 = vld.sshfl [vmem:[#allocation2 + $0x34] sm:$0x1 pattern:$0x75316420] }
 0x1f9   : > { %12601 = vst [vmem:[#allocation47_spill] sm:$0xff] %v10862_v62  ;;  %v1335_v13 = vcombine.low %v1313_v0, %v1320_v55  ;;  %v10873_v34 = vcombine.high %v10862_v62, %v10862_v62  ;;  %v10876_v6 = vrot.slane %v2642_v27, %v10591_v28  ;;  %v2664_v57 = vcombine.high %v8693_v26, %v8693_v26  ;;  %v10881_v0 = vld.sshfl [vmem:[#allocation2 + $0x38] sm:$0x33 pattern:$0x75316420] }
 0x1fa   : > { %12602 = vst [vmem:[#allocation48_spill] sm:$0xff] %v10867_v52  ;;  %12603 = vst [vmem:[#allocation49_spill] sm:$0xff] %v10869_v49  ;;  %9055 = vmatmul.mubr.msk.bf16.gmra.mrb[4].mxu1 %vm1425_vm7, %v3000_v59  ;;  %v1336_v60 = vcombine.low %v1327_v11, %v1334_v1  ;;  %v2671_v33 = vrot.slane %v8693_v26, %v10591_v28  ;;  %v2827_v37 = vunpack.i.h.s16 %v10803_v50  ;;  %v12606_v55 = vmov 0.0   ;;  %v674_v11 = vld [vmem:[#allocation2 + $0x34] sm:$0x6] }
 0x1fb   : > { %12604 = vst [vmem:[#allocation50_spill] sm:$0xff] %v10873_v34  ;;  %12605 = vst [vmem:[#allocation51_spill] sm:$0xff] %v10876_v6  ;;  %v1343_v53 = vrot.slane %v1335_v13, %v10591_v28  ;;  %9058 = vmatprep.mubr.msk.bf16.mxu1 %vm10041_vm1, %v12606_v55  ;;  %v2829_v61 = vunpack.i.h.s16 %v10852_v10  ;;  %v3002_v27 = vcombine.low %v10862_v62, %v10869_v49  ;;  %vm680_vm11 = vcmask 122880  }
 0x1fc   : > { %v3003_v59 = vcombine.low %v10873_v34, %v10867_v52  ;;  %v1350_v26 = vrot.slane %v1336_v60, %v10591_v28  ;;  %v10893_v50 = vrot.slane %v2664_v57, %v10591_v28  ;;  %v10895_v1 = vcombine.high %v2671_v33, %v2671_v33 }
 0x1fd   : > { %v8707_v13 = vpack.i.b16 %v10852_v10, %v2827_v37  ;;  %v8708_v2 = vpack.i.b16 %v10857_v54, %v2829_v61  ;;  %v3018_v18 = vrot.slane %v3002_v27, %v10591_v28  ;;  %v10902_v49 = vrot.slane %v8628_v36, %v10591_v28 }
 0x1fe   : > { %v3025_v45 = vrot.slane %v3003_v59, %v10591_v28  ;;  %v1351_v52 = vcombine.low %v1343_v53, %v1350_v26  ;;  %v12497_v34 = vunpack.i.h.s16 %v10893_v50  ;;  %v8709_v60 = vpack.i.b16 %v10893_v50, %v10876_v6  ;;  %v8694_v26 = vld.sshfl [vmem:[#allocation2 + $0x2c] sm:$0x11 pattern:$0x75316420] }
 0x1ff   : > { %12607 = vst [vmem:[#allocation52_spill] sm:$0xff] %v10902_v49  ;;  %v1028_v57 = vcombine.high %v8629_v43, %v8629_v43  ;;  %v3001_v33 = vcombine.low %v8707_v13, %v8708_v2  ;;  %v10908_v62 = vrot.slane %v8629_v43, %v10591_v28  ;;  %v10911_v37 = vrot.slane %v8630_v44, %v10591_v28 }
 0x200   : > { %v10915_v61 = vrot.slane %v10881_v0, %v10591_v28  ;;  %9015 = vmatmul.mubr.msk.bf16.gmra.mrb[8].mxu0 %vm1425_vm7, %v1351_v52  ;;  %v8710_v36 = vpack.i.b16 %v10895_v1, %v12497_v34  ;;  %v8650_v2 = vcombine.high %v10829_v35, %v10837_v46  ;;  %v675_v43 = vsel %vm10571_vm6, 0, %v674_v11  ;;  %v8695_v34 = vld.sshfl [vmem:[#allocation2 + $0x30] sm:$0x32 pattern:$0x75316420] }
 0x201   : > { %12608 = vst [vmem:[#allocation53_spill] sm:$0xff] %v10908_v62  ;;  %v10922_v53 = vrot.slane %v1028_v57, %v10591_v28  ;;  %v3011_v44 = vrot.slane %v3001_v33, %v10591_v28  ;;  %9018 = vmatprep.mubr.msk.bf16.mxu0 %vm10041_vm1, %v12606_v55  ;;  %v10933_v52 = vcombine.high %v10908_v62, %v10908_v62  ;;  %v1151_v27 = vunpack.i.h.s16 %v10908_v62  ;;  %v8697_v46 = vld.sshfl [vmem:[#allocation2 + $0x38] sm:$0x32 pattern:$0x75316420] }
 0x202   : > { %v1159_v59 = vunpack.i.h.s16 %v10911_v37  ;;  %676 = vst [vmem:[#allocation2 + $0x34] sm:$0x6] %v675_v43  ;;  %v3004_v13 = vcombine.low %v8709_v60, %v8710_v36  ;;  %v12511_v33 = vunpack.i.h.s16 %v10915_v61  ;;  %v1362_v62 = vrot.slane %v8650_v2, %v10591_v28 }
 0x203   : > { %12609 = vst [vmem:[#allocation54_spill] sm:$0xff] %v10922_v53  ;;  %v10939_v57 = vcombine.high %v10922_v53, %v10922_v53  ;;  %v1153_v11 = vunpack.i.h.s16 %v10922_v53  ;;  %v3033_v10 = vcombine.low %v3011_v44, %v3018_v18  ;;  %v1155_v54 = vunpack.i.h.s16 %v10933_v52 }
 0x204   : > { %v8645_v6 = vpack.i.b16 %v10922_v53, %v1151_v27  ;;  %v3032_v43 = vrot.slane %v3004_v13, %v10591_v28  ;;  %v1200_v35 = vpack.i.b16 %v12511_v33, %v1159_v59  ;;  %v10956_v27 = vcombine.high %v10893_v50, %v10893_v50 }
 0x205   : > { %12610 = vst [vmem:[#allocation55_spill] sm:$0xff] %v10939_v57  ;;  %v1157_v60 = vunpack.i.h.s16 %v10939_v57  ;;  %v8646_v36 = vpack.i.b16 %v10933_v52, %v1153_v11  ;;  %v3041_v19 = vrot.slane %v3033_v10, %v10591_v28  ;;  %v8647_v18 = vpack.i.b16 %v10939_v57, %v1155_v54 }
 0x206   : > { %v1353_v44 = vcombine.low %v10902_v49, %v8645_v6  ;;  %12611 = vst [vmem:[#allocation56_spill] sm:$0xff] %v10956_v27  ;;  %v3034_v2 = vcombine.low %v3025_v45, %v3032_v43  ;;  %v2688_v53 = vcombine.high %v8694_v26, %v8694_v26  ;;  %v10960_v42 = vrot.slane %v8694_v26, %v10591_v28 }
 0x207   : > { %v8648_v13 = vpack.i.b16 %v10911_v37, %v1157_v60  ;;  %v1354_v11 = vcombine.low %v8646_v36, %v8647_v18  ;;  %v2710_v33 = vcombine.high %v8695_v34, %v8695_v34  ;;  %v10964_v10 = vrot.slane %v8695_v34, %v10591_v28 }
 0x208   : > { %12612 = vst [vmem:[#allocation57_spill] sm:$0xff] %v10960_v42  ;;  %v1369_v59 = vrot.slane %v1353_v44, %v10591_v28  ;;  %v3048_v54 = vrot.slane %v3034_v2, %v10591_v28  ;;  %v10968_v49 = vrot.slane %v2688_v53, %v10591_v28  ;;  %v2756_v45 = vcombine.high %v8697_v46, %v8697_v46  ;;  %v8632_v2 = vld.sshfl [vmem:[#allocation2 + $0x3c] sm:$0x1 pattern:$0x75316420] }
 0x209   : > { %12613 = vst [vmem:[#allocation58_spill] sm:$0xff] %v10964_v10  ;;  %v1355_v6 = vcombine.low %v8648_v13, %v1200_v35  ;;  %v8696_v57 = vld.sshfl [vmem:[#allocation2 + $0x34] sm:$0x11 pattern:$0x75316420]  ;;  %v1376_v43 = vrot.slane %v1354_v11, %v10591_v28  ;;  %v10972_v26 = vrot.slane %v2710_v33, %v10591_v28  ;;  %v2845_v33 = vunpack.i.h.s16 %v10956_v27 }
 0x20a   : > { %v1384_v60 = vcombine.low %v1362_v62, %v1369_v59  ;;  %v2734_v36 = vcombine.high %v8696_v57, %v8696_v57  ;;  %v3049_v18 = vcombine.low %v3041_v19, %v3048_v54  ;;  %v10976_v34 = vrot.slane %v8696_v57, %v10591_v28  ;;  %v677_v53 = vld [vmem:[#allocation2 + $0x3c] sm:$0x6] }
 0x20b   : > { %v1383_v44 = vrot.slane %v1355_v6, %v10591_v28  ;;  %v10979_v35 = vrot.slane %v2756_v45, %v10591_v28  ;;  %v2843_v62 = vunpack.i.h.s16 %v10895_v1  ;;  %v2847_v57 = vunpack.i.h.s16 %v10960_v42 }
 0x20c   : > { %v1392_v13 = vrot.slane %v1384_v60, %v10591_v28  ;;  %v10983_v11 = vrot.slane %v2734_v36, %v10591_v28  ;;  %9059 = vmatmul.mubr.msk.bf16.gmra.mrb[8].mxu1 %vm1425_vm7, %v3049_v18  ;;  %v8720_v59 = vcombine.high %v10964_v10, %v10972_v26  ;;  %v1066_v54 = vcombine.high %v10881_v0, %v10881_v0  ;;  %v3824_v10 = vld [vmem:[#allocation10 + $0xc] sm:$0xf] }
 0x20d   : > { %v1385_v19 = vcombine.low %v1376_v43, %v1383_v44  ;;  %9062 = vmatprep.mubr.msk.bf16.mxu1 %vm10041_vm1, %v12606_v55  ;;  %v8711_v6 = vpack.i.b16 %v10956_v27, %v2843_v62  ;;  %v8712_v45 = vpack.i.b16 %v10960_v42, %v2845_v33  ;;  %v11001_v43 = vcombine.high %v10915_v61, %v10915_v61 }
 0x20e   : > { %12614 = vst [vmem:[#allocation59_spill] sm:$0xff] %v10983_v11  ;;  %v8714_v60 = vpack.i.b16 %v10979_v35, %v10983_v11  ;;  %v8713_v18 = vpack.i.b16 %v10968_v49, %v2847_v57  ;;  %v3074_v0 = vrot.slane %v8720_v59, %v10591_v28  ;;  %v11007_v44 = vrot.slane %v1066_v54, %v10591_v28 }
 0x20f   : > { %12615 = vst [vmem:[#allocation60_spill] sm:$0xff] %v11001_v43  ;;  %v1399_v36 = vrot.slane %v1385_v19, %v10591_v28  ;;  %v3050_v62 = vcombine.low %v8711_v6, %v8712_v45  ;;  %v11011_v27 = vrot.slane %v8632_v2, %v10591_v28  ;;  %v678_v42 = vsel %vm10571_vm6, 0, %v677_v53 }
 0x210   : > { %12616 = vst [vmem:[#allocation61_spill] sm:$0xff] %v11007_v44  ;;  %v3053_v33 = vcombine.low %v10976_v34, %v8714_v60  ;;  %v3051_v19 = vcombine.low %v8713_v18, %v10972_v26  ;;  %v11018_v57 = vcombine.high %v11007_v44, %v11007_v44  ;;  %v1401_v59 = vcombine.low %v11007_v44, %v11001_v43 }
 0x211   : > { %12617 = vst [vmem:[#allocation62_spill] sm:$0xff] %v11011_v27  ;;  %v1400_v11 = vcombine.low %v1392_v13, %v1399_v36  ;;  %679 = vst [vmem:[#allocation2 + $0x3c] sm:$0x6] %v678_v42  ;;  %v3060_v54 = vrot.slane %v3050_v62, %v10591_v28  ;;  %v11025_v2 = vrot.slane %v8697_v46, %v10591_v28  ;;  %v12521_v42 = vunpack.i.h.s16 %v10979_v35 }
 0x212   : > { %12618 = vst [vmem:[#allocation63_spill] sm:$0xff] %v11018_v57  ;;  %v3081_v6 = vrot.slane %v3053_v33, %v10591_v28  ;;  %v2772_v5 = vcombine.high %v10979_v35, %v10979_v35  ;;  %v3067_v53 = vrot.slane %v3051_v19, %v10591_v28  ;;  %v1402_v13 = vcombine.low %v11018_v57, %v11011_v27 }
 0x213   : > { %12619 = vst [vmem:[#allocation64_spill] sm:$0xff] %v11025_v2  ;;  %9019 = vmatmul.mubr.msk.bf16.gmra.mrb[12].mxu0 %vm1425_vm7, %v1400_v11  ;;  %v1409_v45 = vrot.slane %v1401_v59, %v10591_v28  ;;  %v2771_v46 = vcombine.high %v11025_v2, %v11025_v2  ;;  %v4553_v18 = vsel %vm1441_vm4, %v3824_v10, 0  ;;  %v853_v33 = vcombine.high %v10619_v56, %v10619_v56 }
 0x214   : > { %v3083_v60 = vcombine.low %v3074_v0, %v3081_v6  ;;  %9022 = vmatprep.mubr.msk.bf16.mxu0 %vm10041_vm1, %v12606_v55  ;;  %v2863_v36 = vunpack.i.h.s16 %v2772_v5  ;;  %v3082_v11 = vcombine.low %v3060_v54, %v3067_v53  ;;  %v1416_v62 = vrot.slane %v1402_v13, %v10591_v28  ;;  %9071 = vmatpush3.bf16.msra.mxu1 %v4553_v18 }
 0x215   : > { %v854_v19 = vcombine.high %v10634_v63, %v10634_v63  ;;  %v2861_v59 = vunpack.i.h.s16 %v2771_v46  ;;  %v8715_v6 = vpack.i.b16 %v2771_v46, %v12521_v42  ;;  %v1108_v2 = vunpack.i.h.s16 %v10634_v63  ;;  %9114 = vmatprep.subr.bf16.mxu1 %v12606_v55  ;;  %v5238_v42 = vld [vmem:[#allocation10 + $0x10] sm:$0xf] }
 0x216   : > { %v3097_v0 = vrot.slane %v3083_v60, %v10591_v28  ;;  %v3090_v10 = vrot.slane %v3082_v11, %v10591_v28  ;;  %v1417_v54 = vcombine.low %v1409_v45, %v1416_v62  ;;  %v1110_v53 = vunpack.i.h.s16 %v853_v33 }
 0x217   : > { %v1561_v56 = vcombine.low %v10613_v51, %v10625_v58  ;;  %v8716_v18 = vpack.i.b16 %v2772_v5, %v2861_v59  ;;  %v8658_v27 = vpack.i.b16 %v853_v33, %v1108_v2  ;;  %v8676_v60 = vcombine.high %v10613_v51, %v10625_v58 }
 0x218   : > { %v8698_v13 = vld.sshfl [vmem:[#allocation2 + $0x3c] sm:$0x11 pattern:$0x75316420]  ;;  %v1585_v46 = vrot.slane %v10647_v21, %v10591_v28  ;;  %v3098_v63 = vcombine.low %v3090_v10, %v3097_v0  ;;  %v1424_v57 = vrot.slane %v1417_v54, %v10591_v28  ;;  %v8659_v62 = vpack.i.b16 %v854_v19, %v1110_v53 }
 0x219   : > { %v2780_v43 = vcombine.high %v8698_v13, %v8698_v13  ;;  %v11059_v45 = vrot.slane %v8698_v13, %v10591_v28  ;;  %v3099_v11 = vcombine.low %v8715_v6, %v8716_v18  ;;  %v1571_v44 = vrot.slane %v1561_v56, %v10591_v28 }
 0x21a   : > { %v1578_v2 = vrot.slane %v8676_v60, %v10591_v28  ;;  %9063 = vmatmul.mubr.msk.bf16.gmra.mrb[12].mxu1 %vm1425_vm7, %v3098_v63  ;;  %v5975_v5 = vsel %vm1441_vm4, %v5238_v42, 0  ;;  %v1564_v0 = vcombine.low %v8658_v27, %v8659_v62  ;;  %v4211_v6 = vunpack.i.h.s16 %v10652_v23 }
 0x21b   : > { %9023 = vmatmul.mubr.msk.bf16.gmra.mrb[16].mxu0 %vm1425_vm7, %v1424_v57  ;;  %v11066_v51 = vrot.slane %v2780_v43, %v10591_v28  ;;  %v2865_v58 = vunpack.i.h.s16 %v11059_v45  ;;  %v8717_v21 = vpack.i.b16 %v11059_v45, %v2863_v36  ;;  %9066 = vmatprep.mubr.msk.bf16.mxu1 %vm10041_vm1, %v12606_v55  ;;  %v3107_v33 = vrot.slane %v3099_v11, %v10591_v28 }
 0x21c   : > { %9028 = vmatprep.mubr.msk.bf16.mxu0 %vm10041_vm1, %v12606_v55  ;;  %v1593_v59 = vcombine.low %v1571_v44, %v1578_v2  ;;  %v4209_v57 = vunpack.i.h.s16 %v10650_v22  ;;  %v4213_v36 = vunpack.i.h.s16 %v10659_v30  ;;  %v4215_v42 = vunpack.i.h.s16 %v10662_v31 }
 0x21d   : > { %v8718_v43 = vpack.i.b16 %v11066_v51, %v2865_v58  ;;  %v1592_v10 = vrot.slane %v1564_v0, %v10591_v28  ;;  %v4217_v53 = vunpack.i.h.s16 %v10668_v38  ;;  %v8743_v44 = vpack.i.b16 %v10659_v30, %v4211_v6 }
 0x21e   : > { %v1601_v54 = vrot.slane %v1593_v59, %v10591_v28  ;;  %v8742_v56 = vpack.i.b16 %v10652_v23, %v4209_v57  ;;  %v8744_v22 = vpack.i.b16 %v10662_v31, %v4213_v36  ;;  %v8745_v13 = vpack.i.b16 %v10668_v38, %v4215_v42 }
 0x21f   : > { %v3100_v27 = vcombine.low %v8717_v21, %v8718_v43  ;;  %v1594_v18 = vcombine.low %v1585_v46, %v1592_v10  ;;  %v12620_v60 = vunpack.i.h.s16 %v10671_v39  ;;  %v4320_v11 = vcombine.low %v10689_v48, %v10677_v41 }
 0x220   : > { %v1112_v62 = vunpack.i.h.s16 %v854_v19  ;;  %v4317_v58 = vcombine.low %v8742_v56, %v8743_v44  ;;  %v4318_v0 = vcombine.low %v8744_v22, %v8745_v13  ;;  %v1126_v23 = vunpack.i.h.s16 %v10728_v24 }
 0x221   : > { %v4285_v63 = vpack.i.b16 %v12620_v60, %v4217_v53  ;;  %v3114_v2 = vrot.slane %v3100_v27, %v10591_v28  ;;  %v1608_v30 = vrot.slane %v1594_v18, %v10591_v28  ;;  %v4348_v38 = vrot.slane %v4320_v11, %v10591_v28 }
 0x222   : > { %v8660_v46 = vpack.i.b16 %v10685_v47, %v1112_v62  ;;  %v4327_v21 = vrot.slane %v4317_v58, %v10591_v28  ;;  %v4334_v41 = vrot.slane %v4318_v0, %v10591_v28  ;;  %v8661_v48 = vpack.i.b16 %v10720_v17, %v10708_v9 }
 0x223   : > { %v4319_v31 = vcombine.low %v4285_v63, %v10673_v40  ;;  %v3115_v39 = vcombine.low %v3107_v33, %v3114_v2  ;;  %v1609_v19 = vcombine.low %v1601_v54, %v1608_v30  ;;  %v12621_v57 = vunpack.i.h.s16 %v10720_v17 }
 0x224   : > { %v8663_v40 = vpack.i.b16 %v10733_v25, %v1126_v23  ;;  %v4349_v47 = vcombine.low %v4327_v21, %v4334_v41  ;;  %v1610_v33 = vcombine.low %v8660_v46, %v10705_v8  ;;  %v1611_v36 = vcombine.low %v10712_v12, %v10717_v16  ;;  %v12625_v21 = vld [vmem:[#allocation43_spill] sm:$0xff] }
 0x225   : > { %v4341_v59 = vrot.slane %v4319_v31, %v10591_v28  ;;  %v8662_v43 = vpack.i.b16 %v10728_v24, %v12621_v57  ;;  %v3122_v6 = vrot.slane %v3115_v39, %v10591_v28  ;;  %9029 = vmatmul.mubr.msk.bf16.vlgmr.msra.gmra.mrb[0].mxu0 %vm1425_vm7, %v1609_v19  ;;  %v1612_v42 = vcombine.low %v10725_v20, %v8661_v48  ;;  %v12624_v39 = vld [vmem:[#allocation42_spill] sm:$0xff] }
 0x226   : > { %v3955_v17 = vcombine.high %v10763_v4, %v10763_v4  ;;  %9093 = vmatpush3.bf16.msra.mxu0 %v5975_v5  ;;  %v4357_v24 = vrot.slane %v4349_v47, %v10591_v28  ;;  %v1620_v54 = vrot.slane %v1610_v33, %v10591_v28  ;;  %v1627_v8 = vrot.slane %v1611_v36, %v10591_v28 }
 0x227   : > { %v4350_v9 = vcombine.low %v4341_v59, %v4348_v38  ;;  %v1613_v10 = vcombine.low %v8662_v43, %v8663_v40  ;;  %9067 = vmatmul.mubr.msk.bf16.gmra.mrb[16].mxu1 %vm1425_vm7, %v3122_v6  ;;  %v4227_v12 = vunpack.i.h.s16 %v10768_v7  ;;  %9032 = vmatprep.mubr.msk.bf16.mxu0 %vm10041_vm1, %v12606_v55  ;;  %v1634_v20 = vrot.slane %v1612_v42, %v10591_v28  ;;  %v12627_v59 = vld [vmem:[#allocation44_spill] sm:$0xff]  ;;  %v12628_v43 = vld [vmem:[#allocation39_spill] sm:$0xff]  ;;  %v12629_v40 = vld [vmem:[#allocation41_spill] sm:$0xff] }
 0x228   : > { %9072 = vmatprep.mubr.msk.bf16.mxu1 %vm10041_vm1, %v12606_v55  ;;  %v4229_v5 = vunpack.i.h.s16 %v3955_v17  ;;  %v1642_v53 = vcombine.low %v1620_v54, %v1627_v8  ;;  %v3956_v56 = vcombine.high %v10768_v7, %v10768_v7  ;;  %v4233_v27 = vunpack.i.h.s16 %v10772_v14  ;;  %9140 = vmatprep.subr.bf16.mxu0 %v12606_v55  ;;  %v12630_v6 = vld [vmem:[#allocation40_spill] sm:$0xff]  ;;  %v12631_v42 = vld [vmem:[#allocation47_spill] sm:$0xff]  ;;  %v12632_v8 = vld [vmem:[#allocation49_spill] sm:$0xff] }
 0x229   : > { %v4364_v16 = vrot.slane %v4350_v9, %v10591_v28  ;;  %v1641_v4 = vrot.slane %v1613_v10, %v10591_v28  ;;  %v4235_v44 = vunpack.i.h.s16 %v10775_v29  ;;  %v8746_v18 = vpack.i.b16 %v3955_v17, %v4227_v12 }
 0x22a   : > { %v8758_v60 = vcombine.high %v10778_v32, %v10783_v15  ;;  %v1650_v63 = vrot.slane %v1642_v53, %v10591_v28  ;;  %v4231_v11 = vunpack.i.h.s16 %v3956_v56  ;;  %v8747_v62 = vpack.i.b16 %v3956_v56, %v4229_v5  ;;  %v12623_v32 = vld [vmem:[#allocation38_spill] sm:$0xff] }
 0x22b   : > { %v4365_v22 = vcombine.low %v4357_v24, %v4364_v16  ;;  %v1643_v13 = vcombine.low %v1634_v20, %v1641_v4  ;;  %v8749_v2 = vpack.i.b16 %v10775_v29, %v4233_v27  ;;  %v12622_v58 = vunpack.i.h.s16 %v10783_v15  ;;  %v12633_v5 = vld [vmem:[#allocation50_spill] sm:$0xff] }
 0x22c   : > { %v4366_v23 = vcombine.low %v10760_v3, %v8746_v18  ;;  %v4397_v30 = vrot.slane %v8758_v60, %v10591_v28  ;;  %v8748_v31 = vpack.i.b16 %v10772_v14, %v4231_v11  ;;  %v1128_v38 = vunpack.i.h.s16 %v10733_v25 }
 0x22d   : > { %v1657_v7 = vrot.slane %v1643_v13, %v10591_v28  ;;  %v4294_v0 = vpack.i.b16 %v12622_v58, %v4235_v44  ;;  %v1130_v46 = vunpack.i.h.s16 %v12623_v32  ;;  %v8666_v41 = vpack.i.b16 %v12625_v21, %v12624_v39  ;;  %v12634_v44 = vld [vmem:[#allocation48_spill] sm:$0xff]  ;;  %v12635_v13 = vld [vmem:[#allocation51_spill] sm:$0xff] }
 0x22e   : > { %v4376_v19 = vrot.slane %v4366_v23, %v10591_v28  ;;  %v12626_v15 = vunpack.i.h.s16 %v12625_v21  ;;  %v4367_v3 = vcombine.low %v8747_v62, %v8748_v31  ;;  %v8664_v14 = vpack.i.b16 %v12623_v32, %v1128_v38  ;;  %v12637_v38 = vld [vmem:[#allocation46_spill] sm:$0xff]  ;;  %v12638_v32 = vld [vmem:[#allocation45_spill] sm:$0xff] }
 0x22f   : > { %v1658_v48 = vcombine.low %v1650_v63, %v1657_v7  ;;  %v4368_v29 = vcombine.low %v8749_v2, %v4294_v0  ;;  %9073 = vmatmul.mubr.msk.bf16.vlgmr.msra.gmra.mrb[20].mxu1 %vm1425_vm7, %v4365_v22  ;;  %v8665_v25 = vpack.i.b16 %v12628_v43, %v1130_v46  ;;  %v1660_v47 = vcombine.low %v12630_v6, %v12629_v40 }
 0x230   : > { %v8667_v57 = vpack.i.b16 %v12627_v59, %v12626_v15  ;;  %9076 = vmatprep.mubr.msk.bf16.mxu1 %vm10041_vm1, %v12606_v55  ;;  %v8677_v36 = vcombine.high %v12630_v6, %v12629_v40  ;;  %v4245_v10 = vunpack.i.h.s16 %v12631_v42  ;;  %v4383_v17 = vrot.slane %v4367_v3, %v10591_v28 }
 0x231   : > { %9033 = vmatmul.mubr.msk.bf16.gmra.mrb[4].mxu0 %vm1425_vm7, %v1658_v48  ;;  %v4390_v33 = vrot.slane %v4368_v29, %v10591_v28  ;;  %v1659_v24 = vcombine.low %v8664_v14, %v8665_v25  ;;  %v1676_v54 = vrot.slane %v1660_v47, %v10591_v28  ;;  %v4247_v12 = vunpack.i.h.s16 %v12632_v8 }
 0x232   : > { %v1662_v9 = vcombine.low %v8666_v41, %v8667_v57  ;;  %9036 = vmatprep.mubr.msk.bf16.mxu0 %vm10041_vm1, %v12606_v55  ;;  %v1683_v20 = vrot.slane %v8677_v36, %v10591_v28  ;;  %v4249_v53 = vunpack.i.h.s16 %v12633_v5  ;;  %v4398_v56 = vcombine.low %v4376_v19, %v4383_v17 }
 0x233   : > { %v4399_v16 = vcombine.low %v4390_v33, %v4397_v30  ;;  %v1669_v27 = vrot.slane %v1659_v24, %v10591_v28  ;;  %v4251_v22 = vunpack.i.h.s16 %v12634_v44  ;;  %v4253_v18 = vunpack.i.h.s16 %v12635_v13 }
 0x234   : > { %v1690_v4 = vrot.slane %v1662_v9, %v10591_v28  ;;  %v8750_v11 = vpack.i.b16 %v12632_v8, %v4245_v10  ;;  %v8751_v62 = vpack.i.b16 %v12633_v5, %v4247_v12  ;;  %v4406_v2 = vrot.slane %v4398_v56, %v10591_v28  ;;  %v12639_v9 = vld [vmem:[#allocation54_spill] sm:$0xff]  ;;  %v12642_v12 = vld [vmem:[#allocation55_spill] sm:$0xff] }
 0x235   : > { %v4413_v60 = vrot.slane %v4399_v16, %v10591_v28  ;;  %v1691_v7 = vcombine.low %v1669_v27, %v1676_v54  ;;  %v8752_v58 = vpack.i.b16 %v12634_v44, %v4249_v53  ;;  %v8753_v0 = vpack.i.b16 %v12635_v13, %v4251_v22  ;;  %v12640_v10 = vld [vmem:[#allocation58_spill] sm:$0xff]  ;;  %v12641_v54 = vld [vmem:[#allocation52_spill] sm:$0xff]  ;;  %v12643_v53 = vld [vmem:[#allocation53_spill] sm:$0xff] }
 0x236   : > { %v1692_v63 = vcombine.low %v1683_v20, %v1690_v4  ;;  %v12636_v30 = vunpack.i.h.s16 %v10893_v50  ;;  %v4415_v46 = vcombine.low %v12638_v32, %v12637_v38  ;;  %v4416_v39 = vcombine.low %v8750_v11, %v8751_v62  ;;  %v12646_v32 = vld [vmem:[#allocation57_spill] sm:$0xff] }
 0x237   : > { %v4414_v41 = vcombine.low %v4406_v2, %v4413_v60  ;;  %v1699_v48 = vrot.slane %v1691_v7, %v10591_v28  ;;  %v4417_v29 = vcombine.low %v8752_v58, %v8753_v0  ;;  %v1005_v19 = vcombine.high %v12625_v21, %v12625_v21  ;;  %v12644_v60 = vld [vmem:[#allocation59_spill] sm:$0xff] }
 0x238   : > { %v1706_v23 = vrot.slane %v1692_v63, %v10591_v28  ;;  %v4303_v31 = vpack.i.b16 %v12636_v30, %v4253_v18  ;;  %v4425_v57 = vrot.slane %v4415_v46, %v10591_v28  ;;  %v4432_v3 = vrot.slane %v4416_v39, %v10591_v28  ;;  %v12647_v46 = vld [vmem:[#allocation56_spill] sm:$0xff] }
 0x239   : > { %v1006_v50 = vcombine.high %v12627_v59, %v12627_v59  ;;  %9077 = vmatmul.mubr.msk.bf16.gmra.mrb[24].mxu1 %vm1425_vm7, %v4414_v41  ;;  %v4439_v43 = vrot.slane %v4417_v29, %v10591_v28  ;;  %v1144_v25 = vunpack.i.h.s16 %v12627_v59  ;;  %v1146_v40 = vunpack.i.h.s16 %v1005_v19  ;;  %v12648_v29 = vld [vmem:[#allocation61_spill] sm:$0xff] }
 0x23a   : > { %v4418_v15 = vcombine.low %v4303_v31, %v10895_v1  ;;  %v1707_v14 = vcombine.low %v1699_v48, %v1706_v23  ;;  %9080 = vmatprep.mubr.msk.bf16.mxu1 %vm10041_vm1, %v12606_v55  ;;  %v4447_v21 = vcombine.low %v4425_v57, %v4432_v3  ;;  %v8671_v47 = vpack.i.b16 %v10915_v61, %v10911_v37 }
 0x23b   : > { %v1148_v6 = vunpack.i.h.s16 %v1006_v50  ;;  %v8668_v33 = vpack.i.b16 %v1005_v19, %v1144_v25  ;;  %v8669_v36 = vpack.i.b16 %v1006_v50, %v1146_v40  ;;  %v1710_v42 = vcombine.low %v12639_v9, %v10933_v52 }
 0x23c   : > { %v4446_v1 = vrot.slane %v4418_v15, %v10591_v28  ;;  %9037 = vmatmul.mubr.msk.bf16.gmra.mrb[8].mxu0 %vm1425_vm7, %v1707_v14  ;;  %v4139_v59 = vcombine.high %v12640_v10, %v12640_v10  ;;  %v4455_v24 = vrot.slane %v4447_v21, %v10591_v28  ;;  %v1711_v37 = vcombine.low %v12642_v12, %v8671_v47  ;;  %v12649_v15 = vld [vmem:[#allocation60_spill] sm:$0xff]  ;;  %v8765_v47 = vld.sshfl [vmem:[#allocation2] sm:$0x22 pattern:$0x75316420] }
 0x23d   : > { %9040 = vmatprep.mubr.msk.bf16.mxu0 %vm10041_vm1, %v12606_v55  ;;  %v8670_v8 = vpack.i.b16 %v12641_v54, %v1148_v6  ;;  %v1708_v16 = vcombine.low %v8668_v33, %v8669_v36  ;;  %v1732_v20 = vrot.slane %v1710_v42, %v10591_v28  ;;  %v4140_v4 = vcombine.high %v10972_v26, %v10972_v26  ;;  %v12652_v42 = vld [vmem:[#allocation62_spill] sm:$0xff] }
 0x23e   : > { %v4448_v17 = vcombine.low %v4439_v43, %v4446_v1  ;;  %v4263_v52 = vunpack.i.h.s16 %v10972_v26  ;;  %v1739_v27 = vrot.slane %v1711_v37, %v10591_v28  ;;  %v4265_v44 = vunpack.i.h.s16 %v4139_v59  ;;  %v12650_v43 = vld [vmem:[#allocation63_spill] sm:$0xff] }
 0x23f   : > { %v1709_v56 = vcombine.low %v8670_v8, %v12643_v53  ;;  %v1718_v22 = vrot.slane %v1708_v16, %v10591_v28  ;;  %v4267_v13 = vunpack.i.h.s16 %v4140_v4  ;;  %v4269_v18 = vunpack.i.h.s16 %v10976_v34  ;;  %v8767_v16 = vld.sshfl [vmem:[#allocation2 + $0x8] sm:$0x22 pattern:$0x75316420] }
 0x240   : > { %v4462_v5 = vrot.slane %v4448_v17, %v10591_v28  ;;  %v4271_v63 = vunpack.i.h.s16 %v12644_v60  ;;  %v1741_v2 = vcombine.low %v1732_v20, %v1739_v27  ;;  %v8754_v7 = vpack.i.b16 %v4139_v59, %v4263_v52 }
 0x241   : > { %v1725_v62 = vrot.slane %v1709_v56, %v10591_v28  ;;  %v8755_v26 = vpack.i.b16 %v4140_v4, %v4265_v44  ;;  %v8756_v58 = vpack.i.b16 %v10976_v34, %v4267_v13  ;;  %v8757_v0 = vpack.i.b16 %v12644_v60, %v4269_v18 }
 0x242   : > { %v4463_v11 = vcombine.low %v4455_v24, %v4462_v5  ;;  %v12645_v23 = vunpack.i.h.s16 %v10979_v35  ;;  %v1755_v38 = vrot.slane %v1741_v2, %v10591_v28  ;;  %v4464_v39 = vcombine.low %v12647_v46, %v12646_v32  ;;  %v12653_v24 = vld [vmem:[#allocation64_spill] sm:$0xff] }
 0x243   : > { %v1740_v31 = vcombine.low %v1718_v22, %v1725_v62  ;;  %v4465_v41 = vcombine.low %v10968_v49, %v8754_v7  ;;  %v4466_v48 = vcombine.low %v8755_v26, %v8756_v58  ;;  %v1162_v19 = vunpack.i.h.s16 %v12648_v29 }
 0x244   : > { %v4312_v30 = vpack.i.b16 %v12645_v23, %v4271_v63  ;;  %9081 = vmatmul.mubr.msk.bf16.gmra.mrb[28].mxu1 %vm1425_vm7, %v4463_v11  ;;  %v1164_v57 = vunpack.i.h.s16 %v12649_v15  ;;  %v4474_v50 = vrot.slane %v4464_v39, %v10591_v28  ;;  %v1166_v25 = vunpack.i.h.s16 %v12650_v43  ;;  %v8769_v23 = vld.sshfl [vmem:[#allocation2 + $0x10] sm:$0x22 pattern:$0x75316420] }
 0x245   : > { %9084 = vmatprep.mubr.msk.bf16.mxu1 %vm10041_vm1, %v12606_v55  ;;  %v1748_v3 = vrot.slane %v1740_v31, %v10591_v28  ;;  %v4481_v14 = vrot.slane %v4465_v41, %v10591_v28  ;;  %v4488_v40 = vrot.slane %v4466_v48, %v10591_v28  ;;  %v12651_v1 = vunpack.i.h.s16 %v10915_v61  ;;  %v8766_v61 = vld.sshfl [vmem:[#allocation2 + $0x4] sm:$0x13 pattern:$0x75316420] }
 0x246   : > { %v4467_v34 = vcombine.low %v8757_v0, %v4312_v30  ;;  %v8673_v6 = vpack.i.b16 %v12649_v15, %v1162_v19  ;;  %v8674_v9 = vpack.i.b16 %v12650_v43, %v1164_v57  ;;  %v8675_v10 = vpack.i.b16 %v12652_v42, %v1166_v25  ;;  %v8771_v15 = vld.sshfl [vmem:[#allocation2 + $0x18] sm:$0x22 pattern:$0x75316420] }
 0x247   : > { %v8672_v21 = vpack.i.b16 %v12648_v29, %v12651_v1  ;;  %v1756_v33 = vcombine.low %v1748_v3, %v1755_v38  ;;  %v4496_v36 = vcombine.low %v4474_v50, %v4481_v14  ;;  %v8759_v54 = vcombine.high %v12653_v24, %v10979_v35  ;;  %v8773_v24 = vld.sshfl [vmem:[#allocation2 + $0x20] sm:$0x22 pattern:$0x75316420] }
 0x248   : > { %v4495_v49 = vrot.slane %v4467_v34, %v10591_v28  ;;  %v4514_v8 = vcombine.low %v11059_v45, %v11066_v51  ;;  %v1758_v37 = vcombine.low %v8674_v9, %v8675_v10  ;;  %v5262_v20 = vcombine.high %v8765_v47, %v8765_v47  ;;  %v8768_v51 = vld.sshfl [vmem:[#allocation2 + $0xc] sm:$0x13 pattern:$0x75316420] }
 0x249   : > { %v1757_v17 = vcombine.low %v8672_v21, %v8673_v6  ;;  %9041 = vmatmul.mubr.msk.bf16.gmra.mrb[12].mxu0 %vm1425_vm7, %v1756_v33  ;;  %v4504_v12 = vrot.slane %v4496_v36, %v10591_v28  ;;  %v5269_v4 = vrot.slane %v8765_v47, %v10591_v28  ;;  %v4521_v5 = vrot.slane %v8759_v54, %v10591_v28  ;;  %v8770_v34 = vld.sshfl [vmem:[#allocation2 + $0x14] sm:$0x13 pattern:$0x75316420] }
 0x24a   : > { %v4497_v59 = vcombine.low %v4488_v40, %v4495_v49  ;;  %9044 = vmatprep.mubr.msk.bf16.mxu0 %vm10041_vm1, %v12606_v55  ;;  %v4528_v45 = vrot.slane %v4514_v8, %v10591_v28  ;;  %v1772_v53 = vrot.slane %v1758_v37, %v10591_v28  ;;  %v5276_v56 = vrot.slane %v5262_v20, %v10591_v28  ;;  %v8772_v33 = vld.sshfl [vmem:[#allocation2 + $0x1c] sm:$0x13 pattern:$0x75316420] }
 0x24b   : > { %v1765_v35 = vrot.slane %v1757_v17, %v10591_v28  ;;  %v5286_v27 = vcombine.high %v8766_v61, %v8766_v61  ;;  %v5293_v44 = vrot.slane %v8766_v61, %v10591_v28  ;;  %v5309_v18 = vcombine.high %v8767_v16, %v8767_v16 }
 0x24c   : > { %v4511_v52 = vrot.slane %v4497_v59, %v10591_v28  ;;  %v4529_v13 = vcombine.low %v4521_v5, %v4528_v45  ;;  %v5316_v60 = vrot.slane %v8767_v16, %v10591_v28  ;;  %v5333_v2 = vcombine.high %v8768_v51, %v8768_v51 }
 0x24d   : > { %v1773_v63 = vcombine.low %v1765_v35, %v1772_v53  ;;  %v5300_v11 = vrot.slane %v5286_v27, %v10591_v28  ;;  %v5301_v62 = vcombine.high %v5293_v44, %v5293_v44  ;;  %v5323_v26 = vrot.slane %v5309_v18, %v10591_v28 }
 0x24e   : > { %v4512_v22 = vcombine.low %v4504_v12, %v4511_v52  ;;  %v4536_v7 = vrot.slane %v4529_v13, %v10591_v28  ;;  %v5324_v58 = vcombine.high %v5316_v60, %v5316_v60  ;;  %v5340_v0 = vrot.slane %v8768_v51, %v10591_v28 }
 0x24f   : > { %v1780_v30 = vrot.slane %v1773_v63, %v10591_v28  ;;  %v5347_v31 = vrot.slane %v5333_v2, %v10591_v28  ;;  %v8801_v38 = vcombine.high %v5269_v4, %v5276_v56  ;;  %v5740_v32 = vcombine.low %v5293_v44, %v5300_v11  ;;  %v8774_v56 = vld.sshfl [vmem:[#allocation2 + $0x24] sm:$0x13 pattern:$0x75316420] }
 0x250   : > { %9085 = vmatmul.mubr.msk.bf16.gmra.mrb[32].mxu1 %vm1425_vm7, %v4512_v22  ;;  %v5325_v46 = vcombine.high %v5323_v26, %v5323_v26  ;;  %v5641_v39 = vunpack.i.h.s16 %v5324_v58  ;;  %v5645_v41 = vunpack.i.h.s16 %v5340_v0  ;;  %v8781_v48 = vpack.i.b16 %v5324_v58, %v5301_v62  ;;  %v8775_v63 = vld.sshfl [vmem:[#allocation2 + $0x28] sm:$0x22 pattern:$0x75316420] }
 0x251   : > { %9088 = vmatprep.mubr.msk.bf16.mxu1 %vm10041_vm1, %v12606_v55  ;;  %9045 = vmatmul.mubr.msk.bf16.gmra.mrb[16].mxu0 %vm1425_vm7, %v1780_v30  ;;  %v5749_v29 = vrot.slane %v8801_v38, %v10591_v28  ;;  %v5756_v19 = vrot.slane %v5740_v32, %v10591_v28  ;;  %v5348_v57 = vcombine.high %v5340_v0, %v5340_v0  ;;  %v5647_v16 = vunpack.i.h.s16 %v5347_v31 }
 0x252   : > { %v5356_v3 = vcombine.high %v8769_v23, %v8769_v23  ;;  %9094 = vmatprep.mubr.msk.bf16.mxu0 %vm10041_vm1, %v12606_v55  ;;  %v5643_v50 = vunpack.i.h.s16 %v5325_v46  ;;  %v8782_v14 = vpack.i.b16 %v5325_v46, %v5641_v39  ;;  %v8784_v43 = vpack.i.b16 %v5347_v31, %v5645_v41 }
 0x253   : > { %v5363_v25 = vrot.slane %v8769_v23, %v10591_v28  ;;  %v5771_v40 = vcombine.low %v5749_v29, %v5756_v19  ;;  %v5380_v1 = vcombine.high %v8770_v34, %v8770_v34  ;;  %v5387_v21 = vrot.slane %v8770_v34, %v10591_v28 }
 0x254   : > { %v5370_v49 = vrot.slane %v5356_v3, %v10591_v28  ;;  %v8783_v6 = vpack.i.b16 %v5340_v0, %v5643_v50  ;;  %v5741_v47 = vcombine.low %v8781_v48, %v8782_v14  ;;  %v5403_v9 = vcombine.high %v8771_v15, %v8771_v15 }
 0x255   : > { %v5371_v36 = vcombine.high %v5363_v25, %v5363_v25  ;;  %v5779_v42 = vrot.slane %v5771_v40, %v10591_v28  ;;  %v5394_v59 = vrot.slane %v5380_v1, %v10591_v28  ;;  %v5395_v17 = vcombine.high %v5387_v21, %v5387_v21 }
 0x256   : > { %v5372_v10 = vcombine.high %v5370_v49, %v5370_v49  ;;  %v5742_v54 = vcombine.low %v8783_v6, %v8784_v43  ;;  %v5763_v8 = vrot.slane %v5741_v47, %v10591_v28  ;;  %v5410_v61 = vrot.slane %v8771_v15, %v10591_v28  ;;  %v8776_v43 = vld.sshfl [vmem:[#allocation2 + $0x2c] sm:$0x13 pattern:$0x75316420] }
 0x257   : > { %v5417_v12 = vrot.slane %v5403_v9, %v10591_v28  ;;  %v5434_v37 = vrot.slane %v8772_v33, %v10591_v28  ;;  %v5427_v4 = vcombine.high %v8772_v33, %v8772_v33  ;;  %v5450_v45 = vcombine.high %v8773_v24, %v8773_v24 }
 0x258   : > { %9089 = vmatmul.mubr.msk.bf16.gmra.mrb[36].mxu1 %vm1425_vm7, %v4536_v7  ;;  %v5789_v20 = vcombine.low %v5372_v10, %v5387_v21  ;;  %v5770_v52 = vrot.slane %v5742_v54, %v10591_v28  ;;  %v5418_v35 = vcombine.high %v5410_v61, %v5410_v61  ;;  %v8785_v51 = vpack.i.b16 %v5348_v57, %v5647_v16  ;;  %v8777_v21 = vld.sshfl [vmem:[#allocation2 + $0x30] sm:$0x22 pattern:$0x75316420] }
 0x259   : > { %9130 = vmatprep.mubr.msk.bf16.mxu1 %vm10041_vm1, %v12606_v55  ;;  %v5419_v5 = vcombine.high %v5417_v12, %v5417_v12  ;;  %v5441_v27 = vrot.slane %v5427_v4, %v10591_v28  ;;  %v5442_v44 = vcombine.high %v5434_v37, %v5434_v37  ;;  %v5457_v62 = vrot.slane %v8773_v24, %v10591_v28  ;;  %v8779_v10 = vld.sshfl [vmem:[#allocation2 + $0x38] sm:$0x22 pattern:$0x75316420] }
 0x25a   : > { %v5805_v53 = vrot.slane %v5789_v20, %v10591_v28  ;;  %v5772_v22 = vcombine.low %v5763_v8, %v5770_v52  ;;  %v5659_v13 = vunpack.i.h.s16 %v5418_v35  ;;  %v8786_v60 = vpack.i.b16 %v5418_v35, %v5395_v17  ;;  %v8778_v61 = vld.sshfl [vmem:[#allocation2 + $0x34] sm:$0x13 pattern:$0x75316420] }
 0x25b   : > { %v5661_v18 = vunpack.i.h.s16 %v5419_v5  ;;  %v5788_v11 = vcombine.low %v8785_v51, %v5371_v36  ;;  %v5464_v2 = vrot.slane %v5450_v45, %v10591_v28  ;;  %v5474_v7 = vcombine.high %v8774_v56, %v8774_v56 }
 0x25c   : > { %v5786_v26 = vrot.slane %v5772_v22, %v10591_v28  ;;  %v8787_v58 = vpack.i.b16 %v5419_v5, %v5659_v13  ;;  %v5790_v23 = vcombine.low %v5394_v59, %v8786_v60  ;;  %v5481_v31 = vrot.slane %v8774_v56, %v10591_v28 }
 0x25d   : > { %v8788_v0 = vpack.i.b16 %v5434_v37, %v5661_v18  ;;  %v5798_v30 = vrot.slane %v5788_v11, %v10591_v28  ;;  %v5488_v38 = vrot.slane %v5474_v7, %v10591_v28  ;;  %v5497_v32 = vcombine.high %v8775_v63, %v8775_v63 }
 0x25e   : > { %v5787_v46 = vcombine.low %v5779_v42, %v5786_v26  ;;  %v5812_v41 = vrot.slane %v5790_v23, %v10591_v28  ;;  %v5504_v48 = vrot.slane %v8775_v63, %v10591_v28  ;;  %v5489_v29 = vcombine.high %v5481_v31, %v5481_v31 }
 0x25f   : > { %v5791_v39 = vcombine.low %v8787_v58, %v8788_v0  ;;  %v5820_v34 = vcombine.low %v5798_v30, %v5805_v53  ;;  %v5511_v19 = vrot.slane %v5497_v32, %v10591_v28  ;;  %v5663_v15 = vunpack.i.h.s16 %v5434_v37 }
 0x260   : > { %9095 = vmatmul.mubr.msk.bf16.vlgmr.msra.gmra.mrb[20].mxu0 %vm1425_vm7, %v5787_v46  ;;  %v5512_v3 = vcombine.high %v5504_v48, %v5504_v48  ;;  %v5665_v50 = vunpack.i.h.s16 %v5441_v27  ;;  %v8802_v14 = vcombine.high %v5457_v62, %v5464_v2  ;;  %v5839_v1 = vcombine.low %v5481_v31, %v5488_v38  ;;  %v8780_v2 = vld.sshfl [vmem:[#allocation2 + $0x3c] sm:$0x13 pattern:$0x75316420] }
 0x261   : > { %v5819_v57 = vrot.slane %v5791_v39, %v10591_v28  ;;  %9098 = vmatprep.mubr.msk.bf16.mxu0 %vm10041_vm1, %v12606_v55  ;;  %v5828_v25 = vrot.slane %v5820_v34, %v10591_v28  ;;  %v5513_v40 = vcombine.high %v5511_v19, %v5511_v19  ;;  %v8789_v49 = vpack.i.b16 %v5441_v27, %v5663_v15 }
 0x262   : > { %v5677_v47 = vunpack.i.h.s16 %v5512_v3  ;;  %v8790_v33 = vpack.i.b16 %v5442_v44, %v5665_v50  ;;  %v8791_v36 = vpack.i.b16 %v5512_v3, %v5489_v29  ;;  %v5854_v9 = vrot.slane %v8802_v14, %v10591_v28 }
 0x263   : > { %v5821_v6 = vcombine.low %v5812_v41, %v5819_v57  ;;  %v5861_v42 = vrot.slane %v5839_v1, %v10591_v28  ;;  %v5521_v59 = vcombine.high %v8776_v43, %v8776_v43  ;;  %v5528_v17 = vrot.slane %v8776_v43, %v10591_v28 }
 0x264   : > { %v8792_v54 = vpack.i.b16 %v5513_v40, %v5677_v47  ;;  %v5837_v8 = vcombine.low %v8789_v49, %v8790_v33  ;;  %v5544_v12 = vcombine.high %v8777_v21, %v8777_v21  ;;  %v5551_v20 = vrot.slane %v8777_v21, %v10591_v28 }
 0x265   : > { %v5835_v24 = vrot.slane %v5821_v6, %v10591_v28  ;;  %v5535_v37 = vrot.slane %v5521_v59, %v10591_v28  ;;  %v5536_v16 = vcombine.high %v5528_v17, %v5528_v17  ;;  %v5568_v4 = vcombine.high %v8778_v61, %v8778_v61 }
 0x266   : > { %v5840_v35 = vcombine.low %v8791_v36, %v8792_v54  ;;  %v5847_v5 = vrot.slane %v5837_v8, %v10591_v28  ;;  %v5558_v45 = vrot.slane %v5544_v12, %v10591_v28  ;;  %v5559_v51 = vcombine.high %v5551_v20, %v5551_v20 }
 0x267   : > { %v5836_v52 = vcombine.low %v5828_v25, %v5835_v24  ;;  %v5575_v53 = vrot.slane %v8778_v61, %v10591_v28  ;;  %v5582_v56 = vrot.slane %v5568_v4, %v10591_v28  ;;  %v5598_v27 = vrot.slane %v8779_v10, %v10591_v28 }
 0x268   : > { %v5868_v44 = vrot.slane %v5840_v35, %v10591_v28  ;;  %v5869_v22 = vcombine.low %v5847_v5, %v5854_v9  ;;  %v5560_v13 = vcombine.high %v5558_v45, %v5558_v45  ;;  %v5679_v18 = vunpack.i.h.s16 %v5513_v40 }
 0x269   : > { %9099 = vmatmul.mubr.msk.bf16.gmra.mrb[24].mxu0 %vm1425_vm7, %v5836_v52  ;;  %v5583_v60 = vcombine.high %v5575_v53, %v5575_v53  ;;  %v5606_v63 = vcombine.high %v5598_v27, %v5598_v27  ;;  %v5681_v11 = vunpack.i.h.s16 %v5528_v17  ;;  %v5683_v62 = vunpack.i.h.s16 %v5535_v37 }
 0x26a   : > { %9102 = vmatprep.mubr.msk.bf16.mxu0 %vm10041_vm1, %v12606_v55  ;;  %v5870_v7 = vcombine.low %v5861_v42, %v5868_v44  ;;  %v5877_v26 = vrot.slane %v5869_v22, %v10591_v28  ;;  %v8793_v58 = vpack.i.b16 %v5528_v17, %v5679_v18  ;;  %v5888_v0 = vcombine.low %v5560_v13, %v5575_v53 }
 0x26b   : > { %v8794_v23 = vpack.i.b16 %v5535_v37, %v5681_v11  ;;  %v8795_v30 = vpack.i.b16 %v5536_v16, %v5683_v62  ;;  %v8796_v31 = vpack.i.b16 %v5606_v63, %v5583_v60  ;;  %v5591_v38 = vcombine.high %v8779_v10, %v8779_v10 }
 0x26c   : > { %v5884_v32 = vrot.slane %v5870_v7, %v10591_v28  ;;  %v5910_v46 = vrot.slane %v5888_v0, %v10591_v28  ;;  %v5615_v39 = vcombine.high %v8780_v2, %v8780_v2  ;;  %v5622_v41 = vrot.slane %v8780_v2, %v10591_v28 }
 0x26d   : > { %v5886_v48 = vcombine.low %v8793_v58, %v8794_v23  ;;  %v5887_v34 = vcombine.low %v8795_v30, %v5559_v51  ;;  %v5889_v29 = vcombine.low %v5582_v56, %v8796_v31  ;;  %v5605_v19 = vrot.slane %v5591_v38, %v10591_v28 }
 0x26e   : > { %v5885_v15 = vcombine.low %v5877_v26, %v5884_v32  ;;  %v5629_v57 = vrot.slane %v5615_v39, %v10591_v28  ;;  %v5630_v3 = vcombine.high %v5622_v41, %v5622_v41  ;;  %v5695_v50 = vunpack.i.h.s16 %v5606_v63 }
 0x26f   : > { %v5896_v14 = vrot.slane %v5886_v48, %v10591_v28  ;;  %v5903_v43 = vrot.slane %v5887_v34, %v10591_v28  ;;  %v5917_v25 = vrot.slane %v5889_v29, %v10591_v28  ;;  %v5607_v40 = vcombine.high %v5605_v19, %v5605_v19 }
 0x270   : > { %v5699_v49 = vunpack.i.h.s16 %v5622_v41  ;;  %v5701_v1 = vunpack.i.h.s16 %v5629_v57  ;;  %vm7266_vm12 = vcmask 125953   ;;  %vm7246_vm13 = vcmask 1046534  }
 0x271   : > { %9103 = vmatmul.mubr.msk.bf16.gmra.mrb[28].mxu0 %vm1425_vm7, %v5885_v15  ;;  %v5918_v21 = vcombine.low %v5896_v14, %v5903_v43  ;;  %v5919_v6 = vcombine.low %v5910_v46, %v5917_v25  ;;  %v5697_v47 = vunpack.i.h.s16 %v5607_v40  ;;  %v8797_v33 = vpack.i.b16 %v5607_v40, %v5695_v50 }
 0x272   : > { %9106 = vmatprep.mubr.msk.bf16.mxu0 %vm10041_vm1, %v12606_v55  ;;  %v8799_v36 = vpack.i.b16 %v5629_v57, %v5699_v49  ;;  %v8800_v9 = vpack.i.b16 %v5630_v3, %v5701_v1  ;;  %vm682_vm14 = vcmask 124929   ;;  %vm688_vm0 = vcmask 1042433  }
 0x273   : > { %v5926_v42 = vrot.slane %v5918_v21, %v10591_v28  ;;  %v5933_v10 = vrot.slane %v5919_v6, %v10591_v28  ;;  %v8798_v59 = vpack.i.b16 %v5622_v41, %v5697_v47  ;;  %vm683_vm15 = vmand %vm682_vm14, %vm654_vm3  ;;  %vm7249_vm4 = vcmask 1047559  }
 0x274   : > { %v5936_v17 = vcombine.low %v8799_v36, %v8800_v9  ;;  %vm689_vm2 = vmand %vm688_vm0, %vm654_vm3  ;;  %vm7252_vm3 = vcmask 1041409   ;;  %vm7397_vm5 = vcmask 130048  }
 0x275   : > { %v5934_v24 = vcombine.low %v5926_v42, %v5933_v10  ;;  %v5935_v54 = vcombine.low %v8797_v33, %v8798_v59 }
 0x276   : > { %v5950_v8 = vrot.slane %v5936_v17, %v10591_v28 }
 0x277   : > { %v5943_v61 = vrot.slane %v5935_v54, %v10591_v28 }
 0x279   : > { %9107 = vmatmul.mubr.msk.bf16.gmra.mrb[32].mxu0 %vm1425_vm7, %v5934_v24  ;;  %v5951_v12 = vcombine.low %v5943_v61, %v5950_v8 }
 0x27a   : > { %9110 = vmatprep.mubr.msk.bf16.mxu0 %vm10041_vm1, %v12606_v55 }
 0x27b   : > { %v5958_v37 = vrot.slane %v5951_v12, %v10591_v28 }
 0x281   : > { %9111 = vmatmul.mubr.msk.bf16.gmra.mrb[36].mxu0 %vm1425_vm7, %v5958_v37 }
 0x282   : > { %9156 = vmatprep.mubr.msk.bf16.mxu0 %vm10041_vm1, %v12606_v55 }
 0x2bc   : > { %v3175_v16 = vpop.f32.mrb[0].mxu1 }
 0x2bd   : > { %v9052_v20 = vpop.f32.mrb[1].mxu1  ;;  %v3222_v53 = vcombine.high %v3175_v16, %v3175_v16  ;;  %v3229_v56 = vrot.slane %v3175_v16, %v10591_v28 }
 0x2be   : > { %v3178_v4 = vpop.f32.mrb[2].mxu1 }
 0x2bf   : > { %v9053_v52 = vpop.f32.mrb[3].mxu1  ;;  %v3271_v27 = vcombine.high %v3178_v4, %v3178_v4  ;;  %v3236_v44 = vrot.slane %v3222_v53, %v10591_v28  ;;  %v3237_v22 = vcombine.high %v3229_v56, %v3229_v56  ;;  %v3278_v13 = vrot.slane %v3178_v4, %v10591_v28 }
 0x2c0   : > { %v11349_v62 = vrot.slane %v3229_v56, %v10591_v28 }
 0x2c1   : > { %v3285_v63 = vrot.slane %v3271_v27, %v10591_v28  ;;  %v3238_v26 = vcombine.high %v3236_v44, %v3236_v44  ;;  %v11353_v58 = vrot.slane %v3236_v44, %v10591_v28  ;;  %v11356_v30 = vrot.slane %v3237_v22, %v10591_v28 }
 0x2c2   : > { %v3286_v31 = vcombine.high %v3278_v13, %v3278_v13  ;;  %v11360_v46 = vrot.slane %v3278_v13, %v10591_v28  ;;  %v3267_v41 = vcombine.high %v11349_v62, %v11349_v62 }
 0x2c3   : > { %v3287_v32 = vcombine.high %v3285_v63, %v3285_v63  ;;  %v11366_v34 = vrot.slane %v3238_v26, %v10591_v28  ;;  %v3268_v29 = vcombine.high %v11353_v58, %v11353_v58  ;;  %v11371_v19 = vrot.slane %v3285_v63, %v10591_v28 }
 0x2c4   : > { %v3269_v57 = vcombine.high %v11356_v30, %v11356_v30  ;;  %v11377_v3 = vrot.slane %v3286_v31, %v10591_v28 }
 0x2c5   : > { %v11380_v43 = vrot.slane %v3287_v32, %v10591_v28  ;;  %v3270_v33 = vcombine.high %v11366_v34, %v11366_v34 }
 0x2cd   : > { %v3183_v35 = vpop.f32.mrb[4].mxu1 }
 0x2ce   : > { %v9056_v5 = vpop.f32.mrb[5].mxu1  ;;  %v3320_v18 = vcombine.high %v3183_v35, %v3183_v35  ;;  %v3327_v2 = vrot.slane %v3183_v35, %v10591_v28 }
 0x2cf   : > { %v3186_v45 = vpop.f32.mrb[6].mxu1 }
 0x2d0   : > { %v9057_v51 = vpop.f32.mrb[7].mxu1  ;;  %v3369_v0 = vcombine.high %v3186_v45, %v3186_v45  ;;  %v3334_v38 = vrot.slane %v3320_v18, %v10591_v28  ;;  %v3376_v39 = vrot.slane %v3186_v45, %v10591_v28  ;;  %v3335_v48 = vcombine.high %v3327_v2, %v3327_v2 }
 0x2d1   : > { %v11385_v1 = vrot.slane %v3327_v2, %v10591_v28 }
 0x2d2   : > { %v3383_v15 = vrot.slane %v3369_v0, %v10591_v28  ;;  %v3336_v50 = vcombine.high %v3334_v38, %v3334_v38  ;;  %v3384_v40 = vcombine.high %v3376_v39, %v3376_v39  ;;  %v11388_v21 = vrot.slane %v3334_v38, %v10591_v28 }
 0x2d3   : > { %v11391_v6 = vrot.slane %v3335_v48, %v10591_v28  ;;  %v11394_v47 = vrot.slane %v3376_v39, %v10591_v28 }
 0x2d4   : > { %v3385_v9 = vcombine.high %v3383_v15, %v3383_v15  ;;  %v11402_v10 = vrot.slane %v3336_v50, %v10591_v28  ;;  %v11405_v59 = vrot.slane %v3383_v15, %v10591_v28  ;;  %v11414_v61 = vrot.slane %v3384_v40, %v10591_v28 }
 0x2d6   : > { %v11426_v35 = vrot.slane %v3385_v9, %v10591_v28 }
 0x2df   : > { %v3191_v60 = vpop.f32.mrb[8].mxu1 }
 0x2e0   : > { %v9060_v11 = vpop.f32.mrb[9].mxu1  ;;  %v3418_v14 = vcombine.high %v3191_v60, %v3191_v60  ;;  %v3425_v42 = vrot.slane %v3191_v60, %v10591_v28 }
 0x2e1   : > { %v3194_v7 = vpop.f32.mrb[10].mxu1 }
 0x2e2   : > { %v9061_v23 = vpop.f32.mrb[11].mxu1  ;;  %v3467_v49 = vcombine.high %v3194_v7, %v3194_v7  ;;  %v3432_v17 = vrot.slane %v3418_v14, %v10591_v28  ;;  %v3474_v24 = vrot.slane %v3194_v7, %v10591_v28  ;;  %v3433_v5 = vcombine.high %v3425_v42, %v3425_v42 }
 0x2e3   : > { %v11437_v7 = vrot.slane %v3425_v42, %v10591_v28 }
 0x2e4   : > { %v3481_v12 = vrot.slane %v3467_v49, %v10591_v28  ;;  %v3434_v44 = vcombine.high %v3432_v17, %v3432_v17  ;;  %v3482_v22 = vcombine.high %v3474_v24, %v3474_v24  ;;  %v11440_v26 = vrot.slane %v3432_v17, %v10591_v28 }
 0x2e5   : > { %v11446_v38 = vrot.slane %v3433_v5, %v10591_v28  ;;  %v11449_v32 = vrot.slane %v3474_v24, %v10591_v28 }
 0x2e6   : > { %v3483_v60 = vcombine.high %v3481_v12, %v3481_v12  ;;  %v11452_v48 = vrot.slane %v3434_v44, %v10591_v28  ;;  %v11455_v15 = vrot.slane %v3481_v12, %v10591_v28  ;;  %v11458_v50 = vrot.slane %v3482_v22, %v10591_v28 }
 0x2e8   : > { %v11462_v40 = vrot.slane %v3483_v60, %v10591_v28 }
 0x2ed   : > { %v3199_v52 = vpop.f32.mrb[12].mxu1 }
 0x2ee   : > { %v3516_v45 = vcombine.high %v3199_v52, %v3199_v52  ;;  %v3523_v51 = vrot.slane %v3199_v52, %v10591_v28  ;;  %v9064_v53 = vpop.f32.mrb[13].mxu1 }
 0x2ef   : > { %v3202_v13 = vpop.f32.mrb[14].mxu1 }
 0x2f0   : > { %v3530_v63 = vrot.slane %v3516_v45, %v10591_v28  ;;  %v3565_v11 = vcombine.high %v3202_v13, %v3202_v13  ;;  %v9065_v2 = vpop.f32.mrb[15].mxu1  ;;  %v3531_v0 = vcombine.high %v3523_v51, %v3523_v51  ;;  %v3572_v23 = vrot.slane %v3202_v13, %v10591_v28 }
 0x2f1   : > { %v11465_v49 = vrot.slane %v3523_v51, %v10591_v28 }
 0x2f2   : > { %v3532_v39 = vcombine.high %v3530_v63, %v3530_v63  ;;  %v3579_v14 = vrot.slane %v3565_v11, %v10591_v28  ;;  %v11468_v9 = vrot.slane %v3530_v63, %v10591_v28  ;;  %v3580_v42 = vcombine.high %v3572_v23, %v3572_v23 }
 0x2f3   : > { %v11475_v12 = vrot.slane %v3531_v0, %v10591_v28  ;;  %v11478_v52 = vrot.slane %v3572_v23, %v10591_v28 }
 0x2f4   : > { %v11485_v51 = vrot.slane %v3532_v39, %v10591_v28  ;;  %v3581_v53 = vcombine.high %v3579_v14, %v3579_v14  ;;  %v11494_v60 = vrot.slane %v3579_v14, %v10591_v28  ;;  %v11503_v0 = vrot.slane %v3580_v42, %v10591_v28 }
 0x2f6   : > { %12654 = vst [vmem:[#allocation38_spill] sm:$0xff] %v11494_v60  ;;  %v11513_v2 = vrot.slane %v3581_v53, %v10591_v28 }
 0x2f8   : > { %v1833_v23 = vpop.f32.mrb[0].mxu0  ;;  %12655 = vst [vmem:[#allocation42_spill] sm:$0xff] %v11513_v2 }
 0x2f9   : > { %v1880_v22 = vcombine.high %v1833_v23, %v1833_v23  ;;  %v1887_v63 = vrot.slane %v1833_v23, %v10591_v28  ;;  %v9030_v45 = vpop.f32.mrb[1].mxu0 }
 0x2fa   : > { %v3207_v13 = vpop.f32.mrb[16].mxu1  ;;  %v1836_v24 = vpop.f32.mrb[2].mxu0 }
 0x2fb   : > { %v3614_v42 = vcombine.high %v3207_v13, %v3207_v13  ;;  %v3621_v44 = vrot.slane %v3207_v13, %v10591_v28  ;;  %v9068_v5 = vpop.f32.mrb[17].mxu1  ;;  %v1894_v14 = vrot.slane %v1880_v22, %v10591_v28  ;;  %v1895_v17 = vcombine.high %v1887_v63, %v1887_v63  ;;  %v9031_v31 = vpop.f32.mrb[3].mxu0 }
 0x2fc   : > { %v1903_v23 = vrot.slane %v1887_v63, %v10591_v28  ;;  %v3210_v45 = vpop.f32.mrb[18].mxu1  ;;  %v1936_v11 = vrot.slane %v1836_v24, %v10591_v28 }
 0x2fd   : > { %v3628_v53 = vrot.slane %v3614_v42, %v10591_v28  ;;  %v3629_v18 = vcombine.high %v3621_v44, %v3621_v44  ;;  %v11524_v13 = vrot.slane %v3621_v44, %v10591_v28  ;;  %v9069_v5 = vpop.f32.mrb[19].mxu1  ;;  %v1896_v27 = vcombine.high %v1894_v14, %v1894_v14 }
 0x2fe   : > { %v1910_v39 = vrot.slane %v1894_v14, %v10591_v28  ;;  %v1917_v22 = vrot.slane %v1895_v17, %v10591_v28  ;;  %v1925_v4 = vcombine.high %v1903_v23, %v1903_v23  ;;  %v1929_v45 = vcombine.high %v1836_v24, %v1836_v24 }
 0x2ff   : > { %12656 = vst [vmem:[#allocation43_spill] sm:$0xff] %v11524_v13  ;;  %v3630_v31 = vcombine.high %v3628_v53, %v3628_v53  ;;  %v1924_v42 = vrot.slane %v1896_v27, %v10591_v28  ;;  %v3735_v44 = vadd.f32 %v11349_v62, %v1903_v23  ;;  %v11534_v5 = vrot.slane %v3628_v53, %v10591_v28 }
 0x300   : > { %v1926_v56 = vcombine.high %v1910_v39, %v1910_v39  ;;  %v1927_v20 = vcombine.high %v1917_v22, %v1917_v22  ;;  %v11537_v14 = vrot.slane %v3629_v18, %v10591_v28  ;;  %v3736_v63 = vadd.f32 %v11356_v30, %v1917_v22 }
 0x301   : > { %v1928_v16 = vcombine.high %v1924_v42, %v1924_v42  ;;  %v3737_v27 = vadd.f32 %v3267_v41, %v1925_v4  ;;  %v3739_v23 = vadd.f32 %v11353_v58, %v1910_v39  ;;  %v11550_v18 = vrot.slane %v3630_v31, %v10591_v28 }
 0x302   : > { %v3738_v24 = vadd.f32 %v3269_v57, %v1927_v20  ;;  %v4589_v53 = vpop.f32.mrb[20].mxu1  ;;  %v3740_v37 = vadd.f32 %v11366_v34, %v1924_v42  ;;  %v3741_v22 = vadd.f32 %v3268_v29, %v1926_v56  ;;  %v1943_v17 = vrot.slane %v1929_v45, %v10591_v28 }
 0x303   : > { %v9074_v62 = vpop.f32.mrb[21].mxu1  ;;  %v3742_v30 = vadd.f32 %v3270_v33, %v1928_v16  ;;  %v1944_v57 = vcombine.high %v1936_v11, %v1936_v11  ;;  %v1952_v20 = vrot.slane %v1936_v11, %v10591_v28  ;;  %v4636_v4 = vcombine.high %v4589_v53, %v4589_v53 }
 0x304   : > { %v11557_v41 = vpop.f32.mrb[4].mxu0  ;;  %v4592_v39 = vpop.f32.mrb[22].mxu1  ;;  %v1945_v42 = vcombine.high %v1943_v17, %v1943_v17  ;;  %v1959_v8 = vrot.slane %v1943_v17, %v10591_v28  ;;  %v4643_v58 = vrot.slane %v4589_v53, %v10591_v28 }
 0x305   : > { %v9034_v31 = vpop.f32.mrb[5].mxu0  ;;  %v4685_v29 = vcombine.high %v4592_v39, %v4592_v39  ;;  %v9075_v56 = vpop.f32.mrb[23].mxu1  ;;  %v1966_v62 = vrot.slane %v1944_v57, %v10591_v28  ;;  %v1974_v54 = vcombine.high %v1952_v20, %v1952_v20  ;;  %v3743_v34 = vadd.f32 %v11360_v46, %v1952_v20 }
 0x306   : > { %v11565_v45 = vpop.f32.mrb[6].mxu0  ;;  %v4650_v33 = vrot.slane %v4636_v4, %v10591_v28  ;;  %v1973_v11 = vrot.slane %v1945_v42, %v10591_v28  ;;  %v1975_v31 = vcombine.high %v1959_v8, %v1959_v8  ;;  %v3747_v36 = vadd.f32 %v11371_v19, %v1959_v8 }
 0x307   : > { %v9035_v16 = vpop.f32.mrb[7].mxu0  ;;  %v4651_v17 = vcombine.high %v4643_v58, %v4643_v58  ;;  %v1976_v25 = vcombine.high %v1966_v62, %v1966_v62  ;;  %v3744_v53 = vadd.f32 %v11377_v3, %v1966_v62  ;;  %v12657_v56 = vcombine.high %v11360_v46, %v11360_v46 }
 0x308   : > { %v4652_v57 = vcombine.high %v4650_v33, %v4650_v33  ;;  %v1977_v13 = vcombine.high %v1973_v11, %v1973_v11  ;;  %v3748_v20 = vadd.f32 %v11380_v43, %v1973_v11  ;;  %v12658_v4 = vcombine.high %v11371_v19, %v11371_v19 }
 0x309   : > { %v3745_v55 = vadd.f32 %v12657_v56, %v1974_v54  ;;  %v4659_v42 = vrot.slane %v4643_v58, %v10591_v28  ;;  %v12659_v8 = vcombine.high %v11377_v3, %v11377_v3  ;;  %v4666_v62 = vrot.slane %v4650_v33, %v10591_v28 }
 0x30a   : > { %v3749_v16 = vadd.f32 %v12658_v4, %v1975_v31  ;;  %v4673_v60 = vrot.slane %v4651_v17, %v10591_v28  ;;  %v4680_v46 = vrot.slane %v4652_v57, %v10591_v28  ;;  %v12660_v54 = vcombine.high %v11380_v43, %v11380_v43 }
 0x30b   : > { %v3746_v2 = vadd.f32 %v12659_v8, %v1976_v25  ;;  %v4681_v56 = vcombine.high %v4659_v42, %v4659_v42  ;;  %v11592_v19 = vadd.f32 %v4659_v42, %v3735_v44  ;;  %v4692_v58 = vrot.slane %v4592_v39, %v10591_v28 }
 0x30c   : > { %v11590_v11 = vadd.f32 %v12660_v54, %v1977_v13  ;;  %v4682_v31 = vcombine.high %v4666_v62, %v4666_v62  ;;  %v4683_v4 = vcombine.high %v4673_v60, %v4673_v60  ;;  %v4684_v3 = vcombine.high %v4680_v46, %v4680_v46  ;;  %v11597_v33 = vpop.f32.mrb[24].mxu1 }
 0x30d   : > { %12661 = vst [vmem:[#allocation44_spill] sm:$0xff] %v11592_v19  ;;  %v11595_v25 = vadd.f32 %v4673_v60, %v3736_v63  ;;  %v11599_v17 = vadd.f32 %v4681_v56, %v3737_v27  ;;  %v11601_v57 = vadd.f32 %v4666_v62, %v3739_v23  ;;  %v11603_v8 = vadd.f32 %v4680_v46, %v3740_v37  ;;  %v9078_v13 = vpop.f32.mrb[25].mxu1 }
 0x30e   : > { %v4699_v43 = vrot.slane %v4685_v29, %v10591_v28  ;;  %v11606_v44 = vadd.f32 %v4683_v4, %v3738_v24  ;;  %v11608_v42 = vadd.f32 %v4682_v31, %v3741_v22  ;;  %v11610_v39 = vadd.f32 %v4684_v3, %v3742_v30  ;;  %v11612_v60 = vpop.f32.mrb[26].mxu1 }
 0x30f   : > { %12662 = vst [vmem:[#allocation39_spill] sm:$0xff] %v11595_v25  ;;  %12663 = vst [vmem:[#allocation41_spill] sm:$0xff] %v11599_v17  ;;  %v4700_v54 = vcombine.high %v4692_v58, %v4692_v58  ;;  %v11614_v63 = vpop.f32.mrb[8].mxu0  ;;  %v4708_v23 = vrot.slane %v4692_v58, %v10591_v28  ;;  %v1978_v29 = vcombine.high %v11557_v41, %v11557_v41  ;;  %v9079_v24 = vpop.f32.mrb[27].mxu1 }
 0x310   : > { %12664 = vst [vmem:[#allocation40_spill] sm:$0xff] %v11601_v57  ;;  %12665 = vst [vmem:[#allocation47_spill] sm:$0xff] %v11603_v8  ;;  %v4701_v27 = vcombine.high %v4699_v43, %v4699_v43  ;;  %v4715_v37 = vrot.slane %v4699_v43, %v10591_v28  ;;  %v9038_v62 = vpop.f32.mrb[9].mxu0  ;;  %v1985_v30 = vrot.slane %v11557_v41, %v10591_v28 }
 0x311   : > { %12666 = vst [vmem:[#allocation49_spill] sm:$0xff] %v11606_v44  ;;  %12667 = vst [vmem:[#allocation50_spill] sm:$0xff] %v11608_v42  ;;  %v4722_v22 = vrot.slane %v4700_v54, %v10591_v28  ;;  %v2027_v46 = vcombine.high %v11565_v45, %v11565_v45  ;;  %v2034_v56 = vrot.slane %v11565_v45, %v10591_v28  ;;  %v11627_v31 = vpop.f32.mrb[10].mxu0 }
 0x312   : > { %12668 = vst [vmem:[#allocation48_spill] sm:$0xff] %v11610_v39  ;;  %v11630_v58 = vrot.slane %v4701_v27, %v10591_v28  ;;  %v4730_v4 = vcombine.high %v4708_v23, %v4708_v23  ;;  %v4731_v3 = vcombine.high %v4715_v37, %v4715_v37  ;;  %v11632_v43 = vadd.f32 %v4708_v23, %v3743_v34  ;;  %v9039_v13 = vpop.f32.mrb[11].mxu0 }
 0x313   : > { %v4732_v54 = vcombine.high %v4722_v22, %v4722_v22  ;;  %v11634_v62 = vadd.f32 %v4722_v22, %v3744_v53  ;;  %v11636_v41 = vadd.f32 %v4715_v37, %v3747_v36  ;;  %v1992_v24 = vrot.slane %v1978_v29, %v10591_v28 }
 0x314   : > { %12669 = vst [vmem:[#allocation51_spill] sm:$0xff] %v11632_v43  ;;  %v11641_v39 = vadd.f32 %v4730_v4, %v3745_v55  ;;  %v11644_v27 = vadd.f32 %v11630_v58, %v3748_v20  ;;  %v11646_v42 = vadd.f32 %v4731_v3, %v3749_v16  ;;  %v1993_v23 = vcombine.high %v1985_v30, %v1985_v30 }
 0x315   : > { %12670 = vst [vmem:[#allocation46_spill] sm:$0xff] %v11634_v62  ;;  %12671 = vst [vmem:[#allocation45_spill] sm:$0xff] %v11636_v41  ;;  %v11648_v34 = vadd.f32 %v4732_v54, %v3746_v2  ;;  %v1994_v13 = vcombine.high %v1992_v24, %v1992_v24  ;;  %v2001_v53 = vrot.slane %v1985_v30, %v10591_v28 }
 0x316   : > { %12672 = vst [vmem:[#allocation54_spill] sm:$0xff] %v11641_v39  ;;  %12673 = vst [vmem:[#allocation58_spill] sm:$0xff] %v11644_v27  ;;  %v2008_v36 = vrot.slane %v1992_v24, %v10591_v28  ;;  %v2041_v37 = vrot.slane %v2027_v46, %v10591_v28  ;;  %v2042_v29 = vcombine.high %v2034_v56, %v2034_v56 }
 0x317   : > { %12674 = vst [vmem:[#allocation52_spill] sm:$0xff] %v11646_v42  ;;  %12675 = vst [vmem:[#allocation55_spill] sm:$0xff] %v11648_v34  ;;  %v2050_v22 = vrot.slane %v2034_v56, %v10591_v28  ;;  %v11654_v55 = vpop.f32.mrb[28].mxu1  ;;  %v2015_v20 = vrot.slane %v1993_v23, %v10591_v28  ;;  %v2022_v16 = vrot.slane %v1994_v13, %v10591_v28 }
 0x318   : > { %v2023_v4 = vcombine.high %v2001_v53, %v2001_v53  ;;  %v3751_v2 = vadd.f32 %v11385_v1, %v2001_v53  ;;  %v9082_v3 = vpop.f32.mrb[29].mxu1  ;;  %v2024_v54 = vcombine.high %v2008_v36, %v2008_v36  ;;  %v11660_v30 = vadd.f32 %v11388_v21, %v2008_v36 }
 0x319   : > { %v2043_v24 = vcombine.high %v2041_v37, %v2041_v37  ;;  %v2057_v46 = vrot.slane %v2041_v37, %v10591_v28  ;;  %v11663_v45 = vpop.f32.mrb[30].mxu1  ;;  %v2025_v56 = vcombine.high %v2015_v20, %v2015_v20  ;;  %v2026_v42 = vcombine.high %v2022_v16, %v2022_v16 }
 0x31a   : > { %v3752_v27 = vadd.f32 %v11391_v6, %v2015_v20  ;;  %v12676_v23 = vcombine.high %v11385_v1, %v11385_v1  ;;  %v9083_v41 = vpop.f32.mrb[31].mxu1  ;;  %v3756_v53 = vadd.f32 %v11402_v10, %v2022_v16  ;;  %v12677_v36 = vcombine.high %v11388_v21, %v11388_v21 }
 0x31b   : > { %v2064_v34 = vrot.slane %v2042_v29, %v10591_v28  ;;  %v2071_v37 = vrot.slane %v2043_v24, %v10591_v28  ;;  %v12678_v39 = vcombine.high %v11391_v6, %v11391_v6  ;;  %v12679_v20 = vcombine.high %v11402_v10, %v11402_v10 }
 0x31c   : > { %v3753_v13 = vadd.f32 %v12676_v23, %v2023_v4  ;;  %v3757_v3 = vadd.f32 %v12677_v36, %v2024_v54  ;;  %v2072_v41 = vcombine.high %v2050_v22, %v2050_v22  ;;  %v2073_v4 = vcombine.high %v2057_v46, %v2057_v46  ;;  %v11685_v29 = vpop.f32.mrb[12].mxu0 }
 0x31d   : > { %v3754_v62 = vadd.f32 %v12678_v39, %v2025_v56  ;;  %v11681_v1 = vadd.f32 %v12679_v20, %v2026_v42  ;;  %v2074_v16 = vcombine.high %v2064_v34, %v2064_v34  ;;  %v2075_v23 = vcombine.high %v2071_v37, %v2071_v37  ;;  %v9042_v36 = vpop.f32.mrb[13].mxu0 }
 0x31e   : > { %v3759_v21 = vadd.f32 %v11394_v47, %v2050_v22  ;;  %v3760_v54 = vadd.f32 %v11414_v61, %v2064_v34  ;;  %v12680_v24 = vcombine.high %v11394_v47, %v11394_v47  ;;  %v3763_v39 = vadd.f32 %v11405_v59, %v2057_v46 }
 0x31f   : > { %v3764_v10 = vadd.f32 %v11426_v35, %v2071_v37  ;;  %v12681_v42 = vcombine.high %v11405_v59, %v11405_v59  ;;  %v12682_v22 = vcombine.high %v11414_v61, %v11414_v61  ;;  %v12683_v34 = vcombine.high %v11426_v35, %v11426_v35  ;;  %v11707_v37 = vpop.f32.mrb[14].mxu0 }
 0x320   : > { %v3761_v6 = vadd.f32 %v12680_v24, %v2072_v41  ;;  %v4734_v47 = vcombine.high %v11597_v33, %v11597_v33  ;;  %v4741_v46 = vrot.slane %v11597_v33, %v10591_v28  ;;  %v4783_v61 = vcombine.high %v11612_v60, %v11612_v60 }
 0x321   : > { %v3765_v56 = vadd.f32 %v12681_v42, %v2073_v4  ;;  %v3762_v20 = vadd.f32 %v12682_v22, %v2074_v16  ;;  %v11701_v43 = vadd.f32 %v12683_v34, %v2075_v23  ;;  %v4790_v41 = vrot.slane %v11612_v60, %v10591_v28  ;;  %v9043_v4 = vpop.f32.mrb[15].mxu0 }
 0x322   : > { %v2076_v35 = vcombine.high %v11614_v63, %v11614_v63  ;;  %v4748_v16 = vrot.slane %v4734_v47, %v10591_v28  ;;  %v4749_v23 = vcombine.high %v4741_v46, %v4741_v46  ;;  %v4757_v33 = vrot.slane %v4741_v46, %v10591_v28 }
 0x323   : > { %12684 = vst [vmem:[#allocation53_spill] sm:$0xff] %v11701_v43  ;;  %v2083_v24 = vrot.slane %v11614_v63, %v10591_v28  ;;  %v4797_v42 = vrot.slane %v4783_v61, %v10591_v28  ;;  %v4798_v36 = vcombine.high %v4790_v41, %v4790_v41  ;;  %v4806_v22 = vrot.slane %v4790_v41, %v10591_v28  ;;  %v11724_v60 = vpop.f32.mrb[32].mxu1 }
 0x324   : > { %v2090_v34 = vrot.slane %v2076_v35, %v10591_v28  ;;  %v4750_v59 = vcombine.high %v4748_v16, %v4748_v16  ;;  %v4764_v4 = vrot.slane %v4748_v16, %v10591_v28  ;;  %v4771_v47 = vrot.slane %v4749_v23, %v10591_v28  ;;  %v9086_v44 = vpop.f32.mrb[33].mxu1  ;;  %v11737_v16 = vpop.f32.mrb[16].mxu0 }
 0x325   : > { %v4779_v43 = vcombine.high %v4757_v33, %v4757_v33  ;;  %v11728_v46 = vadd.f32 %v4757_v33, %v3751_v2  ;;  %v4799_v17 = vcombine.high %v4797_v42, %v4797_v42  ;;  %v4813_v63 = vrot.slane %v4797_v42, %v10591_v28  ;;  %v11732_v8 = vpop.f32.mrb[34].mxu1  ;;  %v9046_v42 = vpop.f32.mrb[17].mxu0 }
 0x326   : > { %v4820_v61 = vrot.slane %v4798_v36, %v10591_v28  ;;  %v4778_v41 = vrot.slane %v4750_v59, %v10591_v28  ;;  %v4780_v35 = vcombine.high %v4764_v4, %v4764_v4  ;;  %v4781_v57 = vcombine.high %v4771_v47, %v4771_v47  ;;  %v9087_v23 = vpop.f32.mrb[35].mxu1 }
 0x327   : > { %12685 = vst [vmem:[#allocation59_spill] sm:$0xff] %v11728_v46  ;;  %v11735_v25 = vadd.f32 %v4771_v47, %v3752_v27  ;;  %v11739_v19 = vadd.f32 %v4779_v43, %v3753_v13  ;;  %v11742_v44 = vadd.f32 %v4764_v4, %v11660_v30  ;;  %v11745_v2 = vrot.slane %v4799_v17, %v10591_v28  ;;  %v1868_v47 = vpop.f32.mrb[18].mxu0 }
 0x328   : > { %v4828_v33 = vcombine.high %v4806_v22, %v4806_v22  ;;  %v4782_v36 = vcombine.high %v4778_v41, %v4778_v41  ;;  %v11747_v46 = vadd.f32 %v4781_v57, %v3754_v62  ;;  %v11749_v59 = vadd.f32 %v4778_v41, %v3756_v53  ;;  %v9047_v13 = vpop.f32.mrb[19].mxu0 }
 0x329   : > { %12686 = vst [vmem:[#allocation57_spill] sm:$0xff] %v11735_v25  ;;  %12687 = vst [vmem:[#allocation56_spill] sm:$0xff] %v11745_v2  ;;  %v11751_v27 = vadd.f32 %v4780_v35, %v3757_v3  ;;  %v4829_v25 = vcombine.high %v4813_v63, %v4813_v63  ;;  %v4830_v23 = vcombine.high %v4820_v61, %v4820_v61 }
 0x32a   : > { %v11753_v43 = vadd.f32 %v4806_v22, %v3759_v21  ;;  %v2125_v30 = vcombine.high %v11627_v31, %v11627_v31  ;;  %v11758_v17 = vadd.f32 %v4782_v36, %v11681_v1  ;;  %v11760_v4 = vadd.f32 %v4820_v61, %v3760_v54 }
 0x32b   : > { %v11762_v57 = vadd.f32 %v4828_v33, %v3761_v6  ;;  %v11764_v62 = vadd.f32 %v4813_v63, %v3763_v39  ;;  %v11766_v53 = vadd.f32 %v4830_v23, %v3762_v20  ;;  %v11769_v3 = vadd.f32 %v11745_v2, %v3764_v10  ;;  %v11773_v41 = vpop.f32.mrb[36].mxu1 }
 0x32c   : > { %v11771_v21 = vadd.f32 %v4829_v25, %v3765_v56  ;;  %v2091_v22 = vcombine.high %v2083_v24, %v2083_v24  ;;  %v2092_v35 = vcombine.high %v2090_v34, %v2090_v34  ;;  %v2099_v1 = vrot.slane %v2083_v24, %v10591_v28  ;;  %v9090_v39 = vpop.f32.mrb[37].mxu1 }
 0x32d   : > { %12688 = vst [vmem:[#allocation61_spill] sm:$0xff] %v11764_v62  ;;  %12689 = vst [vmem:[#allocation60_spill] sm:$0xff] %v11766_v53  ;;  %v2106_v54 = vrot.slane %v2090_v34, %v10591_v28  ;;  %v2132_v6 = vrot.slane %v11627_v31, %v10591_v28  ;;  %v2139_v63 = vrot.slane %v2125_v30, %v10591_v28  ;;  %v4624_v56 = vpop.f32.mrb[38].mxu1 }
 0x32e   : > { %12690 = vst [vmem:[#allocation63_spill] sm:$0xff] %v11769_v3  ;;  %12691 = vst [vmem:[#allocation62_spill] sm:$0xff] %v11771_v21  ;;  %v2113_v20 = vrot.slane %v2091_v22, %v10591_v28  ;;  %v4832_v25 = vcombine.high %v11654_v55, %v11654_v55  ;;  %v4839_v10 = vrot.slane %v11654_v55, %v10591_v28  ;;  %v9091_v42 = vpop.f32.mrb[39].mxu1 }
 0x32f   : > { %v2120_v61 = vrot.slane %v2092_v35, %v10591_v28  ;;  %v2121_v24 = vcombine.high %v2099_v1, %v2099_v1  ;;  %v2122_v33 = vcombine.high %v2106_v54, %v2106_v54  ;;  %v3767_v34 = vadd.f32 %v11437_v7, %v2099_v1 }
 0x330   : > { %v2123_v31 = vcombine.high %v2113_v20, %v2113_v20  ;;  %v3768_v36 = vadd.f32 %v11446_v38, %v2113_v20  ;;  %v3771_v47 = vadd.f32 %v11440_v26, %v2106_v54  ;;  %v2140_v23 = vcombine.high %v2132_v6, %v2132_v6 }
 0x331   : > { %v2124_v30 = vcombine.high %v2120_v61, %v2120_v61  ;;  %v12692_v13 = vcombine.high %v11437_v7, %v11437_v7  ;;  %v3772_v55 = vadd.f32 %v11452_v48, %v2120_v61  ;;  %v12693_v35 = vcombine.high %v11440_v26, %v11440_v26 }
 0x332   : > { %v12694_v1 = vcombine.high %v11446_v38, %v11446_v38  ;;  %v2141_v42 = vcombine.high %v2139_v63, %v2139_v63  ;;  %v2148_v20 = vrot.slane %v2132_v6, %v10591_v28  ;;  %v2155_v54 = vrot.slane %v2139_v63, %v10591_v28 }
 0x333   : > { %v3769_v22 = vadd.f32 %v12692_v13, %v2121_v24  ;;  %v3773_v39 = vadd.f32 %v12693_v35, %v2122_v33  ;;  %v12695_v21 = vcombine.high %v11452_v48, %v11452_v48  ;;  %v2162_v24 = vrot.slane %v2140_v23, %v10591_v28 }
 0x334   : > { %v3770_v56 = vadd.f32 %v12694_v1, %v2123_v31  ;;  %v4846_v61 = vrot.slane %v4832_v25, %v10591_v28  ;;  %v4847_v13 = vcombine.high %v4839_v10, %v4839_v10  ;;  %v2169_v26 = vrot.slane %v2141_v42, %v10591_v28  ;;  %v11817_v42 = vpop.f32.mrb[20].mxu0 }
 0x335   : > { %v3774_v7 = vadd.f32 %v12695_v21, %v2124_v30  ;;  %v2170_v33 = vcombine.high %v2148_v20, %v2148_v20  ;;  %v2171_v35 = vcombine.high %v2155_v54, %v2155_v54  ;;  %v3775_v38 = vadd.f32 %v11449_v32, %v2148_v20 }
 0x336   : > { %v2172_v31 = vcombine.high %v2162_v24, %v2162_v24  ;;  %v3776_v6 = vadd.f32 %v11458_v50, %v2162_v24  ;;  %v3779_v63 = vadd.f32 %v11455_v15, %v2155_v54  ;;  %v4848_v1 = vcombine.high %v4846_v61, %v4846_v61 }
 0x337   : > { %v2173_v3 = vcombine.high %v2169_v26, %v2169_v26  ;;  %v12696_v48 = vcombine.high %v11449_v32, %v11449_v32  ;;  %v3780_v25 = vadd.f32 %v11462_v40, %v2169_v26  ;;  %v12697_v23 = vcombine.high %v11455_v15, %v11455_v15  ;;  %v9096_v32 = vpop.f32.mrb[21].mxu0 }
 0x338   : > { %v12698_v20 = vcombine.high %v11458_v50, %v11458_v50  ;;  %v4855_v54 = vrot.slane %v4839_v10, %v10591_v28  ;;  %v4862_v62 = vrot.slane %v4846_v61, %v10591_v28  ;;  %v4869_v53 = vrot.slane %v4847_v13, %v10591_v28 }
 0x339   : > { %v3777_v21 = vadd.f32 %v12696_v48, %v2170_v33  ;;  %v3781_v30 = vadd.f32 %v12697_v23, %v2171_v35  ;;  %v12699_v26 = vcombine.high %v11462_v40, %v11462_v40  ;;  %v4876_v15 = vrot.slane %v4848_v1, %v10591_v28 }
 0x33a   : > { %v3778_v24 = vadd.f32 %v12698_v20, %v2172_v31  ;;  %v4881_v35 = vcombine.high %v11663_v45, %v11663_v45  ;;  %v4888_v50 = vrot.slane %v11663_v45, %v10591_v28  ;;  %v11835_v31 = vpop.f32.mrb[22].mxu0  ;;  %v4877_v10 = vcombine.high %v4855_v54, %v4855_v54 }
 0x33b   : > { %v11828_v33 = vadd.f32 %v12699_v26, %v2173_v3  ;;  %v4878_v61 = vcombine.high %v4862_v62, %v4862_v62  ;;  %v4879_v48 = vcombine.high %v4869_v53, %v4869_v53  ;;  %v11837_v13 = vadd.f32 %v4855_v54, %v3767_v34  ;;  %v9097_v23 = vpop.f32.mrb[23].mxu0 }
 0x33c   : > { %v4880_v20 = vcombine.high %v4876_v15, %v4876_v15  ;;  %v11839_v40 = vadd.f32 %v4869_v53, %v3768_v36  ;;  %v11841_v3 = vadd.f32 %v4862_v62, %v3771_v47  ;;  %v11843_v1 = vadd.f32 %v4876_v15, %v3772_v55  ;;  %v11866_v15 = vpop.f32.mrb[24].mxu0 }
 0x33d   : > { %12700 = vst [vmem:[#allocation64_spill] sm:$0xff] %v11828_v33  ;;  %v11845_v32 = vadd.f32 %v4877_v10, %v3769_v22  ;;  %v11847_v26 = vadd.f32 %v4879_v48, %v3770_v56  ;;  %v11849_v45 = vadd.f32 %v4878_v61, %v3773_v39  ;;  %v4895_v33 = vrot.slane %v4881_v35, %v10591_v28 }
 0x33e   : > { %v11852_v2 = vadd.f32 %v4880_v20, %v3774_v7  ;;  %v4896_v34 = vcombine.high %v4888_v50, %v4888_v50  ;;  %v4904_v54 = vrot.slane %v4888_v50, %v10591_v28  ;;  %v2174_v53 = vcombine.high %v11685_v29, %v11685_v29 }
 0x33f   : > { %12701 = vst [vmem:[#allocation65_spill] sm:$0xff] %v11847_v26  ;;  %12702 = vst [vmem:[#allocation66_spill] sm:$0xff] %v11849_v45  ;;  %v4897_v62 = vcombine.high %v4895_v33, %v4895_v33  ;;  %v4911_v36 = vrot.slane %v4895_v33, %v10591_v28  ;;  %v2181_v47 = vrot.slane %v11685_v29, %v10591_v28  ;;  %v9100_v29 = vpop.f32.mrb[25].mxu0 }
 0x340   : > { %12703 = vst [vmem:[#allocation67_spill] sm:$0xff] %v11852_v2  ;;  %v2223_v22 = vcombine.high %v11707_v37, %v11707_v37  ;;  %v4918_v55 = vrot.slane %v4896_v34, %v10591_v28  ;;  %v4926_v39 = vcombine.high %v4904_v54, %v4904_v54  ;;  %v11863_v56 = vadd.f32 %v4904_v54, %v3775_v38  ;;  %v11877_v38 = vpop.f32.mrb[26].mxu0 }
 0x341   : > { %v2188_v7 = vrot.slane %v2174_v53, %v10591_v28  ;;  %v11869_v35 = vrot.slane %v4897_v62, %v10591_v28  ;;  %v4927_v50 = vcombine.high %v4911_v36, %v4911_v36  ;;  %v11871_v33 = vadd.f32 %v4911_v36, %v3779_v63  ;;  %v9101_v62 = vpop.f32.mrb[27].mxu0 }
 0x342   : > { %12704 = vst [vmem:[#allocation68_spill] sm:$0xff] %v11863_v56  ;;  %v2189_v10 = vcombine.high %v2181_v47, %v2181_v47  ;;  %v4928_v61 = vcombine.high %v4918_v55, %v4918_v55  ;;  %v11873_v48 = vadd.f32 %v4918_v55, %v3776_v6  ;;  %v11875_v23 = vadd.f32 %v4926_v39, %v3777_v21 }
 0x343   : > { %12705 = vst [vmem:[#allocation69_spill] sm:$0xff] %v11871_v33  ;;  %v2190_v20 = vcombine.high %v2188_v7, %v2188_v7  ;;  %v11882_v54 = vadd.f32 %v11869_v35, %v3780_v25  ;;  %v11884_v53 = vadd.f32 %v4927_v50, %v3781_v30  ;;  %v2197_v63 = vrot.slane %v2181_v47, %v10591_v28 }
 0x344   : > { %12706 = vst [vmem:[#allocation70_spill] sm:$0xff] %v11873_v48  ;;  %12707 = vst [vmem:[#allocation71_spill] sm:$0xff] %v11875_v23  ;;  %v11887_v36 = vadd.f32 %v4928_v61, %v3778_v24  ;;  %v2204_v6 = vrot.slane %v2188_v7, %v10591_v28  ;;  %v2211_v21 = vrot.slane %v2189_v10, %v10591_v28 }
 0x345   : > { %12708 = vst [vmem:[#allocation72_spill] sm:$0xff] %v11882_v54  ;;  %12709 = vst [vmem:[#allocation73_spill] sm:$0xff] %v11884_v53  ;;  %v2218_v55 = vrot.slane %v2190_v20, %v10591_v28  ;;  %v2219_v39 = vcombine.high %v2197_v63, %v2197_v63  ;;  %v3783_v29 = vadd.f32 %v11465_v49, %v2197_v63 }
 0x346   : > { %12710 = vst [vmem:[#allocation74_spill] sm:$0xff] %v11887_v36  ;;  %v2230_v25 = vrot.slane %v11707_v37, %v10591_v28  ;;  %v2237_v30 = vrot.slane %v2223_v22, %v10591_v28  ;;  %v2220_v50 = vcombine.high %v2204_v6, %v2204_v6  ;;  %v2221_v34 = vcombine.high %v2211_v21, %v2211_v21 }
 0x347   : > { %v2222_v47 = vcombine.high %v2218_v55, %v2218_v55  ;;  %v3784_v24 = vadd.f32 %v11475_v12, %v2211_v21  ;;  %v12711_v7 = vcombine.high %v11465_v49, %v11465_v49  ;;  %v3787_v10 = vadd.f32 %v11468_v9, %v2204_v6  ;;  %v11911_v49 = vpop.f32.mrb[28].mxu0 }
 0x348   : > { %v3788_v20 = vadd.f32 %v11485_v51, %v2218_v55  ;;  %v2238_v62 = vcombine.high %v2230_v25, %v2230_v25  ;;  %v12712_v63 = vcombine.high %v11475_v12, %v11475_v12  ;;  %v12713_v22 = vcombine.high %v11468_v9, %v11468_v9 }
 0x349   : > { %v3785_v61 = vadd.f32 %v12711_v7, %v2219_v39  ;;  %v12714_v21 = vcombine.high %v11485_v51, %v11485_v51  ;;  %v2239_v36 = vcombine.high %v2237_v30, %v2237_v30  ;;  %v2246_v6 = vrot.slane %v2230_v25, %v10591_v28 }
 0x34a   : > { %v3786_v37 = vadd.f32 %v12712_v63, %v2221_v34  ;;  %v3789_v53 = vadd.f32 %v12713_v22, %v2220_v50  ;;  %v2253_v55 = vrot.slane %v2237_v30, %v10591_v28  ;;  %v2260_v39 = vrot.slane %v2238_v62, %v10591_v28  ;;  %v9104_v34 = vpop.f32.mrb[29].mxu0 }
 0x34b   : > { %v3790_v54 = vadd.f32 %v12714_v21, %v2222_v47  ;;  %v4930_v12 = vcombine.high %v11724_v60, %v11724_v60  ;;  %v2267_v9 = vrot.slane %v2239_v36, %v10591_v28  ;;  %v4937_v50 = vrot.slane %v11724_v60, %v10591_v28  ;;  %v11925_v25 = vpop.f32.mrb[30].mxu0  ;;  %v12715_v34 = vld [vmem:[#allocation38_spill] sm:$0xff] }
 0x34c   : > { %v4979_v51 = vcombine.high %v11732_v8, %v11732_v8  ;;  %v4986_v47 = vrot.slane %v11732_v8, %v10591_v28  ;;  %v2268_v30 = vcombine.high %v2246_v6, %v2246_v6  ;;  %v2269_v7 = vcombine.high %v2253_v55, %v2253_v55  ;;  %v9105_v22 = vpop.f32.mrb[31].mxu0  ;;  %v12716_v60 = vld [vmem:[#allocation42_spill] sm:$0xff] }
 0x34d   : > { %v2270_v62 = vcombine.high %v2260_v39, %v2260_v39  ;;  %v3791_v63 = vadd.f32 %v11478_v52, %v2246_v6  ;;  %v2271_v21 = vcombine.high %v2267_v9, %v2267_v9  ;;  %v3792_v36 = vadd.f32 %v11503_v0, %v2260_v39 }
 0x34e   : > { %v3795_v33 = vadd.f32 %v12715_v34, %v2253_v55  ;;  %v3796_v23 = vadd.f32 %v12716_v60, %v2267_v9  ;;  %v12717_v48 = vcombine.high %v11478_v52, %v11478_v52  ;;  %v12718_v8 = vcombine.high %v11503_v0, %v11503_v0 }
 0x34f   : > { %v12719_v45 = vcombine.high %v12715_v34, %v12715_v34  ;;  %v4944_v22 = vrot.slane %v4930_v12, %v10591_v28  ;;  %v12720_v39 = vcombine.high %v12716_v60, %v12716_v60  ;;  %v4945_v9 = vcombine.high %v4937_v50, %v4937_v50  ;;  %v11953_v60 = vpop.f32.mrb[32].mxu0 }
 0x350   : > { %v3793_v56 = vadd.f32 %v12717_v48, %v2268_v30  ;;  %v3794_v2 = vadd.f32 %v12718_v8, %v2270_v62  ;;  %v4953_v26 = vrot.slane %v4937_v50, %v10591_v28  ;;  %v4993_v52 = vrot.slane %v4979_v51, %v10591_v28  ;;  %12723 = vst [vmem:[#allocation75_spill] sm:$0xff] %v11953_v60 }
 0x351   : > { %v3797_v6 = vadd.f32 %v12719_v45, %v2269_v7  ;;  %v11944_v55 = vadd.f32 %v12720_v39, %v2271_v21  ;;  %v4946_v48 = vcombine.high %v4944_v22, %v4944_v22  ;;  %v4960_v0 = vrot.slane %v4944_v22, %v10591_v28  ;;  %v9108_v39 = vpop.f32.mrb[33].mxu0 }
 0x352   : > { %v4994_v30 = vcombine.high %v4986_v47, %v4986_v47  ;;  %v5002_v62 = vrot.slane %v4986_v47, %v10591_v28  ;;  %v4967_v45 = vrot.slane %v4945_v9, %v10591_v28  ;;  %v4975_v7 = vcombine.high %v4953_v26, %v4953_v26 }
 0x353   : > { %12721 = vst [vmem:[#allocation38_spill] sm:$0xff] %v11944_v55  ;;  %v11951_v12 = vadd.f32 %v4953_v26, %v3783_v29  ;;  %v4995_v34 = vcombine.high %v4993_v52, %v4993_v52  ;;  %v4974_v21 = vrot.slane %v4946_v48, %v10591_v28  ;;  %v4976_v8 = vcombine.high %v4960_v0, %v4960_v0  ;;  %v11964_v26 = vpop.f32.mrb[34].mxu0 }
 0x354   : > { %v11956_v50 = vadd.f32 %v4960_v0, %v3787_v10  ;;  %v5009_v51 = vrot.slane %v4993_v52, %v10591_v28  ;;  %v4977_v22 = vcombine.high %v4967_v45, %v4967_v45  ;;  %v11959_v55 = vadd.f32 %v4967_v45, %v3784_v24  ;;  %12724 = vst [vmem:[#allocation76_spill] sm:$0xff] %v11964_v26  ;;  %v9109_v48 = vpop.f32.mrb[35].mxu0 }
 0x355   : > { %12722 = vst [vmem:[#allocation42_spill] sm:$0xff] %v11951_v12  ;;  %v11961_v47 = vadd.f32 %v4975_v7, %v3785_v61  ;;  %v5016_v9 = vrot.slane %v4994_v30, %v10591_v28  ;;  %v4978_v29 = vcombine.high %v4974_v21, %v4974_v21  ;;  %v11966_v12 = vadd.f32 %v4974_v21, %v3788_v20 }
 0x356   : > { %v11968_v60 = vadd.f32 %v4976_v8, %v3789_v53  ;;  %v11971_v10 = vrot.slane %v4995_v34, %v10591_v28  ;;  %v11973_v52 = vadd.f32 %v4977_v22, %v3786_v37  ;;  %v5024_v0 = vcombine.high %v5002_v62, %v5002_v62 }
 0x357   : > { %v5025_v24 = vcombine.high %v5009_v51, %v5009_v51  ;;  %v5026_v45 = vcombine.high %v5016_v9, %v5016_v9  ;;  %v11977_v30 = vadd.f32 %v4978_v29, %v3790_v54  ;;  %v11979_v7 = vadd.f32 %v5002_v62, %v3791_v63 }
 0x358   : > { %v11981_v20 = vadd.f32 %v5016_v9, %v3792_v36  ;;  %v11983_v53 = vadd.f32 %v5024_v0, %v3793_v56  ;;  %v11987_v34 = vadd.f32 %v5009_v51, %v3795_v33  ;;  %v11990_v37 = vadd.f32 %v11971_v10, %v3796_v23  ;;  %v12008_v36 = vpop.f32.mrb[36].mxu0 }
 0x359   : > { %12725 = vst [vmem:[#allocation77_spill] sm:$0xff] %v11979_v7  ;;  %v11985_v21 = vadd.f32 %v5026_v45, %v3794_v2  ;;  %v11992_v8 = vadd.f32 %v5025_v24, %v3797_v6  ;;  %v2272_v39 = vcombine.high %v11737_v16, %v11737_v16  ;;  %v2279_v54 = vrot.slane %v11737_v16, %v10591_v28  ;;  %v9112_v22 = vpop.f32.mrb[37].mxu0 }
 0x35a   : > { %12726 = vst [vmem:[#allocation78_spill] sm:$0xff] %v11981_v20  ;;  %12727 = vst [vmem:[#allocation79_spill] sm:$0xff] %v11983_v53  ;;  %v5028_v63 = vcombine.high %v11773_v41, %v11773_v41  ;;  %v5035_v2 = vrot.slane %v11773_v41, %v10591_v28  ;;  %v6058_v56 = vcombine.high %v11817_v42, %v11817_v42 }
 0x35b   : > { %12728 = vst [vmem:[#allocation80_spill] sm:$0xff] %v11985_v21  ;;  %12729 = vst [vmem:[#allocation81_spill] sm:$0xff] %v11987_v34  ;;  %v6065_v33 = vrot.slane %v11817_v42, %v10591_v28  ;;  %v6107_v23 = vcombine.high %v11835_v31, %v11835_v31  ;;  %v2286_v6 = vrot.slane %v2272_v39, %v10591_v28  ;;  %v6046_v42 = vpop.f32.mrb[38].mxu0  ;;  %v12733_v21 = vld [vmem:[#allocation43_spill] sm:$0xff] }
 0x35c   : > { %12730 = vst [vmem:[#allocation82_spill] sm:$0xff] %v11990_v37  ;;  %12731 = vst [vmem:[#allocation83_spill] sm:$0xff] %v11992_v8  ;;  %v2287_v16 = vcombine.high %v2279_v54, %v2279_v54  ;;  %v2295_v62 = vrot.slane %v2279_v54, %v10591_v28  ;;  %v5042_v51 = vrot.slane %v5028_v63, %v10591_v28  ;;  %v9113_v39 = vpop.f32.mrb[39].mxu0 }
 0x35d   : > { %12732 = vst [vmem:[#allocation84_spill] sm:$0xff] %v12008_v36  ;;  %v5043_v41 = vcombine.high %v5035_v2, %v5035_v2  ;;  %v5051_v9 = vrot.slane %v5035_v2, %v10591_v28  ;;  %v6072_v29 = vrot.slane %v6058_v56, %v10591_v28  ;;  %v6073_v48 = vcombine.high %v6065_v33, %v6065_v33 }
 0x35e   : > { %v2288_v0 = vcombine.high %v2286_v6, %v2286_v6  ;;  %v2302_v24 = vrot.slane %v2286_v6, %v10591_v28  ;;  %v2309_v45 = vrot.slane %v2287_v16, %v10591_v28  ;;  %v2317_v61 = vcombine.high %v2295_v62, %v2295_v62 }
 0x35f   : > { %v3799_v8 = vadd.f32 %v12733_v21, %v2295_v62  ;;  %v5044_v54 = vcombine.high %v5042_v51, %v5042_v51  ;;  %v5058_v63 = vrot.slane %v5042_v51, %v10591_v28  ;;  %v5065_v22 = vrot.slane %v5043_v41, %v10591_v28 }
 0x360   : > { %v2316_v2 = vrot.slane %v2288_v0, %v10591_v28  ;;  %v2318_v37 = vcombine.high %v2302_v24, %v2302_v24  ;;  %v2319_v56 = vcombine.high %v2309_v45, %v2309_v45  ;;  %v3800_v42 = vadd.f32 %v11537_v14, %v2309_v45 }
 0x361   : > { %v12734_v6 = vcombine.high %v12733_v21, %v12733_v21  ;;  %v3803_v16 = vadd.f32 %v11534_v5, %v2302_v24  ;;  %v5072_v39 = vrot.slane %v5044_v54, %v10591_v28  ;;  %v5073_v62 = vcombine.high %v5051_v9, %v5051_v9 }
 0x362   : > { %v2320_v20 = vcombine.high %v2316_v2, %v2316_v2  ;;  %v12735_v51 = vcombine.high %v11537_v14, %v11537_v14  ;;  %v3804_v0 = vadd.f32 %v11550_v18, %v2316_v2  ;;  %v12736_v34 = vcombine.high %v11534_v5, %v11534_v5 }
 0x363   : > { %v3801_v53 = vadd.f32 %v12734_v6, %v2317_v61  ;;  %v5074_v7 = vcombine.high %v5058_v63, %v5058_v63  ;;  %v5075_v36 = vcombine.high %v5065_v22, %v5065_v22  ;;  %v5076_v21 = vcombine.high %v5072_v39, %v5072_v39 }
 0x364   : > { %v3802_v41 = vadd.f32 %v12735_v51, %v2319_v56  ;;  %v3805_v45 = vadd.f32 %v12736_v34, %v2318_v37  ;;  %v12034_v61 = vadd.f32 %v5051_v9, %v3799_v8  ;;  %v12737_v24 = vcombine.high %v11550_v18, %v11550_v18  ;;  %v12745_v51 = vld [vmem:[#allocation40_spill] sm:$0xff] }
 0x365   : > { %v12039_v6 = vadd.f32 %v5065_v22, %v3800_v42  ;;  %v12041_v26 = vadd.f32 %v5073_v62, %v3801_v53  ;;  %v12043_v14 = vadd.f32 %v5058_v63, %v3803_v16  ;;  %v12047_v56 = vadd.f32 %v5072_v39, %v3804_v0  ;;  %v12744_v62 = vld [vmem:[#allocation39_spill] sm:$0xff] }
 0x366   : > { %v3806_v54 = vadd.f32 %v12737_v24, %v2320_v20  ;;  %v12045_v2 = vadd.f32 %v5075_v36, %v3802_v41  ;;  %v12049_v5 = vadd.f32 %v5074_v7, %v3805_v45  ;;  %v6074_v34 = vcombine.high %v6072_v29, %v6072_v29  ;;  %v12746_v0 = vld [vmem:[#allocation47_spill] sm:$0xff] }
 0x367   : > { %12738 = vst [vmem:[#allocation43_spill] sm:$0xff] %v12043_v14  ;;  %12739 = vst [vmem:[#allocation85_spill] sm:$0xff] %v12047_v56  ;;  %v6081_v8 = vrot.slane %v6065_v33, %v10591_v28  ;;  %v6088_v18 = vrot.slane %v6072_v29, %v10591_v28  ;;  %v6095_v20 = vrot.slane %v6073_v48, %v10591_v28  ;;  %v12743_v33 = vld [vmem:[#allocation44_spill] sm:$0xff] }
 0x368   : > { %12740 = vst [vmem:[#allocation86_spill] sm:$0xff] %v12049_v5  ;;  %v12051_v37 = vadd.f32 %v5076_v21, %v3806_v54  ;;  %v6102_v53 = vrot.slane %v6074_v34, %v10591_v28  ;;  %v6114_v9 = vrot.slane %v11835_v31, %v10591_v28  ;;  %v6121_v36 = vrot.slane %v6107_v23, %v10591_v28  ;;  %v12747_v31 = vld [vmem:[#allocation41_spill] sm:$0xff]  ;;  %v12749_v54 = vld [vmem:[#allocation50_spill] sm:$0xff] }
 0x369   : > { %v12742_v7 = vcombine.high %v11630_v58, %v11630_v58  ;;  %v6103_v22 = vcombine.high %v6081_v8, %v6081_v8  ;;  %v6104_v42 = vcombine.high %v6088_v18, %v6088_v18  ;;  %v6105_v16 = vcombine.high %v6095_v20, %v6095_v20  ;;  %v12748_v23 = vld [vmem:[#allocation49_spill] sm:$0xff] }
 0x36a   : > { %12741 = vst [vmem:[#allocation87_spill] sm:$0xff] %v12051_v37  ;;  %v6571_v39 = vadd.f32 %v6081_v8, %v12743_v33  ;;  %v6106_v29 = vcombine.high %v6102_v53, %v6102_v53  ;;  %v6572_v48 = vadd.f32 %v6095_v20, %v12744_v62  ;;  %v6575_v41 = vadd.f32 %v6088_v18, %v12745_v51 }
 0x36b   : > { %v5164_v63 = vadd.f32 %v12742_v7, %v11590_v11  ;;  %v6576_v45 = vadd.f32 %v6102_v53, %v12746_v0  ;;  %v6573_v21 = vadd.f32 %v6103_v22, %v12747_v31  ;;  %v6574_v24 = vadd.f32 %v6105_v16, %v12748_v23  ;;  %v12750_v11 = vld [vmem:[#allocation48_spill] sm:$0xff]  ;;  %v12753_v23 = vld [vmem:[#allocation54_spill] sm:$0xff] }
 0x36c   : > { %v6577_v34 = vadd.f32 %v6104_v42, %v12749_v54  ;;  %v6122_v58 = vcombine.high %v6114_v9, %v6114_v9  ;;  %v6578_v7 = vadd.f32 %v6106_v29, %v12750_v11  ;;  %v6707_v37 = vcombine.low %v6571_v39, %v6572_v48  ;;  %v9472_v31 = vld [vmem:[#allocation16] sm:$0xff]   ;;  %v12756_v11 = vld [vmem:[#allocation58_spill] sm:$0xff] }
 0x36d   : > { %v6709_v5 = vcombine.low %v6575_v41, %v6576_v45  ;;  %v6123_v56 = vcombine.high %v6121_v36, %v6121_v36  ;;  %v6708_v8 = vcombine.low %v6573_v21, %v6574_v24  ;;  %v6130_v33 = vrot.slane %v6114_v9, %v10591_v28  ;;  %v12751_v9 = vld [vmem:[#allocation51_spill] sm:$0xff]  ;;  %v12755_v54 = vld [vmem:[#allocation45_spill] sm:$0xff]  ;;  %9115 = vmatpush3.bf16.msra.mxu1 %v9472_v31 }
 0x36e   : > { %v6137_v20 = vrot.slane %v6121_v36, %v10591_v28  ;;  %v6144_v18 = vrot.slane %v6122_v58, %v10591_v28  ;;  %v6710_v53 = vcombine.low %v6577_v34, %v6578_v7  ;;  %v6717_v22 = vrot.slane %v6707_v37, %v10591_v28  ;;  %v12752_v36 = vld [vmem:[#allocation46_spill] sm:$0xff]  ;;  %v12754_v24 = vld [vmem:[#allocation55_spill] sm:$0xff]  ;;  %v9475_v34 = vld [vmem:[#allocation16 + $0x40] sm:$0xff]  }
 0x36f   : > { %v6731_v16 = vrot.slane %v6709_v5, %v10591_v28  ;;  %v6151_v42 = vrot.slane %v6123_v56, %v10591_v28  ;;  %v6724_v62 = vrot.slane %v6708_v8, %v10591_v28  ;;  %v6152_v29 = vcombine.high %v6130_v33, %v6130_v33  ;;  %v12757_v8 = vld [vmem:[#allocation52_spill] sm:$0xff]  ;;  %9141 = vmatpush3.bf16.msra.mxu0 %v9475_v34  ;;  %v12759_v34 = vld [vmem:[#allocation59_spill] sm:$0xff] }
 0x370   : > { %v6153_v39 = vcombine.high %v6137_v20, %v6137_v20  ;;  %v6154_v48 = vcombine.high %v6144_v18, %v6144_v18  ;;  %v6738_v51 = vrot.slane %v6710_v53, %v10591_v28  ;;  %v6579_v0 = vadd.f32 %v6130_v33, %v12751_v9  ;;  %v9473_v53 = vld [vmem:[#allocation16 + $0x8] sm:$0xff]  }
 0x371   : > { %v6155_v41 = vcombine.high %v6151_v42, %v6151_v42  ;;  %v6580_v45 = vadd.f32 %v6144_v18, %v12752_v36  ;;  %v6739_v21 = vcombine.low %v6717_v22, %v6724_v62  ;;  %v6581_v37 = vadd.f32 %v6152_v29, %v12753_v23  ;;  %v12088_v36 = vld [vmem:[#allocation13] sm:$0x1] }
 0x372   : > { %v6582_v5 = vadd.f32 %v6154_v48, %v12754_v24  ;;  %v6583_v56 = vadd.f32 %v6137_v20, %v12755_v54  ;;  %v6740_v58 = vcombine.low %v6731_v16, %v6738_v51  ;;  %v6584_v7 = vadd.f32 %v6151_v42, %v12756_v11 }
 0x373   : > { %v6585_v14 = vadd.f32 %v6153_v39, %v12757_v8  ;;  %v6747_v33 = vrot.slane %v6739_v21, %v10591_v28  ;;  %v6756_v9 = vcombine.low %v6580_v45, %v6581_v37  ;;  %v6156_v22 = vcombine.high %v11866_v15, %v11866_v15  ;;  %v9477_v39 = vld [vmem:[#allocation16 + $0x48] sm:$0xff]  }
 0x374   : > { %v6757_v18 = vcombine.low %v6582_v5, %v6583_v56  ;;  %v12758_v62 = vmov 0.0   ;;  %v6754_v20 = vrot.slane %v6740_v58, %v10591_v28  ;;  %v6163_v42 = vrot.slane %v11866_v15, %v10591_v28  ;;  %v9474_v15 = vld [vmem:[#allocation16 + $0x10] sm:$0xff]  }
 0x375   : > { %9116 = vmatprep.subr.bf16.mxu1 %v12758_v62  ;;  %v6758_v16 = vcombine.low %v6584_v7, %v6585_v14  ;;  %v6586_v29 = vadd.f32 %v6155_v41, %v5164_v63  ;;  %v6766_v48 = vrot.slane %v6756_v9, %v10591_v28  ;;  %v6170_v45 = vrot.slane %v6156_v22, %v10591_v28  ;;  %v9479_v58 = vld [vmem:[#allocation16 + $0x50] sm:$0xff]  }
 0x376   : > { %v6773_v51 = vrot.slane %v6757_v18, %v10591_v28  ;;  %9142 = vmatprep.subr.bf16.mxu0 %v12758_v62  ;;  %v6755_v31 = vcombine.low %v6747_v33, %v6754_v20  ;;  %v12101_v21 = vadd.f32 %v12088_v36, %v6579_v0  ;;  %v6171_v23 = vcombine.high %v6163_v42, %v6163_v42  ;;  %v12760_v18 = vld [vmem:[#allocation57_spill] sm:$0xff] }
 0x377   : > { %v6179_v14 = vrot.slane %v6163_v42, %v10591_v28  ;;  %9117 = vmatpush3.bf16.msra.mxu1 %v9473_v53  ;;  %v6172_v41 = vcombine.high %v6170_v45, %v6170_v45  ;;  %v6186_v37 = vrot.slane %v6170_v45, %v10591_v28  ;;  %v6780_v24 = vrot.slane %v6758_v16, %v10591_v28  ;;  %v9476_v16 = vld [vmem:[#allocation16 + $0x18] sm:$0xff]  }
 0x378   : > { %v6788_v63 = vcombine.low %v6766_v48, %v6773_v51  ;;  %9118 = vmatprep.subr.bf16.mxu1 %v12758_v62  ;;  %v7107_v5 = vrot.slane %v6755_v31, 4  ;;  %v6193_v54 = vrot.slane %v6171_v23, %v10591_v28  ;;  %9143 = vmatpush3.bf16.msra.mxu0 %v9477_v39  ;;  %v6205_v53 = vcombine.high %v11877_v38, %v11877_v38 }
 0x379   : > { %v6201_v56 = vcombine.high %v6179_v14, %v6179_v14  ;;  %v6587_v0 = vadd.f32 %v6179_v14, %v12759_v34  ;;  %v6200_v11 = vrot.slane %v6172_v41, %v10591_v28  ;;  %v6202_v7 = vcombine.high %v6186_v37, %v6186_v37  ;;  %9144 = vmatprep.subr.bf16.mxu0 %v12758_v62 }
 0x37a   : > { %v6591_v8 = vadd.f32 %v6186_v37, %v11742_v44  ;;  %v7108_v33 = vmax.f32 %v6755_v31, %v7107_v5  ;;  %v6203_v9 = vcombine.high %v6193_v54, %v6193_v54  ;;  %v12115_v22 = vadd.f32 %v6193_v54, %v12760_v18 }
 0x37b   : > { %v6589_v20 = vadd.f32 %v6201_v56, %v11739_v19  ;;  %9119 = vmatpush3.bf16.msra.mxu1 %v9474_v15  ;;  %v6204_v42 = vcombine.high %v6200_v11, %v6200_v11  ;;  %v6592_v39 = vadd.f32 %v6200_v11, %v11749_v59  ;;  %v6593_v48 = vadd.f32 %v6202_v7, %v11751_v27  ;;  %v9481_v19 = vld [vmem:[#allocation16 + $0x58] sm:$0xff]   ;;  %v9483_v11 = vld [vmem:[#allocation16 + $0x60] sm:$0xff]  }
 0x37c   : > { %v6759_v44 = vcombine.low %v6586_v29, %v6587_v0  ;;  %9120 = vmatprep.subr.bf16.mxu1 %v12758_v62  ;;  %v6796_v51 = vrot.slane %v6788_v63, %v10591_v28  ;;  %v7109_v45 = vrot.slane %v7108_v33, 2  ;;  %v6590_v31 = vadd.f32 %v6203_v9, %v11747_v46  ;;  %9145 = vmatpush3.bf16.msra.mxu0 %v9479_v58  ;;  %v9478_v46 = vld [vmem:[#allocation16 + $0x20] sm:$0xff]  }
 0x37d   : > { %v6212_v23 = vrot.slane %v11877_v38, %v10591_v28  ;;  %v6594_v14 = vadd.f32 %v6204_v42, %v11758_v17  ;;  %v6806_v59 = vcombine.low %v6591_v8, %v6592_v39  ;;  %v6219_v27 = vrot.slane %v6205_v53, %v10591_v28  ;;  %9146 = vmatprep.subr.bf16.mxu0 %v12758_v62  ;;  %v12139_v42 = vld [vmem:[#allocation11] ss:$0 sm:$0xff] }
 0x37e   : > { %v6787_v15 = vrot.slane %v6759_v44, %v10591_v28  ;;  %v7110_v29 = vmax.f32 %v7108_v33, %v7109_v45  ;;  %v6805_v41 = vcombine.low %v6589_v20, %v6590_v31  ;;  %v12761_v45 = vld [vmem:[#allocation56_spill] sm:$0xff] }
 0x37f   : > { %v6220_v63 = vcombine.high %v6212_v23, %v6212_v23  ;;  %v6228_v37 = vrot.slane %v6212_v23, %v10591_v28  ;;  %9121 = vmatpush3.bf16.msra.mxu1 %v9476_v16  ;;  %v6807_v38 = vcombine.low %v6593_v48, %v6594_v14  ;;  %v6822_v54 = vrot.slane %v6806_v59, %v10591_v28  ;;  %v9480_v16 = vld [vmem:[#allocation16 + $0x28] sm:$0xff]   ;;  %v12762_v23 = vld [vmem:[#allocation60_spill] sm:$0xff] }
 0x380   : > { %v6789_v5 = vcombine.low %v6780_v24, %v6787_v15  ;;  %v6221_v56 = vcombine.high %v6219_v27, %v6219_v27  ;;  %9122 = vmatprep.subr.bf16.mxu1 %v12758_v62  ;;  %v7111_v17 = vrot.slane %v7110_v29, 1  ;;  %v6815_v34 = vrot.slane %v6805_v41, %v10591_v28  ;;  %9147 = vmatpush3.bf16.msra.mxu0 %v9481_v19  ;;  %v12763_v14 = vld [vmem:[#allocation61_spill] sm:$0xff] }
 0x381   : > { %v6235_v0 = vrot.slane %v6219_v27, %v10591_v28  ;;  %v6242_v58 = vrot.slane %v6220_v63, %v10591_v28  ;;  %v6250_v24 = vcombine.high %v6228_v37, %v6228_v37  ;;  %v6595_v53 = vadd.f32 %v6228_v37, %v11753_v43  ;;  %9148 = vmatprep.subr.bf16.mxu0 %v12758_v62  ;;  %v9484_v59 = vld [vmem:[#allocation16 + $0x68] sm:$0xff]  }
 0x382   : > { %v6803_v7 = vrot.slane %v6789_v5, %v10591_v28  ;;  %v6249_v8 = vrot.slane %v6221_v56, %v10591_v28  ;;  %v7112_v33 = vmax.f32 %v7110_v29, %v7111_v17  ;;  %v6837_v9 = vcombine.low %v6815_v34, %v6822_v54  ;;  %v9482_v5 = vld [vmem:[#allocation16 + $0x30] sm:$0xff]  }
 0x383   : > { %v6251_v18 = vcombine.high %v6235_v0, %v6235_v0  ;;  %v6252_v20 = vcombine.high %v6242_v58, %v6242_v58  ;;  %9123 = vmatpush3.bf16.msra.mxu1 %v9478_v46  ;;  %v6596_v48 = vadd.f32 %v6242_v58, %v11760_v4  ;;  %v12143_v44 = vadd.f32 %v6250_v24, %v11762_v57  ;;  %v12765_v4 = vld [vmem:[#allocation62_spill] sm:$0xff]  ;;  %v12766_v58 = vld [vmem:[#allocation53_spill] sm:$0xff] }
 0x384   : > { %v6804_v39 = vcombine.low %v6796_v51, %v6803_v7  ;;  %9124 = vmatprep.subr.bf16.mxu1 %v12758_v62  ;;  %v4831_v43 = vcombine.high %v12761_v45, %v12761_v45  ;;  %v7164_v31 = vmax.f32 %v7112_v33, %v12101_v21  ;;  %v6599_v15 = vadd.f32 %v6235_v0, %v12763_v14  ;;  %v12764_v51 = vld [vmem:[#allocation63_spill] sm:$0xff] }
 0x385   : > { %v6598_v19 = vadd.f32 %v6252_v20, %v12762_v23  ;;  %9149 = vmatpush3.bf16.msra.mxu0 %v9483_v11  ;;  %v6600_v29 = vadd.f32 %v6249_v8, %v12764_v51  ;;  %v6601_v41 = vadd.f32 %v6251_v18, %v12765_v4  ;;  %v6808_v57 = vcombine.low %v6595_v53, %v6596_v48  ;;  %v9486_v7 = vld [vmem:[#allocation16 + $0x70] sm:$0xff]   ;;  %v9485_v48 = vld [vmem:[#allocation16 + $0x38] sm:$0xff]  }
 0x386   : > { %v7113_v27 = vrot.slane %v6804_v39, 4  ;;  %9150 = vmatprep.subr.bf16.mxu0 %v12758_v62  ;;  %v7179_v63 = vadd.f32 %v12139_v42, %v7164_v31  ;;  %v6253_v37 = vcombine.high %v6249_v8, %v6249_v8  ;;  %v6829_v46 = vrot.slane %v6807_v38, %v10591_v28  ;;  %v9489_v14 = vld [vmem:[#allocation16 + $0x78] sm:$0xff]  }
 0x387   : > { %v6854_v21 = vcombine.low %v6598_v19, %v6599_v15  ;;  %9125 = vmatpush3.bf16.msra.mxu1 %v9480_v16  ;;  %v4929_v54 = vcombine.high %v11869_v35, %v11869_v35  ;;  %v6836_v17 = vrot.slane %v6808_v57, %v10591_v28  ;;  %v6855_v34 = vcombine.low %v6600_v29, %v6601_v41 }
 0x388   : > { %v7114_v56 = vmax.f32 %v6804_v39, %v7113_v27  ;;  %9126 = vmatprep.subr.bf16.mxu1 %v12758_v62  ;;  %9539 = vtanh.f32 %v7179_v63  ;;  %v5180_v11 = vadd.f32 %v4831_v43, %v12766_v58  ;;  %v6254_v38 = vcombine.high %v11911_v49, %v11911_v49  ;;  %v12767_v58 = vld [vmem:[#allocation65_spill] sm:$0xff] }
 0x389   : > { %v6864_v0 = vrot.slane %v6854_v21, %v10591_v28  ;;  %9151 = vmatpush3.bf16.msra.mxu0 %v9484_v59  ;;  %v6838_v24 = vcombine.low %v6829_v46, %v6836_v17  ;;  %v6871_v53 = vrot.slane %v6855_v34, %v10591_v28  ;;  %v6261_v33 = vrot.slane %v11911_v49, %v10591_v28 }
 0x38a   : > { %v7115_v8 = vrot.slane %v7114_v56, 2  ;;  %9152 = vmatprep.subr.bf16.mxu0 %v12758_v62  ;;  %v6845_v18 = vrot.slane %v6837_v9, %v10591_v28  ;;  %v7157_v20 = vadd.f32 %v12088_v36, %v12115_v22  ;;  %v6268_v16 = vrot.slane %v6254_v38, %v10591_v28 }
 0x38b   : > { %v6602_v39 = vadd.f32 %v6253_v37, %v5180_v11  ;;  %9127 = vmatpush3.bf16.msra.mxu1 %v9482_v5  ;;  %v6852_v43 = vrot.slane %v6838_v24, %v10591_v28  ;;  %v6886_v31 = vcombine.low %v6864_v0, %v6871_v53  ;;  %v6269_v23 = vcombine.high %v6261_v33, %v6261_v33  ;;  %v12768_v11 = vld [vmem:[#allocation66_spill] sm:$0xff] }
 0x38c   : > { %v7116_v45 = vmax.f32 %v7114_v56, %v7115_v8  ;;  %9128 = vmatprep.subr.bf16.mxu1 %v12758_v62  ;;  %v6270_v49 = vcombine.high %v6268_v16, %v6268_v16  ;;  %v6277_v19 = vrot.slane %v6261_v33, %v10591_v28  ;;  %v6284_v9 = vrot.slane %v6268_v16, %v10591_v28 }
 0x38d   : > { %v6303_v22 = vcombine.high %v11925_v25, %v11925_v25  ;;  %9153 = vmatpush3.bf16.msra.mxu0 %v9486_v7  ;;  %v6853_v59 = vcombine.low %v6845_v18, %v6852_v43  ;;  %v6291_v27 = vrot.slane %v6269_v23, %v10591_v28  ;;  %v6310_v51 = vrot.slane %v11925_v25, %v10591_v28 }
 0x38e   : > { %v7117_v15 = vrot.slane %v7116_v45, 1  ;;  %9154 = vmatprep.subr.bf16.mxu0 %v12758_v62  ;;  %v6298_v29 = vrot.slane %v6270_v49, %v10591_v28  ;;  %v6299_v4 = vcombine.high %v6277_v19, %v6277_v19  ;;  %v6300_v41 = vcombine.high %v6284_v9, %v6284_v9 }
 0x38f   : > { %v6603_v57 = vadd.f32 %v6277_v19, %v11837_v13  ;;  %9129 = vmatpush3.bf16.msra.mxu1 %v9485_v48  ;;  %v7119_v37 = vrot.slane %v6853_v59, 4  ;;  %v6301_v46 = vcombine.high %v6291_v27, %v6291_v27  ;;  %v6604_v21 = vadd.f32 %v6291_v27, %v11839_v40  ;;  %v12769_v40 = vld [vmem:[#allocation67_spill] sm:$0xff] }
 0x390   : > { %v7118_v63 = vmax.f32 %v7116_v45, %v7117_v15  ;;  %9134 = vmatprep.subr.bf16.mxu1 %v12758_v62  ;;  %v6302_v5 = vcombine.high %v6298_v29, %v6298_v29  ;;  %v6605_v56 = vadd.f32 %v6299_v4, %v11845_v32  ;;  %v6607_v25 = vadd.f32 %v6284_v9, %v11841_v3 }
 0x391   : > { %v6608_v17 = vadd.f32 %v6298_v29, %v11843_v1  ;;  %9155 = vmatpush3.bf16.msra.mxu0 %v9489_v14  ;;  %v7120_v0 = vmax.f32 %v6853_v59, %v7119_v37  ;;  %v6606_v13 = vadd.f32 %v6301_v46, %v12767_v58  ;;  %v6609_v38 = vadd.f32 %v6300_v41, %v12768_v11  ;;  %v12770_v37 = vld [vmem:[#allocation68_spill] sm:$0xff]  ;;  %v12773_v11 = vld [vmem:[#allocation69_spill] sm:$0xff] }
 0x392   : > { %v7165_v34 = vmax.f32 %v7118_v63, %v7157_v20  ;;  %9186 = vmatprep.subr.bf16.mxu0 %v12758_v62  ;;  %v9540_v7 = vpop.eup %9539  ;;  %v6610_v8 = vadd.f32 %v6302_v5, %v12769_v40  ;;  %v6856_v24 = vcombine.low %v6602_v39, %v6603_v57  ;;  %v6857_v53 = vcombine.low %v6604_v21, %v6605_v56  ;;  %v12771_v56 = vld [vmem:[#allocation70_spill] sm:$0xff] }
 0x393   : > { %v6903_v33 = vcombine.low %v6607_v25, %v6608_v17  ;;  %v8893_v32 = vpack.c.bf16 %v9540_v7, %v9540_v7  ;;  %v7121_v18 = vrot.slane %v7120_v0, 2  ;;  %v7158_v1 = vadd.f32 %v12088_v36, %v12143_v44  ;;  %v12774_v40 = vld [vmem:[#allocation74_spill] sm:$0xff] }
 0x394   : > { %v7180_v3 = vadd.f32 %v12139_v42, %v7165_v34  ;;  %v6894_v20 = vrot.slane %v6886_v31, %v10591_v28  ;;  %v6878_v16 = vrot.slane %v6856_v24, %v10591_v28  ;;  %v6885_v48 = vrot.slane %v6857_v53, %v10591_v28  ;;  %v12775_v24 = vld [vmem:[#allocation72_spill] sm:$0xff] }
 0x395   : > { %v6904_v45 = vcombine.low %v6609_v38, %v6610_v8  ;;  %v7122_v43 = vmax.f32 %v7120_v0, %v7121_v18  ;;  %v6913_v39 = vrot.slane %v6903_v33, %v10591_v28  ;;  %v6317_v23 = vrot.slane %v6303_v22, %v10591_v28  ;;  %v12772_v0 = vld [vmem:[#allocation71_spill] sm:$0xff]  ;;  %v12776_v33 = vld [vmem:[#allocation73_spill] sm:$0xff] }
 0x396   : > { %9541 = vtanh.f32 %v7180_v3  ;;  %v6887_v49 = vcombine.low %v6878_v16, %v6885_v48  ;;  %v6318_v9 = vcombine.high %v6310_v51, %v6310_v51  ;;  %v6326_v14 = vrot.slane %v6310_v51, %v10591_v28 }
 0x397   : > { %v6920_v19 = vrot.slane %v6904_v45, %v10591_v28  ;;  %v12203_v44 = vunpack.c.l.b16 %v8893_v32  ;;  %v7123_v31 = vrot.slane %v7122_v43, 1  ;;  %v6319_v15 = vcombine.high %v6317_v23, %v6317_v23 }
 0x398   : > { %v6333_v59 = vrot.slane %v6317_v23, %v10591_v28  ;;  %v6901_v27 = vrot.slane %v6887_v49, %v10591_v28  ;;  %v6340_v4 = vrot.slane %v6318_v9, %v10591_v28  ;;  %v6348_v41 = vcombine.high %v6326_v14, %v6326_v14 }
 0x399   : > { %v6935_v29 = vcombine.low %v6913_v39, %v6920_v19  ;;  %v7124_v57 = vmax.f32 %v7122_v43, %v7123_v31  ;;  %v6347_v22 = vrot.slane %v6319_v15, %v10591_v28  ;;  %v6611_v46 = vadd.f32 %v6326_v14, %v12770_v37  ;;  %v12777_v43 = vld [vmem:[#allocation64_spill] sm:$0xff]  ;;  %v12778_v19 = vld [vmem:[#allocation75_spill] sm:$0xff] }
 0x39a   : > { %v6349_v63 = vcombine.high %v6333_v59, %v6333_v59  ;;  %v5027_v51 = vcombine.high %v11971_v10, %v11971_v10  ;;  %v6902_v21 = vcombine.low %v6894_v20, %v6901_v27  ;;  %v6350_v5 = vcombine.high %v6340_v4, %v6340_v4 }
 0x39b   : > { %v6612_v25 = vadd.f32 %v6340_v4, %v12771_v56  ;;  %v7166_v17 = vmax.f32 %v7124_v57, %v7158_v1  ;;  %v6351_v34 = vcombine.high %v6347_v22, %v6347_v22  ;;  %v6613_v58 = vadd.f32 %v6348_v41, %v12772_v0 }
 0x39c   : > { %v6615_v38 = vadd.f32 %v6333_v59, %v12773_v11  ;;  %v7125_v7 = vrot.slane %v6902_v21, 4  ;;  %v6614_v8 = vadd.f32 %v6350_v5, %v12774_v40  ;;  %v6616_v53 = vadd.f32 %v6347_v22, %v12775_v24 }
 0x39d   : > { %v6617_v32 = vadd.f32 %v6349_v63, %v12776_v33  ;;  %v7235_v3 = vrot.slane %v12203_v44, 6  ;;  %v7181_v18 = vadd.f32 %v12139_v42, %v7166_v17  ;;  %v7159_v20 = vadd.f32 %v12088_v36, %v6606_v13 }
 0x39e   : > { %v6905_v16 = vcombine.low %v6611_v46, %v6612_v25  ;;  %v7126_v1 = vmax.f32 %v6902_v21, %v7125_v7  ;;  %v6906_v48 = vcombine.low %v6613_v58, %v6614_v8  ;;  %v5196_v39 = vadd.f32 %v4929_v54, %v12777_v43  ;;  %v12779_v25 = vld [vmem:[#allocation42_spill] sm:$0xff] }
 0x39f   : > { %v6952_v45 = vcombine.low %v6616_v53, %v6617_v32  ;;  %9543 = vtanh.f32 %v7181_v18  ;;  %v6352_v9 = vcombine.high %v12778_v19, %v12778_v19  ;;  %v6359_v14 = vrot.slane %v12778_v19, %v10591_v28 }
 0x3a0   : > { %v9542_v23 = vpop.eup %9541  ;;  %v6927_v49 = vrot.slane %v6905_v16, %v10591_v28  ;;  %v7127_v44 = vrot.slane %v7126_v1, 2  ;;  %v6934_v31 = vrot.slane %v6906_v48, %v10591_v28  ;;  %v6618_v15 = vadd.f32 %v6351_v34, %v5196_v39 }
 0x3a1   : > { %v8894_v13 = vpack.c.bf16 %v9542_v23, %v9542_v23  ;;  %v6943_v59 = vrot.slane %v6935_v29, %v10591_v28  ;;  %v6366_v35 = vrot.slane %v6352_v9, %v10591_v28  ;;  %v6367_v54 = vcombine.high %v6359_v14, %v6359_v14 }
 0x3a2   : > { %v6375_v27 = vrot.slane %v6359_v14, %v10591_v28  ;;  %v7128_v41 = vmax.f32 %v7126_v1, %v7127_v44  ;;  %v6936_v57 = vcombine.low %v6927_v49, %v6934_v31  ;;  %v12235_v22 = vadd.f32 %v12088_v36, %v6615_v38 }
 0x3a3   : > { %v7228_v4 = vunpack.c.l.b16 %v8894_v13  ;;  %v6368_v63 = vcombine.high %v6366_v35, %v6366_v35  ;;  %v6382_v37 = vrot.slane %v6366_v35, %v10591_v28  ;;  %v6389_v46 = vrot.slane %v6367_v54, %v10591_v28 }
 0x3a4   : > { %v6397_v21 = vcombine.high %v6375_v27, %v6375_v27  ;;  %v7129_v56 = vrot.slane %v7128_v41, 1  ;;  %v6950_v29 = vrot.slane %v6936_v57, %v10591_v28  ;;  %v6619_v17 = vadd.f32 %v6375_v27, %v12779_v25  ;;  %v12781_v27 = vld [vmem:[#allocation38_spill] sm:$0xff] }
 0x3a5   : > { %v7236_v5 = vrot.slane %v7228_v4, 5  ;;  %v6396_v34 = vrot.slane %v6368_v63, %v10591_v28  ;;  %v6398_v0 = vcombine.high %v6382_v37, %v6382_v37  ;;  %v6399_v58 = vcombine.high %v6389_v46, %v6389_v46 }
 0x3a6   : > { %v6620_v11 = vadd.f32 %v6389_v46, %v11959_v55  ;;  %v7130_v7 = vmax.f32 %v7128_v41, %v7129_v56  ;;  %v6951_v40 = vcombine.low %v6943_v59, %v6950_v29  ;;  %v6621_v8 = vadd.f32 %v6397_v21, %v11961_v47  ;;  %v12782_v56 = vld [vmem:[#allocation84_spill] sm:$0xff] }
 0x3a7   : > { %v7238_v38 = vsel %vm7237_vm8, %v7236_v5, %v7235_v3  ;;  %v6400_v24 = vcombine.high %v6396_v34, %v6396_v34  ;;  %v6622_v53 = vadd.f32 %v6399_v58, %v11973_v52  ;;  %v6623_v33 = vadd.f32 %v6382_v37, %v11956_v50  ;;  %v12783_v58 = vld [vmem:[#allocation77_spill] sm:$0xff] }
 0x3a8   : > { %v6624_v32 = vadd.f32 %v6396_v34, %v11966_v12  ;;  %v7167_v18 = vmax.f32 %v7130_v7, %v7159_v20  ;;  %v7131_v16 = vrot.slane %v6951_v40, 4  ;;  %v6625_v1 = vadd.f32 %v6398_v0, %v11968_v60  ;;  %v12780_v60 = vld [vmem:[#allocation76_spill] sm:$0xff]  ;;  %v12784_v7 = vld [vmem:[#allocation81_spill] sm:$0xff] }
 0x3a9   : > { %v6953_v48 = vcombine.low %v6618_v15, %v6619_v17  ;;  %v9544_v43 = vpop.eup %9543  ;;  %v6626_v55 = vadd.f32 %v6400_v24, %v11977_v30  ;;  %v6954_v3 = vcombine.low %v6620_v11, %v6621_v8  ;;  %v6955_v39 = vcombine.low %v6622_v53, %v6623_v33  ;;  %v12785_v24 = vld [vmem:[#allocation78_spill] sm:$0xff] }
 0x3aa   : > { %v6962_v23 = vrot.slane %v6952_v45, %v10591_v28  ;;  %v8895_v47 = vpack.c.bf16 %v9544_v43, %v9544_v43  ;;  %v7182_v49 = vadd.f32 %v12139_v42, %v7167_v18  ;;  %v7132_v52 = vmax.f32 %v6951_v40, %v7131_v16  ;;  %v12786_v18 = vld [vmem:[#allocation79_spill] sm:$0xff] }
 0x3ab   : > { %v6969_v50 = vrot.slane %v6953_v48, %v10591_v28  ;;  %v6976_v12 = vrot.slane %v6954_v3, %v10591_v28  ;;  %v6983_v20 = vrot.slane %v6955_v39, %v10591_v28  ;;  %v7001_v19 = vcombine.low %v6625_v1, %v6626_v55  ;;  %v12787_v1 = vld [vmem:[#allocation82_spill] sm:$0xff]  ;;  %v12788_v43 = vld [vmem:[#allocation83_spill] sm:$0xff]  ;;  %v12789_v39 = vld [vmem:[#allocation80_spill] sm:$0xff] }
 0x3ac   : > { %v6401_v9 = vcombine.high %v12780_v60, %v12780_v60  ;;  %v7229_v14 = vunpack.c.l.b16 %v8895_v47  ;;  %9545 = vtanh.f32 %v7182_v49  ;;  %v7133_v30 = vrot.slane %v7132_v52, 2 }
 0x3ad   : > { %v6984_v13 = vcombine.low %v6962_v23, %v6969_v50  ;;  %v6985_v44 = vcombine.low %v6976_v12, %v6983_v20  ;;  %v12258_v45 = vadd.f32 %v12088_v36, %v6624_v32  ;;  %v6408_v31 = vrot.slane %v12780_v60, %v10591_v28 }
 0x3ae   : > { %v6415_v15 = vrot.slane %v6401_v9, %v10591_v28  ;;  %v7239_v59 = vrot.slane %v7229_v14, 4  ;;  %v7134_v35 = vmax.f32 %v7132_v52, %v7133_v30  ;;  %v5212_v4 = vadd.f32 %v5027_v51, %v12781_v27 }
 0x3af   : > { %v6992_v54 = vrot.slane %v6984_v13, %v10591_v28  ;;  %v6999_v41 = vrot.slane %v6985_v44, %v10591_v28  ;;  %v6416_v57 = vcombine.high %v6408_v31, %v6408_v31  ;;  %v6424_v37 = vrot.slane %v6408_v31, %v10591_v28 }
 0x3b0   : > { %v6417_v63 = vcombine.high %v6415_v15, %v6415_v15  ;;  %v7241_v46 = vsel %vm7240_vm9, %v7239_v59, %v7238_v38  ;;  %v7135_v21 = vrot.slane %v7134_v35, 1  ;;  %v6431_v5 = vrot.slane %v6415_v15, %v10591_v28 }
 0x3b1   : > { %v6450_v29 = vcombine.high %v12782_v56, %v12782_v56  ;;  %v7000_v25 = vcombine.low %v6992_v54, %v6999_v41  ;;  %v6438_v17 = vrot.slane %v6416_v57, %v10591_v28  ;;  %v6446_v51 = vcombine.high %v6424_v37, %v6424_v37 }
 0x3b2   : > { %v6445_v10 = vrot.slane %v6417_v63, %v10591_v28  ;;  %v7136_v34 = vmax.f32 %v7134_v35, %v7135_v21  ;;  %v6447_v0 = vcombine.high %v6431_v5, %v6431_v5  ;;  %v6627_v11 = vadd.f32 %v6424_v37, %v12783_v58 }
 0x3b3   : > { %v6631_v40 = vadd.f32 %v6431_v5, %v12784_v7  ;;  %v7137_v38 = vrot.slane %v7000_v25, 4  ;;  %v6448_v8 = vcombine.high %v6438_v17, %v6438_v17  ;;  %v6628_v53 = vadd.f32 %v6438_v17, %v12785_v24  ;;  %v12790_v24 = vld [vmem:[#allocation43_spill] sm:$0xff] }
 0x3b4   : > { %v7011_v33 = vrot.slane %v7001_v19, %v10591_v28  ;;  %v7168_v32 = vmax.f32 %v7136_v34, %v12235_v22  ;;  %v6629_v16 = vadd.f32 %v6446_v51, %v12786_v18  ;;  %v6632_v48 = vadd.f32 %v6445_v10, %v12787_v1 }
 0x3b5   : > { %v12284_v55 = vadd.f32 %v6447_v0, %v12788_v43  ;;  %v7138_v3 = vmax.f32 %v7000_v25, %v7137_v38  ;;  %v6630_v23 = vadd.f32 %v6448_v8, %v12789_v39  ;;  %v7002_v47 = vcombine.low %v6627_v11, %v6628_v53 }
 0x3b6   : > { %v6457_v49 = vrot.slane %v12782_v56, %v10591_v28  ;;  %v9546_v52 = vpop.eup %9545  ;;  %v7183_v50 = vadd.f32 %v12139_v42, %v7168_v32  ;;  %v6449_v12 = vcombine.high %v6445_v10, %v6445_v10  ;;  %v7004_v20 = vcombine.low %v6631_v40, %v6632_v48  ;;  %v12792_v32 = vld [vmem:[#allocation86_spill] sm:$0xff] }
 0x3b7   : > { %v6464_v22 = vrot.slane %v6450_v29, %v10591_v28  ;;  %v8896_v19 = vpack.c.bf16 %v9546_v52, %v9546_v52  ;;  %v7139_v60 = vrot.slane %v7138_v3, 2  ;;  %v7003_v9 = vcombine.low %v6629_v16, %v6630_v23  ;;  %v12793_v16 = vld [vmem:[#allocation87_spill] sm:$0xff] }
 0x3b8   : > { %v7018_v14 = vrot.slane %v7002_v47, %v10591_v28  ;;  %9547 = vtanh.f32 %v7183_v50  ;;  %v7032_v30 = vrot.slane %v7004_v20, %v10591_v28  ;;  %v6465_v13 = vcombine.high %v6457_v49, %v6457_v49 }
 0x3b9   : > { %v6466_v44 = vcombine.high %v6464_v22, %v6464_v22  ;;  %v7230_v31 = vunpack.c.l.b16 %v8896_v19  ;;  %v7140_v15 = vmax.f32 %v7138_v3, %v7139_v60  ;;  %v7025_v59 = vrot.slane %v7003_v9, %v10591_v28  ;;  %v684_v60 = vld [vmem:[#allocation3 + $0x4] sm:$0x6] }
 0x3ba   : > { %v7033_v35 = vcombine.low %v7011_v33, %v7018_v14  ;;  %v6473_v54 = vrot.slane %v6457_v49, %v10591_v28  ;;  %v6480_v27 = vrot.slane %v6464_v22, %v10591_v28  ;;  %v6487_v41 = vrot.slane %v6465_v13, %v10591_v28  ;;  %v12791_v33 = vld [vmem:[#allocation85_spill] sm:$0xff] }
 0x3bb   : > { %v6494_v57 = vrot.slane %v6466_v44, %v10591_v28  ;;  %v7242_v63 = vrot.slane %v7230_v31, 3  ;;  %v7141_v37 = vrot.slane %v7140_v15, 1  ;;  %v7034_v21 = vcombine.low %v7025_v59, %v7032_v30  ;;  %v690_v30 = vld [vmem:[#allocation4 + $0x4] sm:$0x6] }
 0x3bc   : > { %v7041_v5 = vrot.slane %v7033_v35, %v10591_v28  ;;  %v6495_v56 = vcombine.high %v6473_v54, %v6473_v54  ;;  %v6496_v29 = vcombine.high %v6480_v27, %v6480_v27  ;;  %v6497_v25 = vcombine.high %v6487_v41, %v6487_v41 }
 0x3bd   : > { %v6498_v17 = vcombine.high %v6494_v57, %v6494_v57  ;;  %v7244_v10 = vsel %vm7243_vm10, %v7242_v63, %v7241_v46  ;;  %v7142_v51 = vmax.f32 %v7140_v15, %v7141_v37  ;;  %v7048_v34 = vrot.slane %v7034_v21, %v10591_v28 }
 0x3be   : > { %v6634_v0 = vadd.f32 %v6449_v12, %v5212_v4  ;;  %v6635_v58 = vadd.f32 %v6473_v54, %v12034_v61  ;;  %v6636_v11 = vadd.f32 %v6487_v41, %v12039_v6  ;;  %v6637_v7 = vadd.f32 %v6495_v56, %v12041_v26  ;;  %v7260_v26 = vld [vmem:[%s10517_s24] sm:$0xf] }
 0x3bf   : > { %v6638_v40 = vadd.f32 %v6497_v25, %v12045_v2  ;;  %v7169_v38 = vmax.f32 %v7142_v51, %v12258_v45  ;;  %v7049_v8 = vcombine.low %v7041_v5, %v7048_v34  ;;  %v6639_v53 = vadd.f32 %v6480_v27, %v12790_v24 }
 0x3c0   : > { %v6640_v46 = vadd.f32 %v6494_v57, %v12791_v33  ;;  %v6641_v18 = vadd.f32 %v6496_v29, %v12792_v32  ;;  %v6642_v4 = vadd.f32 %v6498_v17, %v12793_v16  ;;  %v7050_v1 = vcombine.low %v6634_v0, %v6635_v58 }
 0x3c1   : > { %v7051_v48 = vcombine.low %v6636_v11, %v6637_v7  ;;  %v7184_v61 = vadd.f32 %v12139_v42, %v7169_v38  ;;  %v7143_v6 = vrot.slane %v7049_v8, 4  ;;  %v7052_v43 = vcombine.low %v6638_v40, %v6639_v53 }
 0x3c2   : > { %v9548_v3 = vpop.eup %9547  ;;  %v7053_v2 = vcombine.low %v6640_v46, %v6641_v18  ;;  %v7060_v45 = vrot.slane %v7050_v1, %v10591_v28  ;;  %v7262_v12 = vrot.slane %v7260_v26, 7  ;;  %v12794_v19 = vmov 0   ;;  %v9488_v1 = vld [vmem:[#allocation14] sm:$0xff]  }
 0x3c3   : > { %v7067_v39 = vrot.slane %v7051_v48, %v10591_v28  ;;  %v8897_v23 = vpack.c.bf16 %v9548_v3, %v9548_v3  ;;  %9549 = vtanh.f32 %v7184_v61  ;;  %v7144_v47 = vmax.f32 %v7049_v8, %v7143_v6  ;;  %681 = vst.msk [vmem:[#allocation3] sm:$0x1] %vm680_vm11, %v12794_v19  ;;  %v9492_v6 = vld [vmem:[#allocation14 + $0x10] sm:$0xff]   ;;  %v9491_v3 = vld [vmem:[#allocation14 + $0x8] sm:$0xff]   ;;  %v9500_v19 = vld [vmem:[#allocation16 + $0xd8] sm:$0xff]  }
 0x3c4   : > { %v7074_v49 = vrot.slane %v7052_v43, %v10591_v28  ;;  %v7081_v52 = vrot.slane %v7053_v2, %v10591_v28  ;;  %v7263_v14 = vrot.slane %v7262_v12, 4  ;;  %7267 = vst.msk [vmem:[#allocation3] sm:$0xe] %vm7266_vm12, %v7262_v12  ;;  %v685_v59 = vsel %vm683_vm15, 0, %v684_v60  ;;  %v9497_v12 = vld [vmem:[#allocation16 + $0x88] sm:$0xff]   ;;  %v9501_v60 = vld [vmem:[#allocation16 + $0x98] sm:$0xff]  }
 0x3c5   : > { %v7082_v50 = vcombine.low %v7060_v45, %v7067_v39  ;;  %v7231_v20 = vunpack.c.l.b16 %v8897_v23  ;;  %v7145_v22 = vrot.slane %v7144_v47, 2  ;;  %686 = vst [vmem:[#allocation3 + $0x4] sm:$0x6] %v685_v59  ;;  %v691_v27 = vsel %vm689_vm2, 0, %v690_v30  ;;  %v9504_v30 = vld [vmem:[#allocation16 + $0xe8] sm:$0xff]  }
 0x3c6   : > { %v7083_v9 = vcombine.low %v7074_v49, %v7081_v52  ;;  %7268 = vst.msk [vmem:[#allocation3 + $0x4] sm:$0x1] %vm680_vm11, %v7263_v14  ;;  %692 = vst [vmem:[#allocation4 + $0x4] sm:$0x6] %v691_v27  ;;  %v7162_v63 = vadd.f32 %v12088_v36, %v12284_v55  ;;  %v7163_v7 = vadd.f32 %v12088_v36, %v6642_v4  ;;  %v9495_v52 = vld [vmem:[#allocation16 + $0x80] sm:$0xff]  }
 0x3c7   : > { %v7245_v13 = vrot.slane %v7231_v20, 2  ;;  %v7146_v44 = vmax.f32 %v7144_v47, %v7145_v22  ;;  %v7090_v31 = vrot.slane %v7082_v50, %v10591_v28  ;;  %v9494_v47 = vld [vmem:[#allocation16 + $0xc0] sm:$0xff]   ;;  %v9496_v50 = vld [vmem:[#allocation16 + $0xc8] sm:$0xff]   ;;  %v9498_v20 = vld [vmem:[#allocation16 + $0xd0] sm:$0xff]  }
 0x3c8   : > { %v7097_v15 = vrot.slane %v7083_v9, %v10591_v28  ;;  %v9499_v22 = vld [vmem:[#allocation16 + $0x90] sm:$0xff]   ;;  %v9502_v9 = vld [vmem:[#allocation16 + $0xe0] sm:$0xff]  }
 0x3c9   : > { %v7247_v35 = vsel %vm7246_vm13, %v7245_v13, %v7244_v10  ;;  %v7147_v54 = vrot.slane %v7146_v44, 1  ;;  %v9503_v14 = vld [vmem:[#allocation16 + $0xa0] sm:$0xff]  }
 0x3ca   : > { %v7098_v41 = vcombine.low %v7090_v31, %v7097_v15  ;;  %v9506_v31 = vld [vmem:[#allocation16 + $0xf0] sm:$0xff]  }
 0x3cb   : > { %v7148_v57 = vmax.f32 %v7146_v44, %v7147_v54  ;;  %v9505_v44 = vld [vmem:[#allocation16 + $0xa8] sm:$0xff]   ;;  %v9508_v54 = vld [vmem:[#allocation16 + $0xf8] sm:$0xff]  }
 0x3cc   : > { %v7149_v37 = vrot.slane %v7098_v41, 4 }
 0x3cd   : > { %v9550_v21 = vpop.eup %9549  ;;  %v7170_v5 = vmax.f32 %v7148_v57, %v7162_v63  ;;  %v9490_v61 = vld [vmem:[#allocation3] sm:$0x1f]   ;;  %v9509_v57 = vld [vmem:[#allocation16 + $0xb8] sm:$0xff]  }
 0x3ce   : > { %v8898_v28 = vpack.c.bf16 %v9550_v21, %v9550_v21  ;;  %v7150_v56 = vmax.f32 %v7098_v41, %v7149_v37  ;;  %v7561_v26 = vshll.u32 %v9490_v61, 16  ;;  %v12332_v2 = vld [vmem:[#allocation3] sm:$0x3e]   ;;  %v7559_v45 = vshrl.u32 %v9490_v61, 16  ;;  %v9519_v63 = vld [vmem:[#allocation14 + $0x20] sm:$0xff]  }
 0x3cf   : > { %v7185_v58 = vadd.f32 %v12139_v42, %v7170_v5  ;;  %v7742_v23 = vrot.slane %v12332_v2, 1  ;;  %v7914_v21 = vshrl.u32 %v12332_v2, 16  ;;  %v7917_v5 = vshll.u32 %v12332_v2, 16 }
 0x3d0   : > { %v7232_v29 = vunpack.c.l.b16 %v8898_v28  ;;  %v7151_v25 = vrot.slane %v7150_v56, 2  ;;  %v7563_v39 = vrot.slane %v7561_v26, 1  ;;  %v9511_v28 = vld [vmem:[#allocation14 + $0x18] sm:$0xff]   ;;  %v9530_v26 = vld [vmem:[#allocation20 + $0x38] sm:$0xff]  }
 0x3d1   : > { %9551 = vtanh.f32 %v7185_v58  ;;  %v9514_v58 = vld [vmem:[#allocation16 + $0x110] sm:$0xff]  }
 0x3d2   : > { %v7248_v17 = vrot.slane %v7232_v29, 1  ;;  %v7152_v51 = vmax.f32 %v7150_v56, %v7151_v25  ;;  %v7564_v49 = vor.u32 %v7563_v39, %v7559_v45  ;;  %v9521_v29 = vld [vmem:[#allocation3] sm:$0x7c]   ;;  %v7916_v25 = vrot.slane %v7914_v21, 1 }
 0x3d4   : > { %v7250_v10 = vsel %vm7249_vm4, %v7248_v17, %v7247_v35  ;;  %v7153_v34 = vrot.slane %v7152_v51, 1  ;;  %v9507_v35 = vld [vmem:[#allocation16 + $0xb0] sm:$0xff]   ;;  %v7919_v17 = vrot.slane %v7917_v5, 2 }
 0x3d5   : > { %v7254_v0 = vpack.c.b16 %v7250_v10, %v7250_v10 }
 0x3d6   : > { %v7154_v11 = vmax.f32 %v7152_v51, %v7153_v34  ;;  %v8098_v51 = vrot.slane %v9521_v29, 2  ;;  %v7920_v10 = vor.u32 %v7919_v17, %v7916_v25  ;;  %v9512_v34 = vld [vmem:[#allocation16 + $0x100] sm:$0xff]  }
 0x3d7   : > { %7258 = vst [vmem:[#allocation4] sm:$0xe] %v7254_v0  ;;  %v9513_v0 = vld [vmem:[#allocation16 + $0x108] sm:$0xff]  }
 0x3d8   : > { %v7171_v55 = vmax.f32 %v7154_v11, %v7163_v7  ;;  %v9515_v11 = vld [vmem:[#allocation16 + $0x118] sm:$0xff]   ;;  %v9516_v7 = vld [vmem:[#allocation16 + $0x120] sm:$0xff]  }
 0x3da   : > { %v7186_v40 = vadd.f32 %v12139_v42, %v7171_v55  ;;  %v9517_v55 = vld [vmem:[#allocation16 + $0x128] sm:$0xff]  }
 0x3db   : > { %v9552_v38 = vpop.eup %9551 }
 0x3dc   : > { %9553 = vtanh.f32 %v7186_v40  ;;  %v8899_v24 = vpack.c.bf16 %v9552_v38, %v9552_v38  ;;  %v9518_v40 = vld [vmem:[#allocation16 + $0x130] sm:$0xff]   ;;  %v9520_v38 = vld [vmem:[#allocation16 + $0x138] sm:$0xff]  }
 0x3de   : > { %v7233_v46 = vunpack.c.l.b16 %v8899_v24 }
 0x3e6   : > { %v9554_v8 = vpop.eup %9553 }
 0x3e7   : > { %v8900_v53 = vpack.c.bf16 %v9554_v8, %v9554_v8 }
 0x3e9   : > { %v7234_v33 = vunpack.c.l.b16 %v8900_v53  ;;  %v9523_v53 = vld [vmem:[#allocation20] sm:$0xff]  }
 0x3eb   : > { %v7251_v32 = vrot.slane %v7234_v33, 7  ;;  %v9524_v33 = vld [vmem:[#allocation20 + $0x8] sm:$0xff]  }
 0x3ed   : > { %v7253_v18 = vsel %vm7252_vm3, %v7251_v32, %v7233_v46  ;;  %v9525_v46 = vld [vmem:[#allocation20 + $0x10] sm:$0xff]   ;;  %v9526_v32 = vld [vmem:[#allocation20 + $0x18] sm:$0xff]  }
 0x3ee   : > { %v7255_v16 = vpack.c.b16 %v7253_v18, %v7253_v18  ;;  %v9527_v18 = vld [vmem:[#allocation20 + $0x20] sm:$0xff]  }
 0x3f0   : > { %7259 = vst [vmem:[#allocation4 + $0x4] sm:$0x1] %v7255_v16  ;;  %v9528_v16 = vld [vmem:[#allocation20 + $0x28] sm:$0xff]  }
 0x3f7   : > { %v9487_v48 = vld [vmem:[#allocation4] sm:$0x1f]  }
 0x3f8   : > { %9131 = vmatmul.mubr.bf16.vlgmr.msra.gmra.mrb[40].mxu1 %v9487_v48  ;;  %v7465_v36 = vshll.u32 %v9487_v48, 16  ;;  %v7463_v42 = vshrl.u32 %v9487_v48, 16  ;;  %v9510_v13 = vld [vmem:[#allocation4] sm:$0x3e]  }
 0x3f9   : > { %9135 = vmatpush3.bf16.msra.mxu1 %v9488_v1  ;;  %9136 = vmatprep.mubr.msk.bf16.mxu1 %vm10041_vm1, %v12758_v62  ;;  %v7816_v15 = vshrl.u32 %v9510_v13, 16  ;;  %v7819_v59 = vshll.u32 %v9510_v13, 16  ;;  %v7646_v56 = vrot.slane %v9510_v13, 1  ;;  %v9522_v8 = vld [vmem:[#allocation4] sm:$0x7c]  }
 0x3fa   : > { %v7467_v4 = vrot.slane %v7465_v36, 1  ;;  %9160 = vmatprep.subr.bf16.mxu1 %v12758_v62  ;;  %v8002_v24 = vrot.slane %v9522_v8, 2 }
 0x3fb   : > { %v7818_v27 = vrot.slane %v7816_v15, 1  ;;  %v7821_v41 = vrot.slane %v7819_v59, 2 }
 0x3fc   : > { %v7468_v43 = vor.u32 %v7467_v4, %v7463_v42  ;;  %v9529_v4 = vld [vmem:[#allocation20 + $0x30] sm:$0xff]  }
 0x3fd   : > { %v7822_v37 = vor.u32 %v7821_v41, %v7818_v27 }
 0x3fe   : > { %9157 = vmatmul.mubr.bf16.vlgmr.msra.gmra.mrb[40].mxu0 %v7468_v43 }
 0x3ff   : > { %9187 = vmatpush3.bf16.msra.mxu0 %v9492_v6  ;;  %9188 = vmatprep.mubr.msk.bf16.mxu0 %vm10041_vm1, %v12758_v62 }
 0x400   : > { %9137 = vmatmul.mubr.msk.bf16.vlgmr.msra.gmra.mrb[44].mxu1 %vm7397_vm5, %v9490_v61  ;;  %9192 = vmatprep.subr.bf16.mxu0 %v12758_v62  ;;  %v9531_v61 = vld [vmem:[#allocation23] sm:$0xff]  }
 0x401   : > { %9161 = vmatpush3.bf16.msra.mxu1 %v9491_v3  ;;  %9162 = vmatprep.mubr.msk.bf16.mxu1 %vm10041_vm1, %v12758_v62  ;;  %v9532_v3 = vld [vmem:[#allocation23 + $0x8] sm:$0xff]  }
 0x402   : > { %9166 = vmatprep.subr.bf16.mxu1 %v12758_v62 }
 0x406   : > { %9189 = vmatmul.mubr.msk.bf16.vlgmr.msra.gmra.mrb[44].mxu0 %vm7397_vm5, %v7742_v23 }
 0x407   : > { %9193 = vmatpush3.bf16.msra.mxu0 %v9494_v47  ;;  %9208 = vmatprep.mubr.msk.bf16.mxu0 %vm10041_vm1, %v12758_v62 }
 0x408   : > { %9163 = vmatmul.mubr.msk.bf16.vlgmr.msra.gmra.mrb[48].mxu1 %vm7397_vm5, %v7564_v49  ;;  %9194 = vmatprep.subr.bf16.mxu0 %v12758_v62 }
 0x409   : > { %9167 = vmatpush3.bf16.msra.mxu1 %v9495_v52  ;;  %9182 = vmatprep.mubr.msk.bf16.mxu1 %vm10041_vm1, %v12758_v62 }
 0x40a   : > { %9168 = vmatprep.subr.bf16.mxu1 %v12758_v62 }
 0x40b   : > { %9195 = vmatpush3.bf16.msra.mxu0 %v9496_v50 }
 0x40c   : > { %9196 = vmatprep.subr.bf16.mxu0 %v12758_v62 }
 0x40d   : > { %9169 = vmatpush3.bf16.msra.mxu1 %v9497_v12  ;;  %v9533_v12 = vld [vmem:[#allocation23 + $0x10] sm:$0xff]  }
 0x40e   : > { %9170 = vmatprep.subr.bf16.mxu1 %v12758_v62 }
 0x40f   : > { %9197 = vmatpush3.bf16.msra.mxu0 %v9498_v20 }
 0x410   : > { %9198 = vmatprep.subr.bf16.mxu0 %v12758_v62 }
 0x411   : > { %9171 = vmatpush3.bf16.msra.mxu1 %v9499_v22 }
 0x412   : > { %9172 = vmatprep.subr.bf16.mxu1 %v12758_v62 }
 0x413   : > { %9199 = vmatpush3.bf16.msra.mxu0 %v9500_v19  ;;  %v9534_v19 = vld [vmem:[#allocation23 + $0x18] sm:$0xff]  }
 0x414   : > { %9200 = vmatprep.subr.bf16.mxu0 %v12758_v62 }
 0x415   : > { %9173 = vmatpush3.bf16.msra.mxu1 %v9501_v60 }
 0x416   : > { %9174 = vmatprep.subr.bf16.mxu1 %v12758_v62 }
 0x417   : > { %9201 = vmatpush3.bf16.msra.mxu0 %v9502_v9 }
 0x418   : > { %9202 = vmatprep.subr.bf16.mxu0 %v12758_v62 }
 0x419   : > { %9175 = vmatpush3.bf16.msra.mxu1 %v9503_v14 }
 0x41a   : > { %9176 = vmatprep.subr.bf16.mxu1 %v12758_v62 }
 0x41b   : > { %9203 = vmatpush3.bf16.msra.mxu0 %v9504_v30 }
 0x41c   : > { %9204 = vmatprep.subr.bf16.mxu0 %v12758_v62 }
 0x41d   : > { %9177 = vmatpush3.bf16.msra.mxu1 %v9505_v44 }
 0x41e   : > { %9178 = vmatprep.subr.bf16.mxu1 %v12758_v62 }
 0x41f   : > { %9205 = vmatpush3.bf16.msra.mxu0 %v9506_v31 }
 0x420   : > { %9206 = vmatprep.subr.bf16.mxu0 %v12758_v62 }
 0x421   : > { %9179 = vmatpush3.bf16.msra.mxu1 %v9507_v35 }
 0x422   : > { %9180 = vmatprep.subr.bf16.mxu1 %v12758_v62 }
 0x423   : > { %9207 = vmatpush3.bf16.msra.mxu0 %v9508_v54 }
 0x424   : > { %9238 = vmatprep.subr.bf16.mxu0 %v12758_v62 }
 0x425   : > { %9181 = vmatpush3.bf16.msra.mxu1 %v9509_v57 }
 0x426   : > { %9209 = vmatmul.mubr.bf16.vlgmr.msra.gmra.mrb[48].mxu0 %v7822_v37  ;;  %9212 = vmatprep.subr.bf16.mxu1 %v12758_v62 }
 0x427   : > { %9239 = vmatpush3.bf16.msra.mxu0 %v9519_v63  ;;  %9240 = vmatprep.mubr.msk.bf16.mxu0 %vm10041_vm1, %v12758_v62 }
 0x428   : > { %9183 = vmatmul.mubr.bf16.vlgmr.msra.gmra.mrb[52].mxu1 %v7646_v56  ;;  %9244 = vmatprep.subr.bf16.mxu0 %v12758_v62 }
 0x429   : > { %9213 = vmatpush3.bf16.msra.mxu1 %v9511_v28  ;;  %9214 = vmatprep.mubr.msk.bf16.mxu1 %vm10041_vm1, %v12758_v62 }
 0x42a   : > { %9218 = vmatprep.subr.bf16.mxu1 %v12758_v62 }
 0x42e   : > { %9241 = vmatmul.mubr.msk.bf16.vlgmr.msra.gmra.mrb[52].mxu0 %vm7397_vm5, %v8098_v51 }
 0x42f   : > { %9260 = vmatprep.mubr.msk.bf16.mxu0 %vm10041_vm1, %v12758_v62  ;;  %9245 = vmatpush3.bf16.msra.mxu0 %v9523_v53 }
 0x430   : > { %9215 = vmatmul.mubr.msk.bf16.vlgmr.msra.gmra.mrb[56].mxu1 %vm7397_vm5, %v7920_v10  ;;  %9246 = vmatprep.subr.bf16.mxu0 %v12758_v62 }
 0x431   : > { %9219 = vmatpush3.bf16.msra.mxu1 %v9512_v34  ;;  %9234 = vmatprep.mubr.msk.bf16.mxu1 %vm10041_vm1, %v12758_v62 }
 0x432   : > { %9220 = vmatprep.subr.bf16.mxu1 %v12758_v62 }
 0x433   : > { %9247 = vmatpush3.bf16.msra.mxu0 %v9524_v33 }
 0x434   : > { %9248 = vmatprep.subr.bf16.mxu0 %v12758_v62 }
 0x435   : > { %9221 = vmatpush3.bf16.msra.mxu1 %v9513_v0 }
 0x436   : > { %9222 = vmatprep.subr.bf16.mxu1 %v12758_v62 }
 0x437   : > { %9249 = vmatpush3.bf16.msra.mxu0 %v9525_v46 }
 0x438   : > { %9250 = vmatprep.subr.bf16.mxu0 %v12758_v62 }
 0x439   : > { %9223 = vmatpush3.bf16.msra.mxu1 %v9514_v58 }
 0x43a   : > { %9224 = vmatprep.subr.bf16.mxu1 %v12758_v62 }
 0x43b   : > { %9251 = vmatpush3.bf16.msra.mxu0 %v9526_v32 }
 0x43c   : > { %9252 = vmatprep.subr.bf16.mxu0 %v12758_v62 }
 0x43d   : > { %9225 = vmatpush3.bf16.msra.mxu1 %v9515_v11 }
 0x43e   : > { %9226 = vmatprep.subr.bf16.mxu1 %v12758_v62 }
 0x43f   : > { %9253 = vmatpush3.bf16.msra.mxu0 %v9527_v18 }
 0x440   : > { %9254 = vmatprep.subr.bf16.mxu0 %v12758_v62 }
 0x441   : > { %9227 = vmatpush3.bf16.msra.mxu1 %v9516_v7 }
 0x442   : > { %9228 = vmatprep.subr.bf16.mxu1 %v12758_v62 }
 0x443   : > { %9255 = vmatpush3.bf16.msra.mxu0 %v9528_v16 }
 0x444   : > { %9256 = vmatprep.subr.bf16.mxu0 %v12758_v62 }
 0x445   : > { %9229 = vmatpush3.bf16.msra.mxu1 %v9517_v55 }
 0x446   : > { %9230 = vmatprep.subr.bf16.mxu1 %v12758_v62 }
 0x447   : > { %9257 = vmatpush3.bf16.msra.mxu0 %v9529_v4 }
 0x448   : > { %9258 = vmatprep.subr.bf16.mxu0 %v12758_v62 }
 0x449   : > { %9231 = vmatpush3.bf16.msra.mxu1 %v9518_v40 }
 0x44a   : > { %9232 = vmatprep.subr.bf16.mxu1 %v12758_v62 }
 0x44b   : > { %9259 = vmatpush3.bf16.msra.mxu0 %v9530_v26 }
 0x44d   : > { %9233 = vmatpush3.bf16.msra.mxu1 %v9520_v38 }
 0x44e   : > { %9264 = vmatprep.subr.bf16.mxu1 %v12758_v62 }
 0x450   : > { %9235 = vmatmul.mubr.bf16.vlgmr.msra.gmra.mrb[60].mxu1 %v8002_v24 }
 0x451   : > { %9280 = vmatprep.mubr.msk.bf16.mxu1 %vm10041_vm1, %v12758_v62  ;;  %9265 = vmatpush3.bf16.msra.mxu1 %v9531_v61  ;;  %v8157_v61 = vld [vmem:[#allocation19] sm:$0x1] }
 0x452   : > { %9266 = vmatprep.subr.bf16.mxu1 %v12758_v62 }
 0x455   : > { %9267 = vmatpush3.bf16.msra.mxu1 %v9532_v3  ;;  %v8160_v3 = vld [vmem:[#allocation17] sm:$0x1] }
 0x456   : > { %9268 = vmatprep.subr.bf16.mxu1 %v12758_v62 }
 0x459   : > { %9269 = vmatpush3.bf16.msra.mxu1 %v9533_v12  ;;  %v9538_v12 = vld [vmem:[#allocation23 + $0x38] sm:$0xff]  }
 0x45a   : > { %9270 = vmatprep.subr.bf16.mxu1 %v12758_v62 }
 0x45d   : > { %9271 = vmatpush3.bf16.msra.mxu1 %v9534_v19 }
 0x45e   : > { %9272 = vmatprep.subr.bf16.mxu1 %v12758_v62 }
 0x4cb   : > { %v7379_v1 = vpop.f32.mrb[40].mxu1 }
 0x4cc   : > { %v9132_v48 = vpop.f32.mrb[41].mxu1 }
 0x4cd   : > { %v7382_v36 = vpop.f32.mrb[42].mxu1 }
 0x4ce   : > { %v9133_v42 = vpop.f32.mrb[43].mxu1 }
 0x4d1   : > { %v7552_v6 = vpop.f32.mrb[40].mxu0 }
 0x4d2   : > { %v9158_v43 = vpop.f32.mrb[41].mxu0 }
 0x4d3   : > { %v7435_v2 = vpop.f32.mrb[44].mxu1  ;;  %v7555_v45 = vpop.f32.mrb[42].mxu0 }
 0x4d4   : > { %v7436_v39 = vadd.f32 %v7435_v2, %v7379_v1  ;;  %v9138_v23 = vpop.f32.mrb[45].mxu1  ;;  %v9159_v47 = vpop.f32.mrb[43].mxu0 }
 0x4d5   : > { %v7438_v49 = vpop.f32.mrb[46].mxu1 }
 0x4d6   : > { %v7439_v52 = vadd.f32 %v7438_v49, %v7382_v36  ;;  %v9139_v50 = vpop.f32.mrb[47].mxu1  ;;  %v9535_v49 = vld [vmem:[#allocation23 + $0x20] sm:$0xff]  }
 0x4d7   : > { %9273 = vmatpush3.bf16.msra.mxu1 %v9535_v49  ;;  %v9537_v50 = vld [vmem:[#allocation23 + $0x30] sm:$0xff]  }
 0x4d8   : > { %9274 = vmatprep.subr.bf16.mxu1 %v12758_v62 }
 0x4d9   : > { %v7786_v20 = vpop.f32.mrb[44].mxu0 }
 0x4da   : > { %v9190_v22 = vpop.f32.mrb[45].mxu0 }
 0x4db   : > { %v7608_v60 = vpop.f32.mrb[48].mxu1  ;;  %v7789_v9 = vpop.f32.mrb[46].mxu0 }
 0x4dc   : > { %v7609_v14 = vadd.f32 %v7608_v60, %v7552_v6  ;;  %v9164_v30 = vpop.f32.mrb[49].mxu1  ;;  %v9191_v13 = vpop.f32.mrb[47].mxu0 }
 0x4dd   : > { %v7611_v44 = vpop.f32.mrb[50].mxu1 }
 0x4de   : > { %v7615_v31 = vadd.f32 %v7609_v14, %v7436_v39  ;;  %v7612_v15 = vadd.f32 %v7611_v44, %v7555_v45  ;;  %v9165_v59 = vpop.f32.mrb[51].mxu1  ;;  %v8288_v44 = vld [vmem:[#allocation25] sm:$0x1] }
 0x4e0   : > { %v7616_v35 = vadd.f32 %v7612_v15, %v7439_v52  ;;  %v9536_v52 = vld [vmem:[#allocation23 + $0x28] sm:$0xff]  }
 0x4e1   : > { %9275 = vmatpush3.bf16.msra.mxu1 %v9536_v52 }
 0x4e2   : > { %9276 = vmatprep.subr.bf16.mxu1 %v12758_v62 }
 0x4e5   : > { %9277 = vmatpush3.bf16.msra.mxu1 %v9537_v50 }
 0x4e6   : > { %9278 = vmatprep.subr.bf16.mxu1 %v12758_v62 }
 0x4e9   : > { %9279 = vmatpush3.bf16.msra.mxu1 %v9538_v12 }
 0x4f9   : > { %v7906_v54 = vpop.f32.mrb[48].mxu0 }
 0x4fa   : > { %v9210_v27 = vpop.f32.mrb[49].mxu0 }
 0x4fb   : > { %v7730_v41 = vpop.f32.mrb[52].mxu1  ;;  %v7909_v57 = vpop.f32.mrb[50].mxu0 }
 0x4fc   : > { %v7787_v63 = vadd.f32 %v7786_v20, %v7730_v41  ;;  %v9184_v37 = vpop.f32.mrb[53].mxu1  ;;  %v9211_v21 = vpop.f32.mrb[51].mxu0  ;;  %v8181_v20 = vld [vmem:[#allocation22] sm:$0x1] }
 0x4fd   : > { %v7733_v5 = vpop.f32.mrb[54].mxu1 }
 0x4fe   : > { %v7793_v28 = vadd.f32 %v7787_v63, %v7615_v31  ;;  %v7790_v56 = vadd.f32 %v7789_v9, %v7733_v5  ;;  %v9185_v29 = vpop.f32.mrb[55].mxu1 }
 0x500   : > { %v7794_v25 = vadd.f32 %v7790_v56, %v7616_v35 }
 0x501   : > { %v8142_v17 = vpop.f32.mrb[52].mxu0 }
 0x502   : > { %v9242_v51 = vpop.f32.mrb[53].mxu0 }
 0x503   : > { %v7964_v10 = vpop.f32.mrb[56].mxu1  ;;  %v8145_v34 = vpop.f32.mrb[54].mxu0 }
 0x504   : > { %v7965_v0 = vadd.f32 %v7964_v10, %v7906_v54  ;;  %v9216_v58 = vpop.f32.mrb[57].mxu1  ;;  %v9243_v11 = vpop.f32.mrb[55].mxu0 }
 0x505   : > { %v7967_v7 = vpop.f32.mrb[58].mxu1 }
 0x506   : > { %v7971_v55 = vadd.f32 %v7965_v0, %v7793_v28  ;;  %v7968_v40 = vadd.f32 %v7967_v7, %v7909_v57  ;;  %v9217_v38 = vpop.f32.mrb[59].mxu1 }
 0x508   : > { %v7972_v8 = vadd.f32 %v7968_v40, %v7794_v25 }
 0x523   : > { %v8086_v24 = vpop.f32.mrb[60].mxu1 }
 0x524   : > { %v8143_v53 = vadd.f32 %v8142_v17, %v8086_v24  ;;  %v9236_v33 = vpop.f32.mrb[61].mxu1 }
 0x525   : > { %v8089_v46 = vpop.f32.mrb[62].mxu1 }
 0x526   : > { %v8149_v32 = vadd.f32 %v8143_v53, %v7971_v55  ;;  %v8146_v18 = vadd.f32 %v8145_v34, %v8089_v46  ;;  %v9237_v16 = vpop.f32.mrb[63].mxu1 }
 0x528   : > { %v8151_v1 = vrot.slane %v8149_v32, 4  ;;  %v8150_v48 = vadd.f32 %v8146_v18, %v7972_v8 }
 0x52a   : > { %v8152_v36 = vmax.f32 %v8149_v32, %v8151_v1  ;;  %v8158_v26 = vadd.f32 %v8157_v61, %v8150_v48 }
 0x52c   : > { %v8153_v42 = vrot.slane %v8152_v36, 2 }
 0x52e   : > { %v8154_v4 = vmax.f32 %v8152_v36, %v8153_v42 }
 0x530   : > { %v8155_v6 = vrot.slane %v8154_v4, 1 }
 0x532   : > { %v8156_v43 = vmax.f32 %v8154_v4, %v8155_v6 }
 0x534   : > { %v8159_v2 = vmax.f32 %v8156_v43, %v8158_v26 }
 0x536   : > { %v8161_v45 = vadd.f32 %v8160_v3, %v8159_v2 }
 0x538   : > { %9555 = vtanh.f32 %v8161_v45 }
 0x542   : > { %v9556_v39 = vpop.eup %9555 }
 0x543   : > { %9557 = vtanh.f32 %v9556_v39 }
 0x54d   : > { %v9558_v23 = vpop.eup %9557 }
 0x54e   : > { %v8164_v47 = vpack.c.bf16 %v9558_v23, %v9558_v23 }
 0x550   : > { %9261 = vmatmul.mubr.bf16.vlgmr.msra.gmra.mrb[56].mxu0 %v8164_v47 }
 0x623   : > { %v8264_v22 = vpop.f32.mrb[56].mxu0 }
 0x624   : > { %v8265_v19 = vadd.f32 %v8264_v22, %v8181_v20  ;;  %v9262_v60 = vpop.f32.mrb[57].mxu0 }
 0x625   : > { %v8267_v9 = vpop.f32.mrb[58].mxu0 }
 0x626   : > { %9559 = vtanh.f32 %v8265_v19  ;;  %v9263_v14 = vpop.f32.mrb[59].mxu0 }
 0x630   : > { %v9560_v30 = vpop.eup %9559 }
 0x631   : > { %v8271_v13 = vpack.c.bf16 %v9560_v30, %v9560_v30 }
 0x633   : > { %9281 = vmatmul.mubr.bf16.vlgmr.msra.gmra.mrb[64].mxu1 %v8271_v13 }
 0x706   : > { %v8371_v31 = vpop.f32.mrb[64].mxu1 }
 0x707   : > { %v8372_v15 = vadd.f32 %v8371_v31, %v8288_v44  ;;  %v9282_v62 = vpop.f32.mrb[65].mxu1 }
 0x708   : > { %v8374_v59 = vpop.f32.mrb[66].mxu1 }
 0x709   : > { %8377 = vst [vmem:[%s641_s16] sm:$0x1] %v8372_v15  ;;  %v9283_v35 = vpop.f32.mrb[67].mxu1 }
 0x70a   : > { %9942 = shalt.err (!%p9939_p1)
}
 0x70b   : > { %s9943_s29 = scalar_lea.hbm %s12407_s19, 16  ;;  %s9947_s6 = scalar_lea.hbm %s12795_s7, 32 }
 0x70c   : > { %p9944_p3 = scmp.ne.s32.totalorder %s12407_s19, %s9943_s29  ;;  %p9948_p10 = scmp.lt.u32.totalorder %s12407_s19, %s12795_s7 }
 0x70d   : > { %p9949_p5 = scmp.lt.u32.totalorder %s9947_s6, %s9943_s29  ;;  %p9951_p0 = scmp.lt.u32.totalorder %s9943_s29, %s12407_s19 }
 0x70e   : > { %p9945_p2 = pnand %p9944_p3, %p12796_p7 }
 0x70f   : > { %p9950_p9 = por %p9949_p5, %p9948_p10 }
 0x710   : > { %p9946_p6 = pneg %p9945_p2 }
 0x711   : > { %p9952_p11 = por %p9951_p0, %p9950_p9 }
 0x713   : > { %p9953_p8 = pnand %p9952_p11, %p9946_p6 }
 0x715   : > { %9956 = shalt.err (!%p9953_p8)
}
 0x716   : > { %9352 = dma.vmem_to_hbm [thread:$0]  (%p12796_p7), %s12409_s1, 16, %s12407_s19, %s8379_s30  }
 0x717 PF: > { %s8403_s17 = sand.u32 1, %s10011_s25   ;;  %p12797_p4 = scmp.ne.s32.totalorder %s12567_s2, 0 }
 0x718   : > { %p12798_p12 = scmp.ge.s32.totalorder %s10023_s28, 2  ;;  %s8404_s16 = scalar_lea.sflag [#allocation7], %s8403_s17 }
 0x71a   : > { %p9396_p13 = pnand %p12798_p12, %p12797_p4 }
 0x71c   : > { %10006 = dma.done.wait (!%p9396_p13), %s8404_s16, 16  }
 0x71d   : > { %10008 = vsyncadd (!%p9396_p13), %s8404_s16, 4294967280  ;;  %p34_p1 = scmp.ge.s32.totalorder %s10397_s18, 4   ;;  %s12799_s25 = smov %s10015_s26 }
 0x71e   : > { %s12800_s26 = smov %s10019_s27  ;;  %s12801_s27 = smov %s10409_s15 }
 0x71f   : > { %s12802_s28 = smov %s10397_s18  ;;  %36 = sbr.rel (!%p34_p1) target bundleno = 24 (0x18), region = 186 }
 0x726   :  { %8408 = vsyncpa [#allocation6], 1 }
 0x727   :  { %8410 = vsyncpa [#allocation6 + $0x1], 1 }
 0x728   :  { %8411 = vsyncpa [#allocation9], 1 }
 0x729   :  { %8413 = vsyncpa [#allocation9 + $0x1], 1 }
 0x72a   :  { %8414 = vsyncpa [#allocation12], 1 }
 0x72b   :  { %8415 = vsyncpa [#allocation15], 1 }
 0x72c   :  { %8416 = vsyncpa [#allocation18], 1 }
 0x72d   :  { %8417 = vsyncpa [#allocation21], 1 }
 0x72e   :  { %8418 = vsyncpa [#allocation24], 1 }
 0x72f   :  { %8419 = vsyncpa [#allocation7], 1 }
 0x730   :  { %8421 = vsyncpa [#allocation7 + $0x1], 1 }

</bundles_post_ra>
